<compile_context>
chip_gen: v7x
topology: tpu7x:2x2x1
jax: 0.10.0
libtpu: 0.0.40
codegen_flags: <defaults>
</compile_context>

<pallas_src>
import functools
import math

import jax
import jax.numpy as jnp
from jax.experimental import pallas as pl
from jax.experimental.pallas import tpu as pltpu

# ----------------------------- config -------------------------------------------------
NUM_INPUT_CHANNELS = 2
NUM_OUTPUT_CHANNELS = 1          # Mynetk.forward requires 1 channel (self.conv = Conv2d(1,1,1))
NUM_DOWN = [16, 32, 64, 128, 128]
NUM_UP   = [16, 32, 64, 128, 128]
NUM_SKIP = [4, 4, 4, 4, 4]
LEAKY_SLOPE = 0.2
BN_EPS = 1e-5
ACT_DTYPE = jnp.bfloat16         # inter-layer activation storage dtype
XLA_FALLBACK_M = 128             # convs with N*Ho*Wo <= this go to plain XLA


def _rup(x, m):
    return ((x + m - 1) // m) * m


# ----------------------------- Pallas kernel 1: shifted-taps conv GEMM ----------------
def _make_taps_kernel(tm, offsets, cout, act):
    """out[r, n] = act( sum_t A[r + off_t, :] @ W[t, :, n] + shift[n] ), f32 epilogue."""
    def kernel(a_ref, w_ref, s_ref, o_ref):
        base = pl.multiple_of(pl.program_id(0) * tm, 8)
        acc = jnp.zeros((tm, cout), jnp.float32)
        for t, off in enumerate(offsets):                     # <= 9 static taps, unrolled
            a = a_ref[pl.ds(base + off, tm), :]
            acc = acc + jnp.dot(a, w_ref[t], preferred_element_type=jnp.float32)
        y = acc + s_ref[...]
        if act == "leaky":
            y = jnp.maximum(y, LEAKY_SLOPE * y)
        elif act == "sigmoid":
            y = jax.nn.sigmoid(y)
        o_ref[...] = y.astype(o_ref.dtype)
    return kernel


def conv_taps_gemm(a2, w_taps, shift, offsets, act, out_rows):
    """a2: (Msrc, C) source rows; w_taps: (T, C, cout); shift: (cout,) f32.
    Returns (out_rows, cout) in ACT_DTYPE (bf16)."""
    Msrc, C = a2.shape
    T, Cw, cout = w_taps.shape
    assert Cw == C and T == len(offsets)

    if C < 8:                                     # first layer has C=2: explicit zero pad
        a2 = jnp.pad(a2, ((0, 0), (0, 8 - C)))
        w_taps = jnp.pad(w_taps, ((0, 0), (0, 8 - C), (0, 0)))
        C = 8

    # Large tiles for single-TC v5e/v6e, but always >=2 M blocks on the big layers so the
    # "parallel" grid axis can shard across v7x's two TensorCores.
    if out_rows >= 1024:
        tm = 512
    elif out_rows >= 256:
        tm = 256
    else:
        tm = _rup(out_rows, 16)
    Mp = _rup(out_rows, tm)

    max_off = max(offsets)
    Ma = Mp + max_off                              # rows reachable by the largest tap
    if Ma > Msrc:
        a2 = jnp.pad(a2, ((0, Ma - Msrc), (0, 0)))

    wt = w_taps.astype(a2.dtype)                   # homogeneous dtype for the MXU dot
    sh = shift.reshape(1, cout).astype(jnp.float32)

    kern = _make_taps_kernel(tm, tuple(int(o) for o in offsets), cout, act)
    out = pl.pallas_call(
        kern,
        out_shape=jax.ShapeDtypeStruct((Mp, cout), ACT_DTYPE),
        grid_spec=pltpu.PrefetchScalarGridSpec(
            num_scalar_prefetch=0,
            grid=(Mp // tm,),
            in_specs=[
                pl.BlockSpec((Ma, C), lambda i: (0, 0)),          # whole plane, resident
                pl.BlockSpec((T, C, cout), lambda i: (0, 0, 0)),  # all taps' weights
                pl.BlockSpec((1, cout), lambda i: (0, 0)),
            ],
            out_specs=pl.BlockSpec((tm, cout), lambda i: (i, 0)),
        ),
        compiler_params=pltpu.CompilerParams(
            dimension_semantics=("parallel",)),
    )(a2, wt, sh)
    return out[:out_rows]


# ----------------------------- Pallas kernel 2: fused Mynetk tail ---------------------
def _tail_softmax_kernel(x_ref, p_ref, o_ref, *, total):
    """z = x1*(1+w) + b  (1x1 conv on 1 channel + residual add), softmax over ALL elems."""
    z = x_ref[...] * p_ref[0] + p_ref[1]
    rows, cols = z.shape
    ridx = jax.lax.broadcasted_iota(jnp.int32, (rows, cols), 0)
    cidx = jax.lax.broadcasted_iota(jnp.int32, (rows, cols), 1)
    valid = (ridx * cols + cidx) < total
    z = jnp.where(valid, z, -1e30)
    m = jnp.max(jnp.max(z, axis=1, keepdims=True), axis=0, keepdims=True)   # (1,1)
    e = jnp.where(valid, jnp.exp(z - m), 0.0)
    s = jnp.sum(jnp.sum(e, axis=1, keepdims=True), axis=0, keepdims=True)   # (1,1)
    o_ref[...] = e * (1.0 / s)


def postconv_add_softmax(x1, w_post, b_post):
    """softmax over all elements of (x1 + conv1x1_{1->1}(x1)); returns the flat vector."""
    # TODO(synk): single-block global softmax; switch to a gridded two-pass (max/sum then
    #             normalize) structure if kernel_size grows toward the VMEM limit (v7x).
    total = x1.size
    rows = _rup(pl.cdiv(total, 128), 8)
    pad = rows * 128 - total
    xf = jnp.pad(x1.reshape(-1), (0, pad)).reshape(rows, 128).astype(jnp.float32)
    params = jnp.stack([1.0 + w_post.reshape(()), b_post.reshape(())]).astype(jnp.float32)
    out = pl.pallas_call(
        functools.partial(_tail_softmax_kernel, total=total),
        out_shape=jax.ShapeDtypeStruct((rows, 128), jnp.float32),
        in_specs=[
            pl.BlockSpec(memory_space=pltpu.MemorySpace.VMEM),
            pl.BlockSpec(memory_space=pltpu.MemorySpace.SMEM),
        ],
        out_specs=pl.BlockSpec(memory_space=pltpu.MemorySpace.VMEM),
    )(xf, params)
    return out.reshape(-1)[:total]


# ----------------------------- conv glue ----------------------------------------------
def im2col(x, k, stride, pad):
    """x: NHWC -> (N*Ho*Wo, C*k*k) patches ordered (c, dy, dx) to match PyTorch weights."""
    N, H, W, C = x.shape
    if pad:
        x = jnp.pad(x, ((0, 0), (pad, pad), (pad, pad), (0, 0)))
    Hp, Wp = H + 2 * pad, W + 2 * pad
    Ho = (Hp - k) // stride + 1
    Wo = (Wp - k) // stride + 1
    cols = []
    for dy in range(k):
        for dx in range(k):
            cols.append(x[:, dy:dy + stride * (Ho - 1) + 1:stride,
                          dx:dx + stride * (Wo - 1) + 1:stride, :])
    pat = jnp.stack(cols, axis=-1).reshape(N, Ho, Wo, C * k * k)
    return pat.reshape(N * Ho * Wo, C * k * k), (N, Ho, Wo)


def _fold_bn(conv_p, bn_p):
    b = conv_p["b"].astype(jnp.float32)
    cout = conv_p["w"].shape[0]
    if bn_p is None:
        return jnp.ones((cout,), jnp.float32), b
    inv = bn_p["gamma"] * jax.lax.rsqrt(bn_p["var"] + BN_EPS)
    return inv, (b - bn_p["mean"]) * inv + bn_p["beta"]


def _act_xla(y, act):
    if act == "leaky":
        return jnp.maximum(y, LEAKY_SLOPE * y)
    if act == "sigmoid":
        return jax.nn.sigmoid(y)
    return y


def conv_bn_act(x, conv_p, bn_p, stride=1, act="leaky"):
    """PyTorch-style Conv2d ('zero' pad (k-1)//2) [+ eval BatchNorm + activation], NHWC."""
    w = conv_p["w"]
    cout, cin, k, _ = w.shape
    N, H, W, C = x.shape
    pad = (k - 1) // 2
    Ho = (H + 2 * pad - k) // stride + 1
    Wo = (W + 2 * pad - k) // stride + 1
    scale, shift = _fold_bn(conv_p, bn_p)          # BN scale folded into weights below

    if N * Ho * Wo <= XLA_FALLBACK_M:
        # Tiny deep scales: a pallas_call here is pure launch / DMA-setup overhead.
        wk = (jnp.transpose(w, (2, 3, 1, 0)) * scale).astype(jnp.float32)
        y = jax.lax.conv_general_dilated(
            x.astype(jnp.float32), wk, (stride, stride), [(pad, pad), (pad, pad)],
            dimension_numbers=("NHWC", "HWIO", "NHWC"))
        return _act_xla(y + shift, act).astype(ACT_DTYPE)

    if k == 1:
        a2 = x.reshape(N * H * W, C).astype(ACT_DTYPE)
        wt = (w[:, :, 0, 0] * scale[:, None]).T[None]          # (1, cin, cout)
        out = conv_taps_gemm(a2, wt, shift, [0], act, N * H * W)
        return out.reshape(N, H, W, cout)

    if stride == 1:
        # 3x3 conv with in-kernel im2col: 9 contiguous row-shifted views of the padded
        # plane; garbage fringe (w >= Wo, h >= Ho) is computed and sliced off afterwards.
        Hp, Wp = H + 2 * pad, W + 2 * pad
        xp = jnp.pad(x, ((0, 0), (pad, pad), (pad, pad), (0, 0)))
        # TODO(synk): keep this operand bf16 once unaligned packed-sublane dynamic slices
        #             are verified on all generations; f32 here avoids that lowering hazard.
        a2 = xp.reshape(N * Hp * Wp, C).astype(jnp.float32)
        wt = (jnp.transpose(w, (2, 3, 1, 0)) * scale).reshape(k * k, cin, cout)
        offsets = [dy * Wp + dx for dy in range(k) for dx in range(k)]
        slab = conv_taps_gemm(a2, wt, shift, offsets, act, N * Hp * Wp)
        slab = slab.reshape(N, Hp, Wp, cout)
        return slab[:, :Ho, :Wo, :]

    # Strided conv (only scale-0 down_conv1 with cin=2 is big enough to land here):
    # tiny XLA im2col (K = 9*cin = 18) feeding the same single-tap GEMM kernel.
    patches, _ = im2col(x.astype(ACT_DTYPE), k, stride, pad)
    wt = ((w * scale[:, None, None, None]).reshape(cout, cin * k * k).T)[None]
    out = conv_taps_gemm(patches, wt, shift, [0], act, N * Ho * Wo)
    return out.reshape(N, Ho, Wo, cout)


# ----------------------------- parameters ---------------------------------------------
def _init_conv(key, cout, cin, k):
    kw, kb = jax.random.split(key)
    fan_in = cin * k * k
    w = jax.random.normal(kw, (cout, cin, k, k), jnp.float32) * math.sqrt(2.0 / fan_in)
    b = 0.01 * jax.random.normal(kb, (cout,), jnp.float32)
    return {"w": w, "b": b}


def _init_bn(key, c):
    k1, k2, k3, k4 = jax.random.split(key, 4)
    return {"gamma": 1.0 + 0.1 * jax.random.normal(k1, (c,), jnp.float32),
            "beta": 0.1 * jax.random.normal(k2, (c,), jnp.float32),
            "mean": 0.1 * jax.random.normal(k3, (c,), jnp.float32),
            "var": 1.0 + 0.1 * jax.random.uniform(k4, (c,), jnp.float32)}


def build_params(key):
    keys = iter(jax.random.split(key, 128))
    params = {"scales": []}
    input_depth = NUM_INPUT_CHANNELS
    n = len(NUM_DOWN)
    for i in range(n):
        k_ch = NUM_UP[i + 1] if i < n - 1 else NUM_DOWN[i]
        sc = {
            "skip_conv": _init_conv(next(keys), NUM_SKIP[i], input_depth, 1),
            "skip_bn": _init_bn(next(keys), NUM_SKIP[i]),
            "down_conv1": _init_conv(next(keys), NUM_DOWN[i], input_depth, 3),
            "down_bn1": _init_bn(next(keys), NUM_DOWN[i]),
            "down_conv2": _init_conv(next(keys), NUM_DOWN[i], NUM_DOWN[i], 3),
            "down_bn2": _init_bn(next(keys), NUM_DOWN[i]),
            "up_conv": _init_conv(next(keys), NUM_UP[i], NUM_SKIP[i] + k_ch, 3),
            "up_bn": _init_bn(next(keys), NUM_UP[i]),
            "up_conv1x1": _init_conv(next(keys), NUM_UP[i], NUM_UP[i], 1),
            "up_bn1x1": _init_bn(next(keys), NUM_UP[i]),
        }
        params["scales"].append(sc)
        input_depth = NUM_DOWN[i]
    params["final_conv"] = _init_conv(next(keys), NUM_OUTPUT_CHANNELS, NUM_UP[0], 1)
    params["post_conv"] = _init_conv(next(keys), 1, 1, 1)   # Mynetk.self.conv (1x1, 1->1)
    return params


# ----------------------------- forward ------------------------------------------------
def _upsample2x_nearest(d):
    N, H, W, C = d.shape
    d = jnp.broadcast_to(d[:, :, None, :, None, :], (N, H, 2, W, 2, C))
    return d.reshape(N, 2 * H, 2 * W, C)


def _concat_crop(tensors):
    """DIP Concat: center-crop all inputs to min spatial size, concat on channel axis."""
    hs = min(t.shape[1] for t in tensors)
    ws = min(t.shape[2] for t in tensors)
    cropped = []
    for t in tensors:
        dh = (t.shape[1] - hs) // 2
        dw = (t.shape[2] - ws) // 2
        cropped.append(t[:, dh:dh + hs, dw:dw + ws, :])
    return jnp.concatenate(cropped, axis=-1)


def _scale_forward(i, x, params):
    sc = params["scales"][i]
    s = conv_bn_act(x, sc["skip_conv"], sc["skip_bn"], 1, "leaky")
    d = conv_bn_act(x, sc["down_conv1"], sc["down_bn1"], 2, "leaky")
    d = conv_bn_act(d, sc["down_conv2"], sc["down_bn2"], 1, "leaky")
    if i < len(NUM_DOWN) - 1:
        d = _scale_forward(i + 1, d, params)
    d = _upsample2x_nearest(d)                                 # nearest 2x, one pass
    y = _concat_crop([s, d])
    # TODO(synk): Dropout(p=0.1) for i != 0 is treated as eval-mode identity.
    y = conv_bn_act(y, sc["up_conv"], sc["up_bn"], 1, "leaky")
    y = conv_bn_act(y, sc["up_conv1x1"], sc["up_bn1x1"], 1, "leaky")
    return y


def final_conv_sigmoid(y, conv_p):
    # prenet tail: 1x1 conv (NUM_UP[0] -> 1) + Mysoftmax, left to XLA (2048x16 matvec).
    # TODO(synk): Mysoftmax() is not defined in the provided source; treated as an
    #             element-wise Sigmoid (matching the `skip` variant's need_sigmoid path).
    w = conv_p["w"].reshape(-1).astype(jnp.float32)
    b = conv_p["b"].astype(jnp.float32)[0]
    z = jnp.einsum("nhwc,c->nhw", y.astype(jnp.float32), w) + b
    return jax.nn.sigmoid(z)[..., None]


def mynetk_forward(x_nchw, params, kernel_size):
    # layout: NCHW in/out, NHWC inside.
    x = jnp.transpose(x_nchw, (0, 2, 3, 1)).astype(ACT_DTYPE)
    y = _scale_forward(0, x, params)
    y = final_conv_sigmoid(y, params["final_conv"])            # (N, H, W, 1) f32
    N = y.shape[0]
    # Mynetk tail: bilinear resize (align_corners=False) -> fused [1x1 conv + add +
    # softmax over ALL elements] Pallas kernel -> reshape to (-1, 1, kh, kw).
    x1 = jax.image.resize(y, (N, kernel_size[0], kernel_size[1], 1), method="bilinear")
    flat = postconv_add_softmax(x1, params["post_conv"]["w"], params["post_conv"]["b"])
    out = flat.reshape(N, kernel_size[0], kernel_size[1], 1)
    return jnp.transpose(out, (0, 3, 1, 2))


# ----------------------------- main ----------------------------------------------------
if __name__ == "__main__":
    key = jax.random.PRNGKey(0)
    pkey, xkey = jax.random.split(key)
    params = build_params(pkey)

    # spatial must be divisible by 2^5 so the 5-scale U-Net concats line up exactly
    x = jax.random.normal(xkey, (2, NUM_INPUT_CHANNELS, 32, 32), jnp.float32)
    kernel_size = (64, 64)   # stand-in for opt.kernel_size

    fwd = jax.jit(lambda inp: mynetk_forward(inp, params, kernel_size))
    out = fwd(x)
    out = jax.block_until_ready(out)

    assert out.shape == (2, 1, kernel_size[0], kernel_size[1]), out.shape
    assert bool(jnp.all(jnp.isfinite(out)))
    assert abs(float(jnp.sum(out)) - 1.0) < 1e-2   # global softmax sums to 1
    print("KERNEL_OK")
</pallas_src>

<mosaic_0001>
module attributes {stable_mosaic.version = 11 : i64} {
  func.func @kernel(%arg0: i32, %arg1: memref<512x18xbf16, #tpu.memory_space<vmem>>, %arg2: memref<1x18x16xbf16, #tpu.memory_space<vmem>>, %arg3: memref<1x16xf32, #tpu.memory_space<vmem>>, %arg4: memref<256x16xbf16, #tpu.memory_space<vmem>>) attributes {dimension_semantics = [#tpu.dimension_semantics<parallel>], iteration_bounds = array<i64: 2>, scalar_prefetch = 0 : i64, scratch_operands = 0 : i64, tpu.core_type = #tpu.core_type<tc>, window_params = [{pipeline_mode = #tpu.pipeline_mode<synchronous>, transform_indices = @transform_0, window_bounds = array<i64: 512, 18>}, {pipeline_mode = #tpu.pipeline_mode<synchronous>, transform_indices = @transform_1, window_bounds = array<i64: 1, 18, 16>}, {pipeline_mode = #tpu.pipeline_mode<synchronous>, transform_indices = @transform_2, window_bounds = array<i64: 1, 16>}, {transform_indices = @transform_3, window_bounds = array<i64: 256, 16>}]} {
    %c256_i32 = arith.constant 256 : i32
    %0 = arith.muli %arg0, %c256_i32 : i32
    %1 = tpu.assume_multiple %0, 8 : i32
    %cst = arith.constant 0.000000e+00 : f32
    %2 = vector.broadcast %cst : f32 to vector<256x16xf32>
    %c0_i32 = arith.constant 0 : i32
    %3 = arith.addi %1, %c0_i32 : i32
    %4 = arith.index_cast %3 : i32 to index
    %c0 = arith.constant 0 : index
    %5 = vector.load %arg1[%4, %c0] : memref<512x18xbf16, #tpu.memory_space<vmem>>, vector<256x18xbf16>
    %c0_0 = arith.constant 0 : index
    %c0_1 = arith.constant 0 : index
    %c0_2 = arith.constant 0 : index
    %6 = vector.load %arg2[%c0_0, %c0_1, %c0_2] : memref<1x18x16xbf16, #tpu.memory_space<vmem>>, vector<1x18x16xbf16>
    %7 = vector.shape_cast %6 : vector<1x18x16xbf16> to vector<18x16xbf16>
    %cst_3 = arith.constant dense<0.000000e+00> : vector<256x16xf32>
    %8 = tpu.matmul %5, %7, %cst_3 {dimension_numbers = #tpu.dot_dimension_numbers<[1], [0], [0], [1], [0, 0, 1, 1], [], []>} : vector<256x18xbf16>, vector<18x16xbf16>, vector<256x16xf32> -> vector<256x16xf32>
    %9 = arith.addf %2, %8 : vector<256x16xf32>
    %c0_4 = arith.constant 0 : index
    %c0_5 = arith.constant 0 : index
    %10 = vector.load %arg3[%c0_4, %c0_5] : memref<1x16xf32, #tpu.memory_space<vmem>>, vector<1x16xf32>
    %11 = vector.broadcast %10 : vector<1x16xf32> to vector<256x16xf32>
    %12 = arith.addf %9, %11 : vector<256x16xf32>
    %cst_6 = arith.constant 2.000000e-01 : f32
    %13 = vector.broadcast %cst_6 : f32 to vector<256x16xf32>
    %14 = arith.mulf %13, %12 : vector<256x16xf32>
    %15 = arith.maximumf %12, %14 : vector<256x16xf32>
    %16 = arith.truncf %15 : vector<256x16xf32> to vector<256x16xbf16>
    %c0_7 = arith.constant 0 : index
    %c0_8 = arith.constant 0 : index
    %17 = vector.load %arg4[%c0_7, %c0_8] : memref<256x16xbf16, #tpu.memory_space<vmem>>, vector<256x16xbf16>
    tpu.vector_store %arg4[%c0_7, %c0_8], %16 {strides = array<i32>} : memref<256x16xbf16, #tpu.memory_space<vmem>>, vector<256x16xbf16>,
    return
  }
  func.func @transform_0(%arg0: i32) -> (i32, i32) {
    %c0_i32 = arith.constant 0 : i32
    %c0_i32_0 = arith.constant 0 : i32
    %c0_i32_1 = arith.constant 0 : i32
    return %c0_i32, %c0_i32_0 : i32, i32
  }
  func.func @transform_1(%arg0: i32) -> (i32, i32, i32) {
    %c0_i32 = arith.constant 0 : i32
    %c0_i32_0 = arith.constant 0 : i32
    %c0_i32_1 = arith.constant 0 : i32
    %c0_i32_2 = arith.constant 0 : i32
    return %c0_i32, %c0_i32_0, %c0_i32_1 : i32, i32, i32
  }
  func.func @transform_2(%arg0: i32) -> (i32, i32) {
    %c0_i32 = arith.constant 0 : i32
    %c0_i32_0 = arith.constant 0 : i32
    %c0_i32_1 = arith.constant 0 : i32
    return %c0_i32, %c0_i32_0 : i32, i32
  }
  func.func @transform_3(%arg0: i32) -> (i32, i32) {
    %c0_i32 = arith.constant 0 : i32
    %c0_i32_0 = arith.constant 0 : i32
    return %arg0, %c0_i32 : i32, i32
  }
}

module attributes {stable_mosaic.version = 11 : i64} {
  func.func @kernel(%arg0: i32, %arg1: memref<806x16xf32, #tpu.memory_space<vmem>>, %arg2: memref<9x16x16xf32, #tpu.memory_space<vmem>>, %arg3: memref<1x16xf32, #tpu.memory_space<vmem>>, %arg4: memref<256x16xbf16, #tpu.memory_space<vmem>>) attributes {dimension_semantics = [#tpu.dimension_semantics<parallel>], iteration_bounds = array<i64: 3>, scalar_prefetch = 0 : i64, scratch_operands = 0 : i64, tpu.core_type = #tpu.core_type<tc>, window_params = [{pipeline_mode = #tpu.pipeline_mode<synchronous>, transform_indices = @transform_0, window_bounds = array<i64: 806, 16>}, {pipeline_mode = #tpu.pipeline_mode<synchronous>, transform_indices = @transform_1, window_bounds = array<i64: 9, 16, 16>}, {pipeline_mode = #tpu.pipeline_mode<synchronous>, transform_indices = @transform_2, window_bounds = array<i64: 1, 16>}, {transform_indices = @transform_3, window_bounds = array<i64: 256, 16>}]} {
    %c256_i32 = arith.constant 256 : i32
    %0 = arith.muli %arg0, %c256_i32 : i32
    %1 = tpu.assume_multiple %0, 8 : i32
    %cst = arith.constant 0.000000e+00 : f32
    %2 = vector.broadcast %cst : f32 to vector<256x16xf32>
    %c0_i32 = arith.constant 0 : i32
    %3 = arith.addi %1, %c0_i32 : i32
    %4 = arith.index_cast %3 : i32 to index
    %c0 = arith.constant 0 : index
    %5 = vector.load %arg1[%4, %c0] : memref<806x16xf32, #tpu.memory_space<vmem>>, vector<256x16xf32>
    %c0_0 = arith.constant 0 : index
    %c0_1 = arith.constant 0 : index
    %c0_2 = arith.constant 0 : index
    %6 = vector.load %arg2[%c0_0, %c0_1, %c0_2] : memref<9x16x16xf32, #tpu.memory_space<vmem>>, vector<1x16x16xf32>
    %7 = vector.shape_cast %6 : vector<1x16x16xf32> to vector<16x16xf32>
    %cst_3 = arith.constant dense<0.000000e+00> : vector<256x16xf32>
    %8 = tpu.matmul %5, %7, %cst_3 {dimension_numbers = #tpu.dot_dimension_numbers<[1], [0], [0], [1], [0, 0, 1, 1], [], []>} : vector<256x16xf32>, vector<16x16xf32>, vector<256x16xf32> -> vector<256x16xf32>
    %9 = arith.addf %2, %8 : vector<256x16xf32>
    %c1_i32 = arith.constant 1 : i32
    %10 = arith.addi %1, %c1_i32 : i32
    %11 = arith.index_cast %10 : i32 to index
    %c0_4 = arith.constant 0 : index
    %12 = vector.load %arg1[%11, %c0_4] : memref<806x16xf32, #tpu.memory_space<vmem>>, vector<256x16xf32>
    %c1 = arith.constant 1 : index
    %c0_5 = arith.constant 0 : index
    %c0_6 = arith.constant 0 : index
    %13 = vector.load %arg2[%c1, %c0_5, %c0_6] : memref<9x16x16xf32, #tpu.memory_space<vmem>>, vector<1x16x16xf32>
    %14 = vector.shape_cast %13 : vector<1x16x16xf32> to vector<16x16xf32>
    %cst_7 = arith.constant dense<0.000000e+00> : vector<256x16xf32>
    %15 = tpu.matmul %12, %14, %cst_7 {dimension_numbers = #tpu.dot_dimension_numbers<[1], [0], [0], [1], [0, 0, 1, 1], [], []>} : vector<256x16xf32>, vector<16x16xf32>, vector<256x16xf32> -> vector<256x16xf32>
    %16 = arith.addf %9, %15 : vector<256x16xf32>
    %c2_i32 = arith.constant 2 : i32
    %17 = arith.addi %1, %c2_i32 : i32
    %18 = arith.index_cast %17 : i32 to index
    %c0_8 = arith.constant 0 : index
    %19 = vector.load %arg1[%18, %c0_8] : memref<806x16xf32, #tpu.memory_space<vmem>>, vector<256x16xf32>
    %c2 = arith.constant 2 : index
    %c0_9 = arith.constant 0 : index
    %c0_10 = arith.constant 0 : index
    %20 = vector.load %arg2[%c2, %c0_9, %c0_10] : memref<9x16x16xf32, #tpu.memory_space<vmem>>, vector<1x16x16xf32>
    %21 = vector.shape_cast %20 : vector<1x16x16xf32> to vector<16x16xf32>
    %cst_11 = arith.constant dense<0.000000e+00> : vector<256x16xf32>
    %22 = tpu.matmul %19, %21, %cst_11 {dimension_numbers = #tpu.dot_dimension_numbers<[1], [0], [0], [1], [0, 0, 1, 1], [], []>} : vector<256x16xf32>, vector<16x16xf32>, vector<256x16xf32> -> vector<256x16xf32>
    %23 = arith.addf %16, %22 : vector<256x16xf32>
    %c18_i32 = arith.constant 18 : i32
    %24 = arith.addi %1, %c18_i32 : i32
    %25 = arith.index_cast %24 : i32 to index
    %c0_12 = arith.constant 0 : index
    %26 = vector.load %arg1[%25, %c0_12] : memref<806x16xf32, #tpu.memory_space<vmem>>, vector<256x16xf32>
    %c3 = arith.constant 3 : index
    %c0_13 = arith.constant 0 : index
    %c0_14 = arith.constant 0 : index
    %27 = vector.load %arg2[%c3, %c0_13, %c0_14] : memref<9x16x16xf32, #tpu.memory_space<vmem>>, vector<1x16x16xf32>
    %28 = vector.shape_cast %27 : vector<1x16x16xf32> to vector<16x16xf32>
    %cst_15 = arith.constant dense<0.000000e+00> : vector<256x16xf32>
    %29 = tpu.matmul %26, %28, %cst_15 {dimension_numbers = #tpu.dot_dimension_numbers<[1], [0], [0], [1], [0, 0, 1, 1], [], []>} : vector<256x16xf32>, vector<16x16xf32>, vector<256x16xf32> -> vector<256x16xf32>
    %30 = arith.addf %23, %29 : vector<256x16xf32>
    %c19_i32 = arith.constant 19 : i32
    %31 = arith.addi %1, %c19_i32 : i32
    %32 = arith.index_cast %31 : i32 to index
    %c0_16 = arith.constant 0 : index
    %33 = vector.load %arg1[%32, %c0_16] : memref<806x16xf32, #tpu.memory_space<vmem>>, vector<256x16xf32>
    %c4 = arith.constant 4 : index
    %c0_17 = arith.constant 0 : index
    %c0_18 = arith.constant 0 : index
    %34 = vector.load %arg2[%c4, %c0_17, %c0_18] : memref<9x16x16xf32, #tpu.memory_space<vmem>>, vector<1x16x16xf32>
    %35 = vector.shape_cast %34 : vector<1x16x16xf32> to vector<16x16xf32>
    %cst_19 = arith.constant dense<0.000000e+00> : vector<256x16xf32>
    %36 = tpu.matmul %33, %35, %cst_19 {dimension_numbers = #tpu.dot_dimension_numbers<[1], [0], [0], [1], [0, 0, 1, 1], [], []>} : vector<256x16xf32>, vector<16x16xf32>, vector<256x16xf32> -> vector<256x16xf32>
    %37 = arith.addf %30, %36 : vector<256x16xf32>
    %c20_i32 = arith.constant 20 : i32
    %38 = arith.addi %1, %c20_i32 : i32
    %39 = arith.index_cast %38 : i32 to index
    %c0_20 = arith.constant 0 : index
    %40 = vector.load %arg1[%39, %c0_20] : memref<806x16xf32, #tpu.memory_space<vmem>>, vector<256x16xf32>
    %c5 = arith.constant 5 : index
    %c0_21 = arith.constant 0 : index
    %c0_22 = arith.constant 0 : index
    %41 = vector.load %arg2[%c5, %c0_21, %c0_22] : memref<9x16x16xf32, #tpu.memory_space<vmem>>, vector<1x16x16xf32>
    %42 = vector.shape_cast %41 : vector<1x16x16xf32> to vector<16x16xf32>
    %cst_23 = arith.constant dense<0.000000e+00> : vector<256x16xf32>
    %43 = tpu.matmul %40, %42, %cst_23 {dimension_numbers = #tpu.dot_dimension_numbers<[1], [0], [0], [1], [0, 0, 1, 1], [], []>} : vector<256x16xf32>, vector<16x16xf32>, vector<256x16xf32> -> vector<256x16xf32>
    %44 = arith.addf %37, %43 : vector<256x16xf32>
    %c36_i32 = arith.constant 36 : i32
    %45 = arith.addi %1, %c36_i32 : i32
    %46 = arith.index_cast %45 : i32 to index
    %c0_24 = arith.constant 0 : index
    %47 = vector.load %arg1[%46, %c0_24] : memref<806x16xf32, #tpu.memory_space<vmem>>, vector<256x16xf32>
    %c6 = arith.constant 6 : index
    %c0_25 = arith.constant 0 : index
    %c0_26 = arith.constant 0 : index
    %48 = vector.load %arg2[%c6, %c0_25, %c0_26] : memref<9x16x16xf32, #tpu.memory_space<vmem>>, vector<1x16x16xf32>
    %49 = vector.shape_cast %48 : vector<1x16x16xf32> to vector<16x16xf32>
    %cst_27 = arith.constant dense<0.000000e+00> : vector<256x16xf32>
    %50 = tpu.matmul %47, %49, %cst_27 {dimension_numbers = #tpu.dot_dimension_numbers<[1], [0], [0], [1], [0, 0, 1, 1], [], []>} : vector<256x16xf32>, vector<16x16xf32>, vector<256x16xf32> -> vector<256x16xf32>
    %51 = arith.addf %44, %50 : vector<256x16xf32>
    %c37_i32 = arith.constant 37 : i32
    %52 = arith.addi %1, %c37_i32 : i32
    %53 = arith.index_cast %52 : i32 to index
    %c0_28 = arith.constant 0 : index
    %54 = vector.load %arg1[%53, %c0_28] : memref<806x16xf32, #tpu.memory_space<vmem>>, vector<256x16xf32>
    %c7 = arith.constant 7 : index
    %c0_29 = arith.constant 0 : index
    %c0_30 = arith.constant 0 : index
    %55 = vector.load %arg2[%c7, %c0_29, %c0_30] : memref<9x16x16xf32, #tpu.memory_space<vmem>>, vector<1x16x16xf32>
    %56 = vector.shape_cast %55 : vector<1x16x16xf32> to vector<16x16xf32>
    %cst_31 = arith.constant dense<0.000000e+00> : vector<256x16xf32>
    %57 = tpu.matmul %54, %56, %cst_31 {dimension_numbers = #tpu.dot_dimension_numbers<[1], [0], [0], [1], [0, 0, 1, 1], [], []>} : vector<256x16xf32>, vector<16x16xf32>, vector<256x16xf32> -> vector<256x16xf32>
    %58 = arith.addf %51, %57 : vector<256x16xf32>
    %c38_i32 = arith.constant 38 : i32
    %59 = arith.addi %1, %c38_i32 : i32
    %60 = arith.index_cast %59 : i32 to index
    %c0_32 = arith.constant 0 : index
    %61 = vector.load %arg1[%60, %c0_32] : memref<806x16xf32, #tpu.memory_space<vmem>>, vector<256x16xf32>
    %c8 = arith.constant 8 : index
    %c0_33 = arith.constant 0 : index
    %c0_34 = arith.constant 0 : index
    %62 = vector.load %arg2[%c8, %c0_33, %c0_34] : memref<9x16x16xf32, #tpu.memory_space<vmem>>, vector<1x16x16xf32>
    %63 = vector.shape_cast %62 : vector<1x16x16xf32> to vector<16x16xf32>
    %cst_35 = arith.constant dense<0.000000e+00> : vector<256x16xf32>
    %64 = tpu.matmul %61, %63, %cst_35 {dimension_numbers = #tpu.dot_dimension_numbers<[1], [0], [0], [1], [0, 0, 1, 1], [], []>} : vector<256x16xf32>, vector<16x16xf32>, vector<256x16xf32> -> vector<256x16xf32>
    %65 = arith.addf %58, %64 : vector<256x16xf32>
    %c0_36 = arith.constant 0 : index
    %c0_37 = arith.constant 0 : index
    %66 = vector.load %arg3[%c0_36, %c0_37] : memref<1x16xf32, #tpu.memory_space<vmem>>, vector<1x16xf32>
    %67 = vector.broadcast %66 : vector<1x16xf32> to vector<256x16xf32>
    %68 = arith.addf %65, %67 : vector<256x16xf32>
    %cst_38 = arith.constant 2.000000e-01 : f32
    %69 = vector.broadcast %cst_38 : f32 to vector<256x16xf32>
    %70 = arith.mulf %69, %68 : vector<256x16xf32>
    %71 = arith.maximumf %68, %70 : vector<256x16xf32>
    %72 = arith.truncf %71 : vector<256x16xf32> to vector<256x16xbf16>
    %c0_39 = arith.constant 0 : index
    %c0_40 = arith.constant 0 : index
    %73 = vector.load %arg4[%c0_39, %c0_40] : memref<256x16xbf16, #tpu.memory_space<vmem>>, vector<256x16xbf16>
    tpu.vector_store %arg4[%c0_39, %c0_40], %72 {strides = array<i32>} : memref<256x16xbf16, #tpu.memory_space<vmem>>, vector<256x16xbf16>,
    return
  }
  func.func @transform_0(%arg0: i32) -> (i32, i32) {
    %c0_i32 = arith.constant 0 : i32
    %c0_i32_0 = arith.constant 0 : i32
    %c0_i32_1 = arith.constant 0 : i32
    return %c0_i32, %c0_i32_0 : i32, i32
  }
  func.func @transform_1(%arg0: i32) -> (i32, i32, i32) {
    %c0_i32 = arith.constant 0 : i32
    %c0_i32_0 = arith.constant 0 : i32
    %c0_i32_1 = arith.constant 0 : i32
    %c0_i32_2 = arith.constant 0 : i32
    return %c0_i32, %c0_i32_0, %c0_i32_1 : i32, i32, i32
  }
  func.func @transform_2(%arg0: i32) -> (i32, i32) {
    %c0_i32 = arith.constant 0 : i32
    %c0_i32_0 = arith.constant 0 : i32
    %c0_i32_1 = arith.constant 0 : i32
    return %c0_i32, %c0_i32_0 : i32, i32
  }
  func.func @transform_3(%arg0: i32) -> (i32, i32) {
    %c0_i32 = arith.constant 0 : i32
    %c0_i32_0 = arith.constant 0 : i32
    return %arg0, %c0_i32 : i32, i32
  }
}

module attributes {stable_mosaic.version = 11 : i64} {
  func.func @kernel(%arg0: i32, %arg1: memref<512x16xbf16, #tpu.memory_space<vmem>>, %arg2: memref<1x16x4xbf16, #tpu.memory_space<vmem>>, %arg3: memref<1x4xf32, #tpu.memory_space<vmem>>, %arg4: memref<256x4xbf16, #tpu.memory_space<vmem>>) attributes {dimension_semantics = [#tpu.dimension_semantics<parallel>], iteration_bounds = array<i64: 2>, scalar_prefetch = 0 : i64, scratch_operands = 0 : i64, tpu.core_type = #tpu.core_type<tc>, window_params = [{pipeline_mode = #tpu.pipeline_mode<synchronous>, transform_indices = @transform_0, window_bounds = array<i64: 512, 16>}, {pipeline_mode = #tpu.pipeline_mode<synchronous>, transform_indices = @transform_1, window_bounds = array<i64: 1, 16, 4>}, {pipeline_mode = #tpu.pipeline_mode<synchronous>, transform_indices = @transform_2, window_bounds = array<i64: 1, 4>}, {transform_indices = @transform_3, window_bounds = array<i64: 256, 4>}]} {
    %c256_i32 = arith.constant 256 : i32
    %0 = arith.muli %arg0, %c256_i32 : i32
    %1 = tpu.assume_multiple %0, 8 : i32
    %cst = arith.constant 0.000000e+00 : f32
    %2 = vector.broadcast %cst : f32 to vector<256x4xf32>
    %c0_i32 = arith.constant 0 : i32
    %3 = arith.addi %1, %c0_i32 : i32
    %4 = arith.index_cast %3 : i32 to index
    %c0 = arith.constant 0 : index
    %5 = vector.load %arg1[%4, %c0] : memref<512x16xbf16, #tpu.memory_space<vmem>>, vector<256x16xbf16>
    %c0_0 = arith.constant 0 : index
    %c0_1 = arith.constant 0 : index
    %c0_2 = arith.constant 0 : index
    %6 = vector.load %arg2[%c0_0, %c0_1, %c0_2] : memref<1x16x4xbf16, #tpu.memory_space<vmem>>, vector<1x16x4xbf16>
    %7 = vector.shape_cast %6 : vector<1x16x4xbf16> to vector<16x4xbf16>
    %cst_3 = arith.constant dense<0.000000e+00> : vector<256x4xf32>
    %8 = tpu.matmul %5, %7, %cst_3 {dimension_numbers = #tpu.dot_dimension_numbers<[1], [0], [0], [1], [0, 0, 1, 1], [], []>} : vector<256x16xbf16>, vector<16x4xbf16>, vector<256x4xf32> -> vector<256x4xf32>
    %9 = arith.addf %2, %8 : vector<256x4xf32>
    %c0_4 = arith.constant 0 : index
    %c0_5 = arith.constant 0 : index
    %10 = vector.load %arg3[%c0_4, %c0_5] : memref<1x4xf32, #tpu.memory_space<vmem>>, vector<1x4xf32>
    %11 = vector.broadcast %10 : vector<1x4xf32> to vector<256x4xf32>
    %12 = arith.addf %9, %11 : vector<256x4xf32>
    %cst_6 = arith.constant 2.000000e-01 : f32
    %13 = vector.broadcast %cst_6 : f32 to vector<256x4xf32>
    %14 = arith.mulf %13, %12 : vector<256x4xf32>
    %15 = arith.maximumf %12, %14 : vector<256x4xf32>
    %16 = arith.truncf %15 : vector<256x4xf32> to vector<256x4xbf16>
    %c0_7 = arith.constant 0 : index
    %c0_8 = arith.constant 0 : index
    %17 = vector.load %arg4[%c0_7, %c0_8] : memref<256x4xbf16, #tpu.memory_space<vmem>>, vector<256x4xbf16>
    tpu.vector_store %arg4[%c0_7, %c0_8], %16 {strides = array<i32>} : memref<256x4xbf16, #tpu.memory_space<vmem>>, vector<256x4xbf16>,
    return
  }
  func.func @transform_0(%arg0: i32) -> (i32, i32) {
    %c0_i32 = arith.constant 0 : i32
    %c0_i32_0 = arith.constant 0 : i32
    %c0_i32_1 = arith.constant 0 : i32
    return %c0_i32, %c0_i32_0 : i32, i32
  }
  func.func @transform_1(%arg0: i32) -> (i32, i32, i32) {
    %c0_i32 = arith.constant 0 : i32
    %c0_i32_0 = arith.constant 0 : i32
    %c0_i32_1 = arith.constant 0 : i32
    %c0_i32_2 = arith.constant 0 : i32
    return %c0_i32, %c0_i32_0, %c0_i32_1 : i32, i32, i32
  }
  func.func @transform_2(%arg0: i32) -> (i32, i32) {
    %c0_i32 = arith.constant 0 : i32
    %c0_i32_0 = arith.constant 0 : i32
    %c0_i32_1 = arith.constant 0 : i32
    return %c0_i32, %c0_i32_0 : i32, i32
  }
  func.func @transform_3(%arg0: i32) -> (i32, i32) {
    %c0_i32 = arith.constant 0 : i32
    %c0_i32_0 = arith.constant 0 : i32
    return %arg0, %c0_i32 : i32, i32
  }
}

module attributes {stable_mosaic.version = 11 : i64} {
  func.func @kernel(%arg0: i32, %arg1: memref<806x68xf32, #tpu.memory_space<vmem>>, %arg2: memref<9x68x32xf32, #tpu.memory_space<vmem>>, %arg3: memref<1x32xf32, #tpu.memory_space<vmem>>, %arg4: memref<256x32xbf16, #tpu.memory_space<vmem>>) attributes {dimension_semantics = [#tpu.dimension_semantics<parallel>], iteration_bounds = array<i64: 3>, scalar_prefetch = 0 : i64, scratch_operands = 0 : i64, tpu.core_type = #tpu.core_type<tc>, window_params = [{pipeline_mode = #tpu.pipeline_mode<synchronous>, transform_indices = @transform_0, window_bounds = array<i64: 806, 68>}, {pipeline_mode = #tpu.pipeline_mode<synchronous>, transform_indices = @transform_1, window_bounds = array<i64: 9, 68, 32>}, {pipeline_mode = #tpu.pipeline_mode<synchronous>, transform_indices = @transform_2, window_bounds = array<i64: 1, 32>}, {transform_indices = @transform_3, window_bounds = array<i64: 256, 32>}]} {
    %c256_i32 = arith.constant 256 : i32
    %0 = arith.muli %arg0, %c256_i32 : i32
    %1 = tpu.assume_multiple %0, 8 : i32
    %cst = arith.constant 0.000000e+00 : f32
    %2 = vector.broadcast %cst : f32 to vector<256x32xf32>
    %c0_i32 = arith.constant 0 : i32
    %3 = arith.addi %1, %c0_i32 : i32
    %4 = arith.index_cast %3 : i32 to index
    %c0 = arith.constant 0 : index
    %5 = vector.load %arg1[%4, %c0] : memref<806x68xf32, #tpu.memory_space<vmem>>, vector<256x68xf32>
    %c0_0 = arith.constant 0 : index
    %c0_1 = arith.constant 0 : index
    %c0_2 = arith.constant 0 : index
    %6 = vector.load %arg2[%c0_0, %c0_1, %c0_2] : memref<9x68x32xf32, #tpu.memory_space<vmem>>, vector<1x68x32xf32>
    %7 = vector.shape_cast %6 : vector<1x68x32xf32> to vector<68x32xf32>
    %cst_3 = arith.constant dense<0.000000e+00> : vector<256x32xf32>
    %8 = tpu.matmul %5, %7, %cst_3 {dimension_numbers = #tpu.dot_dimension_numbers<[1], [0], [0], [1], [0, 0, 1, 1], [], []>} : vector<256x68xf32>, vector<68x32xf32>, vector<256x32xf32> -> vector<256x32xf32>
    %9 = arith.addf %2, %8 : vector<256x32xf32>
    %c1_i32 = arith.constant 1 : i32
    %10 = arith.addi %1, %c1_i32 : i32
    %11 = arith.index_cast %10 : i32 to index
    %c0_4 = arith.constant 0 : index
    %12 = vector.load %arg1[%11, %c0_4] : memref<806x68xf32, #tpu.memory_space<vmem>>, vector<256x68xf32>
    %c1 = arith.constant 1 : index
    %c0_5 = arith.constant 0 : index
    %c0_6 = arith.constant 0 : index
    %13 = vector.load %arg2[%c1, %c0_5, %c0_6] : memref<9x68x32xf32, #tpu.memory_space<vmem>>, vector<1x68x32xf32>
    %14 = vector.shape_cast %13 : vector<1x68x32xf32> to vector<68x32xf32>
    %cst_7 = arith.constant dense<0.000000e+00> : vector<256x32xf32>
    %15 = tpu.matmul %12, %14, %cst_7 {dimension_numbers = #tpu.dot_dimension_numbers<[1], [0], [0], [1], [0, 0, 1, 1], [], []>} : vector<256x68xf32>, vector<68x32xf32>, vector<256x32xf32> -> vector<256x32xf32>
    %16 = arith.addf %9, %15 : vector<256x32xf32>
    %c2_i32 = arith.constant 2 : i32
    %17 = arith.addi %1, %c2_i32 : i32
    %18 = arith.index_cast %17 : i32 to index
    %c0_8 = arith.constant 0 : index
    %19 = vector.load %arg1[%18, %c0_8] : memref<806x68xf32, #tpu.memory_space<vmem>>, vector<256x68xf32>
    %c2 = arith.constant 2 : index
    %c0_9 = arith.constant 0 : index
    %c0_10 = arith.constant 0 : index
    %20 = vector.load %arg2[%c2, %c0_9, %c0_10] : memref<9x68x32xf32, #tpu.memory_space<vmem>>, vector<1x68x32xf32>
    %21 = vector.shape_cast %20 : vector<1x68x32xf32> to vector<68x32xf32>
    %cst_11 = arith.constant dense<0.000000e+00> : vector<256x32xf32>
    %22 = tpu.matmul %19, %21, %cst_11 {dimension_numbers = #tpu.dot_dimension_numbers<[1], [0], [0], [1], [0, 0, 1, 1], [], []>} : vector<256x68xf32>, vector<68x32xf32>, vector<256x32xf32> -> vector<256x32xf32>
    %23 = arith.addf %16, %22 : vector<256x32xf32>
    %c18_i32 = arith.constant 18 : i32
    %24 = arith.addi %1, %c18_i32 : i32
    %25 = arith.index_cast %24 : i32 to index
    %c0_12 = arith.constant 0 : index
    %26 = vector.load %arg1[%25, %c0_12] : memref<806x68xf32, #tpu.memory_space<vmem>>, vector<256x68xf32>
    %c3 = arith.constant 3 : index
    %c0_13 = arith.constant 0 : index
    %c0_14 = arith.constant 0 : index
    %27 = vector.load %arg2[%c3, %c0_13, %c0_14] : memref<9x68x32xf32, #tpu.memory_space<vmem>>, vector<1x68x32xf32>
    %28 = vector.shape_cast %27 : vector<1x68x32xf32> to vector<68x32xf32>
    %cst_15 = arith.constant dense<0.000000e+00> : vector<256x32xf32>
    %29 = tpu.matmul %26, %28, %cst_15 {dimension_numbers = #tpu.dot_dimension_numbers<[1], [0], [0], [1], [0, 0, 1, 1], [], []>} : vector<256x68xf32>, vector<68x32xf32>, vector<256x32xf32> -> vector<256x32xf32>
    %30 = arith.addf %23, %29 : vector<256x32xf32>
    %c19_i32 = arith.constant 19 : i32
    %31 = arith.addi %1, %c19_i32 : i32
    %32 = arith.index_cast %31 : i32 to index
    %c0_16 = arith.constant 0 : index
    %33 = vector.load %arg1[%32, %c0_16] : memref<806x68xf32, #tpu.memory_space<vmem>>, vector<256x68xf32>
    %c4 = arith.constant 4 : index
    %c0_17 = arith.constant 0 : index
    %c0_18 = arith.constant 0 : index
    %34 = vector.load %arg2[%c4, %c0_17, %c0_18] : memref<9x68x32xf32, #tpu.memory_space<vmem>>, vector<1x68x32xf32>
    %35 = vector.shape_cast %34 : vector<1x68x32xf32> to vector<68x32xf32>
    %cst_19 = arith.constant dense<0.000000e+00> : vector<256x32xf32>
    %36 = tpu.matmul %33, %35, %cst_19 {dimension_numbers = #tpu.dot_dimension_numbers<[1], [0], [0], [1], [0, 0, 1, 1], [], []>} : vector<256x68xf32>, vector<68x32xf32>, vector<256x32xf32> -> vector<256x32xf32>
    %37 = arith.addf %30, %36 : vector<256x32xf32>
    %c20_i32 = arith.constant 20 : i32
    %38 = arith.addi %1, %c20_i32 : i32
    %39 = arith.index_cast %38 : i32 to index
    %c0_20 = arith.constant 0 : index
    %40 = vector.load %arg1[%39, %c0_20] : memref<806x68xf32, #tpu.memory_space<vmem>>, vector<256x68xf32>
    %c5 = arith.constant 5 : index
    %c0_21 = arith.constant 0 : index
    %c0_22 = arith.constant 0 : index
    %41 = vector.load %arg2[%c5, %c0_21, %c0_22] : memref<9x68x32xf32, #tpu.memory_space<vmem>>, vector<1x68x32xf32>
    %42 = vector.shape_cast %41 : vector<1x68x32xf32> to vector<68x32xf32>
    %cst_23 = arith.constant dense<0.000000e+00> : vector<256x32xf32>
    %43 = tpu.matmul %40, %42, %cst_23 {dimension_numbers = #tpu.dot_dimension_numbers<[1], [0], [0], [1], [0, 0, 1, 1], [], []>} : vector<256x68xf32>, vector<68x32xf32>, vector<256x32xf32> -> vector<256x32xf32>
    %44 = arith.addf %37, %43 : vector<256x32xf32>
    %c36_i32 = arith.constant 36 : i32
    %45 = arith.addi %1, %c36_i32 : i32
    %46 = arith.index_cast %45 : i32 to index
    %c0_24 = arith.constant 0 : index
    %47 = vector.load %arg1[%46, %c0_24] : memref<806x68xf32, #tpu.memory_space<vmem>>, vector<256x68xf32>
    %c6 = arith.constant 6 : index
    %c0_25 = arith.constant 0 : index
    %c0_26 = arith.constant 0 : index
    %48 = vector.load %arg2[%c6, %c0_25, %c0_26] : memref<9x68x32xf32, #tpu.memory_space<vmem>>, vector<1x68x32xf32>
    %49 = vector.shape_cast %48 : vector<1x68x32xf32> to vector<68x32xf32>
    %cst_27 = arith.constant dense<0.000000e+00> : vector<256x32xf32>
    %50 = tpu.matmul %47, %49, %cst_27 {dimension_numbers = #tpu.dot_dimension_numbers<[1], [0], [0], [1], [0, 0, 1, 1], [], []>} : vector<256x68xf32>, vector<68x32xf32>, vector<256x32xf32> -> vector<256x32xf32>
    %51 = arith.addf %44, %50 : vector<256x32xf32>
    %c37_i32 = arith.constant 37 : i32
    %52 = arith.addi %1, %c37_i32 : i32
    %53 = arith.index_cast %52 : i32 to index
    %c0_28 = arith.constant 0 : index
    %54 = vector.load %arg1[%53, %c0_28] : memref<806x68xf32, #tpu.memory_space<vmem>>, vector<256x68xf32>
    %c7 = arith.constant 7 : index
    %c0_29 = arith.constant 0 : index
    %c0_30 = arith.constant 0 : index
    %55 = vector.load %arg2[%c7, %c0_29, %c0_30] : memref<9x68x32xf32, #tpu.memory_space<vmem>>, vector<1x68x32xf32>
    %56 = vector.shape_cast %55 : vector<1x68x32xf32> to vector<68x32xf32>
    %cst_31 = arith.constant dense<0.000000e+00> : vector<256x32xf32>
    %57 = tpu.matmul %54, %56, %cst_31 {dimension_numbers = #tpu.dot_dimension_numbers<[1], [0], [0], [1], [0, 0, 1, 1], [], []>} : vector<256x68xf32>, vector<68x32xf32>, vector<256x32xf32> -> vector<256x32xf32>
    %58 = arith.addf %51, %57 : vector<256x32xf32>
    %c38_i32 = arith.constant 38 : i32
    %59 = arith.addi %1, %c38_i32 : i32
    %60 = arith.index_cast %59 : i32 to index
    %c0_32 = arith.constant 0 : index
    %61 = vector.load %arg1[%60, %c0_32] : memref<806x68xf32, #tpu.memory_space<vmem>>, vector<256x68xf32>
    %c8 = arith.constant 8 : index
    %c0_33 = arith.constant 0 : index
    %c0_34 = arith.constant 0 : index
    %62 = vector.load %arg2[%c8, %c0_33, %c0_34] : memref<9x68x32xf32, #tpu.memory_space<vmem>>, vector<1x68x32xf32>
    %63 = vector.shape_cast %62 : vector<1x68x32xf32> to vector<68x32xf32>
    %cst_35 = arith.constant dense<0.000000e+00> : vector<256x32xf32>
    %64 = tpu.matmul %61, %63, %cst_35 {dimension_numbers = #tpu.dot_dimension_numbers<[1], [0], [0], [1], [0, 0, 1, 1], [], []>} : vector<256x68xf32>, vector<68x32xf32>, vector<256x32xf32> -> vector<256x32xf32>
    %65 = arith.addf %58, %64 : vector<256x32xf32>
    %c0_36 = arith.constant 0 : index
    %c0_37 = arith.constant 0 : index
    %66 = vector.load %arg3[%c0_36, %c0_37] : memref<1x32xf32, #tpu.memory_space<vmem>>, vector<1x32xf32>
    %67 = vector.broadcast %66 : vector<1x32xf32> to vector<256x32xf32>
    %68 = arith.addf %65, %67 : vector<256x32xf32>
    %cst_38 = arith.constant 2.000000e-01 : f32
    %69 = vector.broadcast %cst_38 : f32 to vector<256x32xf32>
    %70 = arith.mulf %69, %68 : vector<256x32xf32>
    %71 = arith.maximumf %68, %70 : vector<256x32xf32>
    %72 = arith.truncf %71 : vector<256x32xf32> to vector<256x32xbf16>
    %c0_39 = arith.constant 0 : index
    %c0_40 = arith.constant 0 : index
    %73 = vector.load %arg4[%c0_39, %c0_40] : memref<256x32xbf16, #tpu.memory_space<vmem>>, vector<256x32xbf16>
    tpu.vector_store %arg4[%c0_39, %c0_40], %72 {strides = array<i32>} : memref<256x32xbf16, #tpu.memory_space<vmem>>, vector<256x32xbf16>,
    return
  }
  func.func @transform_0(%arg0: i32) -> (i32, i32) {
    %c0_i32 = arith.constant 0 : i32
    %c0_i32_0 = arith.constant 0 : i32
    %c0_i32_1 = arith.constant 0 : i32
    return %c0_i32, %c0_i32_0 : i32, i32
  }
  func.func @transform_1(%arg0: i32) -> (i32, i32, i32) {
    %c0_i32 = arith.constant 0 : i32
    %c0_i32_0 = arith.constant 0 : i32
    %c0_i32_1 = arith.constant 0 : i32
    %c0_i32_2 = arith.constant 0 : i32
    return %c0_i32, %c0_i32_0, %c0_i32_1 : i32, i32, i32
  }
  func.func @transform_2(%arg0: i32) -> (i32, i32) {
    %c0_i32 = arith.constant 0 : i32
    %c0_i32_0 = arith.constant 0 : i32
    %c0_i32_1 = arith.constant 0 : i32
    return %c0_i32, %c0_i32_0 : i32, i32
  }
  func.func @transform_3(%arg0: i32) -> (i32, i32) {
    %c0_i32 = arith.constant 0 : i32
    %c0_i32_0 = arith.constant 0 : i32
    return %arg0, %c0_i32 : i32, i32
  }
}

module attributes {stable_mosaic.version = 11 : i64} {
  func.func @kernel(%arg0: i32, %arg1: memref<512x32xbf16, #tpu.memory_space<vmem>>, %arg2: memref<1x32x32xbf16, #tpu.memory_space<vmem>>, %arg3: memref<1x32xf32, #tpu.memory_space<vmem>>, %arg4: memref<256x32xbf16, #tpu.memory_space<vmem>>) attributes {dimension_semantics = [#tpu.dimension_semantics<parallel>], iteration_bounds = array<i64: 2>, scalar_prefetch = 0 : i64, scratch_operands = 0 : i64, tpu.core_type = #tpu.core_type<tc>, window_params = [{pipeline_mode = #tpu.pipeline_mode<synchronous>, transform_indices = @transform_0, window_bounds = array<i64: 512, 32>}, {pipeline_mode = #tpu.pipeline_mode<synchronous>, transform_indices = @transform_1, window_bounds = array<i64: 1, 32, 32>}, {pipeline_mode = #tpu.pipeline_mode<synchronous>, transform_indices = @transform_2, window_bounds = array<i64: 1, 32>}, {transform_indices = @transform_3, window_bounds = array<i64: 256, 32>}]} {
    %c256_i32 = arith.constant 256 : i32
    %0 = arith.muli %arg0, %c256_i32 : i32
    %1 = tpu.assume_multiple %0, 8 : i32
    %cst = arith.constant 0.000000e+00 : f32
    %2 = vector.broadcast %cst : f32 to vector<256x32xf32>
    %c0_i32 = arith.constant 0 : i32
    %3 = arith.addi %1, %c0_i32 : i32
    %4 = arith.index_cast %3 : i32 to index
    %c0 = arith.constant 0 : index
    %5 = vector.load %arg1[%4, %c0] : memref<512x32xbf16, #tpu.memory_space<vmem>>, vector<256x32xbf16>
    %c0_0 = arith.constant 0 : index
    %c0_1 = arith.constant 0 : index
    %c0_2 = arith.constant 0 : index
    %6 = vector.load %arg2[%c0_0, %c0_1, %c0_2] : memref<1x32x32xbf16, #tpu.memory_space<vmem>>, vector<1x32x32xbf16>
    %7 = vector.shape_cast %6 : vector<1x32x32xbf16> to vector<32x32xbf16>
    %cst_3 = arith.constant dense<0.000000e+00> : vector<256x32xf32>
    %8 = tpu.matmul %5, %7, %cst_3 {dimension_numbers = #tpu.dot_dimension_numbers<[1], [0], [0], [1], [0, 0, 1, 1], [], []>} : vector<256x32xbf16>, vector<32x32xbf16>, vector<256x32xf32> -> vector<256x32xf32>
    %9 = arith.addf %2, %8 : vector<256x32xf32>
    %c0_4 = arith.constant 0 : index
    %c0_5 = arith.constant 0 : index
    %10 = vector.load %arg3[%c0_4, %c0_5] : memref<1x32xf32, #tpu.memory_space<vmem>>, vector<1x32xf32>
    %11 = vector.broadcast %10 : vector<1x32xf32> to vector<256x32xf32>
    %12 = arith.addf %9, %11 : vector<256x32xf32>
    %cst_6 = arith.constant 2.000000e-01 : f32
    %13 = vector.broadcast %cst_6 : f32 to vector<256x32xf32>
    %14 = arith.mulf %13, %12 : vector<256x32xf32>
    %15 = arith.maximumf %12, %14 : vector<256x32xf32>
    %16 = arith.truncf %15 : vector<256x32xf32> to vector<256x32xbf16>
    %c0_7 = arith.constant 0 : index
    %c0_8 = arith.constant 0 : index
    %17 = vector.load %arg4[%c0_7, %c0_8] : memref<256x32xbf16, #tpu.memory_space<vmem>>, vector<256x32xbf16>
    tpu.vector_store %arg4[%c0_7, %c0_8], %16 {strides = array<i32>} : memref<256x32xbf16, #tpu.memory_space<vmem>>, vector<256x32xbf16>,
    return
  }
  func.func @transform_0(%arg0: i32) -> (i32, i32) {
    %c0_i32 = arith.constant 0 : i32
    %c0_i32_0 = arith.constant 0 : i32
    %c0_i32_1 = arith.constant 0 : i32
    return %c0_i32, %c0_i32_0 : i32, i32
  }
  func.func @transform_1(%arg0: i32) -> (i32, i32, i32) {
    %c0_i32 = arith.constant 0 : i32
    %c0_i32_0 = arith.constant 0 : i32
    %c0_i32_1 = arith.constant 0 : i32
    %c0_i32_2 = arith.constant 0 : i32
    return %c0_i32, %c0_i32_0, %c0_i32_1 : i32, i32, i32
  }
  func.func @transform_2(%arg0: i32) -> (i32, i32) {
    %c0_i32 = arith.constant 0 : i32
    %c0_i32_0 = arith.constant 0 : i32
    %c0_i32_1 = arith.constant 0 : i32
    return %c0_i32, %c0_i32_0 : i32, i32
  }
  func.func @transform_3(%arg0: i32) -> (i32, i32) {
    %c0_i32 = arith.constant 0 : i32
    %c0_i32_0 = arith.constant 0 : i32
    return %arg0, %c0_i32 : i32, i32
  }
}

module attributes {stable_mosaic.version = 11 : i64} {
  func.func @kernel(%arg0: i32, %arg1: memref<2048x8xbf16, #tpu.memory_space<vmem>>, %arg2: memref<1x8x4xbf16, #tpu.memory_space<vmem>>, %arg3: memref<1x4xf32, #tpu.memory_space<vmem>>, %arg4: memref<512x4xbf16, #tpu.memory_space<vmem>>) attributes {dimension_semantics = [#tpu.dimension_semantics<parallel>], iteration_bounds = array<i64: 4>, scalar_prefetch = 0 : i64, scratch_operands = 0 : i64, tpu.core_type = #tpu.core_type<tc>, window_params = [{pipeline_mode = #tpu.pipeline_mode<synchronous>, transform_indices = @transform_0, window_bounds = array<i64: 2048, 8>}, {pipeline_mode = #tpu.pipeline_mode<synchronous>, transform_indices = @transform_1, window_bounds = array<i64: 1, 8, 4>}, {pipeline_mode = #tpu.pipeline_mode<synchronous>, transform_indices = @transform_2, window_bounds = array<i64: 1, 4>}, {transform_indices = @transform_3, window_bounds = array<i64: 512, 4>}]} {
    %c512_i32 = arith.constant 512 : i32
    %0 = arith.muli %arg0, %c512_i32 : i32
    %1 = tpu.assume_multiple %0, 8 : i32
    %cst = arith.constant 0.000000e+00 : f32
    %2 = vector.broadcast %cst : f32 to vector<512x4xf32>
    %c0_i32 = arith.constant 0 : i32
    %3 = arith.addi %1, %c0_i32 : i32
    %4 = arith.index_cast %3 : i32 to index
    %c0 = arith.constant 0 : index
    %5 = vector.load %arg1[%4, %c0] : memref<2048x8xbf16, #tpu.memory_space<vmem>>, vector<512x8xbf16>
    %c0_0 = arith.constant 0 : index
    %c0_1 = arith.constant 0 : index
    %c0_2 = arith.constant 0 : index
    %6 = vector.load %arg2[%c0_0, %c0_1, %c0_2] : memref<1x8x4xbf16, #tpu.memory_space<vmem>>, vector<1x8x4xbf16>
    %7 = vector.shape_cast %6 : vector<1x8x4xbf16> to vector<8x4xbf16>
    %cst_3 = arith.constant dense<0.000000e+00> : vector<512x4xf32>
    %8 = tpu.matmul %5, %7, %cst_3 {dimension_numbers = #tpu.dot_dimension_numbers<[1], [0], [0], [1], [0, 0, 1, 1], [], []>} : vector<512x8xbf16>, vector<8x4xbf16>, vector<512x4xf32> -> vector<512x4xf32>
    %9 = arith.addf %2, %8 : vector<512x4xf32>
    %c0_4 = arith.constant 0 : index
    %c0_5 = arith.constant 0 : index
    %10 = vector.load %arg3[%c0_4, %c0_5] : memref<1x4xf32, #tpu.memory_space<vmem>>, vector<1x4xf32>
    %11 = vector.broadcast %10 : vector<1x4xf32> to vector<512x4xf32>
    %12 = arith.addf %9, %11 : vector<512x4xf32>
    %cst_6 = arith.constant 2.000000e-01 : f32
    %13 = vector.broadcast %cst_6 : f32 to vector<512x4xf32>
    %14 = arith.mulf %13, %12 : vector<512x4xf32>
    %15 = arith.maximumf %12, %14 : vector<512x4xf32>
    %16 = arith.truncf %15 : vector<512x4xf32> to vector<512x4xbf16>
    %c0_7 = arith.constant 0 : index
    %c0_8 = arith.constant 0 : index
    %17 = vector.load %arg4[%c0_7, %c0_8] : memref<512x4xbf16, #tpu.memory_space<vmem>>, vector<512x4xbf16>
    tpu.vector_store %arg4[%c0_7, %c0_8], %16 {strides = array<i32>} : memref<512x4xbf16, #tpu.memory_space<vmem>>, vector<512x4xbf16>,
    return
  }
  func.func @transform_0(%arg0: i32) -> (i32, i32) {
    %c0_i32 = arith.constant 0 : i32
    %c0_i32_0 = arith.constant 0 : i32
    %c0_i32_1 = arith.constant 0 : i32
    return %c0_i32, %c0_i32_0 : i32, i32
  }
  func.func @transform_1(%arg0: i32) -> (i32, i32, i32) {
    %c0_i32 = arith.constant 0 : i32
    %c0_i32_0 = arith.constant 0 : i32
    %c0_i32_1 = arith.constant 0 : i32
    %c0_i32_2 = arith.constant 0 : i32
    return %c0_i32, %c0_i32_0, %c0_i32_1 : i32, i32, i32
  }
  func.func @transform_2(%arg0: i32) -> (i32, i32) {
    %c0_i32 = arith.constant 0 : i32
    %c0_i32_0 = arith.constant 0 : i32
    %c0_i32_1 = arith.constant 0 : i32
    return %c0_i32, %c0_i32_0 : i32, i32
  }
  func.func @transform_3(%arg0: i32) -> (i32, i32) {
    %c0_i32 = arith.constant 0 : i32
    %c0_i32_0 = arith.constant 0 : i32
    return %arg0, %c0_i32 : i32, i32
  }
}

module attributes {stable_mosaic.version = 11 : i64} {
  func.func @kernel(%arg0: i32, %arg1: memref<2630x36xf32, #tpu.memory_space<vmem>>, %arg2: memref<9x36x16xf32, #tpu.memory_space<vmem>>, %arg3: memref<1x16xf32, #tpu.memory_space<vmem>>, %arg4: memref<512x16xbf16, #tpu.memory_space<vmem>>) attributes {dimension_semantics = [#tpu.dimension_semantics<parallel>], iteration_bounds = array<i64: 5>, scalar_prefetch = 0 : i64, scratch_operands = 0 : i64, tpu.core_type = #tpu.core_type<tc>, window_params = [{pipeline_mode = #tpu.pipeline_mode<synchronous>, transform_indices = @transform_0, window_bounds = array<i64: 2630, 36>}, {pipeline_mode = #tpu.pipeline_mode<synchronous>, transform_indices = @transform_1, window_bounds = array<i64: 9, 36, 16>}, {pipeline_mode = #tpu.pipeline_mode<synchronous>, transform_indices = @transform_2, window_bounds = array<i64: 1, 16>}, {transform_indices = @transform_3, window_bounds = array<i64: 512, 16>}]} {
    %c512_i32 = arith.constant 512 : i32
    %0 = arith.muli %arg0, %c512_i32 : i32
    %1 = tpu.assume_multiple %0, 8 : i32
    %cst = arith.constant 0.000000e+00 : f32
    %2 = vector.broadcast %cst : f32 to vector<512x16xf32>
    %c0_i32 = arith.constant 0 : i32
    %3 = arith.addi %1, %c0_i32 : i32
    %4 = arith.index_cast %3 : i32 to index
    %c0 = arith.constant 0 : index
    %5 = vector.load %arg1[%4, %c0] : memref<2630x36xf32, #tpu.memory_space<vmem>>, vector<512x36xf32>
    %c0_0 = arith.constant 0 : index
    %c0_1 = arith.constant 0 : index
    %c0_2 = arith.constant 0 : index
    %6 = vector.load %arg2[%c0_0, %c0_1, %c0_2] : memref<9x36x16xf32, #tpu.memory_space<vmem>>, vector<1x36x16xf32>
    %7 = vector.shape_cast %6 : vector<1x36x16xf32> to vector<36x16xf32>
    %cst_3 = arith.constant dense<0.000000e+00> : vector<512x16xf32>
    %8 = tpu.matmul %5, %7, %cst_3 {dimension_numbers = #tpu.dot_dimension_numbers<[1], [0], [0], [1], [0, 0, 1, 1], [], []>} : vector<512x36xf32>, vector<36x16xf32>, vector<512x16xf32> -> vector<512x16xf32>
    %9 = arith.addf %2, %8 : vector<512x16xf32>
    %c1_i32 = arith.constant 1 : i32
    %10 = arith.addi %1, %c1_i32 : i32
    %11 = arith.index_cast %10 : i32 to index
    %c0_4 = arith.constant 0 : index
    %12 = vector.load %arg1[%11, %c0_4] : memref<2630x36xf32, #tpu.memory_space<vmem>>, vector<512x36xf32>
    %c1 = arith.constant 1 : index
    %c0_5 = arith.constant 0 : index
    %c0_6 = arith.constant 0 : index
    %13 = vector.load %arg2[%c1, %c0_5, %c0_6] : memref<9x36x16xf32, #tpu.memory_space<vmem>>, vector<1x36x16xf32>
    %14 = vector.shape_cast %13 : vector<1x36x16xf32> to vector<36x16xf32>
    %cst_7 = arith.constant dense<0.000000e+00> : vector<512x16xf32>
    %15 = tpu.matmul %12, %14, %cst_7 {dimension_numbers = #tpu.dot_dimension_numbers<[1], [0], [0], [1], [0, 0, 1, 1], [], []>} : vector<512x36xf32>, vector<36x16xf32>, vector<512x16xf32> -> vector<512x16xf32>
    %16 = arith.addf %9, %15 : vector<512x16xf32>
    %c2_i32 = arith.constant 2 : i32
    %17 = arith.addi %1, %c2_i32 : i32
    %18 = arith.index_cast %17 : i32 to index
    %c0_8 = arith.constant 0 : index
    %19 = vector.load %arg1[%18, %c0_8] : memref<2630x36xf32, #tpu.memory_space<vmem>>, vector<512x36xf32>
    %c2 = arith.constant 2 : index
    %c0_9 = arith.constant 0 : index
    %c0_10 = arith.constant 0 : index
    %20 = vector.load %arg2[%c2, %c0_9, %c0_10] : memref<9x36x16xf32, #tpu.memory_space<vmem>>, vector<1x36x16xf32>
    %21 = vector.shape_cast %20 : vector<1x36x16xf32> to vector<36x16xf32>
    %cst_11 = arith.constant dense<0.000000e+00> : vector<512x16xf32>
    %22 = tpu.matmul %19, %21, %cst_11 {dimension_numbers = #tpu.dot_dimension_numbers<[1], [0], [0], [1], [0, 0, 1, 1], [], []>} : vector<512x36xf32>, vector<36x16xf32>, vector<512x16xf32> -> vector<512x16xf32>
    %23 = arith.addf %16, %22 : vector<512x16xf32>
    %c34_i32 = arith.constant 34 : i32
    %24 = arith.addi %1, %c34_i32 : i32
    %25 = arith.index_cast %24 : i32 to index
    %c0_12 = arith.constant 0 : index
    %26 = vector.load %arg1[%25, %c0_12] : memref<2630x36xf32, #tpu.memory_space<vmem>>, vector<512x36xf32>
    %c3 = arith.constant 3 : index
    %c0_13 = arith.constant 0 : index
    %c0_14 = arith.constant 0 : index
    %27 = vector.load %arg2[%c3, %c0_13, %c0_14] : memref<9x36x16xf32, #tpu.memory_space<vmem>>, vector<1x36x16xf32>
    %28 = vector.shape_cast %27 : vector<1x36x16xf32> to vector<36x16xf32>
    %cst_15 = arith.constant dense<0.000000e+00> : vector<512x16xf32>
    %29 = tpu.matmul %26, %28, %cst_15 {dimension_numbers = #tpu.dot_dimension_numbers<[1], [0], [0], [1], [0, 0, 1, 1], [], []>} : vector<512x36xf32>, vector<36x16xf32>, vector<512x16xf32> -> vector<512x16xf32>
    %30 = arith.addf %23, %29 : vector<512x16xf32>
    %c35_i32 = arith.constant 35 : i32
    %31 = arith.addi %1, %c35_i32 : i32
    %32 = arith.index_cast %31 : i32 to index
    %c0_16 = arith.constant 0 : index
    %33 = vector.load %arg1[%32, %c0_16] : memref<2630x36xf32, #tpu.memory_space<vmem>>, vector<512x36xf32>
    %c4 = arith.constant 4 : index
    %c0_17 = arith.constant 0 : index
    %c0_18 = arith.constant 0 : index
    %34 = vector.load %arg2[%c4, %c0_17, %c0_18] : memref<9x36x16xf32, #tpu.memory_space<vmem>>, vector<1x36x16xf32>
    %35 = vector.shape_cast %34 : vector<1x36x16xf32> to vector<36x16xf32>
    %cst_19 = arith.constant dense<0.000000e+00> : vector<512x16xf32>
    %36 = tpu.matmul %33, %35, %cst_19 {dimension_numbers = #tpu.dot_dimension_numbers<[1], [0], [0], [1], [0, 0, 1, 1], [], []>} : vector<512x36xf32>, vector<36x16xf32>, vector<512x16xf32> -> vector<512x16xf32>
    %37 = arith.addf %30, %36 : vector<512x16xf32>
    %c36_i32 = arith.constant 36 : i32
    %38 = arith.addi %1, %c36_i32 : i32
    %39 = arith.index_cast %38 : i32 to index
    %c0_20 = arith.constant 0 : index
    %40 = vector.load %arg1[%39, %c0_20] : memref<2630x36xf32, #tpu.memory_space<vmem>>, vector<512x36xf32>
    %c5 = arith.constant 5 : index
    %c0_21 = arith.constant 0 : index
    %c0_22 = arith.constant 0 : index
    %41 = vector.load %arg2[%c5, %c0_21, %c0_22] : memref<9x36x16xf32, #tpu.memory_space<vmem>>, vector<1x36x16xf32>
    %42 = vector.shape_cast %41 : vector<1x36x16xf32> to vector<36x16xf32>
    %cst_23 = arith.constant dense<0.000000e+00> : vector<512x16xf32>
    %43 = tpu.matmul %40, %42, %cst_23 {dimension_numbers = #tpu.dot_dimension_numbers<[1], [0], [0], [1], [0, 0, 1, 1], [], []>} : vector<512x36xf32>, vector<36x16xf32>, vector<512x16xf32> -> vector<512x16xf32>
    %44 = arith.addf %37, %43 : vector<512x16xf32>
    %c68_i32 = arith.constant 68 : i32
    %45 = arith.addi %1, %c68_i32 : i32
    %46 = arith.index_cast %45 : i32 to index
    %c0_24 = arith.constant 0 : index
    %47 = vector.load %arg1[%46, %c0_24] : memref<2630x36xf32, #tpu.memory_space<vmem>>, vector<512x36xf32>
    %c6 = arith.constant 6 : index
    %c0_25 = arith.constant 0 : index
    %c0_26 = arith.constant 0 : index
    %48 = vector.load %arg2[%c6, %c0_25, %c0_26] : memref<9x36x16xf32, #tpu.memory_space<vmem>>, vector<1x36x16xf32>
    %49 = vector.shape_cast %48 : vector<1x36x16xf32> to vector<36x16xf32>
    %cst_27 = arith.constant dense<0.000000e+00> : vector<512x16xf32>
    %50 = tpu.matmul %47, %49, %cst_27 {dimension_numbers = #tpu.dot_dimension_numbers<[1], [0], [0], [1], [0, 0, 1, 1], [], []>} : vector<512x36xf32>, vector<36x16xf32>, vector<512x16xf32> -> vector<512x16xf32>
    %51 = arith.addf %44, %50 : vector<512x16xf32>
    %c69_i32 = arith.constant 69 : i32
    %52 = arith.addi %1, %c69_i32 : i32
    %53 = arith.index_cast %52 : i32 to index
    %c0_28 = arith.constant 0 : index
    %54 = vector.load %arg1[%53, %c0_28] : memref<2630x36xf32, #tpu.memory_space<vmem>>, vector<512x36xf32>
    %c7 = arith.constant 7 : index
    %c0_29 = arith.constant 0 : index
    %c0_30 = arith.constant 0 : index
    %55 = vector.load %arg2[%c7, %c0_29, %c0_30] : memref<9x36x16xf32, #tpu.memory_space<vmem>>, vector<1x36x16xf32>
    %56 = vector.shape_cast %55 : vector<1x36x16xf32> to vector<36x16xf32>
    %cst_31 = arith.constant dense<0.000000e+00> : vector<512x16xf32>
    %57 = tpu.matmul %54, %56, %cst_31 {dimension_numbers = #tpu.dot_dimension_numbers<[1], [0], [0], [1], [0, 0, 1, 1], [], []>} : vector<512x36xf32>, vector<36x16xf32>, vector<512x16xf32> -> vector<512x16xf32>
    %58 = arith.addf %51, %57 : vector<512x16xf32>
    %c70_i32 = arith.constant 70 : i32
    %59 = arith.addi %1, %c70_i32 : i32
    %60 = arith.index_cast %59 : i32 to index
    %c0_32 = arith.constant 0 : index
    %61 = vector.load %arg1[%60, %c0_32] : memref<2630x36xf32, #tpu.memory_space<vmem>>, vector<512x36xf32>
    %c8 = arith.constant 8 : index
    %c0_33 = arith.constant 0 : index
    %c0_34 = arith.constant 0 : index
    %62 = vector.load %arg2[%c8, %c0_33, %c0_34] : memref<9x36x16xf32, #tpu.memory_space<vmem>>, vector<1x36x16xf32>
    %63 = vector.shape_cast %62 : vector<1x36x16xf32> to vector<36x16xf32>
    %cst_35 = arith.constant dense<0.000000e+00> : vector<512x16xf32>
    %64 = tpu.matmul %61, %63, %cst_35 {dimension_numbers = #tpu.dot_dimension_numbers<[1], [0], [0], [1], [0, 0, 1, 1], [], []>} : vector<512x36xf32>, vector<36x16xf32>, vector<512x16xf32> -> vector<512x16xf32>
    %65 = arith.addf %58, %64 : vector<512x16xf32>
    %c0_36 = arith.constant 0 : index
    %c0_37 = arith.constant 0 : index
    %66 = vector.load %arg3[%c0_36, %c0_37] : memref<1x16xf32, #tpu.memory_space<vmem>>, vector<1x16xf32>
    %67 = vector.broadcast %66 : vector<1x16xf32> to vector<512x16xf32>
    %68 = arith.addf %65, %67 : vector<512x16xf32>
    %cst_38 = arith.constant 2.000000e-01 : f32
    %69 = vector.broadcast %cst_38 : f32 to vector<512x16xf32>
    %70 = arith.mulf %69, %68 : vector<512x16xf32>
    %71 = arith.maximumf %68, %70 : vector<512x16xf32>
    %72 = arith.truncf %71 : vector<512x16xf32> to vector<512x16xbf16>
    %c0_39 = arith.constant 0 : index
    %c0_40 = arith.constant 0 : index
    %73 = vector.load %arg4[%c0_39, %c0_40] : memref<512x16xbf16, #tpu.memory_space<vmem>>, vector<512x16xbf16>
    tpu.vector_store %arg4[%c0_39, %c0_40], %72 {strides = array<i32>} : memref<512x16xbf16, #tpu.memory_space<vmem>>, vector<512x16xbf16>,
    return
  }
  func.func @transform_0(%arg0: i32) -> (i32, i32) {
    %c0_i32 = arith.constant 0 : i32
    %c0_i32_0 = arith.constant 0 : i32
    %c0_i32_1 = arith.constant 0 : i32
    return %c0_i32, %c0_i32_0 : i32, i32
  }
  func.func @transform_1(%arg0: i32) -> (i32, i32, i32) {
    %c0_i32 = arith.constant 0 : i32
    %c0_i32_0 = arith.constant 0 : i32
    %c0_i32_1 = arith.constant 0 : i32
    %c0_i32_2 = arith.constant 0 : i32
    return %c0_i32, %c0_i32_0, %c0_i32_1 : i32, i32, i32
  }
  func.func @transform_2(%arg0: i32) -> (i32, i32) {
    %c0_i32 = arith.constant 0 : i32
    %c0_i32_0 = arith.constant 0 : i32
    %c0_i32_1 = arith.constant 0 : i32
    return %c0_i32, %c0_i32_0 : i32, i32
  }
  func.func @transform_3(%arg0: i32) -> (i32, i32) {
    %c0_i32 = arith.constant 0 : i32
    %c0_i32_0 = arith.constant 0 : i32
    return %arg0, %c0_i32 : i32, i32
  }
}

module attributes {stable_mosaic.version = 11 : i64} {
  func.func @kernel(%arg0: i32, %arg1: memref<2048x16xbf16, #tpu.memory_space<vmem>>, %arg2: memref<1x16x16xbf16, #tpu.memory_space<vmem>>, %arg3: memref<1x16xf32, #tpu.memory_space<vmem>>, %arg4: memref<512x16xbf16, #tpu.memory_space<vmem>>) attributes {dimension_semantics = [#tpu.dimension_semantics<parallel>], iteration_bounds = array<i64: 4>, scalar_prefetch = 0 : i64, scratch_operands = 0 : i64, tpu.core_type = #tpu.core_type<tc>, window_params = [{pipeline_mode = #tpu.pipeline_mode<synchronous>, transform_indices = @transform_0, window_bounds = array<i64: 2048, 16>}, {pipeline_mode = #tpu.pipeline_mode<synchronous>, transform_indices = @transform_1, window_bounds = array<i64: 1, 16, 16>}, {pipeline_mode = #tpu.pipeline_mode<synchronous>, transform_indices = @transform_2, window_bounds = array<i64: 1, 16>}, {transform_indices = @transform_3, window_bounds = array<i64: 512, 16>}]} {
    %c512_i32 = arith.constant 512 : i32
    %0 = arith.muli %arg0, %c512_i32 : i32
    %1 = tpu.assume_multiple %0, 8 : i32
    %cst = arith.constant 0.000000e+00 : f32
    %2 = vector.broadcast %cst : f32 to vector<512x16xf32>
    %c0_i32 = arith.constant 0 : i32
    %3 = arith.addi %1, %c0_i32 : i32
    %4 = arith.index_cast %3 : i32 to index
    %c0 = arith.constant 0 : index
    %5 = vector.load %arg1[%4, %c0] : memref<2048x16xbf16, #tpu.memory_space<vmem>>, vector<512x16xbf16>
    %c0_0 = arith.constant 0 : index
    %c0_1 = arith.constant 0 : index
    %c0_2 = arith.constant 0 : index
    %6 = vector.load %arg2[%c0_0, %c0_1, %c0_2] : memref<1x16x16xbf16, #tpu.memory_space<vmem>>, vector<1x16x16xbf16>
    %7 = vector.shape_cast %6 : vector<1x16x16xbf16> to vector<16x16xbf16>
    %cst_3 = arith.constant dense<0.000000e+00> : vector<512x16xf32>
    %8 = tpu.matmul %5, %7, %cst_3 {dimension_numbers = #tpu.dot_dimension_numbers<[1], [0], [0], [1], [0, 0, 1, 1], [], []>} : vector<512x16xbf16>, vector<16x16xbf16>, vector<512x16xf32> -> vector<512x16xf32>
    %9 = arith.addf %2, %8 : vector<512x16xf32>
    %c0_4 = arith.constant 0 : index
    %c0_5 = arith.constant 0 : index
    %10 = vector.load %arg3[%c0_4, %c0_5] : memref<1x16xf32, #tpu.memory_space<vmem>>, vector<1x16xf32>
    %11 = vector.broadcast %10 : vector<1x16xf32> to vector<512x16xf32>
    %12 = arith.addf %9, %11 : vector<512x16xf32>
    %cst_6 = arith.constant 2.000000e-01 : f32
    %13 = vector.broadcast %cst_6 : f32 to vector<512x16xf32>
    %14 = arith.mulf %13, %12 : vector<512x16xf32>
    %15 = arith.maximumf %12, %14 : vector<512x16xf32>
    %16 = arith.truncf %15 : vector<512x16xf32> to vector<512x16xbf16>
    %c0_7 = arith.constant 0 : index
    %c0_8 = arith.constant 0 : index
    %17 = vector.load %arg4[%c0_7, %c0_8] : memref<512x16xbf16, #tpu.memory_space<vmem>>, vector<512x16xbf16>
    tpu.vector_store %arg4[%c0_7, %c0_8], %16 {strides = array<i32>} : memref<512x16xbf16, #tpu.memory_space<vmem>>, vector<512x16xbf16>,
    return
  }
  func.func @transform_0(%arg0: i32) -> (i32, i32) {
    %c0_i32 = arith.constant 0 : i32
    %c0_i32_0 = arith.constant 0 : i32
    %c0_i32_1 = arith.constant 0 : i32
    return %c0_i32, %c0_i32_0 : i32, i32
  }
  func.func @transform_1(%arg0: i32) -> (i32, i32, i32) {
    %c0_i32 = arith.constant 0 : i32
    %c0_i32_0 = arith.constant 0 : i32
    %c0_i32_1 = arith.constant 0 : i32
    %c0_i32_2 = arith.constant 0 : i32
    return %c0_i32, %c0_i32_0, %c0_i32_1 : i32, i32, i32
  }
  func.func @transform_2(%arg0: i32) -> (i32, i32) {
    %c0_i32 = arith.constant 0 : i32
    %c0_i32_0 = arith.constant 0 : i32
    %c0_i32_1 = arith.constant 0 : i32
    return %c0_i32, %c0_i32_0 : i32, i32
  }
  func.func @transform_3(%arg0: i32) -> (i32, i32) {
    %c0_i32 = arith.constant 0 : i32
    %c0_i32_0 = arith.constant 0 : i32
    return %arg0, %c0_i32 : i32, i32
  }
}

module attributes {stable_mosaic.version = 11 : i64} {
  func.func @_tail_softmax_kernel(%arg0: memref<64x128xf32, #tpu.memory_space<vmem>>, %arg1: memref<2xf32, #tpu.memory_space<smem>>, %arg2: memref<64x128xf32, #tpu.memory_space<vmem>>) attributes {dimension_semantics = [], scalar_prefetch = 0 : i64, scratch_operands = 0 : i64, tpu.core_type = #tpu.core_type<tc>} {
    %c0 = arith.constant 0 : index
    %c0_0 = arith.constant 0 : index
    %0 = vector.load %arg0[%c0, %c0_0] : memref<64x128xf32, #tpu.memory_space<vmem>>, vector<64x128xf32>
    %c0_1 = arith.constant 0 : index
    %1 = memref.load %arg1[%c0_1] : memref<2xf32, #tpu.memory_space<smem>>
    %2 = vector.broadcast %1 : f32 to vector<64x128xf32>
    %3 = arith.mulf %0, %2 : vector<64x128xf32>
    %c1 = arith.constant 1 : index
    %4 = memref.load %arg1[%c1] : memref<2xf32, #tpu.memory_space<smem>>
    %5 = vector.broadcast %4 : f32 to vector<64x128xf32>
    %6 = arith.addf %3, %5 : vector<64x128xf32>
    %7 = tpu.iota {dimensions = array<i32: 0>} : vector<64x128xi32>
    %8 = tpu.iota {dimensions = array<i32: 1>} : vector<64x128xi32>
    %c128_i32 = arith.constant 128 : i32
    %9 = vector.broadcast %c128_i32 : i32 to vector<64x128xi32>
    %10 = arith.muli %7, %9 : vector<64x128xi32>
    %11 = arith.addi %10, %8 : vector<64x128xi32>
    %c8192_i32 = arith.constant 8192 : i32
    %12 = vector.broadcast %c8192_i32 : i32 to vector<64x128xi32>
    %13 = arith.cmpi slt, %11, %12 : vector<64x128xi32>
    %cst = arith.constant -1.000000e+30 : f32
    %14 = vector.broadcast %cst : f32 to vector<64x128xf32>
    %15 = arith.select %13, %6, %14 : vector<64x128xi1>, vector<64x128xf32>
    %cst_2 = arith.constant dense<0xFF800000> : vector<64xf32>
    %16 = vector.multi_reduction <maximumf>, %15, %cst_2 [1] : vector<64x128xf32> to vector<64xf32>
    %17 = vector.shape_cast %16 : vector<64xf32> to vector<64x1xf32>
    %cst_3 = arith.constant dense<0xFF800000> : vector<1xf32>
    %18 = vector.multi_reduction <maximumf>, %17, %cst_3 [0] : vector<64x1xf32> to vector<1xf32>
    %19 = vector.shape_cast %18 : vector<1xf32> to vector<1x1xf32>
    %20 = vector.broadcast %19 : vector<1x1xf32> to vector<64x128xf32>
    %21 = arith.subf %15, %20 : vector<64x128xf32>
    %22 = math.exp %21 : vector<64x128xf32>
    %cst_4 = arith.constant 0.000000e+00 : f32
    %23 = vector.broadcast %cst_4 : f32 to vector<64x128xf32>
    %24 = arith.select %13, %22, %23 : vector<64x128xi1>, vector<64x128xf32>
    %cst_5 = arith.constant dense<0.000000e+00> : vector<64xf32>
    %25 = vector.multi_reduction <add>, %24, %cst_5 [1] : vector<64x128xf32> to vector<64xf32>
    %26 = vector.shape_cast %25 : vector<64xf32> to vector<64x1xf32>
    %cst_6 = arith.constant dense<0.000000e+00> : vector<1xf32>
    %27 = vector.multi_reduction <add>, %26, %cst_6 [0] : vector<64x1xf32> to vector<1xf32>
    %28 = vector.shape_cast %27 : vector<1xf32> to vector<1x1xf32>
    %cst_7 = arith.constant 1.000000e+00 : f32
    %29 = vector.broadcast %cst_7 : f32 to vector<1x1xf32>
    %30 = arith.divf %29, %28 : vector<1x1xf32>
    %31 = vector.broadcast %30 : vector<1x1xf32> to vector<64x128xf32>
    %32 = arith.mulf %24, %31 : vector<64x128xf32>
    %c0_8 = arith.constant 0 : index
    %c0_9 = arith.constant 0 : index
    %33 = vector.load %arg2[%c0_8, %c0_9] : memref<64x128xf32, #tpu.memory_space<vmem>>, vector<64x128xf32>
    tpu.vector_store %arg2[%c0_8, %c0_9], %32 {strides = array<i32>} : memref<64x128xf32, #tpu.memory_space<vmem>>, vector<64x128xf32>,
    return
  }
}

</mosaic_0001>

<bundles_post_ra>
// kernel: _lambda_.10
= control target key start
LH: loop header
LB: loop body
LE: loop exit
PB: predicated region body
PF: predicated region fallthrough
CT: control target
= control target key end

     0   :  { %s997_s12 = smov 0   ;;  %s1164_s0 = inlined_call_operand.vmem [shape: bf16[512,18], index: 0, kind: input, shape index: {}]   ;;  %s1165_s1 = inlined_call_operand.vmem [shape: bf16[1,18,16], index: 1, kind: input, shape index: {}]   ;;  %s1166_s2 = inlined_call_operand.vmem [shape: f32[1,16], index: 2, kind: input, shape index: {}]   ;;  %s1167_s3 = inlined_call_operand.vmem [shape: bf16[512,16], index: 3, kind: output, shape index: {}]  }
   0x1 LB: > { %s774_s13 = sadd.s32 4294967295, %s975_s12   ;;  %p777_p0 = scmp.ge.s32.totalorder %s975_s12, 1  ;;  %s975_s12 = sphi %s997_s12, %s13_s12  }
   0x2   : > { %p127_p1 = scmp.lt.s32.totalorder %s975_s12, 3 }
   0x4   : > { %p128_p2 = pnand %p777_p0, %p127_p1 }
   0x5   : > { %v951_v0 = vld [vmem:[%s1165_s1] sm:$0xff] (!%p128_p2)   ;;  %vm338_vm0 = vcmask (!%p128_p2), 1040384   ;;  %v952_v1 = vld [vmem:[%s1165_s1 + $0x8] ss:$0 sps:$4 sm:$0x11] (!%p128_p2)   ;;  %s780_s18 = sshll.u32 (!%p128_p2), %s774_s13, 8 }
   0x6   : > { %131 = sbr.rel (%p128_p2) target bundleno = 265 (0x109), region = 32  ;;  %901 = vmatprep.subr.bf16.mxu0 (!%p128_p2), %v951_v0  ;;  %937 = vmatprep.subr.bf16.mxu1 (!%p128_p2), %v951_v0  ;;  %s154_s19 = sshra.s32 (!%p128_p2), %s780_s18, 3  ;;  %v340_v2 = vsel (!%p128_p2), %vm338_vm0, %v952_v1, 0  ;;  %vm289_vm1 = vcmask (!%p128_p2), 146432   ;;  %v1057_v19 = vld [vmem:[%s1166_s2] ss:$0 sm:$0xff] (!%p128_p2) }
   0x7   : > { %902 = vmatpush3.bf16.msra.mxu0 (!%p128_p2), %v951_v0  ;;  %939 = vmatpush3.bf16.msra.mxu1 (!%p128_p2), %v951_v0  ;;  %s781_s20 = sshll.u32 (!%p128_p2), %s154_s19, 2  ;;  %s778_s24 = sshll.u32 (!%p128_p2), %s774_s13, 5  ;;  %vm695_vm2 = vcmask (!%p128_p2), 125952  }
   0x8   : > { %941 = vmatprep.subr.msk.bf16.mxu0 (!%p128_p2), %vm338_vm0, %v952_v1  ;;  %942 = vmatprep.subr.msk.bf16.mxu1 (!%p128_p2), %vm338_vm0, %v952_v1  ;;  %s1016_s23 = scalar_lea.vmem (!%p128_p2), %s1164_s0, %s781_s20  ;;  %p147_p3 = scmp.lt.s32.totalorder (!%p128_p2), %s778_s24, 63 }
   0x9   : > { %v953_v3 = vld [vmem:[%s1016_s23] sm:$0xff] (!%p128_p2)   ;;  %v955_v5 = vld [vmem:[%s1016_s23 + $0x8] sm:$0xff] (!%p128_p2)   ;;  %v957_v7 = vld [vmem:[%s1016_s23 + $0x10] sm:$0xff] (!%p128_p2)  }
   0xa   : > { %v954_v4 = vld [vmem:[%s1016_s23 + $0x40] sm:$0xff] (!%p128_p2)   ;;  %905 = vmatprep.mubr.msk.bf16.mxu0 (!%p128_p2), %vm289_vm1, %v953_v3  ;;  %v956_v6 = vld [vmem:[%s1016_s23 + $0x48] sm:$0xff] (!%p128_p2)   ;;  %v958_v8 = vld [vmem:[%s1016_s23 + $0x50] sm:$0xff] (!%p128_p2)  }
   0xb   : > { %904 = vmatpush3.bf16.msra.mxu0 (!%p128_p2), %v340_v2  ;;  %940 = vmatpush3.bf16.msra.mxu1 (!%p128_p2), %v340_v2  ;;  %v959_v9 = vld [vmem:[%s1016_s23 + $0x18] sm:$0xff] (!%p128_p2)   ;;  %v961_v11 = vld [vmem:[%s1016_s23 + $0x20] sm:$0xff] (!%p128_p2)   ;;  %v963_v13 = vld [vmem:[%s1016_s23 + $0x28] sm:$0xff] (!%p128_p2)  }
   0xc   : > { %921 = vmatprep.mubr.msk.bf16.mxu1 (!%p128_p2), %vm289_vm1, %v954_v4  ;;  %v960_v10 = vld [vmem:[%s1016_s23 + $0x58] sm:$0xff] (!%p128_p2)   ;;  %v962_v12 = vld [vmem:[%s1016_s23 + $0x60] sm:$0xff] (!%p128_p2)   ;;  %v964_v14 = vld [vmem:[%s1016_s23 + $0x68] sm:$0xff] (!%p128_p2)  }
   0xd   : > { %v965_v15 = vld [vmem:[%s1016_s23 + $0x30] sm:$0xff]   ;;  %v967_v17 = vld [vmem:[%s1016_s23 + $0x38] sm:$0xff]   ;;  %s1169_s24 = smov (!%p147_p3, %s778_s24), 63 }
   0xe   : > { %906 = vmatmul.mubr.msk.bf16.vlgmr.msra.gmra.mrb[0].mxu0 %vm289_vm1, %v955_v5  ;;  %922 = vmatmul.mubr.msk.bf16.vlgmr.msra.gmra.mrb[0].mxu1 %vm289_vm1, %v956_v6  ;;  %v966_v16 = vld [vmem:[%s1016_s23 + $0x70] sm:$0xff]   ;;  %v968_v18 = vld [vmem:[%s1016_s23 + $0x78] sm:$0xff]   ;;  %s779_s27 = sshll.u32 %s1169_s24, 2 }
   0xf   : > { %909 = vmatprep.mubr.msk.bf16.mxu0 %vm289_vm1, %v957_v7  ;;  %925 = vmatprep.mubr.msk.bf16.mxu1 %vm289_vm1, %v958_v8  ;;  %s1071_s30 = scalar_lea.vmem %s1167_s3, %s779_s27 }
  0x16   : > { %910 = vmatmul.mubr.msk.bf16.gmra.mrb[4].mxu0 %vm289_vm1, %v959_v9  ;;  %926 = vmatmul.mubr.msk.bf16.gmra.mrb[4].mxu1 %vm289_vm1, %v960_v10 }
  0x17   : > { %913 = vmatprep.mubr.msk.bf16.mxu0 %vm289_vm1, %v961_v11  ;;  %929 = vmatprep.mubr.msk.bf16.mxu1 %vm289_vm1, %v962_v12 }
  0x1e   : > { %914 = vmatmul.mubr.msk.bf16.gmra.mrb[8].mxu0 %vm289_vm1, %v963_v13  ;;  %930 = vmatmul.mubr.msk.bf16.gmra.mrb[8].mxu1 %vm289_vm1, %v964_v14 }
  0x1f   : > { %917 = vmatprep.mubr.msk.bf16.mxu0 %vm289_vm1, %v965_v15  ;;  %933 = vmatprep.mubr.msk.bf16.mxu1 %vm289_vm1, %v966_v16 }
  0x26   : > { %918 = vmatmul.mubr.msk.bf16.gmra.mrb[12].mxu0 %vm289_vm1, %v967_v17  ;;  %934 = vmatmul.mubr.msk.bf16.gmra.mrb[12].mxu1 %vm289_vm1, %v968_v18 }
  0xe1   : > { %v907_v20 = vpop.f32.mrb[0].mxu0  ;;  %v923_v21 = vpop.f32.mrb[0].mxu1 }
  0xe2   : > { %v385_v22 = vadd.f32 %v907_v20, %v1057_v19  ;;  %v449_v23 = vadd.f32 %v923_v21, %v1057_v19  ;;  %v376_v24 = vpop.f32.mrb[1].mxu0  ;;  %v440_v25 = vpop.f32.mrb[1].mxu1 }
  0xe3   : > { %v377_v26 = vadd.f32 %v1057_v19, %v376_v24  ;;  %v441_v27 = vadd.f32 %v1057_v19, %v440_v25  ;;  %v908_v28 = vpop.f32.mrb[2].mxu0  ;;  %v924_v29 = vpop.f32.mrb[2].mxu1 }
  0xe4   : > { %v505_v30 = vmul.f32 0.2, %v385_v22  ;;  %v521_v31 = vmul.f32 0.2, %v449_v23  ;;  %v388_v32 = vadd.f32 %v908_v28, %v1057_v19  ;;  %v452_v33 = vadd.f32 %v924_v29, %v1057_v19  ;;  %v379_v34 = vpop.f32.mrb[3].mxu0  ;;  %v443_v35 = vpop.f32.mrb[3].mxu1 }
  0xe5   : > { %v503_v36 = vmul.f32 0.2, %v377_v26  ;;  %v519_v37 = vmul.f32 0.2, %v441_v27  ;;  %v380_v38 = vadd.f32 %v1057_v19, %v379_v34  ;;  %v444_v39 = vadd.f32 %v1057_v19, %v443_v35 }
  0xe6   : > { %v537_v40 = vmax.f32 %v385_v22, %v505_v30  ;;  %v553_v41 = vmax.f32 %v449_v23, %v521_v31  ;;  %v506_v42 = vmul.f32 0.2, %v388_v32  ;;  %v522_v43 = vmul.f32 0.2, %v452_v33 }
  0xe7   : > { %v535_v44 = vmax.f32 %v377_v26, %v503_v36  ;;  %v551_v45 = vmax.f32 %v441_v27, %v519_v37  ;;  %v504_v46 = vmul.f32 0.2, %v380_v38  ;;  %v520_v47 = vmul.f32 0.2, %v444_v39 }
  0xe8   : > { %v853_v48 = vpack.c.bf16 %v537_v40, %v537_v40  ;;  %v869_v49 = vpack.c.bf16 %v553_v41, %v553_v41  ;;  %v538_v50 = vmax.f32 %v388_v32, %v506_v42  ;;  %v554_v51 = vmax.f32 %v452_v33, %v522_v43 }
  0xe9   : > { %v851_v52 = vpack.c.bf16 %v535_v44, %v535_v44  ;;  %v867_v53 = vpack.c.bf16 %v551_v45, %v551_v45  ;;  %v536_v54 = vmax.f32 %v380_v38, %v504_v46  ;;  %v552_v55 = vmax.f32 %v444_v39, %v520_v47  ;;  %v911_v56 = vpop.f32.mrb[4].mxu0  ;;  %v927_v57 = vpop.f32.mrb[4].mxu1 }
  0xea   : > { %698 = vst.msk [vmem:[%s1071_s30 + $0x8] sm:$0xf] %vm695_vm2, %v853_v48  ;;  %714 = vst.msk [vmem:[%s1071_s30 + $0x48] sm:$0xf] %vm695_vm2, %v869_v49  ;;  %v854_v58 = vpack.c.bf16 %v538_v50, %v538_v50  ;;  %v870_v59 = vpack.c.bf16 %v554_v51, %v554_v51  ;;  %v401_v60 = vadd.f32 %v911_v56, %v1057_v19  ;;  %v392_v62 = vpop.f32.mrb[5].mxu0  ;;  %v456_v63 = vpop.f32.mrb[5].mxu1 }
  0xeb   : > { %v465_v61 = vadd.f32 %v927_v57, %v1057_v19  ;;  %696 = vst.msk [vmem:[%s1071_s30] sm:$0xf] %vm695_vm2, %v851_v52  ;;  %712 = vst.msk [vmem:[%s1071_s30 + $0x40] sm:$0xf] %vm695_vm2, %v867_v53  ;;  %v852_v0 = vpack.c.bf16 %v536_v54, %v536_v54  ;;  %v868_v1 = vpack.c.bf16 %v552_v55, %v552_v55  ;;  %v912_v4 = vpop.f32.mrb[6].mxu0  ;;  %v928_v5 = vpop.f32.mrb[6].mxu1 }
  0xec   : > { %v393_v2 = vadd.f32 %v1057_v19, %v392_v62  ;;  %v457_v3 = vadd.f32 %v1057_v19, %v456_v63  ;;  %699 = vst.msk [vmem:[%s1071_s30 + $0xc] sm:$0xf] %vm695_vm2, %v854_v58  ;;  %715 = vst.msk [vmem:[%s1071_s30 + $0x4c] sm:$0xf] %vm695_vm2, %v870_v59  ;;  %v509_v6 = vmul.f32 0.2, %v401_v60  ;;  %v404_v8 = vadd.f32 %v912_v4, %v1057_v19 }
  0xed   : > { %v525_v7 = vmul.f32 0.2, %v465_v61  ;;  %v468_v9 = vadd.f32 %v928_v5, %v1057_v19  ;;  %v395_v10 = vpop.f32.mrb[7].mxu0  ;;  %v459_v11 = vpop.f32.mrb[7].mxu1  ;;  %697 = vst.msk [vmem:[%s1071_s30 + $0x4] sm:$0xf] %vm695_vm2, %v852_v0 }
  0xee   : > { %713 = vst.msk [vmem:[%s1071_s30 + $0x44] sm:$0xf] %vm695_vm2, %v868_v1  ;;  %v507_v12 = vmul.f32 0.2, %v393_v2  ;;  %v523_v13 = vmul.f32 0.2, %v457_v3  ;;  %v396_v14 = vadd.f32 %v1057_v19, %v395_v10  ;;  %v460_v15 = vadd.f32 %v1057_v19, %v459_v11 }
  0xef   : > { %v541_v16 = vmax.f32 %v401_v60, %v509_v6  ;;  %v557_v17 = vmax.f32 %v465_v61, %v525_v7  ;;  %v510_v18 = vmul.f32 0.2, %v404_v8  ;;  %v526_v20 = vmul.f32 0.2, %v468_v9 }
  0xf0   : > { %v539_v21 = vmax.f32 %v393_v2, %v507_v12  ;;  %v555_v22 = vmax.f32 %v457_v3, %v523_v13  ;;  %v508_v23 = vmul.f32 0.2, %v396_v14  ;;  %v524_v24 = vmul.f32 0.2, %v460_v15 }
  0xf1   : > { %v857_v25 = vpack.c.bf16 %v541_v16, %v541_v16  ;;  %v873_v26 = vpack.c.bf16 %v557_v17, %v557_v17  ;;  %v542_v27 = vmax.f32 %v404_v8, %v510_v18  ;;  %v558_v28 = vmax.f32 %v468_v9, %v526_v20  ;;  %v915_v33 = vpop.f32.mrb[8].mxu0  ;;  %v931_v34 = vpop.f32.mrb[8].mxu1 }
  0xf2   : > { %v855_v29 = vpack.c.bf16 %v539_v21, %v539_v21  ;;  %v871_v30 = vpack.c.bf16 %v555_v22, %v555_v22  ;;  %v540_v31 = vmax.f32 %v396_v14, %v508_v23  ;;  %v556_v32 = vmax.f32 %v460_v15, %v524_v24  ;;  %v408_v39 = vpop.f32.mrb[9].mxu0  ;;  %v472_v40 = vpop.f32.mrb[9].mxu1 }
  0xf3   : > { %702 = vst.msk [vmem:[%s1071_s30 + $0x18] sm:$0xf] %vm695_vm2, %v857_v25  ;;  %718 = vst.msk [vmem:[%s1071_s30 + $0x58] sm:$0xf] %vm695_vm2, %v873_v26  ;;  %v858_v35 = vpack.c.bf16 %v542_v27, %v542_v27  ;;  %v874_v36 = vpack.c.bf16 %v558_v28, %v558_v28  ;;  %v417_v37 = vadd.f32 %v915_v33, %v1057_v19  ;;  %v916_v45 = vpop.f32.mrb[10].mxu0  ;;  %v932_v46 = vpop.f32.mrb[10].mxu1 }
  0xf4   : > { %v481_v38 = vadd.f32 %v931_v34, %v1057_v19  ;;  %700 = vst.msk [vmem:[%s1071_s30 + $0x10] sm:$0xf] %vm695_vm2, %v855_v29  ;;  %716 = vst.msk [vmem:[%s1071_s30 + $0x50] sm:$0xf] %vm695_vm2, %v871_v30  ;;  %v856_v41 = vpack.c.bf16 %v540_v31, %v540_v31  ;;  %v872_v42 = vpack.c.bf16 %v556_v32, %v556_v32  ;;  %v411_v51 = vpop.f32.mrb[11].mxu0  ;;  %v475_v52 = vpop.f32.mrb[11].mxu1 }
  0xf5   : > { %v409_v43 = vadd.f32 %v1057_v19, %v408_v39  ;;  %v473_v44 = vadd.f32 %v1057_v19, %v472_v40  ;;  %703 = vst.msk [vmem:[%s1071_s30 + $0x1c] sm:$0xf] %vm695_vm2, %v858_v35  ;;  %719 = vst.msk [vmem:[%s1071_s30 + $0x5c] sm:$0xf] %vm695_vm2, %v874_v36  ;;  %v513_v47 = vmul.f32 0.2, %v417_v37  ;;  %v420_v49 = vadd.f32 %v916_v45, %v1057_v19 }
  0xf6   : > { %v529_v48 = vmul.f32 0.2, %v481_v38  ;;  %v484_v50 = vadd.f32 %v932_v46, %v1057_v19  ;;  %701 = vst.msk [vmem:[%s1071_s30 + $0x14] sm:$0xf] %vm695_vm2, %v856_v41  ;;  %717 = vst.msk [vmem:[%s1071_s30 + $0x54] sm:$0xf] %vm695_vm2, %v872_v42  ;;  %v412_v55 = vadd.f32 %v1057_v19, %v411_v51  ;;  %v476_v56 = vadd.f32 %v1057_v19, %v475_v52 }
  0xf7   : > { %v511_v53 = vmul.f32 0.2, %v409_v43  ;;  %v527_v54 = vmul.f32 0.2, %v473_v44  ;;  %v545_v57 = vmax.f32 %v417_v37, %v513_v47  ;;  %v514_v59 = vmul.f32 0.2, %v420_v49 }
  0xf8   : > { %v561_v58 = vmax.f32 %v481_v38, %v529_v48  ;;  %v530_v60 = vmul.f32 0.2, %v484_v50  ;;  %v512_v63 = vmul.f32 0.2, %v412_v55  ;;  %v528_v0 = vmul.f32 0.2, %v476_v56 }
  0xf9   : > { %v543_v61 = vmax.f32 %v409_v43, %v511_v53  ;;  %v559_v62 = vmax.f32 %v473_v44, %v527_v54  ;;  %v861_v1 = vpack.c.bf16 %v545_v57, %v545_v57  ;;  %v546_v3 = vmax.f32 %v420_v49, %v514_v59  ;;  %v919_v9 = vpop.f32.mrb[12].mxu0  ;;  %v935_v10 = vpop.f32.mrb[12].mxu1 }
  0xfa   : > { %v877_v2 = vpack.c.bf16 %v561_v58, %v561_v58  ;;  %v562_v4 = vmax.f32 %v484_v50, %v530_v60  ;;  %v544_v7 = vmax.f32 %v412_v55, %v512_v63  ;;  %v560_v8 = vmax.f32 %v476_v56, %v528_v0  ;;  %v424_v15 = vpop.f32.mrb[13].mxu0  ;;  %v488_v16 = vpop.f32.mrb[13].mxu1 }
  0xfb   : > { %v859_v5 = vpack.c.bf16 %v543_v61, %v543_v61  ;;  %v875_v6 = vpack.c.bf16 %v559_v62, %v559_v62  ;;  %706 = vst.msk [vmem:[%s1071_s30 + $0x28] sm:$0xf] %vm695_vm2, %v861_v1  ;;  %v862_v11 = vpack.c.bf16 %v546_v3, %v546_v3  ;;  %v433_v13 = vadd.f32 %v919_v9, %v1057_v19  ;;  %v920_v22 = vpop.f32.mrb[14].mxu0  ;;  %v936_v23 = vpop.f32.mrb[14].mxu1 }
  0xfc   : > { %722 = vst.msk [vmem:[%s1071_s30 + $0x68] sm:$0xf] %vm695_vm2, %v877_v2  ;;  %v878_v12 = vpack.c.bf16 %v562_v4, %v562_v4  ;;  %v497_v14 = vadd.f32 %v935_v10, %v1057_v19  ;;  %v860_v17 = vpack.c.bf16 %v544_v7, %v544_v7  ;;  %v876_v18 = vpack.c.bf16 %v560_v8, %v560_v8  ;;  %v427_v28 = vpop.f32.mrb[15].mxu0  ;;  %v491_v29 = vpop.f32.mrb[15].mxu1 }
  0xfd   : > { %704 = vst.msk [vmem:[%s1071_s30 + $0x20] sm:$0xf] %vm695_vm2, %v859_v5  ;;  %720 = vst.msk [vmem:[%s1071_s30 + $0x60] sm:$0xf] %vm695_vm2, %v875_v6  ;;  %v425_v20 = vadd.f32 %v1057_v19, %v424_v15  ;;  %v489_v21 = vadd.f32 %v1057_v19, %v488_v16  ;;  %v517_v24 = vmul.f32 0.2, %v433_v13  ;;  %v436_v26 = vadd.f32 %v920_v22, %v1057_v19 }
  0xfe   : > { %707 = vst.msk [vmem:[%s1071_s30 + $0x2c] sm:$0xf] %vm695_vm2, %v862_v11  ;;  %723 = vst.msk [vmem:[%s1071_s30 + $0x6c] sm:$0xf] %vm695_vm2, %v878_v12  ;;  %v533_v25 = vmul.f32 0.2, %v497_v14  ;;  %v500_v27 = vadd.f32 %v936_v23, %v1057_v19  ;;  %v428_v32 = vadd.f32 %v1057_v19, %v427_v28  ;;  %v492_v33 = vadd.f32 %v1057_v19, %v491_v29 }
  0xff   : > { %705 = vst.msk [vmem:[%s1071_s30 + $0x24] sm:$0xf] %vm695_vm2, %v860_v17  ;;  %721 = vst.msk [vmem:[%s1071_s30 + $0x64] sm:$0xf] %vm695_vm2, %v876_v18  ;;  %v515_v30 = vmul.f32 0.2, %v425_v20  ;;  %v549_v34 = vmax.f32 %v433_v13, %v517_v24 }
 0x100   : > { %v531_v31 = vmul.f32 0.2, %v489_v21  ;;  %v565_v35 = vmax.f32 %v497_v14, %v533_v25  ;;  %v518_v36 = vmul.f32 0.2, %v436_v26  ;;  %v534_v37 = vmul.f32 0.2, %v500_v27 }
 0x101   : > { %v547_v38 = vmax.f32 %v425_v20, %v515_v30  ;;  %v516_v40 = vmul.f32 0.2, %v428_v32  ;;  %v532_v41 = vmul.f32 0.2, %v492_v33  ;;  %v865_v42 = vpack.c.bf16 %v549_v34, %v549_v34 }
 0x102   : > { %v563_v39 = vmax.f32 %v489_v21, %v531_v31  ;;  %v881_v43 = vpack.c.bf16 %v565_v35, %v565_v35  ;;  %v550_v44 = vmax.f32 %v436_v26, %v518_v36  ;;  %v566_v45 = vmax.f32 %v500_v27, %v534_v37 }
 0x103   : > { %v863_v19 = vpack.c.bf16 %v547_v38, %v547_v38  ;;  %v548_v47 = vmax.f32 %v428_v32, %v516_v40  ;;  %v564_v48 = vmax.f32 %v492_v33, %v532_v41  ;;  %710 = vst.msk [vmem:[%s1071_s30 + $0x38] sm:$0xf] %vm695_vm2, %v865_v42 }
 0x104   : > { %v879_v46 = vpack.c.bf16 %v563_v39, %v563_v39  ;;  %726 = vst.msk [vmem:[%s1071_s30 + $0x78] sm:$0xf] %vm695_vm2, %v881_v43  ;;  %v866_v49 = vpack.c.bf16 %v550_v44, %v550_v44  ;;  %v882_v50 = vpack.c.bf16 %v566_v45, %v566_v45 }
 0x105   : > { %708 = vst.msk [vmem:[%s1071_s30 + $0x30] sm:$0xf] %vm695_vm2, %v863_v19  ;;  %v864_v51 = vpack.c.bf16 %v548_v47, %v548_v47  ;;  %v880_v52 = vpack.c.bf16 %v564_v48, %v564_v48 }
 0x106   : > { %724 = vst.msk [vmem:[%s1071_s30 + $0x70] sm:$0xf] %vm695_vm2, %v879_v46  ;;  %711 = vst.msk [vmem:[%s1071_s30 + $0x3c] sm:$0xf] %vm695_vm2, %v866_v49 }
 0x107   : > { %727 = vst.msk [vmem:[%s1071_s30 + $0x7c] sm:$0xf] %vm695_vm2, %v882_v50  ;;  %709 = vst.msk [vmem:[%s1071_s30 + $0x34] sm:$0xf] %vm695_vm2, %v864_v51 }
 0x108   : > { %725 = vst.msk [vmem:[%s1071_s30 + $0x74] sm:$0xf] %vm695_vm2, %v880_v52 }
 0x109 PF: > { %s13_s12 = sadd.s32 1, %s975_s12  }
 0x10a   : > { %p10_p4 = scmp.ge.s32.totalorder %s13_s12, 4  }
 0x10c   :  { %12 = sbr.rel (!%p10_p4) target bundleno = 1 (0x1), region = 60 }

// kernel: _lambda_.11
= control target key start
LH: loop header
LB: loop body
LE: loop exit
PB: predicated region body
PF: predicated region fallthrough
CT: control target
= control target key end

     0   :  { %s5678_s12 = smov 0   ;;  %s6657_s0 = inlined_call_operand.vmem [shape: f32[806,16], index: 0, kind: input, shape index: {}]   ;;  %s6658_s1 = inlined_call_operand.vmem [shape: f32[9,16,16], index: 1, kind: input, shape index: {}]   ;;  %s6659_s2 = inlined_call_operand.vmem [shape: f32[1,16], index: 2, kind: input, shape index: {}]   ;;  %s6660_s3 = inlined_call_operand.vmem [shape: bf16[768,16], index: 3, kind: output, shape index: {}]  }
   0x1 LB: > { %s3932_s13 = sadd.s32 4294967295, %s5656_s12   ;;  %p3935_p0 = scmp.ge.s32.totalorder %s5656_s12, 1  ;;  %s5656_s12 = sphi %s5678_s12, %s13_s12  }
   0x2   : > { %p127_p1 = scmp.lt.s32.totalorder %s5656_s12, 4 }
   0x4   : > { %p128_p2 = pnand %p3935_p0, %p127_p1 }
   0x5   : > { %v3972_v0 = vld [vmem:[%s6658_s1 + $0x10] sm:$0xff] (!%p128_p2)  ;;  %v3973_v1 = vld [vmem:[%s6658_s1 + $0x18] sm:$0xff] (!%p128_p2)  ;;  %v4205_v2 = vld [vmem:[%s6658_s1 + $0x40] sm:$0xff] (!%p128_p2)  ;;  %s3938_s20 = sshll.u32 (!%p128_p2), %s3932_s13, 8  ;;  %vm225_vm0 = vcmask (!%p128_p2), 130048   ;;  %vm3829_vm1 = vcmask (!%p128_p2), 125952  }
   0x6   : > { %131 = sbr.rel (%p128_p2) target bundleno = 521 (0x209), region = 32  ;;  %v5348_v3 = vpack.c.bf16 (!%p128_p2), %v3973_v1, %v3972_v0  ;;  %v4206_v4 = vld [vmem:[%s6658_s1 + $0x48] sm:$0xff] (!%p128_p2)  ;;  %s5703_s25 = scalar_lea.vmem (!%p128_p2), %s6657_s0, %s3938_s20  ;;  %v186_v5 = vld [vmem:[%s6658_s1] sm:$0xff] (!%p128_p2)  ;;  %v4272_v11 = vld [vmem:[%s6658_s1 + $0x50] sm:$0xff] (!%p128_p2) }
   0x7   : > { %v187_v6 = vld [vmem:[%s6658_s1 + $0x8] sm:$0xff] (!%p128_p2)  ;;  %v5711_v7 = vpack.c.bf16 (!%p128_p2), %v4206_v4, %v4205_v2  ;;  %v4173_v9 = vld [vmem:[%s5703_s25 + $0x13] sm:$0xff] (!%p128_p2)  ;;  %v4174_v15 = vld [vmem:[%s5703_s25 + $0x1b] sm:$0xff] (!%p128_p2) }
   0x8   : > { %v3940_v8 = vld [vmem:[%s5703_s25 + $0x1] sm:$0xff] (!%p128_p2)  ;;  %v5352_v10 = vpack.c.bf16 (!%p128_p2), %v187_v6, %v186_v5  ;;  %5349 = vmatprep.subr.bf16.mxu1 (!%p128_p2), %v5348_v3  ;;  %v4273_v12 = vld [vmem:[%s6658_s1 + $0x58] sm:$0xff] (!%p128_p2)  ;;  %v3941_v13 = vld [vmem:[%s5703_s25 + $0x9] sm:$0xff] (!%p128_p2)  ;;  %5092 = vmatprep.mubr.msk.f32.mxu0 (!%p128_p2), %vm225_vm0, %v4173_v9 }
   0x9   : > { %4884 = vmatprep.mubr.msk.f32.mxu1 (!%p128_p2), %vm225_vm0, %v3940_v8  ;;  %5365 = vmatprep.subr.bf16.mxu0 (!%p128_p2), %v5711_v7  ;;  %v5368_v14 = vpack.c.bf16 (!%p128_p2), %v4273_v12, %v4272_v11  ;;  %v3942_v16 = vld [vmem:[%s5703_s25 + $0x11] sm:$0xff] (!%p128_p2)  ;;  %v4175_v17 = vld [vmem:[%s5703_s25 + $0x23] sm:$0xff] (!%p128_p2)  ;;  %v3943_v18 = vld [vmem:[%s5703_s25 + $0x19] sm:$0xff] (!%p128_p2) }
   0xa   : > { %5351 = vmatpush3.bf16.msra.mxu1 (!%p128_p2), %v5348_v3  ;;  %5367 = vmatpush3.bf16.msra.mxu0 (!%p128_p2), %v5711_v7  ;;  %v4176_v19 = vld [vmem:[%s5703_s25 + $0x2b] sm:$0xff] (!%p128_p2)  ;;  %v3944_v20 = vld [vmem:[%s5703_s25 + $0x21] sm:$0xff] (!%p128_p2)  ;;  %v4177_v21 = vld [vmem:[%s5703_s25 + $0x33] sm:$0xff] (!%p128_p2) }
   0xb   : > { %5353 = vmatprep.subr.bf16.mxu1 (!%p128_p2), %v5352_v10  ;;  %5369 = vmatprep.subr.bf16.mxu0 (!%p128_p2), %v5368_v14  ;;  %v3945_v22 = vld [vmem:[%s5703_s25 + $0x29] sm:$0xff] (!%p128_p2)  ;;  %v4178_v23 = vld [vmem:[%s5703_s25 + $0x3b] sm:$0xff] (!%p128_p2)  ;;  %v3946_v24 = vld [vmem:[%s5703_s25 + $0x31] sm:$0xff] (!%p128_p2) }
   0xc   : > { %v4179_v25 = vld [vmem:[%s5703_s25 + $0x43] sm:$0xff] (!%p128_p2)  ;;  %v3947_v28 = vld [vmem:[%s5703_s25 + $0x39] sm:$0xff] (!%p128_p2)  ;;  %v4180_v30 = vld [vmem:[%s5703_s25 + $0x4b] sm:$0xff] (!%p128_p2) }
   0xd   : > { %4885 = vmatmul.mubr.msk.f32.vlgmr.msra.gmra.mrb[0].mxu1 %vm225_vm0, %v3941_v13  ;;  %5093 = vmatmul.mubr.msk.f32.vlgmr.msra.gmra.mrb[0].mxu0 %vm225_vm0, %v4174_v15  ;;  %v4339_v26 = vld [vmem:[%s6658_s1 + $0x60] sm:$0xff]  ;;  %v4340_v27 = vld [vmem:[%s6658_s1 + $0x68] sm:$0xff]  ;;  %v4181_v32 = vld [vmem:[%s5703_s25 + $0x53] sm:$0xff] }
   0xe   : > { %5355 = vmatpush3.bf16.msra.mxu1 %v5352_v10  ;;  %5371 = vmatpush3.bf16.msra.mxu0 %v5368_v14  ;;  %v5372_v29 = vpack.c.bf16 %v4340_v27, %v4339_v26  ;;  %v3948_v31 = vld [vmem:[%s5703_s25 + $0x41] sm:$0xff]  ;;  %v3949_v33 = vld [vmem:[%s5703_s25 + $0x49] sm:$0xff]  ;;  %v3950_v35 = vld [vmem:[%s5703_s25 + $0x51] sm:$0xff] }
   0xf   : > { %4887 = vmatprep.mubr.msk.f32.mxu1 %vm225_vm0, %v3942_v16  ;;  %5095 = vmatprep.mubr.msk.f32.mxu0 %vm225_vm0, %v4175_v17  ;;  %v4182_v34 = vld [vmem:[%s5703_s25 + $0x5b] sm:$0xff]  ;;  %v4183_v36 = vld [vmem:[%s5703_s25 + $0x63] sm:$0xff]  ;;  %v4184_v38 = vld [vmem:[%s5703_s25 + $0x6b] sm:$0xff] }
  0x10   : > { %5373 = vmatprep.subr.bf16.mxu0 %v5372_v29  ;;  %v3951_v37 = vld [vmem:[%s5703_s25 + $0x59] sm:$0xff]  ;;  %v3952_v39 = vld [vmem:[%s5703_s25 + $0x61] sm:$0xff]  ;;  %v3953_v44 = vld [vmem:[%s5703_s25 + $0x69] sm:$0xff] }
  0x11   : > { %4888 = vmatmul.mubr.msk.f32.gmra.mrb[2].mxu1 %vm225_vm0, %v3943_v18  ;;  %5096 = vmatmul.mubr.msk.f32.gmra.mrb[2].mxu0 %vm225_vm0, %v4176_v19  ;;  %v4071_v40 = vld [vmem:[%s6658_s1 + $0x20] sm:$0xff]  ;;  %v4185_v41 = vld [vmem:[%s5703_s25 + $0x73] sm:$0xff]  ;;  %v4072_v42 = vld [vmem:[%s6658_s1 + $0x28] sm:$0xff] }
  0x12   : > { %4890 = vmatprep.mubr.msk.f32.mxu1 %vm225_vm0, %v3944_v20  ;;  %5098 = vmatprep.mubr.msk.f32.mxu0 %vm225_vm0, %v4177_v21  ;;  %v5782_v43 = vpack.c.bf16 %v4072_v42, %v4071_v40  ;;  %v4186_v45 = vld [vmem:[%s5703_s25 + $0x7b] sm:$0xff]  ;;  %v3954_v46 = vld [vmem:[%s5703_s25 + $0x71] sm:$0xff]  ;;  %v4187_v47 = vld [vmem:[%s5703_s25 + $0x83] sm:$0xff] }
  0x13   : > { %v3955_v48 = vld [vmem:[%s5703_s25 + $0x79] sm:$0xff]  ;;  %v4188_v49 = vld [vmem:[%s5703_s25 + $0x8b] sm:$0xff]  ;;  %v3956_v50 = vld [vmem:[%s5703_s25 + $0x81] sm:$0xff] }
  0x14   : > { %5357 = vmatprep.subr.bf16.mxu1 %v5782_v43  ;;  %v4240_v51 = vld [vmem:[%s5703_s25 + $0x14] sm:$0xff]  ;;  %v3957_v52 = vld [vmem:[%s5703_s25 + $0x89] sm:$0xff]  ;;  %v4241_v54 = vld [vmem:[%s5703_s25 + $0x1c] sm:$0xff] }
  0x15   : > { %4891 = vmatmul.mubr.msk.f32.gmra.mrb[4].mxu1 %vm225_vm0, %v3945_v22  ;;  %5099 = vmatmul.mubr.msk.f32.gmra.mrb[4].mxu0 %vm225_vm0, %v4178_v23  ;;  %v4406_v53 = vld [vmem:[%s6658_s1 + $0x70] sm:$0xff]  ;;  %v4407_v56 = vld [vmem:[%s6658_s1 + $0x78] sm:$0xff]  ;;  %v5814_v57 = vld [vmem:[%s5703_s25 + $0x24] sm:$0xff] }
  0x16   : > { %4893 = vmatprep.mubr.msk.f32.mxu1 %vm225_vm0, %v3946_v24  ;;  %5101 = vmatprep.mubr.msk.f32.mxu0 %vm225_vm0, %v4179_v25  ;;  %v3958_v55 = vld [vmem:[%s5703_s25 + $0x91] sm:$0xff]  ;;  %v5816_v58 = vpack.c.bf16 %v4407_v56, %v4406_v53  ;;  %v3959_v59 = vld [vmem:[%s5703_s25 + $0x99] sm:$0xff]  ;;  %v3960_v61 = vld [vmem:[%s5703_s25 + $0xa1] sm:$0xff] }
  0x17   : > { %v5825_v60 = vld [vmem:[%s5703_s25 + $0x2c] sm:$0xff]  ;;  %v5829_v62 = vld [vmem:[%s5703_s25 + $0x34] sm:$0xff]  ;;  %v5840_v0 = vld [vmem:[%s5703_s25 + $0x3c] sm:$0xff] }
  0x18   : > { %v3961_v63 = vld [vmem:[%s5703_s25 + $0xa9] sm:$0xff]  ;;  %v3962_v1 = vld [vmem:[%s5703_s25 + $0xb1] sm:$0xff]  ;;  %v3963_v3 = vld [vmem:[%s5703_s25 + $0xb9] sm:$0xff] }
  0x19   : > { %4894 = vmatmul.mubr.msk.f32.gmra.mrb[6].mxu1 %vm225_vm0, %v3947_v28  ;;  %5102 = vmatmul.mubr.msk.f32.gmra.mrb[6].mxu0 %vm225_vm0, %v4180_v30  ;;  %v5844_v2 = vld [vmem:[%s5703_s25 + $0x44] sm:$0xff]  ;;  %v5854_v4 = vld [vmem:[%s5703_s25 + $0x4c] sm:$0xff]  ;;  %v5858_v6 = vld [vmem:[%s5703_s25 + $0x54] sm:$0xff] }
  0x1a   : > { %4896 = vmatprep.mubr.msk.f32.mxu1 %vm225_vm0, %v3948_v31  ;;  %5104 = vmatprep.mubr.msk.f32.mxu0 %vm225_vm0, %v4181_v32  ;;  %v3964_v5 = vld [vmem:[%s5703_s25 + $0xc1] sm:$0xff]  ;;  %v3965_v8 = vld [vmem:[%s5703_s25 + $0xc9] sm:$0xff]  ;;  %v3966_v10 = vld [vmem:[%s5703_s25 + $0xd1] sm:$0xff] }
  0x1b   : > { %v5868_v9 = vld [vmem:[%s5703_s25 + $0x5c] sm:$0xff]  ;;  %v5872_v11 = vld [vmem:[%s5703_s25 + $0x64] sm:$0xff]  ;;  %v5882_v13 = vld [vmem:[%s5703_s25 + $0x6c] sm:$0xff] }
  0x1c   : > { %v3967_v12 = vld [vmem:[%s5703_s25 + $0xd9] sm:$0xff]  ;;  %v3968_v14 = vld [vmem:[%s5703_s25 + $0xe1] sm:$0xff]  ;;  %v3969_v16 = vld [vmem:[%s5703_s25 + $0xe9] sm:$0xff] }
  0x1d   : > { %4897 = vmatmul.mubr.msk.f32.gmra.mrb[8].mxu1 %vm225_vm0, %v3949_v33  ;;  %5105 = vmatmul.mubr.msk.f32.gmra.mrb[8].mxu0 %vm225_vm0, %v4182_v34  ;;  %v5886_v15 = vld [vmem:[%s5703_s25 + $0x74] sm:$0xff]  ;;  %v5896_v17 = vld [vmem:[%s5703_s25 + $0x7c] sm:$0xff]  ;;  %v5900_v19 = vld [vmem:[%s5703_s25 + $0x84] sm:$0xff] }
  0x1e   : > { %4899 = vmatprep.mubr.msk.f32.mxu1 %vm225_vm0, %v3950_v35  ;;  %5107 = vmatprep.mubr.msk.f32.mxu0 %vm225_vm0, %v4183_v36  ;;  %v3970_v18 = vld [vmem:[%s5703_s25 + $0xf1] sm:$0xff]  ;;  %v3971_v20 = vld [vmem:[%s5703_s25 + $0xf9] sm:$0xff]  ;;  %v155_v26 = vld [vmem:[%s5703_s25 + $0x8] sm:$0xff] }
  0x1f   : > { %v5910_v21 = vld [vmem:[%s5703_s25 + $0x8c] sm:$0xff]  ;;  %v154_v22 = vld [vmem:[%s5703_s25] sm:$0xff]  ;;  %v5914_v23 = vld [vmem:[%s5703_s25 + $0x94] sm:$0xff] }
  0x20   : > { %v4138_v24 = vld [vmem:[%s6658_s1 + $0x30] sm:$0xff]  ;;  %v4139_v25 = vld [vmem:[%s6658_s1 + $0x38] sm:$0xff]  ;;  %v158_v33 = vld [vmem:[%s5703_s25 + $0x20] sm:$0xff] }
  0x21   : > { %4900 = vmatmul.mubr.msk.f32.gmra.mrb[10].mxu1 %vm225_vm0, %v3951_v37  ;;  %5108 = vmatmul.mubr.msk.f32.gmra.mrb[10].mxu0 %vm225_vm0, %v4184_v38  ;;  %v5930_v27 = vld [vmem:[%s5703_s25 + $0x9c] sm:$0xff]  ;;  %v156_v28 = vld [vmem:[%s5703_s25 + $0x10] sm:$0xff]  ;;  %v5936_v30 = vpack.c.bf16 %v4139_v25, %v4138_v24  ;;  %v159_v35 = vld [vmem:[%s5703_s25 + $0x28] sm:$0xff] }
  0x22   : > { %4902 = vmatprep.mubr.msk.f32.mxu1 %vm225_vm0, %v3952_v39  ;;  %5110 = vmatprep.mubr.msk.f32.mxu0 %vm225_vm0, %v4185_v41  ;;  %v157_v31 = vld [vmem:[%s5703_s25 + $0x18] sm:$0xff]  ;;  %v5947_v32 = vld [vmem:[%s5703_s25 + $0xac] sm:$0xff]  ;;  %v5966_v38 = vld [vmem:[%s5703_s25 + $0xc4] sm:$0xff] }
  0x23   : > { %v5951_v34 = vld [vmem:[%s5703_s25 + $0xb4] sm:$0xff]  ;;  %v5962_v36 = vld [vmem:[%s5703_s25 + $0xbc] sm:$0xff]  ;;  %v5976_v40 = vld [vmem:[%s5703_s25 + $0xcc] sm:$0xff] }
  0x24   : > { %v160_v37 = vld [vmem:[%s5703_s25 + $0x30] sm:$0xff]  ;;  %v161_v39 = vld [vmem:[%s5703_s25 + $0x38] sm:$0xff]  ;;  %v162_v41 = vld [vmem:[%s5703_s25 + $0x40] sm:$0xff] }
  0x25   : > { %4903 = vmatmul.mubr.msk.f32.gmra.mrb[12].mxu1 %vm225_vm0, %v3953_v44  ;;  %5111 = vmatmul.mubr.msk.f32.gmra.mrb[12].mxu0 %vm225_vm0, %v4186_v45  ;;  %v5980_v42 = vld [vmem:[%s5703_s25 + $0xd4] sm:$0xff]  ;;  %v5990_v44 = vld [vmem:[%s5703_s25 + $0xdc] sm:$0xff]  ;;  %v6032_v56 = vld [vmem:[%s5703_s25 + $0x10c] sm:$0xff] }
  0x26   : > { %4905 = vmatprep.mubr.msk.f32.mxu1 %vm225_vm0, %v3954_v46  ;;  %5113 = vmatprep.mubr.msk.f32.mxu0 %vm225_vm0, %v4187_v47  ;;  %v164_v45 = vld [vmem:[%s5703_s25 + $0x50] sm:$0xff]  ;;  %v5994_v46 = vld [vmem:[%s5703_s25 + $0xe4] sm:$0xff]  ;;  %v165_v47 = vld [vmem:[%s5703_s25 + $0x58] sm:$0xff] }
  0x27   : > { %v168_v53 = vld [vmem:[%s5703_s25 + $0x70] sm:$0xff]  ;;  %v6183_v24 = vld [vmem:[%s5703_s25 + $0x5a] sm:$0xff]  ;;  %v6188_v25 = vld [vmem:[%s5703_s25 + $0x62] sm:$0xff] }
  0x29   : > { %4906 = vmatmul.mubr.msk.f32.gmra.mrb[14].mxu1 %vm225_vm0, %v3955_v48  ;;  %5114 = vmatmul.mubr.msk.f32.gmra.mrb[14].mxu0 %vm225_vm0, %v4188_v49  ;;  %v6004_v48 = vld [vmem:[%s5703_s25 + $0xec] sm:$0xff]  ;;  %v166_v49 = vld [vmem:[%s5703_s25 + $0x60] sm:$0xff] }
  0x2a   : > { %4908 = vmatprep.mubr.msk.f32.mxu1 %vm225_vm0, %v3956_v50  ;;  %5144 = vmatprep.mubr.msk.f32.mxu0 %vm225_vm0, %v4240_v51  ;;  %v6008_v50 = vld [vmem:[%s5703_s25 + $0xf4] sm:$0xff]  ;;  %v167_v51 = vld [vmem:[%s5703_s25 + $0x68] sm:$0xff] }
  0x2d   : > { %4909 = vmatmul.mubr.msk.f32.gmra.mrb[16].mxu1 %vm225_vm0, %v3957_v52  ;;  %5145 = vmatmul.mubr.msk.f32.vlgmr.msra.gmra.mrb[0].mxu0 %vm225_vm0, %v4241_v54  ;;  %v6018_v52 = vld [vmem:[%s5703_s25 + $0xfc] sm:$0xff]  ;;  %v6022_v54 = vld [vmem:[%s5703_s25 + $0x104] sm:$0xff] }
  0x2e   : > { %4911 = vmatprep.mubr.msk.f32.mxu1 %vm225_vm0, %v3958_v55  ;;  %5375 = vmatpush3.bf16.msra.mxu0 %v5372_v29  ;;  %v5934_v29 = vld [vmem:[%s5703_s25 + $0xa4] sm:$0xff]  ;;  %v169_v55 = vld [vmem:[%s5703_s25 + $0x78] sm:$0xff] }
  0x2f   : > { %5147 = vmatprep.mubr.msk.f32.mxu0 %vm225_vm0, %v5814_v57  ;;  %5377 = vmatprep.subr.bf16.mxu0 %v5816_v58 }
  0x31   : > { %4912 = vmatmul.mubr.msk.f32.gmra.mrb[18].mxu1 %vm225_vm0, %v3959_v59  ;;  %5148 = vmatmul.mubr.msk.f32.gmra.mrb[2].mxu0 %vm225_vm0, %v5825_v60  ;;  %v170_v59 = vld [vmem:[%s5703_s25 + $0x80] sm:$0xff] }
  0x32   : > { %4914 = vmatprep.mubr.msk.f32.mxu1 %vm225_vm0, %v3960_v61  ;;  %5150 = vmatprep.mubr.msk.f32.mxu0 %vm225_vm0, %v5829_v62  ;;  %v4473_v61 = vld [vmem:[%s6658_s1 + $0x80] sm:$0xff] }
  0x35   : > { %4915 = vmatmul.mubr.msk.f32.gmra.mrb[20].mxu1 %vm225_vm0, %v3961_v63  ;;  %5151 = vmatmul.mubr.msk.f32.gmra.mrb[4].mxu0 %vm225_vm0, %v5840_v0  ;;  %v4474_v63 = vld [vmem:[%s6658_s1 + $0x88] sm:$0xff] }
  0x36   : > { %4917 = vmatprep.mubr.msk.f32.mxu1 %vm225_vm0, %v3962_v1  ;;  %5153 = vmatprep.mubr.msk.f32.mxu0 %vm225_vm0, %v5844_v2  ;;  %v171_v1 = vld [vmem:[%s5703_s25 + $0x88] sm:$0xff] }
  0x39   : > { %4918 = vmatmul.mubr.msk.f32.gmra.mrb[22].mxu1 %vm225_vm0, %v3963_v3  ;;  %5154 = vmatmul.mubr.msk.f32.gmra.mrb[6].mxu0 %vm225_vm0, %v5854_v4  ;;  %v172_v3 = vld [vmem:[%s5703_s25 + $0x90] sm:$0xff] }
  0x3a   : > { %4920 = vmatprep.mubr.msk.f32.mxu1 %vm225_vm0, %v3964_v5  ;;  %5156 = vmatprep.mubr.msk.f32.mxu0 %vm225_vm0, %v5858_v6  ;;  %v6049_v5 = vpack.c.bf16 %v4474_v63, %v4473_v61  ;;  %v4387_v61 = vld [vmem:[%s5703_s25 + $0x8d] sm:$0xff] }
  0x3b   : > { %v6316_v63 = vld [vmem:[%s5703_s25 + $0xf2] sm:$0xff] }
  0x3d   : > { %4921 = vmatmul.mubr.msk.f32.gmra.mrb[24].mxu1 %vm225_vm0, %v3965_v8  ;;  %5157 = vmatmul.mubr.msk.f32.gmra.mrb[8].mxu0 %vm225_vm0, %v5868_v9  ;;  %v173_v8 = vld [vmem:[%s5703_s25 + $0x98] sm:$0xff] }
  0x3e   : > { %4923 = vmatprep.mubr.msk.f32.mxu1 %vm225_vm0, %v3966_v10  ;;  %5159 = vmatprep.mubr.msk.f32.mxu0 %vm225_vm0, %v5872_v11  ;;  %v183_v10 = vld [vmem:[%s5703_s25 + $0xe8] sm:$0xff] }
  0x41   : > { %4924 = vmatmul.mubr.msk.f32.gmra.mrb[26].mxu1 %vm225_vm0, %v3967_v12  ;;  %5160 = vmatmul.mubr.msk.f32.gmra.mrb[10].mxu0 %vm225_vm0, %v5882_v13  ;;  %v185_v12 = vld [vmem:[%s5703_s25 + $0xf8] sm:$0xff] }
  0x42   : > { %4926 = vmatprep.mubr.msk.f32.mxu1 %vm225_vm0, %v3968_v14  ;;  %5162 = vmatprep.mubr.msk.f32.mxu0 %vm225_vm0, %v5886_v15  ;;  %v4040_v14 = vld [vmem:[%s5703_s25 + $0xa] sm:$0xff] }
  0x45   : > { %4927 = vmatmul.mubr.msk.f32.gmra.mrb[28].mxu1 %vm225_vm0, %v3969_v16  ;;  %5163 = vmatmul.mubr.msk.f32.gmra.mrb[12].mxu0 %vm225_vm0, %v5896_v17  ;;  %v6124_v16 = vld [vmem:[%s5703_s25 + $0x1a] sm:$0xff] }
  0x46   : > { %4929 = vmatprep.mubr.msk.f32.mxu1 %vm225_vm0, %v3970_v18  ;;  %5165 = vmatprep.mubr.msk.f32.mxu0 %vm225_vm0, %v5900_v19  ;;  %v6141_v18 = vld [vmem:[%s5703_s25 + $0x2a] sm:$0xff] }
  0x49   : > { %4930 = vmatmul.mubr.msk.f32.gmra.mrb[30].mxu1 %vm225_vm0, %v3971_v20  ;;  %5166 = vmatmul.mubr.msk.f32.gmra.mrb[14].mxu0 %vm225_vm0, %v5910_v21  ;;  %v6155_v20 = vld [vmem:[%s5703_s25 + $0x3a] sm:$0xff] }
  0x4a   : > { %4936 = vmatprep.mubr.msk.f32.mxu1 %vm225_vm0, %v154_v22  ;;  %5168 = vmatprep.mubr.msk.f32.mxu0 %vm225_vm0, %v5914_v23  ;;  %v6169_v22 = vld [vmem:[%s5703_s25 + $0x4a] sm:$0xff] }
  0x4d   : > { %4937 = vmatmul.mubr.msk.f32.vlgmr.msra.gmra.mrb[0].mxu1 %vm225_vm0, %v155_v26  ;;  %5169 = vmatmul.mubr.msk.f32.gmra.mrb[16].mxu0 %vm225_vm0, %v5930_v27  ;;  %v6197_v26 = vld [vmem:[%s5703_s25 + $0x6a] sm:$0xff] }
  0x4e   : > { %5359 = vmatpush3.bf16.msra.mxu1 %v5782_v43  ;;  %4939 = vmatprep.mubr.msk.f32.mxu1 %vm225_vm0, %v156_v28  ;;  %v163_v43 = vld [vmem:[%s5703_s25 + $0x48] sm:$0xff]  ;;  %v4337_v28 = vld [vmem:[%s5703_s25 + $0x114] sm:$0xff] }
  0x4f   : > { %5171 = vmatprep.mubr.msk.f32.mxu0 %vm225_vm0, %v5934_v29  ;;  %5361 = vmatprep.subr.bf16.mxu1 %v5936_v30 }
  0x51   : > { %4940 = vmatmul.mubr.msk.f32.gmra.mrb[2].mxu1 %vm225_vm0, %v157_v31  ;;  %5172 = vmatmul.mubr.msk.f32.gmra.mrb[18].mxu0 %vm225_vm0, %v5947_v32  ;;  %v6217_v31 = vld [vmem:[%s5703_s25 + $0x82] sm:$0xff] }
  0x52   : > { %4942 = vmatprep.mubr.msk.f32.mxu1 %vm225_vm0, %v158_v33  ;;  %5174 = vmatprep.mubr.msk.f32.mxu0 %vm225_vm0, %v5951_v34  ;;  %v6226_v33 = vld [vmem:[%s5703_s25 + $0x8a] sm:$0xff] }
  0x55   : > { %4943 = vmatmul.mubr.msk.f32.gmra.mrb[4].mxu1 %vm225_vm0, %v159_v35  ;;  %5175 = vmatmul.mubr.msk.f32.gmra.mrb[20].mxu0 %vm225_vm0, %v5962_v36  ;;  %v6231_v35 = vld [vmem:[%s5703_s25 + $0x92] sm:$0xff] }
  0x56   : > { %4945 = vmatprep.mubr.msk.f32.mxu1 %vm225_vm0, %v160_v37  ;;  %5177 = vmatprep.mubr.msk.f32.mxu0 %vm225_vm0, %v5966_v38  ;;  %v6240_v37 = vld [vmem:[%s5703_s25 + $0x9a] sm:$0xff] }
  0x59   : > { %4946 = vmatmul.mubr.msk.f32.gmra.mrb[6].mxu1 %vm225_vm0, %v161_v39  ;;  %5178 = vmatmul.mubr.msk.f32.gmra.mrb[22].mxu0 %vm225_vm0, %v5976_v40  ;;  %v6246_v39 = vld [vmem:[%s5703_s25 + $0xa2] sm:$0xff] }
  0x5a   : > { %4948 = vmatprep.mubr.msk.f32.mxu1 %vm225_vm0, %v162_v41  ;;  %5180 = vmatprep.mubr.msk.f32.mxu0 %vm225_vm0, %v5980_v42  ;;  %v6255_v41 = vld [vmem:[%s5703_s25 + $0xaa] sm:$0xff] }
  0x5d   : > { %4949 = vmatmul.mubr.msk.f32.gmra.mrb[8].mxu1 %vm225_vm0, %v163_v43  ;;  %5181 = vmatmul.mubr.msk.f32.gmra.mrb[24].mxu0 %vm225_vm0, %v5990_v44  ;;  %v6260_v43 = vld [vmem:[%s5703_s25 + $0xb2] sm:$0xff] }
  0x5e   : > { %4951 = vmatprep.mubr.msk.f32.mxu1 %vm225_vm0, %v164_v45  ;;  %5183 = vmatprep.mubr.msk.f32.mxu0 %vm225_vm0, %v5994_v46  ;;  %v6269_v45 = vld [vmem:[%s5703_s25 + $0xba] sm:$0xff] }
  0x61   : > { %4952 = vmatmul.mubr.msk.f32.gmra.mrb[10].mxu1 %vm225_vm0, %v165_v47  ;;  %5184 = vmatmul.mubr.msk.f32.gmra.mrb[26].mxu0 %vm225_vm0, %v6004_v48  ;;  %v6274_v47 = vld [vmem:[%s5703_s25 + $0xc2] sm:$0xff] }
  0x62   : > { %4954 = vmatprep.mubr.msk.f32.mxu1 %vm225_vm0, %v166_v49  ;;  %5186 = vmatprep.mubr.msk.f32.mxu0 %vm225_vm0, %v6008_v50  ;;  %v6283_v49 = vld [vmem:[%s5703_s25 + $0xca] sm:$0xff] }
  0x65   : > { %4955 = vmatmul.mubr.msk.f32.gmra.mrb[12].mxu1 %vm225_vm0, %v167_v51  ;;  %5187 = vmatmul.mubr.msk.f32.gmra.mrb[28].mxu0 %vm225_vm0, %v6018_v52  ;;  %v6288_v51 = vld [vmem:[%s5703_s25 + $0xd2] sm:$0xff] }
  0x66   : > { %4957 = vmatprep.mubr.msk.f32.mxu1 %vm225_vm0, %v168_v53  ;;  %5189 = vmatprep.mubr.msk.f32.mxu0 %vm225_vm0, %v6022_v54  ;;  %v6297_v53 = vld [vmem:[%s5703_s25 + $0xda] sm:$0xff] }
  0x69   : > { %4958 = vmatmul.mubr.msk.f32.gmra.mrb[14].mxu1 %vm225_vm0, %v169_v55  ;;  %5190 = vmatmul.mubr.msk.f32.gmra.mrb[30].mxu0 %vm225_vm0, %v6032_v56  ;;  %v6302_v55 = vld [vmem:[%s5703_s25 + $0xe2] sm:$0xff] }
  0x6a   : > { %4960 = vmatprep.mubr.msk.f32.mxu1 %vm225_vm0, %v170_v59  ;;  %5196 = vmatprep.mubr.msk.f32.mxu0 %vm225_vm0, %v5814_v57  ;;  %v174_v57 = vld [vmem:[%s5703_s25 + $0xa0] sm:$0xff]  ;;  %v6311_v59 = vld [vmem:[%s5703_s25 + $0xea] sm:$0xff] }
  0x6d   : > { %4961 = vmatmul.mubr.msk.f32.gmra.mrb[16].mxu1 %vm225_vm0, %v171_v1  ;;  %5197 = vmatmul.mubr.msk.f32.vlgmr.msra.gmra.mrb[0].mxu0 %vm225_vm0, %v5825_v60  ;;  %v175_v60 = vld [vmem:[%s5703_s25 + $0xa8] sm:$0xff]  ;;  %v4388_v1 = vld [vmem:[%s5703_s25 + $0x95] sm:$0xff] }
  0x6e   : > { %4963 = vmatprep.mubr.msk.f32.mxu1 %vm225_vm0, %v172_v3  ;;  %5379 = vmatpush3.bf16.msra.mxu0 %v5816_v58  ;;  %v176_v58 = vld [vmem:[%s5703_s25 + $0xb0] sm:$0xff]  ;;  %v6325_v3 = vld [vmem:[%s5703_s25 + $0xfa] sm:$0xff] }
  0x6f   : > { %5199 = vmatprep.mubr.msk.f32.mxu0 %vm225_vm0, %v5829_v62  ;;  %5381 = vmatprep.subr.bf16.mxu0 %v6049_v5  ;;  %v177_v62 = vld [vmem:[%s5703_s25 + $0xb8] sm:$0xff] }
  0x71   : > { %4964 = vmatmul.mubr.msk.f32.gmra.mrb[18].mxu1 %vm225_vm0, %v173_v8  ;;  %5200 = vmatmul.mubr.msk.f32.gmra.mrb[2].mxu0 %vm225_vm0, %v5840_v0  ;;  %v178_v0 = vld [vmem:[%s5703_s25 + $0xc0] sm:$0xff] }
  0x72   : > { %4966 = vmatprep.mubr.msk.f32.mxu1 %vm225_vm0, %v174_v57  ;;  %5202 = vmatprep.mubr.msk.f32.mxu0 %vm225_vm0, %v5844_v2  ;;  %v179_v2 = vld [vmem:[%s5703_s25 + $0xc8] sm:$0xff] }
  0x73   : > { %v4390_v8 = vld [vmem:[%s5703_s25 + $0xa5] sm:$0xff]  ;;  %v4391_v57 = vld [vmem:[%s5703_s25 + $0xad] sm:$0xff] }
  0x75   : > { %4967 = vmatmul.mubr.msk.f32.gmra.mrb[20].mxu1 %vm225_vm0, %v175_v60  ;;  %5203 = vmatmul.mubr.msk.f32.gmra.mrb[4].mxu0 %vm225_vm0, %v5854_v4  ;;  %v180_v4 = vld [vmem:[%s5703_s25 + $0xd0] sm:$0xff] }
  0x76   : > { %4969 = vmatprep.mubr.msk.f32.mxu1 %vm225_vm0, %v176_v58  ;;  %5205 = vmatprep.mubr.msk.f32.mxu0 %vm225_vm0, %v5858_v6  ;;  %v181_v6 = vld [vmem:[%s5703_s25 + $0xd8] sm:$0xff] }
  0x77   : > { %v4392_v60 = vld [vmem:[%s5703_s25 + $0xb5] sm:$0xff]  ;;  %v4393_v58 = vld [vmem:[%s5703_s25 + $0xbd] sm:$0xff] }
  0x79   : > { %4970 = vmatmul.mubr.msk.f32.gmra.mrb[22].mxu1 %vm225_vm0, %v177_v62  ;;  %5206 = vmatmul.mubr.msk.f32.gmra.mrb[6].mxu0 %vm225_vm0, %v5868_v9  ;;  %v182_v9 = vld [vmem:[%s5703_s25 + $0xe0] sm:$0xff] }
  0x7a   : > { %4972 = vmatprep.mubr.msk.f32.mxu1 %vm225_vm0, %v178_v0  ;;  %5208 = vmatprep.mubr.msk.f32.mxu0 %vm225_vm0, %v5872_v11  ;;  %v184_v11 = vld [vmem:[%s5703_s25 + $0xf0] sm:$0xff]  ;;  %v4394_v62 = vld [vmem:[%s5703_s25 + $0xc5] sm:$0xff] }
  0x7b   : > { %v4396_v0 = vld [vmem:[%s5703_s25 + $0xd5] sm:$0xff] }
  0x7d   : > { %4973 = vmatmul.mubr.msk.f32.gmra.mrb[24].mxu1 %vm225_vm0, %v179_v2  ;;  %5209 = vmatmul.mubr.msk.f32.gmra.mrb[8].mxu0 %vm225_vm0, %v5882_v13  ;;  %v4039_v13 = vld [vmem:[%s5703_s25 + $0x2] sm:$0xff] }
  0x7e   : > { %4975 = vmatprep.mubr.msk.f32.mxu1 %vm225_vm0, %v180_v4  ;;  %5211 = vmatprep.mubr.msk.f32.mxu0 %vm225_vm0, %v5886_v15  ;;  %v6117_v15 = vld [vmem:[%s5703_s25 + $0x12] sm:$0xff]  ;;  %v4397_v2 = vld [vmem:[%s5703_s25 + $0xdd] sm:$0xff]  ;;  %v4398_v4 = vld [vmem:[%s5703_s25 + $0xe5] sm:$0xff] }
  0x81   : > { %4976 = vmatmul.mubr.msk.f32.gmra.mrb[26].mxu1 %vm225_vm0, %v181_v6  ;;  %5212 = vmatmul.mubr.msk.f32.gmra.mrb[10].mxu0 %vm225_vm0, %v5896_v17  ;;  %v6131_v17 = vld [vmem:[%s5703_s25 + $0x22] sm:$0xff]  ;;  %v4399_v6 = vld [vmem:[%s5703_s25 + $0xed] sm:$0xff] }
  0x82   : > { %4978 = vmatprep.mubr.msk.f32.mxu1 %vm225_vm0, %v182_v9  ;;  %5214 = vmatprep.mubr.msk.f32.mxu0 %vm225_vm0, %v5900_v19  ;;  %v6146_v19 = vld [vmem:[%s5703_s25 + $0x32] sm:$0xff] }
  0x83   : > { %v4400_v9 = vld [vmem:[%s5703_s25 + $0xf5] sm:$0xff] }
  0x85   : > { %4979 = vmatmul.mubr.msk.f32.gmra.mrb[28].mxu1 %vm225_vm0, %v183_v10  ;;  %5215 = vmatmul.mubr.msk.f32.gmra.mrb[12].mxu0 %vm225_vm0, %v5910_v21  ;;  %v6160_v21 = vld [vmem:[%s5703_s25 + $0x42] sm:$0xff] }
  0x86   : > { %4981 = vmatprep.mubr.msk.f32.mxu1 %vm225_vm0, %v184_v11  ;;  %5217 = vmatprep.mubr.msk.f32.mxu0 %vm225_vm0, %v5914_v23  ;;  %v6174_v23 = vld [vmem:[%s5703_s25 + $0x52] sm:$0xff]  ;;  %v4401_v10 = vld [vmem:[%s5703_s25 + $0xfd] sm:$0xff]  ;;  %v4402_v11 = vld [vmem:[%s5703_s25 + $0x105] sm:$0xff] }
  0x89   : > { %4982 = vmatmul.mubr.msk.f32.gmra.mrb[30].mxu1 %vm225_vm0, %v185_v12  ;;  %5218 = vmatmul.mubr.msk.f32.gmra.mrb[14].mxu0 %vm225_vm0, %v5930_v27  ;;  %v6202_v27 = vld [vmem:[%s5703_s25 + $0x72] sm:$0xff] }
  0x8a   : > { %4988 = vmatprep.mubr.msk.f32.mxu1 %vm225_vm0, %v4039_v13  ;;  %5220 = vmatprep.mubr.msk.f32.mxu0 %vm225_vm0, %v5934_v29  ;;  %v6212_v29 = vld [vmem:[%s5703_s25 + $0x7a] sm:$0xff]  ;;  %v4403_v12 = vld [vmem:[%s5703_s25 + $0x10d] sm:$0xff] }
  0x8b   : > { %v4404_v13 = vld [vmem:[%s5703_s25 + $0x115] sm:$0xff] }
  0x8d   : > { %4989 = vmatmul.mubr.msk.f32.vlgmr.msra.gmra.mrb[0].mxu1 %vm225_vm0, %v4040_v14  ;;  %5221 = vmatmul.mubr.msk.f32.gmra.mrb[16].mxu0 %vm225_vm0, %v5947_v32  ;;  %v4374_v32 = vld [vmem:[%s5703_s25 + $0x25] sm:$0xff]  ;;  %v4405_v14 = vld [vmem:[%s5703_s25 + $0x11d] sm:$0xff] }
  0x8e   : > { %5363 = vmatpush3.bf16.msra.mxu1 %v5936_v30  ;;  %4991 = vmatprep.mubr.msk.f32.mxu1 %vm225_vm0, %v6117_v15  ;;  %v4338_v30 = vld [vmem:[%s5703_s25 + $0x11c] sm:$0xff] }
  0x8f   : > { %5223 = vmatprep.mubr.msk.f32.mxu0 %vm225_vm0, %v5951_v34  ;;  %5384 = vmatprep.subr.bf16.mxu1 %v5711_v7  ;;  %v4375_v34 = vld [vmem:[%s5703_s25 + $0x2d] sm:$0xff] }
  0x91   : > { %4992 = vmatmul.mubr.msk.f32.gmra.mrb[2].mxu1 %vm225_vm0, %v6124_v16  ;;  %5224 = vmatmul.mubr.msk.f32.gmra.mrb[18].mxu0 %vm225_vm0, %v5962_v36  ;;  %v4376_v36 = vld [vmem:[%s5703_s25 + $0x35] sm:$0xff] }
  0x92   : > { %4994 = vmatprep.mubr.msk.f32.mxu1 %vm225_vm0, %v6131_v17  ;;  %5226 = vmatprep.mubr.msk.f32.mxu0 %vm225_vm0, %v5966_v38  ;;  %v4377_v38 = vld [vmem:[%s5703_s25 + $0x3d] sm:$0xff] }
  0x95   : > { %4995 = vmatmul.mubr.msk.f32.gmra.mrb[4].mxu1 %vm225_vm0, %v6141_v18  ;;  %5227 = vmatmul.mubr.msk.f32.gmra.mrb[20].mxu0 %vm225_vm0, %v5976_v40  ;;  %v4378_v40 = vld [vmem:[%s5703_s25 + $0x45] sm:$0xff] }
  0x96   : > { %4997 = vmatprep.mubr.msk.f32.mxu1 %vm225_vm0, %v6146_v19  ;;  %5229 = vmatprep.mubr.msk.f32.mxu0 %vm225_vm0, %v5980_v42  ;;  %v4379_v42 = vld [vmem:[%s5703_s25 + $0x4d] sm:$0xff] }
  0x99   : > { %4998 = vmatmul.mubr.msk.f32.gmra.mrb[6].mxu1 %vm225_vm0, %v6155_v20  ;;  %5230 = vmatmul.mubr.msk.f32.gmra.mrb[22].mxu0 %vm225_vm0, %v5990_v44  ;;  %v4380_v44 = vld [vmem:[%s5703_s25 + $0x55] sm:$0xff] }
  0x9a   : > { %5000 = vmatprep.mubr.msk.f32.mxu1 %vm225_vm0, %v6160_v21  ;;  %5232 = vmatprep.mubr.msk.f32.mxu0 %vm225_vm0, %v5994_v46  ;;  %v4381_v46 = vld [vmem:[%s5703_s25 + $0x5d] sm:$0xff] }
  0x9d   : > { %5001 = vmatmul.mubr.msk.f32.gmra.mrb[8].mxu1 %vm225_vm0, %v6169_v22  ;;  %5233 = vmatmul.mubr.msk.f32.gmra.mrb[24].mxu0 %vm225_vm0, %v6004_v48  ;;  %v4382_v48 = vld [vmem:[%s5703_s25 + $0x65] sm:$0xff] }
  0x9e   : > { %5003 = vmatprep.mubr.msk.f32.mxu1 %vm225_vm0, %v6174_v23  ;;  %5235 = vmatprep.mubr.msk.f32.mxu0 %vm225_vm0, %v6008_v50  ;;  %v4383_v50 = vld [vmem:[%s5703_s25 + $0x6d] sm:$0xff] }
  0xa1   : > { %5004 = vmatmul.mubr.msk.f32.gmra.mrb[10].mxu1 %vm225_vm0, %v6183_v24  ;;  %5236 = vmatmul.mubr.msk.f32.gmra.mrb[26].mxu0 %vm225_vm0, %v6018_v52  ;;  %v4384_v52 = vld [vmem:[%s5703_s25 + $0x75] sm:$0xff] }
  0xa2   : > { %5006 = vmatprep.mubr.msk.f32.mxu1 %vm225_vm0, %v6188_v25  ;;  %5238 = vmatprep.mubr.msk.f32.mxu0 %vm225_vm0, %v6022_v54  ;;  %v4385_v54 = vld [vmem:[%s5703_s25 + $0x7d] sm:$0xff] }
  0xa5   : > { %5007 = vmatmul.mubr.msk.f32.gmra.mrb[12].mxu1 %vm225_vm0, %v6197_v26  ;;  %5239 = vmatmul.mubr.msk.f32.gmra.mrb[28].mxu0 %vm225_vm0, %v6032_v56  ;;  %v4386_v56 = vld [vmem:[%s5703_s25 + $0x85] sm:$0xff] }
  0xa6   : > { %5009 = vmatprep.mubr.msk.f32.mxu1 %vm225_vm0, %v6202_v27  ;;  %5241 = vmatprep.mubr.msk.f32.mxu0 %vm225_vm0, %v4337_v28  ;;  %v4454_v28 = vld [vmem:[%s5703_s25 + $0x8e] sm:$0xff] }
  0xa9   : > { %5010 = vmatmul.mubr.msk.f32.gmra.mrb[14].mxu1 %vm225_vm0, %v6212_v29  ;;  %5242 = vmatmul.mubr.msk.f32.gmra.mrb[30].mxu0 %vm225_vm0, %v4338_v30  ;;  %v4455_v30 = vld [vmem:[%s5703_s25 + $0x96] sm:$0xff] }
  0xaa   : > { %5012 = vmatprep.mubr.msk.f32.mxu1 %vm225_vm0, %v6217_v31  ;;  %5248 = vmatprep.mubr.msk.f32.mxu0 %vm225_vm0, %v4374_v32  ;;  %v4456_v32 = vld [vmem:[%s5703_s25 + $0x9e] sm:$0xff] }
  0xad   : > { %5013 = vmatmul.mubr.msk.f32.gmra.mrb[16].mxu1 %vm225_vm0, %v6226_v33  ;;  %5249 = vmatmul.mubr.msk.f32.vlgmr.msra.gmra.mrb[0].mxu0 %vm225_vm0, %v4375_v34  ;;  %v4457_v34 = vld [vmem:[%s5703_s25 + $0xa6] sm:$0xff] }
  0xae   : > { %5015 = vmatprep.mubr.msk.f32.mxu1 %vm225_vm0, %v6231_v35  ;;  %5383 = vmatpush3.bf16.msra.mxu0 %v6049_v5  ;;  %v4389_v5 = vld [vmem:[%s5703_s25 + $0x9d] sm:$0xff] }
  0xaf   : > { %5251 = vmatprep.mubr.msk.f32.mxu0 %vm225_vm0, %v4376_v36  ;;  %v4458_v36 = vld [vmem:[%s5703_s25 + $0xae] sm:$0xff] }
  0xb1   : > { %5016 = vmatmul.mubr.msk.f32.gmra.mrb[18].mxu1 %vm225_vm0, %v6240_v37  ;;  %5252 = vmatmul.mubr.msk.f32.gmra.mrb[2].mxu0 %vm225_vm0, %v4377_v38  ;;  %v4459_v38 = vld [vmem:[%s5703_s25 + $0xb6] sm:$0xff] }
  0xb2   : > { %5018 = vmatprep.mubr.msk.f32.mxu1 %vm225_vm0, %v6246_v39  ;;  %5254 = vmatprep.mubr.msk.f32.mxu0 %vm225_vm0, %v4378_v40  ;;  %v4460_v40 = vld [vmem:[%s5703_s25 + $0xbe] sm:$0xff] }
  0xb5   : > { %5019 = vmatmul.mubr.msk.f32.gmra.mrb[20].mxu1 %vm225_vm0, %v6255_v41  ;;  %5255 = vmatmul.mubr.msk.f32.gmra.mrb[4].mxu0 %vm225_vm0, %v4379_v42  ;;  %v4461_v42 = vld [vmem:[%s5703_s25 + $0xc6] sm:$0xff] }
  0xb6   : > { %5021 = vmatprep.mubr.msk.f32.mxu1 %vm225_vm0, %v6260_v43  ;;  %5257 = vmatprep.mubr.msk.f32.mxu0 %vm225_vm0, %v4380_v44  ;;  %v4462_v44 = vld [vmem:[%s5703_s25 + $0xce] sm:$0xff] }
  0xb9   : > { %5022 = vmatmul.mubr.msk.f32.gmra.mrb[22].mxu1 %vm225_vm0, %v6269_v45  ;;  %5258 = vmatmul.mubr.msk.f32.gmra.mrb[6].mxu0 %vm225_vm0, %v4381_v46  ;;  %v4463_v46 = vld [vmem:[%s5703_s25 + $0xd6] sm:$0xff] }
  0xba   : > { %5024 = vmatprep.mubr.msk.f32.mxu1 %vm225_vm0, %v6274_v47  ;;  %5260 = vmatprep.mubr.msk.f32.mxu0 %vm225_vm0, %v4382_v48  ;;  %v4464_v48 = vld [vmem:[%s5703_s25 + $0xde] sm:$0xff] }
  0xbd   : > { %5025 = vmatmul.mubr.msk.f32.gmra.mrb[24].mxu1 %vm225_vm0, %v6283_v49  ;;  %5261 = vmatmul.mubr.msk.f32.gmra.mrb[8].mxu0 %vm225_vm0, %v4383_v50  ;;  %v4465_v50 = vld [vmem:[%s5703_s25 + $0xe6] sm:$0xff] }
  0xbe   : > { %5027 = vmatprep.mubr.msk.f32.mxu1 %vm225_vm0, %v6288_v51  ;;  %5263 = vmatprep.mubr.msk.f32.mxu0 %vm225_vm0, %v4384_v52  ;;  %v4466_v52 = vld [vmem:[%s5703_s25 + $0xee] sm:$0xff] }
  0xc1   : > { %5028 = vmatmul.mubr.msk.f32.gmra.mrb[26].mxu1 %vm225_vm0, %v6297_v53  ;;  %5264 = vmatmul.mubr.msk.f32.gmra.mrb[10].mxu0 %vm225_vm0, %v4385_v54  ;;  %v4467_v54 = vld [vmem:[%s5703_s25 + $0xf6] sm:$0xff] }
  0xc2   : > { %5030 = vmatprep.mubr.msk.f32.mxu1 %vm225_vm0, %v6302_v55  ;;  %5266 = vmatprep.mubr.msk.f32.mxu0 %vm225_vm0, %v4386_v56  ;;  %v4468_v56 = vld [vmem:[%s5703_s25 + $0xfe] sm:$0xff] }
  0xc5   : > { %5031 = vmatmul.mubr.msk.f32.gmra.mrb[28].mxu1 %vm225_vm0, %v6311_v59  ;;  %5267 = vmatmul.mubr.msk.f32.gmra.mrb[12].mxu0 %vm225_vm0, %v4387_v61  ;;  %v4469_v61 = vld [vmem:[%s5703_s25 + $0x106] sm:$0xff] }
  0xc6   : > { %5033 = vmatprep.mubr.msk.f32.mxu1 %vm225_vm0, %v6316_v63  ;;  %5269 = vmatprep.mubr.msk.f32.mxu0 %vm225_vm0, %v4388_v1  ;;  %v4470_v1 = vld [vmem:[%s5703_s25 + $0x10e] sm:$0xff] }
  0xc9   : > { %5034 = vmatmul.mubr.msk.f32.gmra.mrb[30].mxu1 %vm225_vm0, %v6325_v3  ;;  %5270 = vmatmul.mubr.msk.f32.gmra.mrb[14].mxu0 %vm225_vm0, %v4389_v5  ;;  %v4471_v5 = vld [vmem:[%s5703_s25 + $0x116] sm:$0xff] }
  0xca   : > { %5040 = vmatprep.mubr.msk.f32.mxu1 %vm225_vm0, %v6117_v15  ;;  %5272 = vmatprep.mubr.msk.f32.mxu0 %vm225_vm0, %v4390_v8  ;;  %v4441_v15 = vld [vmem:[%s5703_s25 + $0x26] sm:$0xff] }
  0xcb   : > { %v4204_v8 = vld [vmem:[%s5703_s25 + $0x10b] sm:$0xff] }
  0xcd   : > { %5041 = vmatmul.mubr.msk.f32.vlgmr.msra.gmra.mrb[0].mxu1 %vm225_vm0, %v6124_v16  ;;  %5273 = vmatmul.mubr.msk.f32.gmra.mrb[16].mxu0 %vm225_vm0, %v4391_v57  ;;  %v4442_v16 = vld [vmem:[%s5703_s25 + $0x2e] sm:$0xff]  ;;  %v4472_v57 = vld [vmem:[%s5703_s25 + $0x11e] sm:$0xff] }
  0xce   : > { %5385 = vmatpush3.bf16.msra.mxu1 %v5711_v7  ;;  %5043 = vmatprep.mubr.msk.f32.mxu1 %vm225_vm0, %v6131_v17  ;;  %v4395_v7 = vld [vmem:[%s5703_s25 + $0xcd] sm:$0xff]  ;;  %v4443_v17 = vld [vmem:[%s5703_s25 + $0x36] sm:$0xff] }
  0xcf   : > { %5275 = vmatprep.mubr.msk.f32.mxu0 %vm225_vm0, %v4392_v60 }
  0xd1   : > { %5044 = vmatmul.mubr.msk.f32.gmra.mrb[2].mxu1 %vm225_vm0, %v6141_v18  ;;  %5276 = vmatmul.mubr.msk.f32.gmra.mrb[18].mxu0 %vm225_vm0, %v4393_v58  ;;  %v4444_v18 = vld [vmem:[%s5703_s25 + $0x3e] sm:$0xff] }
  0xd2   : > { %5046 = vmatprep.mubr.msk.f32.mxu1 %vm225_vm0, %v6146_v19  ;;  %5278 = vmatprep.mubr.msk.f32.mxu0 %vm225_vm0, %v4394_v62  ;;  %v4445_v19 = vld [vmem:[%s5703_s25 + $0x46] sm:$0xff] }
  0xd5   : > { %5047 = vmatmul.mubr.msk.f32.gmra.mrb[4].mxu1 %vm225_vm0, %v6155_v20  ;;  %5279 = vmatmul.mubr.msk.f32.gmra.mrb[20].mxu0 %vm225_vm0, %v4395_v7  ;;  %v4446_v20 = vld [vmem:[%s5703_s25 + $0x4e] sm:$0xff] }
  0xd6   : > { %5049 = vmatprep.mubr.msk.f32.mxu1 %vm225_vm0, %v6160_v21  ;;  %5281 = vmatprep.mubr.msk.f32.mxu0 %vm225_vm0, %v4396_v0  ;;  %v4447_v21 = vld [vmem:[%s5703_s25 + $0x56] sm:$0xff] }
  0xd9   : > { %5050 = vmatmul.mubr.msk.f32.gmra.mrb[6].mxu1 %vm225_vm0, %v6169_v22  ;;  %5282 = vmatmul.mubr.msk.f32.gmra.mrb[22].mxu0 %vm225_vm0, %v4397_v2  ;;  %v4448_v22 = vld [vmem:[%s5703_s25 + $0x5e] sm:$0xff] }
  0xda   : > { %5052 = vmatprep.mubr.msk.f32.mxu1 %vm225_vm0, %v6174_v23  ;;  %5284 = vmatprep.mubr.msk.f32.mxu0 %vm225_vm0, %v4398_v4  ;;  %v4449_v23 = vld [vmem:[%s5703_s25 + $0x66] sm:$0xff] }
  0xdd   : > { %5053 = vmatmul.mubr.msk.f32.gmra.mrb[8].mxu1 %vm225_vm0, %v6183_v24  ;;  %5285 = vmatmul.mubr.msk.f32.gmra.mrb[24].mxu0 %vm225_vm0, %v4399_v6  ;;  %v4450_v24 = vld [vmem:[%s5703_s25 + $0x6e] sm:$0xff] }
  0xde   : > { %5055 = vmatprep.mubr.msk.f32.mxu1 %vm225_vm0, %v6188_v25  ;;  %5287 = vmatprep.mubr.msk.f32.mxu0 %vm225_vm0, %v4400_v9  ;;  %v4451_v25 = vld [vmem:[%s5703_s25 + $0x76] sm:$0xff] }
  0xe1   : > { %5056 = vmatmul.mubr.msk.f32.gmra.mrb[10].mxu1 %vm225_vm0, %v6197_v26  ;;  %5288 = vmatmul.mubr.msk.f32.gmra.mrb[26].mxu0 %vm225_vm0, %v4401_v10  ;;  %v4452_v26 = vld [vmem:[%s5703_s25 + $0x7e] sm:$0xff] }
  0xe2   : > { %5058 = vmatprep.mubr.msk.f32.mxu1 %vm225_vm0, %v6202_v27  ;;  %5290 = vmatprep.mubr.msk.f32.mxu0 %vm225_vm0, %v4402_v11  ;;  %v4453_v27 = vld [vmem:[%s5703_s25 + $0x86] sm:$0xff] }
  0xe5   : > { %5059 = vmatmul.mubr.msk.f32.gmra.mrb[12].mxu1 %vm225_vm0, %v6212_v29  ;;  %5291 = vmatmul.mubr.msk.f32.gmra.mrb[28].mxu0 %vm225_vm0, %v4403_v12  ;;  %v4136_v29 = vld [vmem:[%s5703_s25 + $0x102] sm:$0xff] }
  0xe6   : > { %5061 = vmatprep.mubr.msk.f32.mxu1 %vm225_vm0, %v6217_v31  ;;  %5293 = vmatprep.mubr.msk.f32.mxu0 %vm225_vm0, %v4404_v13  ;;  %v4137_v31 = vld [vmem:[%s5703_s25 + $0x10a] sm:$0xff] }
  0xe9   : > { %5062 = vmatmul.mubr.msk.f32.gmra.mrb[14].mxu1 %vm225_vm0, %v6226_v33  ;;  %5294 = vmatmul.mubr.msk.f32.gmra.mrb[30].mxu0 %vm225_vm0, %v4405_v14  ;;  %v4189_v33 = vld [vmem:[%s5703_s25 + $0x93] sm:$0xff] }
  0xea   : > { %5064 = vmatprep.mubr.msk.f32.mxu1 %vm225_vm0, %v6231_v35  ;;  %5300 = vmatprep.mubr.msk.f32.mxu0 %vm225_vm0, %v4441_v15  ;;  %v4190_v35 = vld [vmem:[%s5703_s25 + $0x9b] sm:$0xff] }
  0xed   : > { %5065 = vmatmul.mubr.msk.f32.gmra.mrb[16].mxu1 %vm225_vm0, %v6240_v37  ;;  %5301 = vmatmul.mubr.msk.f32.vlgmr.msra.gmra.mrb[0].mxu0 %vm225_vm0, %v4442_v16  ;;  %v4191_v37 = vld [vmem:[%s5703_s25 + $0xa3] sm:$0xff] }
  0xee   : > { %5067 = vmatprep.mubr.msk.f32.mxu1 %vm225_vm0, %v6246_v39  ;;  %5303 = vmatprep.mubr.msk.f32.mxu0 %vm225_vm0, %v4443_v17  ;;  %v4192_v39 = vld [vmem:[%s5703_s25 + $0xab] sm:$0xff] }
  0xf1   : > { %5068 = vmatmul.mubr.msk.f32.gmra.mrb[18].mxu1 %vm225_vm0, %v6255_v41  ;;  %5304 = vmatmul.mubr.msk.f32.gmra.mrb[2].mxu0 %vm225_vm0, %v4444_v18  ;;  %v4193_v41 = vld [vmem:[%s5703_s25 + $0xb3] sm:$0xff]  ;;  %v6544_v18 = vld [vmem:[%s6659_s2] ss:$0 sm:$0xff] }
  0xf2   : > { %5070 = vmatprep.mubr.msk.f32.mxu1 %vm225_vm0, %v6260_v43  ;;  %5306 = vmatprep.mubr.msk.f32.mxu0 %vm225_vm0, %v4445_v19  ;;  %v4194_v43 = vld [vmem:[%s5703_s25 + $0xbb] sm:$0xff] }
  0xf5   : > { %5071 = vmatmul.mubr.msk.f32.gmra.mrb[20].mxu1 %vm225_vm0, %v6269_v45  ;;  %5307 = vmatmul.mubr.msk.f32.gmra.mrb[4].mxu0 %vm225_vm0, %v4446_v20  ;;  %v4195_v45 = vld [vmem:[%s5703_s25 + $0xc3] sm:$0xff] }
  0xf6   : > { %5073 = vmatprep.mubr.msk.f32.mxu1 %vm225_vm0, %v6274_v47  ;;  %5309 = vmatprep.mubr.msk.f32.mxu0 %vm225_vm0, %v4447_v21  ;;  %v4196_v47 = vld [vmem:[%s5703_s25 + $0xcb] sm:$0xff] }
  0xf9   : > { %5074 = vmatmul.mubr.msk.f32.gmra.mrb[22].mxu1 %vm225_vm0, %v6283_v49  ;;  %5310 = vmatmul.mubr.msk.f32.gmra.mrb[6].mxu0 %vm225_vm0, %v4448_v22  ;;  %v4197_v49 = vld [vmem:[%s5703_s25 + $0xd3] sm:$0xff] }
  0xfa   : > { %5076 = vmatprep.mubr.msk.f32.mxu1 %vm225_vm0, %v6288_v51  ;;  %5312 = vmatprep.mubr.msk.f32.mxu0 %vm225_vm0, %v4449_v23  ;;  %v4198_v51 = vld [vmem:[%s5703_s25 + $0xdb] sm:$0xff] }
  0xfd   : > { %5077 = vmatmul.mubr.msk.f32.gmra.mrb[24].mxu1 %vm225_vm0, %v6297_v53  ;;  %5313 = vmatmul.mubr.msk.f32.gmra.mrb[8].mxu0 %vm225_vm0, %v4450_v24  ;;  %v4199_v53 = vld [vmem:[%s5703_s25 + $0xe3] sm:$0xff] }
  0xfe   : > { %5079 = vmatprep.mubr.msk.f32.mxu1 %vm225_vm0, %v6302_v55  ;;  %5315 = vmatprep.mubr.msk.f32.mxu0 %vm225_vm0, %v4451_v25  ;;  %v4200_v55 = vld [vmem:[%s5703_s25 + $0xeb] sm:$0xff] }
 0x101   : > { %5080 = vmatmul.mubr.msk.f32.gmra.mrb[26].mxu1 %vm225_vm0, %v6311_v59  ;;  %5316 = vmatmul.mubr.msk.f32.gmra.mrb[10].mxu0 %vm225_vm0, %v4452_v26  ;;  %v4201_v59 = vld [vmem:[%s5703_s25 + $0xf3] sm:$0xff] }
 0x102   : > { %5082 = vmatprep.mubr.msk.f32.mxu1 %vm225_vm0, %v6316_v63  ;;  %5318 = vmatprep.mubr.msk.f32.mxu0 %vm225_vm0, %v4453_v27  ;;  %v4202_v63 = vld [vmem:[%s5703_s25 + $0xfb] sm:$0xff] }
 0x105   : > { %5083 = vmatmul.mubr.msk.f32.gmra.mrb[28].mxu1 %vm225_vm0, %v6325_v3  ;;  %5319 = vmatmul.mubr.msk.f32.gmra.mrb[12].mxu0 %vm225_vm0, %v4454_v28  ;;  %v4203_v3 = vld [vmem:[%s5703_s25 + $0x103] sm:$0xff]  ;;  %s3936_s25 = sshll.u32 %s3932_s13, 5 }
 0x106   : > { %5085 = vmatprep.mubr.msk.f32.mxu1 %vm225_vm0, %v4136_v29  ;;  %5321 = vmatprep.mubr.msk.f32.mxu0 %vm225_vm0, %v4455_v30  ;;  %p147_p3 = scmp.lt.s32.totalorder %s3936_s25, 95 }
 0x108   : > { %s6662_s25 = smov (!%p147_p3, %s3936_s25), 95 }
 0x109   : > { %5086 = vmatmul.mubr.msk.f32.gmra.mrb[30].mxu1 %vm225_vm0, %v4137_v31  ;;  %5322 = vmatmul.mubr.msk.f32.gmra.mrb[14].mxu0 %vm225_vm0, %v4456_v32  ;;  %s3937_s13 = sshll.u32 %s6662_s25, 2 }
 0x10a   : > { %5116 = vmatprep.mubr.msk.f32.mxu1 %vm225_vm0, %v4189_v33  ;;  %5324 = vmatprep.mubr.msk.f32.mxu0 %vm225_vm0, %v4457_v34  ;;  %s6552_s7 = scalar_lea.vmem %s6660_s3, %s3937_s13 }
 0x10d   : > { %5117 = vmatmul.mubr.msk.f32.vlgmr.msra.gmra.mrb[16].mxu1 %vm225_vm0, %v4190_v35  ;;  %5325 = vmatmul.mubr.msk.f32.gmra.mrb[16].mxu0 %vm225_vm0, %v4458_v36 }
 0x10e   : > { %5119 = vmatprep.mubr.msk.f32.mxu1 %vm225_vm0, %v4191_v37  ;;  %5327 = vmatprep.mubr.msk.f32.mxu0 %vm225_vm0, %v4459_v38 }
 0x111   : > { %5120 = vmatmul.mubr.msk.f32.gmra.mrb[18].mxu1 %vm225_vm0, %v4192_v39  ;;  %5328 = vmatmul.mubr.msk.f32.gmra.mrb[18].mxu0 %vm225_vm0, %v4460_v40 }
 0x112   : > { %5122 = vmatprep.mubr.msk.f32.mxu1 %vm225_vm0, %v4193_v41  ;;  %5330 = vmatprep.mubr.msk.f32.mxu0 %vm225_vm0, %v4461_v42 }
 0x115   : > { %5123 = vmatmul.mubr.msk.f32.gmra.mrb[20].mxu1 %vm225_vm0, %v4194_v43  ;;  %5331 = vmatmul.mubr.msk.f32.gmra.mrb[20].mxu0 %vm225_vm0, %v4462_v44 }
 0x116   : > { %5125 = vmatprep.mubr.msk.f32.mxu1 %vm225_vm0, %v4195_v45  ;;  %5333 = vmatprep.mubr.msk.f32.mxu0 %vm225_vm0, %v4463_v46 }
 0x119   : > { %5126 = vmatmul.mubr.msk.f32.gmra.mrb[22].mxu1 %vm225_vm0, %v4196_v47  ;;  %5334 = vmatmul.mubr.msk.f32.gmra.mrb[22].mxu0 %vm225_vm0, %v4464_v48 }
 0x11a   : > { %5128 = vmatprep.mubr.msk.f32.mxu1 %vm225_vm0, %v4197_v49  ;;  %5336 = vmatprep.mubr.msk.f32.mxu0 %vm225_vm0, %v4465_v50 }
 0x11d   : > { %5129 = vmatmul.mubr.msk.f32.gmra.mrb[24].mxu1 %vm225_vm0, %v4198_v51  ;;  %5337 = vmatmul.mubr.msk.f32.gmra.mrb[24].mxu0 %vm225_vm0, %v4466_v52 }
 0x11e   : > { %5131 = vmatprep.mubr.msk.f32.mxu1 %vm225_vm0, %v4199_v53  ;;  %5339 = vmatprep.mubr.msk.f32.mxu0 %vm225_vm0, %v4467_v54 }
 0x121   : > { %5132 = vmatmul.mubr.msk.f32.gmra.mrb[26].mxu1 %vm225_vm0, %v4200_v55  ;;  %5340 = vmatmul.mubr.msk.f32.gmra.mrb[26].mxu0 %vm225_vm0, %v4468_v56 }
 0x122   : > { %5134 = vmatprep.mubr.msk.f32.mxu1 %vm225_vm0, %v4201_v59  ;;  %5342 = vmatprep.mubr.msk.f32.mxu0 %vm225_vm0, %v4469_v61 }
 0x125   : > { %5135 = vmatmul.mubr.msk.f32.gmra.mrb[28].mxu1 %vm225_vm0, %v4202_v63  ;;  %5343 = vmatmul.mubr.msk.f32.gmra.mrb[28].mxu0 %vm225_vm0, %v4470_v1 }
 0x126   : > { %5137 = vmatprep.mubr.msk.f32.mxu1 %vm225_vm0, %v4203_v3  ;;  %5345 = vmatprep.mubr.msk.f32.mxu0 %vm225_vm0, %v4471_v5 }
 0x129   : > { %5138 = vmatmul.mubr.msk.f32.gmra.mrb[30].mxu1 %vm225_vm0, %v4204_v8  ;;  %5346 = vmatmul.mubr.msk.f32.gmra.mrb[30].mxu0 %vm225_vm0, %v4472_v57 }
 0x1a0   : > { %v5042_v60 = vpop.f32.mrb[0].mxu1 }
 0x1a1   : > { %v1457_v58 = vpop.f32.mrb[1].mxu1 }
 0x1a4   : > { %v5045_v62 = vpop.f32.mrb[2].mxu1 }
 0x1a5   : > { %v1467_v7 = vpop.f32.mrb[3].mxu1 }
 0x1a8   : > { %v5048_v0 = vpop.f32.mrb[4].mxu1 }
 0x1a9   : > { %v1477_v2 = vpop.f32.mrb[5].mxu1 }
 0x1ac   : > { %v5051_v4 = vpop.f32.mrb[6].mxu1 }
 0x1ad   : > { %v1487_v6 = vpop.f32.mrb[7].mxu1 }
 0x1b0   : > { %v5054_v9 = vpop.f32.mrb[8].mxu1 }
 0x1b1   : > { %v6525_v10 = vpop.f32.mrb[9].mxu1 }
 0x1b4   : > { %v6527_v11 = vpop.f32.mrb[10].mxu1 }
 0x1b5   : > { %v6529_v12 = vpop.f32.mrb[11].mxu1 }
 0x1b8   : > { %v6531_v13 = vpop.f32.mrb[12].mxu1 }
 0x1b9   : > { %v6533_v14 = vpop.f32.mrb[13].mxu1 }
 0x1bc   : > { %v6537_v15 = vpop.f32.mrb[14].mxu1 }
 0x1bd   : > { %v6539_v16 = vpop.f32.mrb[15].mxu1 }
 0x1c0   : > { %v5302_v17 = vpop.f32.mrb[0].mxu0 }
 0x1c1   : > { %v5386_v19 = vadd.f32 %v5302_v17, %v5042_v60  ;;  %v3407_v20 = vpop.f32.mrb[1].mxu0 }
 0x1c2   : > { %v5387_v21 = vadd.f32 %v3407_v20, %v1457_v58 }
 0x1c3   : > { %v3606_v22 = vadd.f32 %v5386_v19, %v6544_v18 }
 0x1c4   : > { %v3605_v23 = vadd.f32 %v5387_v21, %v6544_v18  ;;  %v5305_v24 = vpop.f32.mrb[2].mxu0 }
 0x1c5   : > { %v3638_v25 = vmul.f32 0.2, %v3606_v22  ;;  %v5388_v26 = vadd.f32 %v5305_v24, %v5045_v62  ;;  %v3417_v27 = vpop.f32.mrb[3].mxu0 }
 0x1c6   : > { %v3637_v28 = vmul.f32 0.2, %v3605_v23  ;;  %v5389_v29 = vadd.f32 %v3417_v27, %v1467_v7 }
 0x1c7   : > { %v3670_v30 = vmax.f32 %v3606_v22, %v3638_v25  ;;  %v3608_v31 = vadd.f32 %v5388_v26, %v6544_v18 }
 0x1c8   : > { %v3669_v32 = vmax.f32 %v3605_v23, %v3637_v28  ;;  %v3607_v33 = vadd.f32 %v5389_v29, %v6544_v18  ;;  %v5308_v34 = vpop.f32.mrb[4].mxu0 }
 0x1c9   : > { %v4543_v35 = vpack.c.bf16 %v3670_v30, %v3670_v30  ;;  %v3640_v36 = vmul.f32 0.2, %v3608_v31  ;;  %v5390_v37 = vadd.f32 %v5308_v34, %v5048_v0  ;;  %v3427_v38 = vpop.f32.mrb[5].mxu0 }
 0x1ca   : > { %v4542_v39 = vpack.c.bf16 %v3669_v32, %v3669_v32  ;;  %v3639_v40 = vmul.f32 0.2, %v3607_v33  ;;  %v5391_v41 = vadd.f32 %v3427_v38, %v1477_v2 }
 0x1cb   : > { %3831 = vst.msk [vmem:[%s6552_s7 + $0x4] sm:$0xf] %vm3829_vm1, %v4543_v35  ;;  %v3672_v42 = vmax.f32 %v3608_v31, %v3640_v36  ;;  %v3610_v43 = vadd.f32 %v5390_v37, %v6544_v18 }
 0x1cc   : > { %3830 = vst.msk [vmem:[%s6552_s7] sm:$0xf] %vm3829_vm1, %v4542_v39  ;;  %v3671_v44 = vmax.f32 %v3607_v33, %v3639_v40  ;;  %v3609_v45 = vadd.f32 %v5391_v41, %v6544_v18  ;;  %v5311_v46 = vpop.f32.mrb[6].mxu0 }
 0x1cd   : > { %v4545_v47 = vpack.c.bf16 %v3672_v42, %v3672_v42  ;;  %v3642_v48 = vmul.f32 0.2, %v3610_v43  ;;  %v5392_v49 = vadd.f32 %v5311_v46, %v5051_v4  ;;  %v3437_v50 = vpop.f32.mrb[7].mxu0 }
 0x1ce   : > { %v4544_v51 = vpack.c.bf16 %v3671_v44, %v3671_v44  ;;  %v3641_v52 = vmul.f32 0.2, %v3609_v45  ;;  %v5393_v53 = vadd.f32 %v3437_v50, %v1487_v6 }
 0x1cf   : > { %3833 = vst.msk [vmem:[%s6552_s7 + $0xc] sm:$0xf] %vm3829_vm1, %v4545_v47  ;;  %v3674_v54 = vmax.f32 %v3610_v43, %v3642_v48  ;;  %v3612_v55 = vadd.f32 %v5392_v49, %v6544_v18 }
 0x1d0   : > { %3832 = vst.msk [vmem:[%s6552_s7 + $0x8] sm:$0xf] %vm3829_vm1, %v4544_v51  ;;  %v3673_v56 = vmax.f32 %v3609_v45, %v3641_v52  ;;  %v3611_v59 = vadd.f32 %v5393_v53, %v6544_v18  ;;  %v5314_v61 = vpop.f32.mrb[8].mxu0 }
 0x1d1   : > { %v4547_v63 = vpack.c.bf16 %v3674_v54, %v3674_v54  ;;  %v3644_v1 = vmul.f32 0.2, %v3612_v55  ;;  %v5394_v3 = vadd.f32 %v5314_v61, %v5054_v9  ;;  %v3447_v5 = vpop.f32.mrb[9].mxu0 }
 0x1d2   : > { %v4546_v8 = vpack.c.bf16 %v3673_v56, %v3673_v56  ;;  %v3643_v57 = vmul.f32 0.2, %v3611_v59  ;;  %v5395_v60 = vadd.f32 %v3447_v5, %v6525_v10 }
 0x1d3   : > { %3835 = vst.msk [vmem:[%s6552_s7 + $0x14] sm:$0xf] %vm3829_vm1, %v4547_v63  ;;  %v3676_v58 = vmax.f32 %v3612_v55, %v3644_v1  ;;  %v3614_v62 = vadd.f32 %v5394_v3, %v6544_v18 }
 0x1d4   : > { %3834 = vst.msk [vmem:[%s6552_s7 + $0x10] sm:$0xf] %vm3829_vm1, %v4546_v8  ;;  %v3675_v7 = vmax.f32 %v3611_v59, %v3643_v57  ;;  %v3613_v0 = vadd.f32 %v5395_v60, %v6544_v18  ;;  %v5317_v2 = vpop.f32.mrb[10].mxu0 }
 0x1d5   : > { %v4549_v4 = vpack.c.bf16 %v3676_v58, %v3676_v58  ;;  %v3646_v6 = vmul.f32 0.2, %v3614_v62  ;;  %v5396_v9 = vadd.f32 %v5317_v2, %v6527_v11  ;;  %v3457_v17 = vpop.f32.mrb[11].mxu0 }
 0x1d6   : > { %v4548_v19 = vpack.c.bf16 %v3675_v7, %v3675_v7  ;;  %v3645_v20 = vmul.f32 0.2, %v3613_v0  ;;  %v5397_v10 = vadd.f32 %v3457_v17, %v6529_v12 }
 0x1d7   : > { %3837 = vst.msk [vmem:[%s6552_s7 + $0x1c] sm:$0xf] %vm3829_vm1, %v4549_v4  ;;  %v3678_v21 = vmax.f32 %v3614_v62, %v3646_v6  ;;  %v3616_v22 = vadd.f32 %v5396_v9, %v6544_v18 }
 0x1d8   : > { %3836 = vst.msk [vmem:[%s6552_s7 + $0x18] sm:$0xf] %vm3829_vm1, %v4548_v19  ;;  %v3677_v23 = vmax.f32 %v3613_v0, %v3645_v20  ;;  %v3615_v24 = vadd.f32 %v5397_v10, %v6544_v18  ;;  %v5320_v25 = vpop.f32.mrb[12].mxu0 }
 0x1d9   : > { %v4551_v26 = vpack.c.bf16 %v3678_v21, %v3678_v21  ;;  %v3648_v11 = vmul.f32 0.2, %v3616_v22  ;;  %v5398_v27 = vadd.f32 %v5320_v25, %v6531_v13  ;;  %v3467_v28 = vpop.f32.mrb[13].mxu0 }
 0x1da   : > { %v4550_v29 = vpack.c.bf16 %v3677_v23, %v3677_v23  ;;  %v3647_v30 = vmul.f32 0.2, %v3615_v24  ;;  %v5399_v12 = vadd.f32 %v3467_v28, %v6533_v14 }
 0x1db   : > { %3839 = vst.msk [vmem:[%s6552_s7 + $0x24] sm:$0xf] %vm3829_vm1, %v4551_v26  ;;  %v3680_v31 = vmax.f32 %v3616_v22, %v3648_v11  ;;  %v3618_v32 = vadd.f32 %v5398_v27, %v6544_v18 }
 0x1dc   : > { %3838 = vst.msk [vmem:[%s6552_s7 + $0x20] sm:$0xf] %vm3829_vm1, %v4550_v29  ;;  %v3679_v33 = vmax.f32 %v3615_v24, %v3647_v30  ;;  %v3617_v34 = vadd.f32 %v5399_v12, %v6544_v18  ;;  %v5323_v35 = vpop.f32.mrb[14].mxu0 }
 0x1dd   : > { %v4553_v36 = vpack.c.bf16 %v3680_v31, %v3680_v31  ;;  %v3650_v13 = vmul.f32 0.2, %v3618_v32  ;;  %v5400_v37 = vadd.f32 %v5323_v35, %v6537_v15  ;;  %v3477_v38 = vpop.f32.mrb[15].mxu0 }
 0x1de   : > { %v4552_v39 = vpack.c.bf16 %v3679_v33, %v3679_v33  ;;  %v3649_v40 = vmul.f32 0.2, %v3617_v34  ;;  %v5401_v14 = vadd.f32 %v3477_v38, %v6539_v16 }
 0x1df   : > { %3841 = vst.msk [vmem:[%s6552_s7 + $0x2c] sm:$0xf] %vm3829_vm1, %v4553_v36  ;;  %v3682_v41 = vmax.f32 %v3618_v32, %v3650_v13  ;;  %v3620_v42 = vadd.f32 %v5400_v37, %v6544_v18 }
 0x1e0   : > { %v5118_v43 = vpop.f32.mrb[16].mxu1  ;;  %3840 = vst.msk [vmem:[%s6552_s7 + $0x28] sm:$0xf] %vm3829_vm1, %v4552_v39  ;;  %v3681_v44 = vmax.f32 %v3617_v34, %v3649_v40  ;;  %v3619_v45 = vadd.f32 %v5401_v14, %v6544_v18  ;;  %v5326_v46 = vpop.f32.mrb[16].mxu0 }
 0x1e1   : > { %v1927_v15 = vpop.f32.mrb[17].mxu1  ;;  %v4555_v47 = vpack.c.bf16 %v3682_v41, %v3682_v41  ;;  %v3652_v48 = vmul.f32 0.2, %v3620_v42  ;;  %v5402_v49 = vadd.f32 %v5326_v46, %v5118_v43  ;;  %v3487_v50 = vpop.f32.mrb[17].mxu0 }
 0x1e2   : > { %v4554_v16 = vpack.c.bf16 %v3681_v44, %v3681_v44  ;;  %v3651_v51 = vmul.f32 0.2, %v3619_v45  ;;  %v5403_v52 = vadd.f32 %v3487_v50, %v1927_v15 }
 0x1e3   : > { %3843 = vst.msk [vmem:[%s6552_s7 + $0x34] sm:$0xf] %vm3829_vm1, %v4555_v47  ;;  %v3684_v53 = vmax.f32 %v3620_v42, %v3652_v48  ;;  %v3622_v54 = vadd.f32 %v5402_v49, %v6544_v18 }
 0x1e4   : > { %v5121_v55 = vpop.f32.mrb[18].mxu1  ;;  %3842 = vst.msk [vmem:[%s6552_s7 + $0x30] sm:$0xf] %vm3829_vm1, %v4554_v16  ;;  %v3683_v56 = vmax.f32 %v3619_v45, %v3651_v51  ;;  %v3621_v59 = vadd.f32 %v5403_v52, %v6544_v18  ;;  %v5329_v61 = vpop.f32.mrb[18].mxu0 }
 0x1e5   : > { %v1937_v63 = vpop.f32.mrb[19].mxu1  ;;  %v4557_v1 = vpack.c.bf16 %v3684_v53, %v3684_v53  ;;  %v3654_v3 = vmul.f32 0.2, %v3622_v54  ;;  %v5404_v5 = vadd.f32 %v5329_v61, %v5121_v55  ;;  %v3497_v8 = vpop.f32.mrb[19].mxu0 }
 0x1e6   : > { %v4556_v57 = vpack.c.bf16 %v3683_v56, %v3683_v56  ;;  %v3653_v60 = vmul.f32 0.2, %v3621_v59  ;;  %v5405_v58 = vadd.f32 %v3497_v8, %v1937_v63 }
 0x1e7   : > { %3845 = vst.msk [vmem:[%s6552_s7 + $0x3c] sm:$0xf] %vm3829_vm1, %v4557_v1  ;;  %v3686_v62 = vmax.f32 %v3622_v54, %v3654_v3  ;;  %v3624_v7 = vadd.f32 %v5404_v5, %v6544_v18 }
 0x1e8   : > { %v5124_v0 = vpop.f32.mrb[20].mxu1  ;;  %3844 = vst.msk [vmem:[%s6552_s7 + $0x38] sm:$0xf] %vm3829_vm1, %v4556_v57  ;;  %v3685_v2 = vmax.f32 %v3621_v59, %v3653_v60  ;;  %v3623_v4 = vadd.f32 %v5405_v58, %v6544_v18  ;;  %v5332_v6 = vpop.f32.mrb[20].mxu0 }
 0x1e9   : > { %v1947_v9 = vpop.f32.mrb[21].mxu1  ;;  %v4559_v17 = vpack.c.bf16 %v3686_v62, %v3686_v62  ;;  %v3656_v19 = vmul.f32 0.2, %v3624_v7  ;;  %v5406_v20 = vadd.f32 %v5332_v6, %v5124_v0  ;;  %v3507_v10 = vpop.f32.mrb[21].mxu0 }
 0x1ea   : > { %v4558_v21 = vpack.c.bf16 %v3685_v2, %v3685_v2  ;;  %v3655_v22 = vmul.f32 0.2, %v3623_v4  ;;  %v5407_v23 = vadd.f32 %v3507_v10, %v1947_v9 }
 0x1eb   : > { %3847 = vst.msk [vmem:[%s6552_s7 + $0x44] sm:$0xf] %vm3829_vm1, %v4559_v17  ;;  %v3688_v24 = vmax.f32 %v3624_v7, %v3656_v19  ;;  %v3626_v25 = vadd.f32 %v5406_v20, %v6544_v18 }
 0x1ec   : > { %v5127_v26 = vpop.f32.mrb[22].mxu1  ;;  %3846 = vst.msk [vmem:[%s6552_s7 + $0x40] sm:$0xf] %vm3829_vm1, %v4558_v21  ;;  %v3687_v11 = vmax.f32 %v3623_v4, %v3655_v22  ;;  %v3625_v27 = vadd.f32 %v5407_v23, %v6544_v18  ;;  %v5335_v28 = vpop.f32.mrb[22].mxu0 }
 0x1ed   : > { %v1957_v29 = vpop.f32.mrb[23].mxu1  ;;  %v4561_v30 = vpack.c.bf16 %v3688_v24, %v3688_v24  ;;  %v3658_v12 = vmul.f32 0.2, %v3626_v25  ;;  %v5408_v31 = vadd.f32 %v5335_v28, %v5127_v26  ;;  %v3517_v32 = vpop.f32.mrb[23].mxu0 }
 0x1ee   : > { %v4560_v33 = vpack.c.bf16 %v3687_v11, %v3687_v11  ;;  %v3657_v34 = vmul.f32 0.2, %v3625_v27  ;;  %v5409_v35 = vadd.f32 %v3517_v32, %v1957_v29 }
 0x1ef   : > { %3849 = vst.msk [vmem:[%s6552_s7 + $0x4c] sm:$0xf] %vm3829_vm1, %v4561_v30  ;;  %v3690_v36 = vmax.f32 %v3626_v25, %v3658_v12  ;;  %v3628_v13 = vadd.f32 %v5408_v31, %v6544_v18 }
 0x1f0   : > { %v5130_v37 = vpop.f32.mrb[24].mxu1  ;;  %3848 = vst.msk [vmem:[%s6552_s7 + $0x48] sm:$0xf] %vm3829_vm1, %v4560_v33  ;;  %v3689_v38 = vmax.f32 %v3625_v27, %v3657_v34  ;;  %v3627_v39 = vadd.f32 %v5409_v35, %v6544_v18  ;;  %v5338_v40 = vpop.f32.mrb[24].mxu0 }
 0x1f1   : > { %v1967_v14 = vpop.f32.mrb[25].mxu1  ;;  %v4563_v41 = vpack.c.bf16 %v3690_v36, %v3690_v36  ;;  %v3660_v42 = vmul.f32 0.2, %v3628_v13  ;;  %v5410_v43 = vadd.f32 %v5338_v40, %v5130_v37  ;;  %v3527_v44 = vpop.f32.mrb[25].mxu0 }
 0x1f2   : > { %v4562_v45 = vpack.c.bf16 %v3689_v38, %v3689_v38  ;;  %v3659_v46 = vmul.f32 0.2, %v3627_v39  ;;  %v5411_v15 = vadd.f32 %v3527_v44, %v1967_v14 }
 0x1f3   : > { %3851 = vst.msk [vmem:[%s6552_s7 + $0x54] sm:$0xf] %vm3829_vm1, %v4563_v41  ;;  %v3692_v47 = vmax.f32 %v3628_v13, %v3660_v42  ;;  %v3630_v48 = vadd.f32 %v5410_v43, %v6544_v18 }
 0x1f4   : > { %v5133_v49 = vpop.f32.mrb[26].mxu1  ;;  %3850 = vst.msk [vmem:[%s6552_s7 + $0x50] sm:$0xf] %vm3829_vm1, %v4562_v45  ;;  %v3691_v50 = vmax.f32 %v3627_v39, %v3659_v46  ;;  %v3629_v16 = vadd.f32 %v5411_v15, %v6544_v18  ;;  %v5341_v51 = vpop.f32.mrb[26].mxu0 }
 0x1f5   : > { %v1977_v52 = vpop.f32.mrb[27].mxu1  ;;  %v4565_v53 = vpack.c.bf16 %v3692_v47, %v3692_v47  ;;  %v3662_v54 = vmul.f32 0.2, %v3630_v48  ;;  %v5412_v55 = vadd.f32 %v5341_v51, %v5133_v49  ;;  %v3537_v56 = vpop.f32.mrb[27].mxu0 }
 0x1f6   : > { %v4564_v59 = vpack.c.bf16 %v3691_v50, %v3691_v50  ;;  %v3661_v61 = vmul.f32 0.2, %v3629_v16  ;;  %v5413_v63 = vadd.f32 %v3537_v56, %v1977_v52 }
 0x1f7   : > { %3853 = vst.msk [vmem:[%s6552_s7 + $0x5c] sm:$0xf] %vm3829_vm1, %v4565_v53  ;;  %v3694_v1 = vmax.f32 %v3630_v48, %v3662_v54  ;;  %v3632_v3 = vadd.f32 %v5412_v55, %v6544_v18 }
 0x1f8   : > { %v5136_v5 = vpop.f32.mrb[28].mxu1  ;;  %3852 = vst.msk [vmem:[%s6552_s7 + $0x58] sm:$0xf] %vm3829_vm1, %v4564_v59  ;;  %v3693_v8 = vmax.f32 %v3629_v16, %v3661_v61  ;;  %v3631_v57 = vadd.f32 %v5413_v63, %v6544_v18  ;;  %v5344_v60 = vpop.f32.mrb[28].mxu0 }
 0x1f9   : > { %v1987_v58 = vpop.f32.mrb[29].mxu1  ;;  %v4567_v62 = vpack.c.bf16 %v3694_v1, %v3694_v1  ;;  %v3664_v7 = vmul.f32 0.2, %v3632_v3  ;;  %v5414_v0 = vadd.f32 %v5344_v60, %v5136_v5  ;;  %v3547_v2 = vpop.f32.mrb[29].mxu0 }
 0x1fa   : > { %v4566_v4 = vpack.c.bf16 %v3693_v8, %v3693_v8  ;;  %v3663_v6 = vmul.f32 0.2, %v3631_v57  ;;  %v5415_v9 = vadd.f32 %v3547_v2, %v1987_v58 }
 0x1fb   : > { %3855 = vst.msk [vmem:[%s6552_s7 + $0x64] sm:$0xf] %vm3829_vm1, %v4567_v62  ;;  %v3696_v17 = vmax.f32 %v3632_v3, %v3664_v7  ;;  %v3634_v19 = vadd.f32 %v5414_v0, %v6544_v18 }
 0x1fc   : > { %v5139_v20 = vpop.f32.mrb[30].mxu1  ;;  %3854 = vst.msk [vmem:[%s6552_s7 + $0x60] sm:$0xf] %vm3829_vm1, %v4566_v4  ;;  %v3695_v10 = vmax.f32 %v3631_v57, %v3663_v6  ;;  %v3633_v21 = vadd.f32 %v5415_v9, %v6544_v18  ;;  %v5347_v22 = vpop.f32.mrb[30].mxu0 }
 0x1fd   : > { %v1997_v23 = vpop.f32.mrb[31].mxu1  ;;  %v4569_v24 = vpack.c.bf16 %v3696_v17, %v3696_v17  ;;  %v3666_v25 = vmul.f32 0.2, %v3634_v19  ;;  %v5416_v26 = vadd.f32 %v5347_v22, %v5139_v20  ;;  %v3557_v11 = vpop.f32.mrb[31].mxu0 }
 0x1fe   : > { %v4568_v27 = vpack.c.bf16 %v3695_v10, %v3695_v10  ;;  %v3665_v28 = vmul.f32 0.2, %v3633_v21  ;;  %v5417_v29 = vadd.f32 %v3557_v11, %v1997_v23 }
 0x1ff   : > { %3857 = vst.msk [vmem:[%s6552_s7 + $0x6c] sm:$0xf] %vm3829_vm1, %v4569_v24  ;;  %v3698_v30 = vmax.f32 %v3634_v19, %v3666_v25  ;;  %v3636_v12 = vadd.f32 %v5416_v26, %v6544_v18 }
 0x200   : > { %3856 = vst.msk [vmem:[%s6552_s7 + $0x68] sm:$0xf] %vm3829_vm1, %v4568_v27  ;;  %v3697_v31 = vmax.f32 %v3633_v21, %v3665_v28  ;;  %v3635_v32 = vadd.f32 %v5417_v29, %v6544_v18 }
 0x201   : > { %v4571_v33 = vpack.c.bf16 %v3698_v30, %v3698_v30  ;;  %v3668_v34 = vmul.f32 0.2, %v3636_v12 }
 0x202   : > { %v4570_v35 = vpack.c.bf16 %v3697_v31, %v3697_v31  ;;  %v3667_v36 = vmul.f32 0.2, %v3635_v32 }
 0x203   : > { %3859 = vst.msk [vmem:[%s6552_s7 + $0x74] sm:$0xf] %vm3829_vm1, %v4571_v33  ;;  %v3700_v13 = vmax.f32 %v3636_v12, %v3668_v34 }
 0x204   : > { %3858 = vst.msk [vmem:[%s6552_s7 + $0x70] sm:$0xf] %vm3829_vm1, %v4570_v35  ;;  %v3699_v37 = vmax.f32 %v3635_v32, %v3667_v36 }
 0x205   : > { %v4573_v38 = vpack.c.bf16 %v3700_v13, %v3700_v13 }
 0x206   : > { %v4572_v39 = vpack.c.bf16 %v3699_v37, %v3699_v37 }
 0x207   : > { %3861 = vst.msk [vmem:[%s6552_s7 + $0x7c] sm:$0xf] %vm3829_vm1, %v4573_v38 }
 0x208   : > { %3860 = vst.msk [vmem:[%s6552_s7 + $0x78] sm:$0xf] %vm3829_vm1, %v4572_v39 }
 0x209 PF: > { %s13_s12 = sadd.s32 1, %s5656_s12  }
 0x20a   : > { %p10_p4 = scmp.ge.s32.totalorder %s13_s12, 5  }
 0x20c   :  { %12 = sbr.rel (!%p10_p4) target bundleno = 1 (0x1), region = 76 }

// kernel: _lambda_.12
= control target key start
LH: loop header
LB: loop body
LE: loop exit
PB: predicated region body
PF: predicated region fallthrough
CT: control target
= control target key end

     0   :  { %s980_s12 = smov 0   ;;  %s1141_s0 = inlined_call_operand.vmem [shape: bf16[512,16], index: 0, kind: input, shape index: {}]   ;;  %s1142_s1 = inlined_call_operand.vmem [shape: bf16[1,16,4], index: 1, kind: input, shape index: {}]   ;;  %s1143_s2 = inlined_call_operand.vmem [shape: f32[1,4], index: 2, kind: input, shape index: {}]   ;;  %s1144_s3 = inlined_call_operand.vmem [shape: bf16[512,4], index: 3, kind: output, shape index: {}]  }
   0x1 LB: > { %s766_s13 = sadd.s32 4294967295, %s958_s12   ;;  %p769_p0 = scmp.ge.s32.totalorder %s958_s12, 1  ;;  %s958_s12 = sphi %s980_s12, %s13_s12  }
   0x2   : > { %p127_p1 = scmp.lt.s32.totalorder %s958_s12, 3 }
   0x4   : > { %p128_p2 = pnand %p769_p0, %p127_p1 }
   0x5   : > { %v935_v0 = vld [vmem:[%s1142_s1] sm:$0xff] (!%p128_p2)   ;;  %s772_s16 = sshll.u32 (!%p128_p2), %s766_s13, 8  ;;  %vm285_vm0 = vcmask (!%p128_p2), 130048   ;;  %s770_s22 = sshll.u32 (!%p128_p2), %s766_s13, 5  ;;  %vm687_vm1 = vcmask (!%p128_p2), 27648  }
   0x6   : > { %131 = sbr.rel (%p128_p2) target bundleno = 262 (0x106), region = 32  ;;  %s154_s17 = sshra.s32 (!%p128_p2), %s772_s16, 3  ;;  %891 = vmatprep.subr.bf16.mxu0 (!%p128_p2), %v935_v0  ;;  %925 = vmatprep.subr.bf16.mxu1 (!%p128_p2), %v935_v0  ;;  %v1035_v17 = vld [vmem:[%s1143_s2] ss:$0 sm:$0xff] (!%p128_p2) }
   0x7   : > { %s773_s18 = sshll.u32 (!%p128_p2), %s154_s17, 2  ;;  %892 = vmatpush3.bf16.msra.mxu0 (!%p128_p2), %v935_v0  ;;  %926 = vmatpush3.bf16.msra.mxu1 (!%p128_p2), %v935_v0  ;;  %p147_p3 = scmp.lt.s32.totalorder (!%p128_p2), %s770_s22, 63 }
   0x8   : > { %s996_s21 = scalar_lea.vmem (!%p128_p2), %s1141_s0, %s773_s18 }
   0x9   : > { %v936_v1 = vld [vmem:[%s996_s21] sm:$0xff] (!%p128_p2)   ;;  %v938_v3 = vld [vmem:[%s996_s21 + $0x8] sm:$0xff] (!%p128_p2)   ;;  %v940_v5 = vld [vmem:[%s996_s21 + $0x10] sm:$0xff] (!%p128_p2)  }
   0xa   : > { %v937_v2 = vld [vmem:[%s996_s21 + $0x40] sm:$0xff] (!%p128_p2)   ;;  %893 = vmatprep.mubr.msk.bf16.mxu0 (!%p128_p2), %vm285_vm0, %v936_v1  ;;  %v939_v4 = vld [vmem:[%s996_s21 + $0x48] sm:$0xff] (!%p128_p2)   ;;  %v941_v6 = vld [vmem:[%s996_s21 + $0x50] sm:$0xff] (!%p128_p2)  }
   0xb   : > { %909 = vmatprep.mubr.msk.bf16.mxu1 (!%p128_p2), %vm285_vm0, %v937_v2  ;;  %894 = vmatmul.mubr.msk.bf16.vlgmr.msra.gmra.mrb[0].mxu0 (!%p128_p2), %vm285_vm0, %v938_v3  ;;  %v942_v7 = vld [vmem:[%s996_s21 + $0x18] sm:$0xff] (!%p128_p2)   ;;  %v944_v9 = vld [vmem:[%s996_s21 + $0x20] sm:$0xff] (!%p128_p2)   ;;  %v946_v11 = vld [vmem:[%s996_s21 + $0x28] sm:$0xff] (!%p128_p2)  }
   0xc   : > { %910 = vmatmul.mubr.msk.bf16.vlgmr.msra.gmra.mrb[0].mxu1 (!%p128_p2), %vm285_vm0, %v939_v4  ;;  %897 = vmatprep.mubr.msk.bf16.mxu0 (!%p128_p2), %vm285_vm0, %v940_v5  ;;  %v943_v8 = vld [vmem:[%s996_s21 + $0x58] sm:$0xff] (!%p128_p2)   ;;  %v945_v10 = vld [vmem:[%s996_s21 + $0x60] sm:$0xff] (!%p128_p2)   ;;  %v947_v12 = vld [vmem:[%s996_s21 + $0x68] sm:$0xff] (!%p128_p2)  }
   0xd   : > { %913 = vmatprep.mubr.msk.bf16.mxu1 %vm285_vm0, %v941_v6  ;;  %v948_v13 = vld [vmem:[%s996_s21 + $0x30] sm:$0xff]   ;;  %v950_v15 = vld [vmem:[%s996_s21 + $0x38] sm:$0xff]   ;;  %s1146_s22 = smov (!%p147_p3, %s770_s22), 63 }
   0xe   : > { %v949_v14 = vld [vmem:[%s996_s21 + $0x70] sm:$0xff]   ;;  %v951_v16 = vld [vmem:[%s996_s21 + $0x78] sm:$0xff]   ;;  %s771_s25 = sshll.u32 %s1146_s22, 2 }
   0xf   : > { %s1048_s28 = scalar_lea.vmem %s1144_s3, %s771_s25 }
  0x13   : > { %898 = vmatmul.mubr.msk.bf16.gmra.mrb[4].mxu0 %vm285_vm0, %v942_v7 }
  0x14   : > { %914 = vmatmul.mubr.msk.bf16.gmra.mrb[4].mxu1 %vm285_vm0, %v943_v8  ;;  %901 = vmatprep.mubr.msk.bf16.mxu0 %vm285_vm0, %v944_v9 }
  0x15   : > { %917 = vmatprep.mubr.msk.bf16.mxu1 %vm285_vm0, %v945_v10 }
  0x1b   : > { %902 = vmatmul.mubr.msk.bf16.gmra.mrb[8].mxu0 %vm285_vm0, %v946_v11 }
  0x1c   : > { %918 = vmatmul.mubr.msk.bf16.gmra.mrb[8].mxu1 %vm285_vm0, %v947_v12  ;;  %905 = vmatprep.mubr.msk.bf16.mxu0 %vm285_vm0, %v948_v13 }
  0x1d   : > { %921 = vmatprep.mubr.msk.bf16.mxu1 %vm285_vm0, %v949_v14 }
  0x23   : > { %906 = vmatmul.mubr.msk.bf16.gmra.mrb[12].mxu0 %vm285_vm0, %v950_v15 }
  0x24   : > { %922 = vmatmul.mubr.msk.bf16.gmra.mrb[12].mxu1 %vm285_vm0, %v951_v16 }
  0xde   : > { %v895_v18 = vpop.f32.mrb[0].mxu0 }
  0xdf   : > { %v377_v19 = vadd.f32 %v895_v18, %v1035_v17  ;;  %v911_v20 = vpop.f32.mrb[0].mxu1  ;;  %v368_v21 = vpop.f32.mrb[1].mxu0 }
  0xe0   : > { %v441_v22 = vadd.f32 %v911_v20, %v1035_v17  ;;  %v369_v23 = vadd.f32 %v1035_v17, %v368_v21  ;;  %v432_v24 = vpop.f32.mrb[1].mxu1  ;;  %v896_v25 = vpop.f32.mrb[2].mxu0 }
  0xe1   : > { %v497_v26 = vmul.f32 0.2, %v377_v19  ;;  %v433_v27 = vadd.f32 %v1035_v17, %v432_v24  ;;  %v380_v28 = vadd.f32 %v896_v25, %v1035_v17  ;;  %v912_v29 = vpop.f32.mrb[2].mxu1  ;;  %v371_v30 = vpop.f32.mrb[3].mxu0 }
  0xe2   : > { %v513_v31 = vmul.f32 0.2, %v441_v22  ;;  %v495_v32 = vmul.f32 0.2, %v369_v23  ;;  %v444_v33 = vadd.f32 %v912_v29, %v1035_v17  ;;  %v372_v34 = vadd.f32 %v1035_v17, %v371_v30  ;;  %v435_v35 = vpop.f32.mrb[3].mxu1 }
  0xe3   : > { %v529_v36 = vmax.f32 %v377_v19, %v497_v26  ;;  %v511_v37 = vmul.f32 0.2, %v433_v27  ;;  %v498_v38 = vmul.f32 0.2, %v380_v28  ;;  %v436_v39 = vadd.f32 %v1035_v17, %v435_v35 }
  0xe4   : > { %v545_v40 = vmax.f32 %v441_v22, %v513_v31  ;;  %v527_v41 = vmax.f32 %v369_v23, %v495_v32  ;;  %v514_v42 = vmul.f32 0.2, %v444_v33  ;;  %v496_v43 = vmul.f32 0.2, %v372_v34 }
  0xe5   : > { %v844_v44 = vpack.c.bf16 %v529_v36, %v529_v36  ;;  %v543_v45 = vmax.f32 %v433_v27, %v511_v37  ;;  %v530_v46 = vmax.f32 %v380_v28, %v498_v38  ;;  %v512_v47 = vmul.f32 0.2, %v436_v39 }
  0xe6   : > { %v860_v48 = vpack.c.bf16 %v545_v40, %v545_v40  ;;  %v842_v49 = vpack.c.bf16 %v527_v41, %v527_v41  ;;  %v546_v50 = vmax.f32 %v444_v33, %v514_v42  ;;  %v528_v51 = vmax.f32 %v372_v34, %v496_v43  ;;  %v899_v52 = vpop.f32.mrb[4].mxu0 }
  0xe7   : > { %690 = vst.msk [vmem:[%s1048_s28 + $0x8] sm:$0xf] %vm687_vm1, %v844_v44  ;;  %v858_v53 = vpack.c.bf16 %v543_v45, %v543_v45  ;;  %v845_v54 = vpack.c.bf16 %v530_v46, %v530_v46  ;;  %v544_v55 = vmax.f32 %v436_v39, %v512_v47  ;;  %v393_v56 = vadd.f32 %v899_v52, %v1035_v17  ;;  %v915_v57 = vpop.f32.mrb[4].mxu1  ;;  %v384_v58 = vpop.f32.mrb[5].mxu0 }
  0xe8   : > { %706 = vst.msk [vmem:[%s1048_s28 + $0x48] sm:$0xf] %vm687_vm1, %v860_v48  ;;  %688 = vst.msk [vmem:[%s1048_s28] sm:$0xf] %vm687_vm1, %v842_v49  ;;  %v861_v59 = vpack.c.bf16 %v546_v50, %v546_v50  ;;  %v843_v60 = vpack.c.bf16 %v528_v51, %v528_v51  ;;  %v457_v61 = vadd.f32 %v915_v57, %v1035_v17  ;;  %v448_v63 = vpop.f32.mrb[5].mxu1  ;;  %v900_v0 = vpop.f32.mrb[6].mxu0 }
  0xe9   : > { %v385_v62 = vadd.f32 %v1035_v17, %v384_v58  ;;  %704 = vst.msk [vmem:[%s1048_s28 + $0x40] sm:$0xf] %vm687_vm1, %v858_v53  ;;  %691 = vst.msk [vmem:[%s1048_s28 + $0xc] sm:$0xf] %vm687_vm1, %v845_v54  ;;  %v859_v1 = vpack.c.bf16 %v544_v55, %v544_v55  ;;  %v501_v2 = vmul.f32 0.2, %v393_v56  ;;  %v449_v3 = vadd.f32 %v1035_v17, %v448_v63 }
  0xea   : > { %v396_v4 = vadd.f32 %v900_v0, %v1035_v17  ;;  %v916_v5 = vpop.f32.mrb[6].mxu1  ;;  %v387_v6 = vpop.f32.mrb[7].mxu0  ;;  %707 = vst.msk [vmem:[%s1048_s28 + $0x4c] sm:$0xf] %vm687_vm1, %v861_v59  ;;  %689 = vst.msk [vmem:[%s1048_s28 + $0x4] sm:$0xf] %vm687_vm1, %v843_v60 }
  0xeb   : > { %v517_v7 = vmul.f32 0.2, %v457_v61  ;;  %v499_v8 = vmul.f32 0.2, %v385_v62  ;;  %v460_v9 = vadd.f32 %v916_v5, %v1035_v17  ;;  %v388_v10 = vadd.f32 %v1035_v17, %v387_v6  ;;  %v451_v11 = vpop.f32.mrb[7].mxu1 }
  0xec   : > { %705 = vst.msk [vmem:[%s1048_s28 + $0x44] sm:$0xf] %vm687_vm1, %v859_v1  ;;  %v533_v12 = vmax.f32 %v393_v56, %v501_v2  ;;  %v515_v13 = vmul.f32 0.2, %v449_v3  ;;  %v502_v14 = vmul.f32 0.2, %v396_v4  ;;  %v452_v15 = vadd.f32 %v1035_v17, %v451_v11 }
  0xed   : > { %v549_v16 = vmax.f32 %v457_v61, %v517_v7  ;;  %v531_v18 = vmax.f32 %v385_v62, %v499_v8  ;;  %v518_v19 = vmul.f32 0.2, %v460_v9  ;;  %v500_v20 = vmul.f32 0.2, %v388_v10 }
  0xee   : > { %v848_v21 = vpack.c.bf16 %v533_v12, %v533_v12  ;;  %v547_v22 = vmax.f32 %v449_v3, %v515_v13  ;;  %v534_v23 = vmax.f32 %v396_v4, %v502_v14  ;;  %v516_v24 = vmul.f32 0.2, %v452_v15  ;;  %v903_v29 = vpop.f32.mrb[8].mxu0 }
  0xef   : > { %v864_v25 = vpack.c.bf16 %v549_v16, %v549_v16  ;;  %v846_v26 = vpack.c.bf16 %v531_v18, %v531_v18  ;;  %v550_v27 = vmax.f32 %v460_v9, %v518_v19  ;;  %v532_v28 = vmax.f32 %v388_v10, %v500_v20  ;;  %v919_v34 = vpop.f32.mrb[8].mxu1  ;;  %v400_v35 = vpop.f32.mrb[9].mxu0 }
  0xf0   : > { %694 = vst.msk [vmem:[%s1048_s28 + $0x18] sm:$0xf] %vm687_vm1, %v848_v21  ;;  %v862_v30 = vpack.c.bf16 %v547_v22, %v547_v22  ;;  %v849_v31 = vpack.c.bf16 %v534_v23, %v534_v23  ;;  %v548_v32 = vmax.f32 %v452_v15, %v516_v24  ;;  %v409_v33 = vadd.f32 %v903_v29, %v1035_v17  ;;  %v464_v40 = vpop.f32.mrb[9].mxu1  ;;  %v904_v41 = vpop.f32.mrb[10].mxu0 }
  0xf1   : > { %710 = vst.msk [vmem:[%s1048_s28 + $0x58] sm:$0xf] %vm687_vm1, %v864_v25  ;;  %692 = vst.msk [vmem:[%s1048_s28 + $0x10] sm:$0xf] %vm687_vm1, %v846_v26  ;;  %v865_v36 = vpack.c.bf16 %v550_v27, %v550_v27  ;;  %v847_v37 = vpack.c.bf16 %v532_v28, %v532_v28  ;;  %v473_v38 = vadd.f32 %v919_v34, %v1035_v17  ;;  %v920_v46 = vpop.f32.mrb[10].mxu1  ;;  %v403_v47 = vpop.f32.mrb[11].mxu0 }
  0xf2   : > { %v401_v39 = vadd.f32 %v1035_v17, %v400_v35  ;;  %708 = vst.msk [vmem:[%s1048_s28 + $0x50] sm:$0xf] %vm687_vm1, %v862_v30  ;;  %695 = vst.msk [vmem:[%s1048_s28 + $0x1c] sm:$0xf] %vm687_vm1, %v849_v31  ;;  %v863_v42 = vpack.c.bf16 %v548_v32, %v548_v32  ;;  %v505_v43 = vmul.f32 0.2, %v409_v33  ;;  %v465_v44 = vadd.f32 %v1035_v17, %v464_v40 }
  0xf3   : > { %v412_v45 = vadd.f32 %v904_v41, %v1035_v17  ;;  %711 = vst.msk [vmem:[%s1048_s28 + $0x5c] sm:$0xf] %vm687_vm1, %v865_v36  ;;  %693 = vst.msk [vmem:[%s1048_s28 + $0x14] sm:$0xf] %vm687_vm1, %v847_v37  ;;  %v521_v48 = vmul.f32 0.2, %v473_v38  ;;  %v476_v50 = vadd.f32 %v920_v46, %v1035_v17  ;;  %v404_v51 = vadd.f32 %v1035_v17, %v403_v47 }
  0xf4   : > { %v503_v49 = vmul.f32 0.2, %v401_v39  ;;  %v467_v52 = vpop.f32.mrb[11].mxu1  ;;  %709 = vst.msk [vmem:[%s1048_s28 + $0x54] sm:$0xf] %vm687_vm1, %v863_v42  ;;  %v537_v53 = vmax.f32 %v409_v33, %v505_v43 }
  0xf5   : > { %v519_v54 = vmul.f32 0.2, %v465_v44  ;;  %v506_v55 = vmul.f32 0.2, %v412_v45  ;;  %v468_v56 = vadd.f32 %v1035_v17, %v467_v52  ;;  %v553_v57 = vmax.f32 %v473_v38, %v521_v48 }
  0xf6   : > { %v535_v58 = vmax.f32 %v401_v39, %v503_v49  ;;  %v522_v59 = vmul.f32 0.2, %v476_v50  ;;  %v504_v60 = vmul.f32 0.2, %v404_v51  ;;  %v852_v61 = vpack.c.bf16 %v537_v53, %v537_v53  ;;  %v907_v5 = vpop.f32.mrb[12].mxu0 }
  0xf7   : > { %v551_v62 = vmax.f32 %v465_v44, %v519_v54  ;;  %v538_v63 = vmax.f32 %v412_v45, %v506_v55  ;;  %v520_v0 = vmul.f32 0.2, %v468_v56  ;;  %v868_v1 = vpack.c.bf16 %v553_v57, %v553_v57  ;;  %v923_v10 = vpop.f32.mrb[12].mxu1  ;;  %v416_v11 = vpop.f32.mrb[13].mxu0 }
  0xf8   : > { %v850_v2 = vpack.c.bf16 %v535_v58, %v535_v58  ;;  %v554_v3 = vmax.f32 %v476_v50, %v522_v59  ;;  %v536_v4 = vmax.f32 %v404_v51, %v504_v60  ;;  %698 = vst.msk [vmem:[%s1048_s28 + $0x28] sm:$0xf] %vm687_vm1, %v852_v61  ;;  %v425_v9 = vadd.f32 %v907_v5, %v1035_v17  ;;  %v480_v16 = vpop.f32.mrb[13].mxu1  ;;  %v908_v18 = vpop.f32.mrb[14].mxu0 }
  0xf9   : > { %v866_v6 = vpack.c.bf16 %v551_v62, %v551_v62  ;;  %v853_v7 = vpack.c.bf16 %v538_v63, %v538_v63  ;;  %v552_v8 = vmax.f32 %v468_v56, %v520_v0  ;;  %714 = vst.msk [vmem:[%s1048_s28 + $0x68] sm:$0xf] %vm687_vm1, %v868_v1  ;;  %v489_v14 = vadd.f32 %v923_v10, %v1035_v17  ;;  %v924_v23 = vpop.f32.mrb[14].mxu1  ;;  %v419_v24 = vpop.f32.mrb[15].mxu0 }
  0xfa   : > { %696 = vst.msk [vmem:[%s1048_s28 + $0x20] sm:$0xf] %vm687_vm1, %v850_v2  ;;  %v869_v12 = vpack.c.bf16 %v554_v3, %v554_v3  ;;  %v851_v13 = vpack.c.bf16 %v536_v4, %v536_v4  ;;  %v417_v15 = vadd.f32 %v1035_v17, %v416_v11  ;;  %v509_v20 = vmul.f32 0.2, %v425_v9  ;;  %v483_v29 = vpop.f32.mrb[15].mxu1 }
  0xfb   : > { %712 = vst.msk [vmem:[%s1048_s28 + $0x60] sm:$0xf] %vm687_vm1, %v866_v6  ;;  %699 = vst.msk [vmem:[%s1048_s28 + $0x2c] sm:$0xf] %vm687_vm1, %v853_v7  ;;  %v867_v19 = vpack.c.bf16 %v552_v8, %v552_v8  ;;  %v481_v21 = vadd.f32 %v1035_v17, %v480_v16  ;;  %v428_v22 = vadd.f32 %v908_v18, %v1035_v17  ;;  %v525_v25 = vmul.f32 0.2, %v489_v14 }
  0xfc   : > { %715 = vst.msk [vmem:[%s1048_s28 + $0x6c] sm:$0xf] %vm687_vm1, %v869_v12  ;;  %697 = vst.msk [vmem:[%s1048_s28 + $0x24] sm:$0xf] %vm687_vm1, %v851_v13  ;;  %v507_v26 = vmul.f32 0.2, %v417_v15  ;;  %v492_v27 = vadd.f32 %v924_v23, %v1035_v17  ;;  %v420_v28 = vadd.f32 %v1035_v17, %v419_v24  ;;  %v541_v30 = vmax.f32 %v425_v9, %v509_v20 }
  0xfd   : > { %713 = vst.msk [vmem:[%s1048_s28 + $0x64] sm:$0xf] %vm687_vm1, %v867_v19  ;;  %v523_v31 = vmul.f32 0.2, %v481_v21  ;;  %v510_v32 = vmul.f32 0.2, %v428_v22  ;;  %v484_v33 = vadd.f32 %v1035_v17, %v483_v29  ;;  %v557_v34 = vmax.f32 %v489_v14, %v525_v25 }
  0xfe   : > { %v539_v35 = vmax.f32 %v417_v15, %v507_v26  ;;  %v526_v36 = vmul.f32 0.2, %v492_v27  ;;  %v508_v37 = vmul.f32 0.2, %v420_v28  ;;  %v856_v38 = vpack.c.bf16 %v541_v30, %v541_v30 }
  0xff   : > { %v555_v39 = vmax.f32 %v481_v21, %v523_v31  ;;  %v542_v40 = vmax.f32 %v428_v22, %v510_v32  ;;  %v524_v41 = vmul.f32 0.2, %v484_v33  ;;  %v872_v42 = vpack.c.bf16 %v557_v34, %v557_v34 }
 0x100   : > { %v854_v43 = vpack.c.bf16 %v539_v35, %v539_v35  ;;  %v558_v44 = vmax.f32 %v492_v27, %v526_v36  ;;  %v540_v45 = vmax.f32 %v420_v28, %v508_v37  ;;  %702 = vst.msk [vmem:[%s1048_s28 + $0x38] sm:$0xf] %vm687_vm1, %v856_v38 }
 0x101   : > { %v870_v17 = vpack.c.bf16 %v555_v39, %v555_v39  ;;  %v857_v46 = vpack.c.bf16 %v542_v40, %v542_v40  ;;  %v556_v47 = vmax.f32 %v484_v33, %v524_v41  ;;  %718 = vst.msk [vmem:[%s1048_s28 + $0x78] sm:$0xf] %vm687_vm1, %v872_v42 }
 0x102   : > { %700 = vst.msk [vmem:[%s1048_s28 + $0x30] sm:$0xf] %vm687_vm1, %v854_v43  ;;  %v873_v48 = vpack.c.bf16 %v558_v44, %v558_v44  ;;  %v855_v49 = vpack.c.bf16 %v540_v45, %v540_v45 }
 0x103   : > { %716 = vst.msk [vmem:[%s1048_s28 + $0x70] sm:$0xf] %vm687_vm1, %v870_v17  ;;  %703 = vst.msk [vmem:[%s1048_s28 + $0x3c] sm:$0xf] %vm687_vm1, %v857_v46  ;;  %v871_v50 = vpack.c.bf16 %v556_v47, %v556_v47 }
 0x104   : > { %719 = vst.msk [vmem:[%s1048_s28 + $0x7c] sm:$0xf] %vm687_vm1, %v873_v48  ;;  %701 = vst.msk [vmem:[%s1048_s28 + $0x34] sm:$0xf] %vm687_vm1, %v855_v49 }
 0x105   : > { %717 = vst.msk [vmem:[%s1048_s28 + $0x74] sm:$0xf] %vm687_vm1, %v871_v50 }
 0x106 PF: > { %s13_s12 = sadd.s32 1, %s958_s12  }
 0x107   : > { %p10_p4 = scmp.ge.s32.totalorder %s13_s12, 4  }
 0x109   :  { %12 = sbr.rel (!%p10_p4) target bundleno = 1 (0x1), region = 60 }

// kernel: _lambda_.14
= control target key start
LH: loop header
LB: loop body
LE: loop exit
PB: predicated region body
PF: predicated region fallthrough
CT: control target
= control target key end

     0   :  { %s995_s12 = smov 0   ;;  %s1162_s0 = inlined_call_operand.vmem [shape: bf16[512,32], index: 0, kind: input, shape index: {}]   ;;  %s1163_s1 = inlined_call_operand.vmem [shape: bf16[1,32,32], index: 1, kind: input, shape index: {}]   ;;  %s1164_s2 = inlined_call_operand.vmem [shape: f32[1,32], index: 2, kind: input, shape index: {}]   ;;  %s1165_s3 = inlined_call_operand.vmem [shape: bf16[512,32], index: 3, kind: output, shape index: {}]  }
   0x1 LB: > { %s774_s13 = sadd.s32 4294967295, %s973_s12   ;;  %p777_p0 = scmp.ge.s32.totalorder %s973_s12, 1  ;;  %s973_s12 = sphi %s995_s12, %s13_s12  }
   0x2   : > { %p127_p1 = scmp.lt.s32.totalorder %s973_s12, 3 }
   0x4   : > { %p128_p2 = pnand %p777_p0, %p127_p1 }
   0x5   : > { %v949_v0 = vld [vmem:[%s1163_s1] sm:$0xff] (!%p128_p2)   ;;  %s780_s16 = sshll.u32 (!%p128_p2), %s774_s13, 8  ;;  %v950_v1 = vld [vmem:[%s1163_s1 + $0x8] sm:$0xff] (!%p128_p2)   ;;  %vm293_vm0 = vcmask (!%p128_p2), 261120   ;;  %s778_s24 = sshll.u32 (!%p128_p2), %s774_s13, 5  ;;  %vm695_vm1 = vcmask (!%p128_p2), 257024  }
   0x6   : > { %131 = sbr.rel (%p128_p2) target bundleno = 265 (0x109), region = 32  ;;  %s154_s19 = sshra.s32 (!%p128_p2), %s780_s16, 3  ;;  %901 = vmatprep.subr.bf16.mxu0 (!%p128_p2), %v949_v0  ;;  %937 = vmatprep.subr.bf16.mxu1 (!%p128_p2), %v949_v0  ;;  %v1055_v18 = vld [vmem:[%s1164_s2] ss:$0 sm:$0xff] (!%p128_p2) }
   0x7   : > { %s781_s20 = sshll.u32 (!%p128_p2), %s154_s19, 2  ;;  %902 = vmatpush3.bf16.msra.mxu0 (!%p128_p2), %v949_v0  ;;  %939 = vmatpush3.bf16.msra.mxu1 (!%p128_p2), %v949_v0  ;;  %p147_p3 = scmp.lt.s32.totalorder (!%p128_p2), %s778_s24, 63 }
   0x8   : > { %s1014_s23 = scalar_lea.vmem (!%p128_p2), %s1162_s0, %s781_s20  ;;  %903 = vmatprep.subr.bf16.mxu0 (!%p128_p2), %v950_v1  ;;  %938 = vmatprep.subr.bf16.mxu1 (!%p128_p2), %v950_v1 }
   0x9   : > { %v951_v2 = vld [vmem:[%s1014_s23] sm:$0xff] (!%p128_p2)   ;;  %v953_v4 = vld [vmem:[%s1014_s23 + $0x8] sm:$0xff] (!%p128_p2)   ;;  %v955_v6 = vld [vmem:[%s1014_s23 + $0x10] sm:$0xff] (!%p128_p2)  }
   0xa   : > { %v952_v3 = vld [vmem:[%s1014_s23 + $0x40] sm:$0xff] (!%p128_p2)   ;;  %905 = vmatprep.mubr.msk.bf16.mxu0 (!%p128_p2), %vm293_vm0, %v951_v2  ;;  %v954_v5 = vld [vmem:[%s1014_s23 + $0x48] sm:$0xff] (!%p128_p2)   ;;  %v956_v7 = vld [vmem:[%s1014_s23 + $0x50] sm:$0xff] (!%p128_p2)  }
   0xb   : > { %904 = vmatpush3.bf16.msra.mxu0 (!%p128_p2), %v950_v1  ;;  %940 = vmatpush3.bf16.msra.mxu1 (!%p128_p2), %v950_v1  ;;  %v957_v8 = vld [vmem:[%s1014_s23 + $0x18] sm:$0xff] (!%p128_p2)   ;;  %v959_v10 = vld [vmem:[%s1014_s23 + $0x20] sm:$0xff] (!%p128_p2)   ;;  %v961_v12 = vld [vmem:[%s1014_s23 + $0x28] sm:$0xff] (!%p128_p2)  }
   0xc   : > { %921 = vmatprep.mubr.msk.bf16.mxu1 (!%p128_p2), %vm293_vm0, %v952_v3  ;;  %v958_v9 = vld [vmem:[%s1014_s23 + $0x58] sm:$0xff] (!%p128_p2)   ;;  %v960_v11 = vld [vmem:[%s1014_s23 + $0x60] sm:$0xff] (!%p128_p2)   ;;  %v962_v13 = vld [vmem:[%s1014_s23 + $0x68] sm:$0xff] (!%p128_p2)  }
   0xd   : > { %v963_v14 = vld [vmem:[%s1014_s23 + $0x30] sm:$0xff]   ;;  %v965_v16 = vld [vmem:[%s1014_s23 + $0x38] sm:$0xff]   ;;  %s1167_s24 = smov (!%p147_p3, %s778_s24), 63 }
   0xe   : > { %906 = vmatmul.mubr.msk.bf16.vlgmr.msra.gmra.mrb[0].mxu0 %vm293_vm0, %v953_v4  ;;  %922 = vmatmul.mubr.msk.bf16.vlgmr.msra.gmra.mrb[0].mxu1 %vm293_vm0, %v954_v5  ;;  %v964_v15 = vld [vmem:[%s1014_s23 + $0x70] sm:$0xff]   ;;  %v966_v17 = vld [vmem:[%s1014_s23 + $0x78] sm:$0xff]   ;;  %s779_s27 = sshll.u32 %s1167_s24, 2 }
   0xf   : > { %909 = vmatprep.mubr.msk.bf16.mxu0 %vm293_vm0, %v955_v6  ;;  %925 = vmatprep.mubr.msk.bf16.mxu1 %vm293_vm0, %v956_v7  ;;  %s1069_s30 = scalar_lea.vmem %s1165_s3, %s779_s27 }
  0x16   : > { %910 = vmatmul.mubr.msk.bf16.gmra.mrb[4].mxu0 %vm293_vm0, %v957_v8  ;;  %926 = vmatmul.mubr.msk.bf16.gmra.mrb[4].mxu1 %vm293_vm0, %v958_v9 }
  0x17   : > { %913 = vmatprep.mubr.msk.bf16.mxu0 %vm293_vm0, %v959_v10  ;;  %929 = vmatprep.mubr.msk.bf16.mxu1 %vm293_vm0, %v960_v11 }
  0x1e   : > { %914 = vmatmul.mubr.msk.bf16.gmra.mrb[8].mxu0 %vm293_vm0, %v961_v12  ;;  %930 = vmatmul.mubr.msk.bf16.gmra.mrb[8].mxu1 %vm293_vm0, %v962_v13 }
  0x1f   : > { %917 = vmatprep.mubr.msk.bf16.mxu0 %vm293_vm0, %v963_v14  ;;  %933 = vmatprep.mubr.msk.bf16.mxu1 %vm293_vm0, %v964_v15 }
  0x26   : > { %918 = vmatmul.mubr.msk.bf16.gmra.mrb[12].mxu0 %vm293_vm0, %v965_v16  ;;  %934 = vmatmul.mubr.msk.bf16.gmra.mrb[12].mxu1 %vm293_vm0, %v966_v17 }
  0xe1   : > { %v907_v19 = vpop.f32.mrb[0].mxu0  ;;  %v923_v20 = vpop.f32.mrb[0].mxu1 }
  0xe2   : > { %v385_v21 = vadd.f32 %v907_v19, %v1055_v18  ;;  %v449_v22 = vadd.f32 %v923_v20, %v1055_v18  ;;  %v376_v23 = vpop.f32.mrb[1].mxu0  ;;  %v440_v24 = vpop.f32.mrb[1].mxu1 }
  0xe3   : > { %v377_v25 = vadd.f32 %v1055_v18, %v376_v23  ;;  %v441_v26 = vadd.f32 %v1055_v18, %v440_v24  ;;  %v908_v27 = vpop.f32.mrb[2].mxu0  ;;  %v924_v28 = vpop.f32.mrb[2].mxu1 }
  0xe4   : > { %v505_v29 = vmul.f32 0.2, %v385_v21  ;;  %v521_v30 = vmul.f32 0.2, %v449_v22  ;;  %v388_v31 = vadd.f32 %v908_v27, %v1055_v18  ;;  %v452_v32 = vadd.f32 %v924_v28, %v1055_v18  ;;  %v379_v33 = vpop.f32.mrb[3].mxu0  ;;  %v443_v34 = vpop.f32.mrb[3].mxu1 }
  0xe5   : > { %v503_v35 = vmul.f32 0.2, %v377_v25  ;;  %v519_v36 = vmul.f32 0.2, %v441_v26  ;;  %v380_v37 = vadd.f32 %v1055_v18, %v379_v33  ;;  %v444_v38 = vadd.f32 %v1055_v18, %v443_v34 }
  0xe6   : > { %v537_v39 = vmax.f32 %v385_v21, %v505_v29  ;;  %v553_v40 = vmax.f32 %v449_v22, %v521_v30  ;;  %v506_v41 = vmul.f32 0.2, %v388_v31  ;;  %v522_v42 = vmul.f32 0.2, %v452_v32 }
  0xe7   : > { %v535_v43 = vmax.f32 %v377_v25, %v503_v35  ;;  %v551_v44 = vmax.f32 %v441_v26, %v519_v36  ;;  %v504_v45 = vmul.f32 0.2, %v380_v37  ;;  %v520_v46 = vmul.f32 0.2, %v444_v38 }
  0xe8   : > { %v853_v47 = vpack.c.bf16 %v537_v39, %v537_v39  ;;  %v869_v48 = vpack.c.bf16 %v553_v40, %v553_v40  ;;  %v538_v49 = vmax.f32 %v388_v31, %v506_v41  ;;  %v554_v50 = vmax.f32 %v452_v32, %v522_v42 }
  0xe9   : > { %v851_v51 = vpack.c.bf16 %v535_v43, %v535_v43  ;;  %v867_v52 = vpack.c.bf16 %v551_v44, %v551_v44  ;;  %v536_v53 = vmax.f32 %v380_v37, %v504_v45  ;;  %v552_v54 = vmax.f32 %v444_v38, %v520_v46  ;;  %v911_v55 = vpop.f32.mrb[4].mxu0  ;;  %v927_v56 = vpop.f32.mrb[4].mxu1 }
  0xea   : > { %698 = vst.msk [vmem:[%s1069_s30 + $0x8] sm:$0xf] %vm695_vm1, %v853_v47  ;;  %714 = vst.msk [vmem:[%s1069_s30 + $0x48] sm:$0xf] %vm695_vm1, %v869_v48  ;;  %v854_v57 = vpack.c.bf16 %v538_v49, %v538_v49  ;;  %v870_v58 = vpack.c.bf16 %v554_v50, %v554_v50  ;;  %v401_v59 = vadd.f32 %v911_v55, %v1055_v18  ;;  %v392_v61 = vpop.f32.mrb[5].mxu0  ;;  %v456_v62 = vpop.f32.mrb[5].mxu1 }
  0xeb   : > { %v465_v60 = vadd.f32 %v927_v56, %v1055_v18  ;;  %696 = vst.msk [vmem:[%s1069_s30] sm:$0xf] %vm695_vm1, %v851_v51  ;;  %712 = vst.msk [vmem:[%s1069_s30 + $0x40] sm:$0xf] %vm695_vm1, %v867_v52  ;;  %v852_v63 = vpack.c.bf16 %v536_v53, %v536_v53  ;;  %v868_v0 = vpack.c.bf16 %v552_v54, %v552_v54  ;;  %v912_v3 = vpop.f32.mrb[6].mxu0  ;;  %v928_v4 = vpop.f32.mrb[6].mxu1 }
  0xec   : > { %v393_v1 = vadd.f32 %v1055_v18, %v392_v61  ;;  %v457_v2 = vadd.f32 %v1055_v18, %v456_v62  ;;  %699 = vst.msk [vmem:[%s1069_s30 + $0xc] sm:$0xf] %vm695_vm1, %v854_v57  ;;  %715 = vst.msk [vmem:[%s1069_s30 + $0x4c] sm:$0xf] %vm695_vm1, %v870_v58  ;;  %v509_v5 = vmul.f32 0.2, %v401_v59  ;;  %v404_v7 = vadd.f32 %v912_v3, %v1055_v18 }
  0xed   : > { %v525_v6 = vmul.f32 0.2, %v465_v60  ;;  %v468_v8 = vadd.f32 %v928_v4, %v1055_v18  ;;  %v395_v9 = vpop.f32.mrb[7].mxu0  ;;  %v459_v10 = vpop.f32.mrb[7].mxu1  ;;  %697 = vst.msk [vmem:[%s1069_s30 + $0x4] sm:$0xf] %vm695_vm1, %v852_v63 }
  0xee   : > { %713 = vst.msk [vmem:[%s1069_s30 + $0x44] sm:$0xf] %vm695_vm1, %v868_v0  ;;  %v507_v11 = vmul.f32 0.2, %v393_v1  ;;  %v523_v12 = vmul.f32 0.2, %v457_v2  ;;  %v396_v13 = vadd.f32 %v1055_v18, %v395_v9  ;;  %v460_v14 = vadd.f32 %v1055_v18, %v459_v10 }
  0xef   : > { %v541_v15 = vmax.f32 %v401_v59, %v509_v5  ;;  %v557_v16 = vmax.f32 %v465_v60, %v525_v6  ;;  %v510_v17 = vmul.f32 0.2, %v404_v7  ;;  %v526_v19 = vmul.f32 0.2, %v468_v8 }
  0xf0   : > { %v539_v20 = vmax.f32 %v393_v1, %v507_v11  ;;  %v555_v21 = vmax.f32 %v457_v2, %v523_v12  ;;  %v508_v22 = vmul.f32 0.2, %v396_v13  ;;  %v524_v23 = vmul.f32 0.2, %v460_v14 }
  0xf1   : > { %v857_v24 = vpack.c.bf16 %v541_v15, %v541_v15  ;;  %v873_v25 = vpack.c.bf16 %v557_v16, %v557_v16  ;;  %v542_v26 = vmax.f32 %v404_v7, %v510_v17  ;;  %v558_v27 = vmax.f32 %v468_v8, %v526_v19  ;;  %v915_v32 = vpop.f32.mrb[8].mxu0  ;;  %v931_v33 = vpop.f32.mrb[8].mxu1 }
  0xf2   : > { %v855_v28 = vpack.c.bf16 %v539_v20, %v539_v20  ;;  %v871_v29 = vpack.c.bf16 %v555_v21, %v555_v21  ;;  %v540_v30 = vmax.f32 %v396_v13, %v508_v22  ;;  %v556_v31 = vmax.f32 %v460_v14, %v524_v23  ;;  %v408_v38 = vpop.f32.mrb[9].mxu0  ;;  %v472_v39 = vpop.f32.mrb[9].mxu1 }
  0xf3   : > { %702 = vst.msk [vmem:[%s1069_s30 + $0x18] sm:$0xf] %vm695_vm1, %v857_v24  ;;  %718 = vst.msk [vmem:[%s1069_s30 + $0x58] sm:$0xf] %vm695_vm1, %v873_v25  ;;  %v858_v34 = vpack.c.bf16 %v542_v26, %v542_v26  ;;  %v874_v35 = vpack.c.bf16 %v558_v27, %v558_v27  ;;  %v417_v36 = vadd.f32 %v915_v32, %v1055_v18  ;;  %v916_v44 = vpop.f32.mrb[10].mxu0  ;;  %v932_v45 = vpop.f32.mrb[10].mxu1 }
  0xf4   : > { %v481_v37 = vadd.f32 %v931_v33, %v1055_v18  ;;  %700 = vst.msk [vmem:[%s1069_s30 + $0x10] sm:$0xf] %vm695_vm1, %v855_v28  ;;  %716 = vst.msk [vmem:[%s1069_s30 + $0x50] sm:$0xf] %vm695_vm1, %v871_v29  ;;  %v856_v40 = vpack.c.bf16 %v540_v30, %v540_v30  ;;  %v872_v41 = vpack.c.bf16 %v556_v31, %v556_v31  ;;  %v411_v50 = vpop.f32.mrb[11].mxu0  ;;  %v475_v51 = vpop.f32.mrb[11].mxu1 }
  0xf5   : > { %v409_v42 = vadd.f32 %v1055_v18, %v408_v38  ;;  %v473_v43 = vadd.f32 %v1055_v18, %v472_v39  ;;  %703 = vst.msk [vmem:[%s1069_s30 + $0x1c] sm:$0xf] %vm695_vm1, %v858_v34  ;;  %719 = vst.msk [vmem:[%s1069_s30 + $0x5c] sm:$0xf] %vm695_vm1, %v874_v35  ;;  %v513_v46 = vmul.f32 0.2, %v417_v36  ;;  %v420_v48 = vadd.f32 %v916_v44, %v1055_v18 }
  0xf6   : > { %v529_v47 = vmul.f32 0.2, %v481_v37  ;;  %v484_v49 = vadd.f32 %v932_v45, %v1055_v18  ;;  %701 = vst.msk [vmem:[%s1069_s30 + $0x14] sm:$0xf] %vm695_vm1, %v856_v40  ;;  %717 = vst.msk [vmem:[%s1069_s30 + $0x54] sm:$0xf] %vm695_vm1, %v872_v41  ;;  %v412_v54 = vadd.f32 %v1055_v18, %v411_v50  ;;  %v476_v55 = vadd.f32 %v1055_v18, %v475_v51 }
  0xf7   : > { %v511_v52 = vmul.f32 0.2, %v409_v42  ;;  %v527_v53 = vmul.f32 0.2, %v473_v43  ;;  %v545_v56 = vmax.f32 %v417_v36, %v513_v46  ;;  %v514_v58 = vmul.f32 0.2, %v420_v48 }
  0xf8   : > { %v561_v57 = vmax.f32 %v481_v37, %v529_v47  ;;  %v530_v59 = vmul.f32 0.2, %v484_v49  ;;  %v512_v62 = vmul.f32 0.2, %v412_v54  ;;  %v528_v63 = vmul.f32 0.2, %v476_v55 }
  0xf9   : > { %v543_v60 = vmax.f32 %v409_v42, %v511_v52  ;;  %v559_v61 = vmax.f32 %v473_v43, %v527_v53  ;;  %v861_v0 = vpack.c.bf16 %v545_v56, %v545_v56  ;;  %v546_v2 = vmax.f32 %v420_v48, %v514_v58  ;;  %v919_v8 = vpop.f32.mrb[12].mxu0  ;;  %v935_v9 = vpop.f32.mrb[12].mxu1 }
  0xfa   : > { %v877_v1 = vpack.c.bf16 %v561_v57, %v561_v57  ;;  %v562_v3 = vmax.f32 %v484_v49, %v530_v59  ;;  %v544_v6 = vmax.f32 %v412_v54, %v512_v62  ;;  %v560_v7 = vmax.f32 %v476_v55, %v528_v63  ;;  %v424_v14 = vpop.f32.mrb[13].mxu0  ;;  %v488_v15 = vpop.f32.mrb[13].mxu1 }
  0xfb   : > { %v859_v4 = vpack.c.bf16 %v543_v60, %v543_v60  ;;  %v875_v5 = vpack.c.bf16 %v559_v61, %v559_v61  ;;  %706 = vst.msk [vmem:[%s1069_s30 + $0x28] sm:$0xf] %vm695_vm1, %v861_v0  ;;  %v862_v10 = vpack.c.bf16 %v546_v2, %v546_v2  ;;  %v433_v12 = vadd.f32 %v919_v8, %v1055_v18  ;;  %v920_v21 = vpop.f32.mrb[14].mxu0  ;;  %v936_v22 = vpop.f32.mrb[14].mxu1 }
  0xfc   : > { %722 = vst.msk [vmem:[%s1069_s30 + $0x68] sm:$0xf] %vm695_vm1, %v877_v1  ;;  %v878_v11 = vpack.c.bf16 %v562_v3, %v562_v3  ;;  %v497_v13 = vadd.f32 %v935_v9, %v1055_v18  ;;  %v860_v16 = vpack.c.bf16 %v544_v6, %v544_v6  ;;  %v876_v17 = vpack.c.bf16 %v560_v7, %v560_v7  ;;  %v427_v27 = vpop.f32.mrb[15].mxu0  ;;  %v491_v28 = vpop.f32.mrb[15].mxu1 }
  0xfd   : > { %704 = vst.msk [vmem:[%s1069_s30 + $0x20] sm:$0xf] %vm695_vm1, %v859_v4  ;;  %720 = vst.msk [vmem:[%s1069_s30 + $0x60] sm:$0xf] %vm695_vm1, %v875_v5  ;;  %v425_v19 = vadd.f32 %v1055_v18, %v424_v14  ;;  %v489_v20 = vadd.f32 %v1055_v18, %v488_v15  ;;  %v517_v23 = vmul.f32 0.2, %v433_v12  ;;  %v436_v25 = vadd.f32 %v920_v21, %v1055_v18 }
  0xfe   : > { %707 = vst.msk [vmem:[%s1069_s30 + $0x2c] sm:$0xf] %vm695_vm1, %v862_v10  ;;  %723 = vst.msk [vmem:[%s1069_s30 + $0x6c] sm:$0xf] %vm695_vm1, %v878_v11  ;;  %v533_v24 = vmul.f32 0.2, %v497_v13  ;;  %v500_v26 = vadd.f32 %v936_v22, %v1055_v18  ;;  %v428_v31 = vadd.f32 %v1055_v18, %v427_v27  ;;  %v492_v32 = vadd.f32 %v1055_v18, %v491_v28 }
  0xff   : > { %705 = vst.msk [vmem:[%s1069_s30 + $0x24] sm:$0xf] %vm695_vm1, %v860_v16  ;;  %721 = vst.msk [vmem:[%s1069_s30 + $0x64] sm:$0xf] %vm695_vm1, %v876_v17  ;;  %v515_v29 = vmul.f32 0.2, %v425_v19  ;;  %v549_v33 = vmax.f32 %v433_v12, %v517_v23 }
 0x100   : > { %v531_v30 = vmul.f32 0.2, %v489_v20  ;;  %v565_v34 = vmax.f32 %v497_v13, %v533_v24  ;;  %v518_v35 = vmul.f32 0.2, %v436_v25  ;;  %v534_v36 = vmul.f32 0.2, %v500_v26 }
 0x101   : > { %v547_v37 = vmax.f32 %v425_v19, %v515_v29  ;;  %v516_v39 = vmul.f32 0.2, %v428_v31  ;;  %v532_v40 = vmul.f32 0.2, %v492_v32  ;;  %v865_v41 = vpack.c.bf16 %v549_v33, %v549_v33 }
 0x102   : > { %v563_v38 = vmax.f32 %v489_v20, %v531_v30  ;;  %v881_v42 = vpack.c.bf16 %v565_v34, %v565_v34  ;;  %v550_v43 = vmax.f32 %v436_v25, %v518_v35  ;;  %v566_v44 = vmax.f32 %v500_v26, %v534_v36 }
 0x103   : > { %v863_v18 = vpack.c.bf16 %v547_v37, %v547_v37  ;;  %v548_v46 = vmax.f32 %v428_v31, %v516_v39  ;;  %v564_v47 = vmax.f32 %v492_v32, %v532_v40  ;;  %710 = vst.msk [vmem:[%s1069_s30 + $0x38] sm:$0xf] %vm695_vm1, %v865_v41 }
 0x104   : > { %v879_v45 = vpack.c.bf16 %v563_v38, %v563_v38  ;;  %726 = vst.msk [vmem:[%s1069_s30 + $0x78] sm:$0xf] %vm695_vm1, %v881_v42  ;;  %v866_v48 = vpack.c.bf16 %v550_v43, %v550_v43  ;;  %v882_v49 = vpack.c.bf16 %v566_v44, %v566_v44 }
 0x105   : > { %708 = vst.msk [vmem:[%s1069_s30 + $0x30] sm:$0xf] %vm695_vm1, %v863_v18  ;;  %v864_v50 = vpack.c.bf16 %v548_v46, %v548_v46  ;;  %v880_v51 = vpack.c.bf16 %v564_v47, %v564_v47 }
 0x106   : > { %724 = vst.msk [vmem:[%s1069_s30 + $0x70] sm:$0xf] %vm695_vm1, %v879_v45  ;;  %711 = vst.msk [vmem:[%s1069_s30 + $0x3c] sm:$0xf] %vm695_vm1, %v866_v48 }
 0x107   : > { %727 = vst.msk [vmem:[%s1069_s30 + $0x7c] sm:$0xf] %vm695_vm1, %v882_v49  ;;  %709 = vst.msk [vmem:[%s1069_s30 + $0x34] sm:$0xf] %vm695_vm1, %v864_v50 }
 0x108   : > { %725 = vst.msk [vmem:[%s1069_s30 + $0x74] sm:$0xf] %vm695_vm1, %v880_v51 }
 0x109 PF: > { %s13_s12 = sadd.s32 1, %s973_s12  }
 0x10a   : > { %p10_p4 = scmp.ge.s32.totalorder %s13_s12, 4  }
 0x10c   :  { %12 = sbr.rel (!%p10_p4) target bundleno = 1 (0x1), region = 60 }

// kernel: _lambda_.13
= control target key start
LH: loop header
LB: loop body
LE: loop exit
PB: predicated region body
PF: predicated region fallthrough
CT: control target
= control target key end

     0   :  { %s6140_s12 = smov 0   ;;  %s7349_s0 = inlined_call_operand.vmem [shape: f32[806,68], index: 0, kind: input, shape index: {}]   ;;  %s7350_s1 = inlined_call_operand.vmem [shape: f32[9,68,32], index: 1, kind: input, shape index: {}]   ;;  %s7351_s2 = inlined_call_operand.vmem [shape: f32[1,32], index: 2, kind: input, shape index: {}]   ;;  %s7352_s3 = inlined_call_operand.vmem [shape: bf16[768,32], index: 3, kind: output, shape index: {}]  }
   0x1 LB: > { %s4023_s13 = sadd.s32 4294967295, %s6118_s12   ;;  %p4026_p0 = scmp.ge.s32.totalorder %s6118_s12, 1  ;;  %s6118_s12 = sphi %s6140_s12, %s13_s12  }
   0x2   : > { %p127_p1 = scmp.lt.s32.totalorder %s6118_s12, 4 }
   0x4   : > { %p128_p2 = pnand %p4026_p0, %p127_p1 }
   0x5   : > { %v4063_v0 = vld [vmem:[%s7350_s1 + $0x48] sm:$0xff] (!%p128_p2)  ;;  %v4064_v1 = vld [vmem:[%s7350_s1 + $0x50] sm:$0xff] (!%p128_p2)  ;;  %v4321_v2 = vld [vmem:[%s7350_s1 + $0x120] sm:$0xff] (!%p128_p2)  ;;  %s4029_s20 = sshll.u32 (!%p128_p2), %s4023_s13, 8  ;;  %vm239_vm0 = vcmask (!%p128_p2), 556032   ;;  %vm336_vm1 = vcmask (!%p128_p2), 1043456  }
   0x6   : > { %131 = sbr.rel (%p128_p2) target bundleno = 535 (0x217), region = 32  ;;  %v5693_v3 = vpack.c.bf16 (!%p128_p2), %v4064_v1, %v4063_v0  ;;  %v4322_v4 = vld [vmem:[%s7350_s1 + $0x128] sm:$0xff] (!%p128_p2)  ;;  %v4065_v5 = vld [vmem:[%s7350_s1 + $0x58] sm:$0xff] (!%p128_p2)  ;;  %v4066_v6 = vld [vmem:[%s7350_s1 + $0x60] sm:$0xff] (!%p128_p2)  ;;  %s6193_s16 = scalar_lea.vmem (!%p128_p2), %s7349_s0, %s4029_s20  ;;  %vm3920_vm2 = vcmask (!%p128_p2), 257024  }
   0x7   : > { %v6168_v7 = vpack.c.bf16 (!%p128_p2), %v4322_v4, %v4321_v2  ;;  %v5697_v8 = vpack.c.bf16 (!%p128_p2), %v4066_v6, %v4065_v5  ;;  %v4323_v9 = vld [vmem:[%s7350_s1 + $0x130] sm:$0xff] (!%p128_p2)  ;;  %v4324_v10 = vld [vmem:[%s7350_s1 + $0x138] sm:$0xff] (!%p128_p2)  ;;  %v4067_v11 = vld [vmem:[%s7350_s1 + $0x68] sm:$0xff] (!%p128_p2) }
   0x8   : > { %5694 = vmatprep.subr.bf16.mxu1 (!%p128_p2), %v5693_v3  ;;  %v6179_v12 = vpack.c.bf16 (!%p128_p2), %v4324_v10, %v4323_v9  ;;  %v4068_v13 = vld [vmem:[%s7350_s1 + $0x70] sm:$0xff] (!%p128_p2)  ;;  %v4325_v14 = vld [vmem:[%s7350_s1 + $0x140] sm:$0xff] (!%p128_p2)  ;;  %v4326_v15 = vld [vmem:[%s7350_s1 + $0x148] sm:$0xff] (!%p128_p2) }
   0x9   : > { %5758 = vmatprep.subr.bf16.mxu0 (!%p128_p2), %v6168_v7  ;;  %5696 = vmatpush3.bf16.msra.mxu1 (!%p128_p2), %v5693_v3  ;;  %v5701_v16 = vpack.c.bf16 (!%p128_p2), %v4068_v13, %v4067_v11  ;;  %v4069_v17 = vld [vmem:[%s7350_s1 + $0x78] sm:$0xff] (!%p128_p2)  ;;  %v6201_v18 = vpack.c.bf16 (!%p128_p2), %v4326_v15, %v4325_v14  ;;  %v4070_v19 = vld [vmem:[%s7350_s1 + $0x80] sm:$0xff] (!%p128_p2)  ;;  %v4327_v22 = vld [vmem:[%s7350_s1 + $0x150] sm:$0xff] (!%p128_p2) }
   0xa   : > { %5760 = vmatpush3.bf16.msra.mxu0 (!%p128_p2), %v6168_v7  ;;  %5698 = vmatprep.subr.bf16.mxu1 (!%p128_p2), %v5697_v8  ;;  %v4031_v20 = vld [vmem:[%s6193_s16 + $0x1] sm:$0xff] (!%p128_p2)  ;;  %v4289_v21 = vld [vmem:[%s6193_s16 + $0x13] sm:$0xff] (!%p128_p2)  ;;  %v5705_v24 = vpack.c.bf16 (!%p128_p2), %v4070_v19, %v4069_v17  ;;  %v4032_v32 = vld [vmem:[%s6193_s16 + $0x9] sm:$0xff] (!%p128_p2) }
   0xb   : > { %5762 = vmatprep.subr.bf16.mxu0 (!%p128_p2), %v6179_v12  ;;  %v4328_v23 = vld [vmem:[%s7350_s1 + $0x158] sm:$0xff] (!%p128_p2)  ;;  %5117 = vmatprep.mubr.msk.f32.mxu1 (!%p128_p2), %vm239_vm0, %v4031_v20  ;;  %v4071_v26 = vld [vmem:[%s7350_s1 + $0x88] sm:$0xf] (!%p128_p2)  ;;  %v4329_v27 = vld [vmem:[%s7350_s1 + $0x160] sm:$0xf] (!%p128_p2) }
   0xc   : > { %5381 = vmatprep.mubr.msk.f32.mxu0 (!%p128_p2), %vm239_vm0, %v4289_v21  ;;  %v6218_v25 = vpack.c.bf16 (!%p128_p2), %v4328_v23, %v4327_v22  ;;  %v186_v28 = vld [vmem:[%s7350_s1] sm:$0xff] (!%p128_p2)  ;;  %v187_v29 = vld [vmem:[%s7350_s1 + $0x8] sm:$0xff] (!%p128_p2)  ;;  %v4397_v31 = vld [vmem:[%s7350_s1 + $0x170] sm:$0xff] (!%p128_p2) }
   0xd   : > { %5700 = vmatpush3.bf16.msra.mxu1 %v5697_v8  ;;  %v4396_v30 = vld [vmem:[%s7350_s1 + $0x168] sm:$0xff]  ;;  %v5709_v33 = vpack.c.bf16 %v187_v29, %v186_v28  ;;  %v4290_v34 = vld [vmem:[%s6193_s16 + $0x1b] sm:$0xff]  ;;  %v4033_v36 = vld [vmem:[%s6193_s16 + $0x11] sm:$0xff] }
   0xe   : > { %5764 = vmatpush3.bf16.msra.mxu0 %v6179_v12  ;;  %5702 = vmatprep.subr.bf16.mxu1 %v5701_v16  ;;  %v5773_v35 = vpack.c.bf16 %v4397_v31, %v4396_v30  ;;  %v4398_v37 = vld [vmem:[%s7350_s1 + $0x178] sm:$0xff]  ;;  %v4399_v38 = vld [vmem:[%s7350_s1 + $0x180] sm:$0xff]  ;;  %v188_v40 = vld [vmem:[%s7350_s1 + $0x10] sm:$0xff] }
   0xf   : > { %5766 = vmatprep.subr.bf16.mxu0 %v6201_v18  ;;  %v4291_v39 = vld [vmem:[%s6193_s16 + $0x23] sm:$0xff]  ;;  %v189_v41 = vld [vmem:[%s7350_s1 + $0x18] sm:$0xff]  ;;  %v4401_v44 = vld [vmem:[%s7350_s1 + $0x190] sm:$0xff]  ;;  %v5777_v47 = vpack.c.bf16 %v4399_v38, %v4398_v37 }
  0x10   : > { %v4034_v42 = vld [vmem:[%s6193_s16 + $0x19] sm:$0xff]  ;;  %v4400_v43 = vld [vmem:[%s7350_s1 + $0x188] sm:$0xff]  ;;  %v5713_v49 = vpack.c.bf16 %v189_v41, %v188_v40  ;;  %v4037_v57 = vld [vmem:[%s6193_s16 + $0x31] sm:$0xff] }
  0x11   : > { %5704 = vmatpush3.bf16.msra.mxu1 %v5701_v16  ;;  %v4292_v45 = vld [vmem:[%s6193_s16 + $0x2b] sm:$0xff]  ;;  %v4035_v46 = vld [vmem:[%s6193_s16 + $0x21] sm:$0xff]  ;;  %v4293_v48 = vld [vmem:[%s6193_s16 + $0x33] sm:$0xff]  ;;  %v5781_v50 = vpack.c.bf16 %v4401_v44, %v4400_v43 }
  0x12   : > { %5768 = vmatpush3.bf16.msra.mxu0 %v6201_v18  ;;  %5706 = vmatprep.subr.bf16.mxu1 %v5705_v24  ;;  %v190_v51 = vld [vmem:[%s7350_s1 + $0x20] sm:$0xff]  ;;  %v191_v52 = vld [vmem:[%s7350_s1 + $0x28] sm:$0xff]  ;;  %v4402_v54 = vld [vmem:[%s7350_s1 + $0x198] sm:$0xff] }
  0x13   : > { %5770 = vmatprep.subr.bf16.mxu0 %v6218_v25  ;;  %v4036_v53 = vld [vmem:[%s6193_s16 + $0x29] sm:$0xff]  ;;  %v4403_v55 = vld [vmem:[%s7350_s1 + $0x1a0] sm:$0xff]  ;;  %v5717_v59 = vpack.c.bf16 %v191_v52, %v190_v51  ;;  %v193_v62 = vld [vmem:[%s7350_s1 + $0x38] sm:$0xff] }
  0x14   : > { %v4294_v56 = vld [vmem:[%s6193_s16 + $0x3b] sm:$0xff]  ;;  %v4295_v58 = vld [vmem:[%s6193_s16 + $0x43] sm:$0xff]  ;;  %v5785_v60 = vpack.c.bf16 %v4403_v55, %v4402_v54  ;;  %v192_v61 = vld [vmem:[%s7350_s1 + $0x30] sm:$0xff] }
  0x15   : > { %5708 = vmatpush3.bf16.msra.mxu1 %v5705_v24  ;;  %v4038_v63 = vld [vmem:[%s6193_s16 + $0x39] sm:$0xff]  ;;  %v4296_v0 = vld [vmem:[%s6193_s16 + $0x4b] sm:$0xff]  ;;  %v4039_v1 = vld [vmem:[%s6193_s16 + $0x41] sm:$0xff]  ;;  %v5721_v3 = vpack.c.bf16 %v193_v62, %v192_v61 }
  0x16   : > { %5772 = vmatpush3.bf16.msra.mxu0 %v6218_v25  ;;  %5115 = vmatprep.subr.msk.mxu1 %vm336_vm1, %v4071_v26  ;;  %v4297_v2 = vld [vmem:[%s6193_s16 + $0x53] sm:$0xff]  ;;  %v4040_v4 = vld [vmem:[%s6193_s16 + $0x49] sm:$0xff]  ;;  %v4298_v9 = vld [vmem:[%s6193_s16 + $0x5b] sm:$0xff] }
  0x17   : > { %5379 = vmatprep.subr.msk.mxu0 %vm336_vm1, %v4329_v27  ;;  %v4404_v5 = vld [vmem:[%s7350_s1 + $0x1a8] sm:$0xf]  ;;  %v4471_v6 = vld [vmem:[%s7350_s1 + $0x1b0] sm:$0xff]  ;;  %v4472_v8 = vld [vmem:[%s7350_s1 + $0x1b8] sm:$0xff] }
  0x18   : > { %v4041_v10 = vld [vmem:[%s6193_s16 + $0x51] sm:$0xff]  ;;  %v4299_v11 = vld [vmem:[%s6193_s16 + $0x63] sm:$0xff]  ;;  %v5789_v13 = vpack.c.bf16 %v4472_v8, %v4471_v6  ;;  %v4042_v17 = vld [vmem:[%s6193_s16 + $0x59] sm:$0xff] }
  0x19   : > { %5116 = vmatpush3.msk.msra.mxu1 %vm336_vm1, %v4071_v26  ;;  %v194_v14 = vld [vmem:[%s7350_s1 + $0x40] sm:$0xf]  ;;  %v4171_v15 = vld [vmem:[%s7350_s1 + $0x90] sm:$0xff]  ;;  %v4172_v16 = vld [vmem:[%s7350_s1 + $0x98] sm:$0xff] }
  0x1a   : > { %5380 = vmatpush3.msk.msra.mxu0 %vm336_vm1, %v4329_v27  ;;  %5118 = vmatmul.mubr.msk.f32.vlgmr.msra.gmra.mrb[0].mxu1 %vm239_vm0, %v4032_v32  ;;  %v4300_v19 = vld [vmem:[%s6193_s16 + $0x6b] sm:$0xff]  ;;  %v4043_v20 = vld [vmem:[%s6193_s16 + $0x61] sm:$0xff]  ;;  %v4301_v21 = vld [vmem:[%s6193_s16 + $0x73] sm:$0xff]  ;;  %v6346_v22 = vpack.c.bf16 %v4172_v16, %v4171_v15 }
  0x1b   : > { %5710 = vmatprep.subr.bf16.mxu1 %v5709_v33  ;;  %5382 = vmatmul.mubr.msk.f32.vlgmr.msra.gmra.mrb[0].mxu0 %vm239_vm0, %v4290_v34  ;;  %v4044_v23 = vld [vmem:[%s6193_s16 + $0x69] sm:$0xff]  ;;  %v4302_v24 = vld [vmem:[%s6193_s16 + $0x7b] sm:$0xff]  ;;  %v4045_v26 = vld [vmem:[%s6193_s16 + $0x71] sm:$0xff] }
  0x1c   : > { %5774 = vmatprep.subr.bf16.mxu0 %v5773_v35  ;;  %5712 = vmatpush3.bf16.msra.mxu1 %v5709_v33  ;;  %v4303_v27 = vld [vmem:[%s6193_s16 + $0x83] sm:$0xff]  ;;  %v4046_v28 = vld [vmem:[%s6193_s16 + $0x79] sm:$0xff]  ;;  %v4304_v29 = vld [vmem:[%s6193_s16 + $0x8b] sm:$0xff] }
  0x1d   : > { %5776 = vmatpush3.bf16.msra.mxu0 %v5773_v35  ;;  %5120 = vmatprep.mubr.msk.f32.mxu1 %vm239_vm0, %v4033_v36  ;;  %v4047_v30 = vld [vmem:[%s6193_s16 + $0x81] sm:$0xff]  ;;  %v4364_v31 = vld [vmem:[%s6193_s16 + $0x14] sm:$0xff]  ;;  %v4048_v34 = vld [vmem:[%s6193_s16 + $0x89] sm:$0xff] }
  0x1e   : > { %5384 = vmatprep.mubr.msk.f32.mxu0 %vm239_vm0, %v4291_v39  ;;  %5121 = vmatmul.mubr.msk.f32.gmra.mrb[2].mxu1 %vm239_vm0, %v4034_v42  ;;  %v4473_v32 = vld [vmem:[%s7350_s1 + $0x1c0] sm:$0xff]  ;;  %v4474_v33 = vld [vmem:[%s7350_s1 + $0x1c8] sm:$0xff]  ;;  %v4049_v36 = vld [vmem:[%s6193_s16 + $0x91] sm:$0xff] }
  0x1f   : > { %5385 = vmatmul.mubr.msk.f32.gmra.mrb[2].mxu0 %vm239_vm0, %v4292_v45  ;;  %5123 = vmatprep.mubr.msk.f32.mxu1 %vm239_vm0, %v4035_v46  ;;  %v4365_v35 = vld [vmem:[%s6193_s16 + $0x1c] sm:$0xff]  ;;  %v6380_v37 = vld [vmem:[%s6193_s16 + $0x24] sm:$0xff]  ;;  %v5793_v38 = vpack.c.bf16 %v4474_v33, %v4473_v32  ;;  %v4475_v39 = vld [vmem:[%s7350_s1 + $0x1d0] sm:$0xff] }
  0x20   : > { %5387 = vmatprep.mubr.msk.f32.mxu0 %vm239_vm0, %v4293_v48  ;;  %5778 = vmatprep.subr.bf16.mxu0 %v5777_v47  ;;  %v4476_v40 = vld [vmem:[%s7350_s1 + $0x1d8] sm:$0xff]  ;;  %v6395_v42 = vld [vmem:[%s6193_s16 + $0x2c] sm:$0xff]  ;;  %v4051_v43 = vld [vmem:[%s6193_s16 + $0xa1] sm:$0xff] }
  0x21   : > { %5780 = vmatpush3.bf16.msra.mxu0 %v5777_v47  ;;  %5714 = vmatprep.subr.bf16.mxu1 %v5713_v49  ;;  %v4050_v41 = vld [vmem:[%s6193_s16 + $0x99] sm:$0xff]  ;;  %v5797_v45 = vpack.c.bf16 %v4476_v40, %v4475_v39  ;;  %v4478_v47 = vld [vmem:[%s7350_s1 + $0x1e8] sm:$0xff]  ;;  %v4057_v62 = vld [vmem:[%s6193_s16 + $0xd1] sm:$0xff] }
  0x22   : > { %5124 = vmatmul.mubr.msk.f32.gmra.mrb[4].mxu1 %vm239_vm0, %v4036_v53  ;;  %5782 = vmatprep.subr.bf16.mxu0 %v5781_v50  ;;  %v6399_v44 = vld [vmem:[%s6193_s16 + $0x34] sm:$0xff]  ;;  %v4477_v46 = vld [vmem:[%s7350_s1 + $0x1e0] sm:$0xff]  ;;  %v4052_v48 = vld [vmem:[%s6193_s16 + $0xa9] sm:$0xff] }
  0x23   : > { %5388 = vmatmul.mubr.msk.f32.gmra.mrb[4].mxu0 %vm239_vm0, %v4294_v56  ;;  %5126 = vmatprep.mubr.msk.f32.mxu1 %vm239_vm0, %v4037_v57  ;;  %v6419_v51 = vld [vmem:[%s6193_s16 + $0x44] sm:$0xff]  ;;  %v5801_v52 = vpack.c.bf16 %v4478_v47, %v4477_v46  ;;  %v4054_v53 = vld [vmem:[%s6193_s16 + $0xb9] sm:$0xff]  ;;  %v6429_v54 = vld [vmem:[%s6193_s16 + $0x4c] sm:$0xff] }
  0x24   : > { %5390 = vmatprep.mubr.msk.f32.mxu0 %vm239_vm0, %v4295_v58  ;;  %5716 = vmatpush3.bf16.msra.mxu1 %v5713_v49  ;;  %v6415_v49 = vld [vmem:[%s6193_s16 + $0x3c] sm:$0xff]  ;;  %v6433_v56 = vld [vmem:[%s6193_s16 + $0x54] sm:$0xff]  ;;  %v4479_v57 = vld [vmem:[%s7350_s1 + $0x1f0] sm:$0xf] }
  0x25   : > { %5784 = vmatpush3.bf16.msra.mxu0 %v5781_v50  ;;  %5718 = vmatprep.subr.bf16.mxu1 %v5717_v59  ;;  %v4053_v50 = vld [vmem:[%s6193_s16 + $0xb1] sm:$0xff]  ;;  %v4055_v55 = vld [vmem:[%s6193_s16 + $0xc1] sm:$0xff] }
  0x26   : > { %5127 = vmatmul.mubr.msk.f32.gmra.mrb[6].mxu1 %vm239_vm0, %v4038_v63  ;;  %5786 = vmatprep.subr.bf16.mxu0 %v5785_v60  ;;  %v4546_v58 = vld [vmem:[%s7350_s1 + $0x1f8] sm:$0xff]  ;;  %v6456_v63 = vld [vmem:[%s6193_s16 + $0x64] sm:$0xff]  ;;  %v6574_v40 = vld [vmem:[%s6193_s16 + $0xcc] sm:$0xff] }
  0x27   : > { %5391 = vmatmul.mubr.msk.f32.gmra.mrb[6].mxu0 %vm239_vm0, %v4296_v0  ;;  %5129 = vmatprep.mubr.msk.f32.mxu1 %vm239_vm0, %v4039_v1  ;;  %v6452_v61 = vld [vmem:[%s6193_s16 + $0x5c] sm:$0xff]  ;;  %v4061_v8 = vld [vmem:[%s6193_s16 + $0xf1] sm:$0xff]  ;;  %v4174_v16 = vld [vmem:[%s7350_s1 + $0xa8] sm:$0xff] }
  0x28   : > { %5393 = vmatprep.mubr.msk.f32.mxu0 %vm239_vm0, %v4297_v2  ;;  %5720 = vmatpush3.bf16.msra.mxu1 %v5717_v59  ;;  %v4547_v59 = vld [vmem:[%s7350_s1 + $0x200] sm:$0xff]  ;;  %v6469_v2 = vld [vmem:[%s6193_s16 + $0x6c] sm:$0xff]  ;;  %v161_v39 = vld [vmem:[%s6193_s16 + $0x38] sm:$0xff] }
  0x29   : > { %5788 = vmatpush3.bf16.msra.mxu0 %v5785_v60  ;;  %5722 = vmatprep.subr.bf16.mxu1 %v5721_v3  ;;  %v4056_v60 = vld [vmem:[%s6193_s16 + $0xc9] sm:$0xff]  ;;  %v6459_v0 = vpack.c.bf16 %v4547_v59, %v4546_v58  ;;  %v4058_v1 = vld [vmem:[%s6193_s16 + $0xd9] sm:$0xff] }
  0x2a   : > { %5130 = vmatmul.mubr.msk.f32.gmra.mrb[8].mxu1 %vm239_vm0, %v4040_v4  ;;  %5445 = vmatprep.subr.msk.mxu0 %vm336_vm1, %v4404_v5  ;;  %v6474_v4 = vld [vmem:[%s6193_s16 + $0x74] sm:$0xff]  ;;  %v6485_v6 = vld [vmem:[%s6193_s16 + $0x7c] sm:$0xff]  ;;  %v4178_v32 = vld [vmem:[%s7350_s1 + $0xc8] sm:$0xff] }
  0x2b   : > { %5394 = vmatmul.mubr.msk.f32.gmra.mrb[8].mxu0 %vm239_vm0, %v4298_v9  ;;  %5132 = vmatprep.mubr.msk.f32.mxu1 %vm239_vm0, %v4041_v10  ;;  %v6489_v9 = vld [vmem:[%s6193_s16 + $0x84] sm:$0xff]  ;;  %v4062_v10 = vld [vmem:[%s6193_s16 + $0xf9] sm:$0xff]  ;;  %v6614_v58 = vld [vmem:[%s6193_s16 + $0xec] sm:$0xff] }
  0x2c   : > { %5396 = vmatprep.mubr.msk.f32.mxu0 %vm239_vm0, %v4299_v11  ;;  %5724 = vmatpush3.bf16.msra.mxu1 %v5721_v3  ;;  %v4059_v3 = vld [vmem:[%s6193_s16 + $0xe1] sm:$0xff]  ;;  %v6499_v11 = vld [vmem:[%s6193_s16 + $0x8c] sm:$0xff]  ;;  %v4246_v46 = vld [vmem:[%s7350_s1 + $0xd8] sm:$0xff] }
  0x2d   : > { %5446 = vmatpush3.msk.msra.mxu0 %vm336_vm1, %v4404_v5  ;;  %5181 = vmatprep.subr.msk.mxu1 %vm336_vm1, %v194_v14  ;;  %v4060_v5 = vld [vmem:[%s6193_s16 + $0xe9] sm:$0xff]  ;;  %v4173_v15 = vld [vmem:[%s7350_s1 + $0xa0] sm:$0xff] }
  0x2e   : > { %5133 = vmatmul.mubr.msk.f32.gmra.mrb[10].mxu1 %vm239_vm0, %v4042_v17  ;;  %5790 = vmatprep.subr.bf16.mxu0 %v5789_v13  ;;  %v155_v17 = vld [vmem:[%s6193_s16 + $0x8] sm:$0xff]  ;;  %v4247_v47 = vld [vmem:[%s7350_s1 + $0xe0] sm:$0xff] }
  0x2f   : > { %5397 = vmatmul.mubr.msk.f32.gmra.mrb[10].mxu0 %vm239_vm0, %v4300_v19  ;;  %5135 = vmatprep.mubr.msk.f32.mxu1 %vm239_vm0, %v4043_v20  ;;  %v6519_v19 = vld [vmem:[%s6193_s16 + $0x9c] sm:$0xff]  ;;  %v156_v20 = vld [vmem:[%s6193_s16 + $0x10] sm:$0xff]  ;;  %v159_v33 = vld [vmem:[%s6193_s16 + $0x28] sm:$0xff] }
  0x30   : > { %5399 = vmatprep.mubr.msk.f32.mxu0 %vm239_vm0, %v4301_v21  ;;  %5182 = vmatpush3.msk.msra.mxu1 %vm336_vm1, %v194_v14  ;;  %v6503_v14 = vld [vmem:[%s6193_s16 + $0x94] sm:$0xff]  ;;  %v6523_v21 = vld [vmem:[%s6193_s16 + $0xa4] sm:$0xff] }
  0x31   : > { %5726 = vmatprep.subr.bf16.mxu1 %v6346_v22  ;;  %v166_v59 = vld [vmem:[%s6193_s16 + $0x60] sm:$0xff] }
  0x32   : > { %5136 = vmatmul.mubr.msk.f32.gmra.mrb[12].mxu1 %vm239_vm0, %v4044_v23  ;;  %v5729_v23 = vpack.c.bf16 %v4174_v16, %v4173_v15  ;;  %v4548_v15 = vld [vmem:[%s7350_s1 + $0x208] sm:$0xff]  ;;  %v4549_v16 = vld [vmem:[%s7350_s1 + $0x210] sm:$0xff] }
  0x33   : > { %5400 = vmatmul.mubr.msk.f32.gmra.mrb[12].mxu0 %vm239_vm0, %v4302_v24  ;;  %5138 = vmatprep.mubr.msk.f32.mxu1 %vm239_vm0, %v4045_v26  ;;  %v4175_v24 = vld [vmem:[%s7350_s1 + $0xb0] sm:$0xff]  ;;  %v4176_v26 = vld [vmem:[%s7350_s1 + $0xb8] sm:$0xff] }
  0x34   : > { %5402 = vmatprep.mubr.msk.f32.mxu0 %vm239_vm0, %v4303_v27  ;;  %v157_v27 = vld [vmem:[%s6193_s16 + $0x18] sm:$0xff] }
  0x36   : > { %5139 = vmatmul.mubr.msk.f32.gmra.mrb[14].mxu1 %vm239_vm0, %v4046_v28  ;;  %v6540_v28 = vld [vmem:[%s6193_s16 + $0xac] sm:$0xff] }
  0x37   : > { %5403 = vmatmul.mubr.msk.f32.gmra.mrb[14].mxu0 %vm239_vm0, %v4304_v29  ;;  %5141 = vmatprep.mubr.msk.f32.mxu1 %vm239_vm0, %v4047_v30  ;;  %v158_v29 = vld [vmem:[%s6193_s16 + $0x20] sm:$0xff]  ;;  %v6544_v30 = vld [vmem:[%s6193_s16 + $0xb4] sm:$0xff] }
  0x38   : > { %5447 = vmatprep.mubr.msk.f32.mxu0 %vm239_vm0, %v4364_v31  ;;  %v5733_v31 = vpack.c.bf16 %v4176_v26, %v4175_v24  ;;  %v4550_v24 = vld [vmem:[%s7350_s1 + $0x218] sm:$0xff]  ;;  %v4551_v26 = vld [vmem:[%s7350_s1 + $0x220] sm:$0xff] }
  0x3a   : > { %5142 = vmatmul.mubr.msk.f32.gmra.mrb[16].mxu1 %vm239_vm0, %v4048_v34  ;;  %v6560_v34 = vld [vmem:[%s6193_s16 + $0xbc] sm:$0xff] }
  0x3b   : > { %5448 = vmatmul.mubr.msk.f32.vlgmr.msra.gmra.mrb[0].mxu0 %vm239_vm0, %v4365_v35  ;;  %5144 = vmatprep.mubr.msk.f32.mxu1 %vm239_vm0, %v4049_v36  ;;  %v160_v35 = vld [vmem:[%s6193_s16 + $0x30] sm:$0xff]  ;;  %v6564_v36 = vld [vmem:[%s6193_s16 + $0xc4] sm:$0xff] }
  0x3c   : > { %5792 = vmatpush3.bf16.msra.mxu0 %v5789_v13  ;;  %5450 = vmatprep.mubr.msk.f32.mxu0 %vm239_vm0, %v6380_v37  ;;  %v154_v13 = vld [vmem:[%s6193_s16] sm:$0xff] }
  0x3d   : > { %5794 = vmatprep.subr.bf16.mxu0 %v5793_v38 }
  0x3e   : > { %5145 = vmatmul.mubr.msk.f32.gmra.mrb[18].mxu1 %vm239_vm0, %v4050_v41  ;;  %v162_v41 = vld [vmem:[%s6193_s16 + $0x40] sm:$0xff] }
  0x3f   : > { %5451 = vmatmul.mubr.msk.f32.gmra.mrb[2].mxu0 %vm239_vm0, %v6395_v42  ;;  %5147 = vmatprep.mubr.msk.f32.mxu1 %vm239_vm0, %v4051_v43  ;;  %v6578_v43 = vld [vmem:[%s6193_s16 + $0xd4] sm:$0xff] }
  0x40   : > { %5453 = vmatprep.mubr.msk.f32.mxu0 %vm239_vm0, %v6399_v44  ;;  %5796 = vmatpush3.bf16.msra.mxu0 %v5793_v38 }
  0x41   : > { %5798 = vmatprep.subr.bf16.mxu0 %v5797_v45 }
  0x42   : > { %5148 = vmatmul.mubr.msk.f32.gmra.mrb[20].mxu1 %vm239_vm0, %v4052_v48  ;;  %v163_v48 = vld [vmem:[%s6193_s16 + $0x48] sm:$0xff] }
  0x43   : > { %5454 = vmatmul.mubr.msk.f32.gmra.mrb[4].mxu0 %vm239_vm0, %v6415_v49  ;;  %5150 = vmatprep.mubr.msk.f32.mxu1 %vm239_vm0, %v4053_v50  ;;  %v6597_v50 = vld [vmem:[%s6193_s16 + $0xdc] sm:$0xff] }
  0x44   : > { %5456 = vmatprep.mubr.msk.f32.mxu0 %vm239_vm0, %v6419_v51  ;;  %5800 = vmatpush3.bf16.msra.mxu0 %v5797_v45  ;;  %v4179_v45 = vld [vmem:[%s7350_s1 + $0xd0] sm:$0xf] }
  0x45   : > { %5802 = vmatprep.subr.bf16.mxu0 %v5801_v52 }
  0x46   : > { %5151 = vmatmul.mubr.msk.f32.gmra.mrb[22].mxu1 %vm239_vm0, %v4054_v53  ;;  %v6601_v53 = vld [vmem:[%s6193_s16 + $0xe4] sm:$0xff] }
  0x47   : > { %5457 = vmatmul.mubr.msk.f32.gmra.mrb[6].mxu0 %vm239_vm0, %v6429_v54  ;;  %5153 = vmatprep.mubr.msk.f32.mxu1 %vm239_vm0, %v4055_v55  ;;  %v6604_v55 = vpack.c.bf16 %v4247_v47, %v4246_v46  ;;  %v4250_v46 = vld [vmem:[%s7350_s1 + $0xf8] sm:$0xff]  ;;  %v6778_v47 = vld [vmem:[%s6193_s16 + $0x22] sm:$0xff] }
  0x48   : > { %5459 = vmatprep.mubr.msk.f32.mxu0 %vm239_vm0, %v6433_v56  ;;  %5804 = vmatpush3.bf16.msra.mxu0 %v5801_v52  ;;  %v164_v52 = vld [vmem:[%s6193_s16 + $0x50] sm:$0xff] }
  0x49   : > { %5511 = vmatprep.subr.msk.mxu0 %vm336_vm1, %v4479_v57 }
  0x4a   : > { %5154 = vmatmul.mubr.msk.f32.gmra.mrb[24].mxu1 %vm239_vm0, %v4056_v60  ;;  %v6619_v60 = vld [vmem:[%s6193_s16 + $0xf4] sm:$0xff] }
  0x4b   : > { %5460 = vmatmul.mubr.msk.f32.gmra.mrb[8].mxu0 %vm239_vm0, %v6452_v61  ;;  %5156 = vmatprep.mubr.msk.f32.mxu1 %vm239_vm0, %v4057_v62  ;;  %v167_v62 = vld [vmem:[%s6193_s16 + $0x68] sm:$0xff] }
  0x4c   : > { %5462 = vmatprep.mubr.msk.f32.mxu0 %vm239_vm0, %v6456_v63  ;;  %5512 = vmatpush3.msk.msra.mxu0 %vm336_vm1, %v4479_v57  ;;  %v165_v57 = vld [vmem:[%s6193_s16 + $0x58] sm:$0xff] }
  0x4d   : > { %5806 = vmatprep.subr.bf16.mxu0 %v6459_v0 }
  0x4e   : > { %5157 = vmatmul.mubr.msk.f32.gmra.mrb[26].mxu1 %vm239_vm0, %v4058_v1  ;;  %v6630_v1 = vld [vmem:[%s6193_s16 + $0xfc] sm:$0xff] }
  0x4f   : > { %5463 = vmatmul.mubr.msk.f32.gmra.mrb[10].mxu0 %vm239_vm0, %v6469_v2  ;;  %5159 = vmatprep.mubr.msk.f32.mxu1 %vm239_vm0, %v4059_v3  ;;  %v168_v3 = vld [vmem:[%s6193_s16 + $0x70] sm:$0xff] }
  0x50   : > { %5465 = vmatprep.mubr.msk.f32.mxu0 %vm239_vm0, %v6474_v4 }
  0x52   : > { %5160 = vmatmul.mubr.msk.f32.gmra.mrb[28].mxu1 %vm239_vm0, %v4060_v5  ;;  %v6634_v5 = vld [vmem:[%s6193_s16 + $0x104] sm:$0xff] }
  0x53   : > { %5466 = vmatmul.mubr.msk.f32.gmra.mrb[12].mxu0 %vm239_vm0, %v6485_v6  ;;  %5162 = vmatprep.mubr.msk.f32.mxu1 %vm239_vm0, %v4061_v8  ;;  %v169_v8 = vld [vmem:[%s6193_s16 + $0x78] sm:$0xff] }
  0x54   : > { %5468 = vmatprep.mubr.msk.f32.mxu0 %vm239_vm0, %v6489_v9 }
  0x56   : > { %5163 = vmatmul.mubr.msk.f32.gmra.mrb[30].mxu1 %vm239_vm0, %v4062_v10  ;;  %v6644_v10 = vld [vmem:[%s6193_s16 + $0x10c] sm:$0xff] }
  0x57   : > { %5469 = vmatmul.mubr.msk.f32.gmra.mrb[14].mxu0 %vm239_vm0, %v6499_v11  ;;  %5183 = vmatprep.mubr.msk.f32.mxu1 %vm239_vm0, %v154_v13  ;;  %v170_v13 = vld [vmem:[%s6193_s16 + $0x80] sm:$0xff] }
  0x58   : > { %5471 = vmatprep.mubr.msk.f32.mxu0 %vm239_vm0, %v6503_v14 }
  0x5a   : > { %5184 = vmatmul.mubr.msk.f32.vlgmr.msra.gmra.mrb[0].mxu1 %vm239_vm0, %v155_v17  ;;  %v171_v17 = vld [vmem:[%s6193_s16 + $0x88] sm:$0xff] }
  0x5b   : > { %5472 = vmatmul.mubr.msk.f32.gmra.mrb[16].mxu0 %vm239_vm0, %v6519_v19  ;;  %5728 = vmatpush3.bf16.msra.mxu1 %v6346_v22  ;;  %v4177_v22 = vld [vmem:[%s7350_s1 + $0xc0] sm:$0xff] }
  0x5c   : > { %5186 = vmatprep.mubr.msk.f32.mxu1 %vm239_vm0, %v156_v20  ;;  %5474 = vmatprep.mubr.msk.f32.mxu0 %vm239_vm0, %v6523_v21  ;;  %v5737_v38 = vpack.c.bf16 %v4178_v32, %v4177_v22  ;;  %v172_v20 = vld [vmem:[%s6193_s16 + $0x90] sm:$0xff]  ;;  %v178_v32 = vld [vmem:[%s6193_s16 + $0xc0] sm:$0xff] }
  0x5d   : > { %5730 = vmatprep.subr.bf16.mxu1 %v5729_v23 }
  0x5e   : > { %5187 = vmatmul.mubr.msk.f32.gmra.mrb[2].mxu1 %vm239_vm0, %v157_v27  ;;  %v174_v27 = vld [vmem:[%s6193_s16 + $0xa0] sm:$0xff] }
  0x5f   : > { %5475 = vmatmul.mubr.msk.f32.gmra.mrb[18].mxu0 %vm239_vm0, %v6540_v28  ;;  %5189 = vmatprep.mubr.msk.f32.mxu1 %vm239_vm0, %v158_v29  ;;  %v5813_v29 = vpack.c.bf16 %v4551_v26, %v4550_v24  ;;  %v4625_v24 = vld [vmem:[%s7350_s1 + $0x260] sm:$0xff]  ;;  %v4626_v26 = vld [vmem:[%s7350_s1 + $0x268] sm:$0xff] }
  0x60   : > { %5477 = vmatprep.mubr.msk.f32.mxu0 %vm239_vm0, %v6544_v30  ;;  %5732 = vmatpush3.bf16.msra.mxu1 %v5729_v23  ;;  %v5809_v23 = vpack.c.bf16 %v4549_v16, %v4548_v15  ;;  %v6890_v15 = vld [vmem:[%s6193_s16 + $0x8a] sm:$0xff] }
  0x61   : > { %5734 = vmatprep.subr.bf16.mxu1 %v5733_v31  ;;  %v4515_v16 = vld [vmem:[%s6193_s16 + $0x2d] sm:$0xff] }
  0x62   : > { %5190 = vmatmul.mubr.msk.f32.gmra.mrb[4].mxu1 %vm239_vm0, %v159_v33  ;;  %v4622_v33 = vld [vmem:[%s7350_s1 + $0x248] sm:$0xff] }
  0x63   : > { %5478 = vmatmul.mubr.msk.f32.gmra.mrb[20].mxu0 %vm239_vm0, %v6560_v34  ;;  %5192 = vmatprep.mubr.msk.f32.mxu1 %vm239_vm0, %v160_v35  ;;  %v180_v35 = vld [vmem:[%s6193_s16 + $0xd0] sm:$0xff] }
  0x64   : > { %5480 = vmatprep.mubr.msk.f32.mxu0 %vm239_vm0, %v6564_v36  ;;  %5736 = vmatpush3.bf16.msra.mxu1 %v5733_v31  ;;  %v4552_v31 = vld [vmem:[%s7350_s1 + $0x228] sm:$0xff] }
  0x65   : > { %5738 = vmatprep.subr.bf16.mxu1 %v5737_v38 }
  0x66   : > { %5193 = vmatmul.mubr.msk.f32.gmra.mrb[6].mxu1 %vm239_vm0, %v161_v39  ;;  %v184_v39 = vld [vmem:[%s6193_s16 + $0xf0] sm:$0xff] }
  0x67   : > { %5481 = vmatmul.mubr.msk.f32.gmra.mrb[22].mxu0 %vm239_vm0, %v6574_v40  ;;  %5195 = vmatprep.mubr.msk.f32.mxu1 %vm239_vm0, %v162_v41  ;;  %v4249_v41 = vld [vmem:[%s7350_s1 + $0xf0] sm:$0xff] }
  0x68   : > { %5483 = vmatprep.mubr.msk.f32.mxu0 %vm239_vm0, %v6578_v43  ;;  %5740 = vmatpush3.bf16.msra.mxu1 %v5737_v38 }
  0x69   : > { %5247 = vmatprep.subr.msk.mxu1 %vm336_vm1, %v4179_v45 }
  0x6a   : > { %5196 = vmatmul.mubr.msk.f32.gmra.mrb[8].mxu1 %vm239_vm0, %v163_v48 }
  0x6b   : > { %5484 = vmatmul.mubr.msk.f32.gmra.mrb[24].mxu0 %vm239_vm0, %v6597_v50  ;;  %5198 = vmatprep.mubr.msk.f32.mxu1 %vm239_vm0, %v164_v52  ;;  %v4253_v52 = vld [vmem:[%s7350_s1 + $0x110] sm:$0xff] }
  0x6c   : > { %5486 = vmatprep.mubr.msk.f32.mxu0 %vm239_vm0, %v6601_v53  ;;  %5248 = vmatpush3.msk.msra.mxu1 %vm336_vm1, %v4179_v45 }
  0x6d   : > { %5742 = vmatprep.subr.bf16.mxu1 %v6604_v55 }
  0x6e   : > { %5199 = vmatmul.mubr.msk.f32.gmra.mrb[10].mxu1 %vm239_vm0, %v165_v57 }
  0x6f   : > { %5487 = vmatmul.mubr.msk.f32.gmra.mrb[26].mxu0 %vm239_vm0, %v6614_v58  ;;  %5201 = vmatprep.mubr.msk.f32.mxu1 %vm239_vm0, %v166_v59  ;;  %v6829_v59 = vld [vmem:[%s6193_s16 + $0x52] sm:$0xff] }
  0x70   : > { %5489 = vmatprep.mubr.msk.f32.mxu0 %vm239_vm0, %v6619_v60 }
  0x72   : > { %5202 = vmatmul.mubr.msk.f32.gmra.mrb[12].mxu1 %vm239_vm0, %v167_v62  ;;  %v4469_v62 = vld [vmem:[%s6193_s16 + $0x114] sm:$0xff] }
  0x73   : > { %5490 = vmatmul.mubr.msk.f32.gmra.mrb[28].mxu0 %vm239_vm0, %v6630_v1  ;;  %5204 = vmatprep.mubr.msk.f32.mxu1 %vm239_vm0, %v168_v3  ;;  %v4470_v3 = vld [vmem:[%s6193_s16 + $0x11c] sm:$0xff] }
  0x74   : > { %5492 = vmatprep.mubr.msk.f32.mxu0 %vm239_vm0, %v6634_v5 }
  0x76   : > { %5205 = vmatmul.mubr.msk.f32.gmra.mrb[14].mxu1 %vm239_vm0, %v169_v8  ;;  %v4514_v8 = vld [vmem:[%s6193_s16 + $0x25] sm:$0xff] }
  0x77   : > { %5493 = vmatmul.mubr.msk.f32.gmra.mrb[30].mxu0 %vm239_vm0, %v6644_v10  ;;  %5207 = vmatprep.mubr.msk.f32.mxu1 %vm239_vm0, %v170_v13  ;;  %v4624_v13 = vld [vmem:[%s7350_s1 + $0x258] sm:$0xff] }
  0x78   : > { %5513 = vmatprep.mubr.msk.f32.mxu0 %vm239_vm0, %v6380_v37  ;;  %v173_v37 = vld [vmem:[%s6193_s16 + $0x98] sm:$0xff] }
  0x7a   : > { %5208 = vmatmul.mubr.msk.f32.gmra.mrb[16].mxu1 %vm239_vm0, %v171_v17  ;;  %v6895_v17 = vld [vmem:[%s6193_s16 + $0x92] sm:$0xff] }
  0x7b   : > { %5514 = vmatmul.mubr.msk.f32.vlgmr.msra.gmra.mrb[0].mxu0 %vm239_vm0, %v6395_v42  ;;  %5210 = vmatprep.mubr.msk.f32.mxu1 %vm239_vm0, %v172_v20  ;;  %v4553_v42 = vld [vmem:[%s7350_s1 + $0x230] sm:$0xff] }
  0x7c   : > { %5808 = vmatpush3.bf16.msra.mxu0 %v6459_v0  ;;  %5516 = vmatprep.mubr.msk.f32.mxu0 %vm239_vm0, %v6399_v44  ;;  %v175_v44 = vld [vmem:[%s6193_s16 + $0xa8] sm:$0xff]  ;;  %v176_v0 = vld [vmem:[%s6193_s16 + $0xb0] sm:$0xff]  ;;  %v5817_v22 = vpack.c.bf16 %v4553_v42, %v4552_v31  ;;  %v5829_v42 = vpack.c.bf16 %v4626_v26, %v4625_v24 }
  0x7d   : > { %5810 = vmatprep.subr.bf16.mxu0 %v5809_v23  ;;  %v4516_v20 = vld [vmem:[%s6193_s16 + $0x35] sm:$0xff]  ;;  %v4518_v31 = vld [vmem:[%s6193_s16 + $0x45] sm:$0xff] }
  0x7e   : > { %5211 = vmatmul.mubr.msk.f32.gmra.mrb[18].mxu1 %vm239_vm0, %v173_v37  ;;  %v6910_v37 = vld [vmem:[%s6193_s16 + $0x9a] sm:$0xff]  ;;  %v4244_v24 = vld [vmem:[%s6193_s16 + $0x102] sm:$0xff] }
  0x7f   : > { %5517 = vmatmul.mubr.msk.f32.gmra.mrb[2].mxu0 %vm239_vm0, %v6415_v49  ;;  %5213 = vmatprep.mubr.msk.f32.mxu1 %vm239_vm0, %v174_v27  ;;  %v177_v49 = vld [vmem:[%s6193_s16 + $0xb8] sm:$0xff] }
  0x80   : > { %5519 = vmatprep.mubr.msk.f32.mxu0 %vm239_vm0, %v6419_v51  ;;  %5812 = vmatpush3.bf16.msra.mxu0 %v5809_v23  ;;  %v4554_v51 = vld [vmem:[%s7350_s1 + $0x238] sm:$0xf]  ;;  %v4517_v27 = vld [vmem:[%s6193_s16 + $0x3d] sm:$0xff] }
  0x81   : > { %5814 = vmatprep.subr.bf16.mxu0 %v5813_v29  ;;  %v4603_v26 = vld [vmem:[%s6193_s16 + $0x96] sm:$0xff] }
  0x82   : > { %5214 = vmatmul.mubr.msk.f32.gmra.mrb[20].mxu1 %vm239_vm0, %v175_v44  ;;  %v4627_v44 = vld [vmem:[%s7350_s1 + $0x270] sm:$0xff] }
  0x83   : > { %5520 = vmatmul.mubr.msk.f32.gmra.mrb[4].mxu0 %vm239_vm0, %v6429_v54  ;;  %5216 = vmatprep.mubr.msk.f32.mxu1 %vm239_vm0, %v176_v0  ;;  %v4621_v54 = vld [vmem:[%s7350_s1 + $0x240] sm:$0xff]  ;;  %v4628_v0 = vld [vmem:[%s7350_s1 + $0x278] sm:$0xff] }
  0x84   : > { %5522 = vmatprep.mubr.msk.f32.mxu0 %vm239_vm0, %v6433_v56  ;;  %5816 = vmatpush3.bf16.msra.mxu0 %v5813_v29  ;;  %v179_v56 = vld [vmem:[%s6193_s16 + $0xc8] sm:$0xff]  ;;  %v6716_v38 = vpack.c.bf16 %v4622_v33, %v4621_v54  ;;  %v5833_v54 = vpack.c.bf16 %v4628_v0, %v4627_v44  ;;  %v6945_v33 = vld [vmem:[%s6193_s16 + $0xba] sm:$0xff] }
  0x85   : > { %5818 = vmatprep.subr.bf16.mxu0 %v5817_v22  ;;  %v6916_v29 = vld [vmem:[%s6193_s16 + $0xa2] sm:$0xff]  ;;  %v4606_v44 = vld [vmem:[%s6193_s16 + $0xae] sm:$0xff] }
  0x86   : > { %5217 = vmatmul.mubr.msk.f32.gmra.mrb[22].mxu1 %vm239_vm0, %v177_v49  ;;  %v4519_v49 = vld [vmem:[%s6193_s16 + $0x4d] sm:$0xff]  ;;  %v4307_v0 = vld [vmem:[%s6193_s16 + $0xa3] sm:$0xff] }
  0x87   : > { %5523 = vmatmul.mubr.msk.f32.gmra.mrb[6].mxu0 %vm239_vm0, %v6452_v61  ;;  %5219 = vmatprep.mubr.msk.f32.mxu1 %vm239_vm0, %v178_v32  ;;  %v181_v61 = vld [vmem:[%s6193_s16 + $0xd8] sm:$0xff] }
  0x88   : > { %5525 = vmatprep.mubr.msk.f32.mxu0 %vm239_vm0, %v6456_v63  ;;  %5820 = vmatpush3.bf16.msra.mxu0 %v5817_v22  ;;  %v182_v63 = vld [vmem:[%s6193_s16 + $0xe0] sm:$0xff]  ;;  %v6931_v22 = vld [vmem:[%s6193_s16 + $0xaa] sm:$0xff]  ;;  %v6936_v32 = vld [vmem:[%s6193_s16 + $0xb2] sm:$0xff] }
  0x89   : > { %5577 = vmatprep.subr.msk.mxu0 %vm336_vm1, %v4554_v51 }
  0x8a   : > { %5220 = vmatmul.mubr.msk.f32.gmra.mrb[24].mxu1 %vm239_vm0, %v179_v56  ;;  %v4521_v56 = vld [vmem:[%s6193_s16 + $0x5d] sm:$0xff] }
  0x8b   : > { %5526 = vmatmul.mubr.msk.f32.gmra.mrb[8].mxu0 %vm239_vm0, %v6469_v2  ;;  %5222 = vmatprep.mubr.msk.f32.mxu1 %vm239_vm0, %v180_v35  ;;  %v183_v2 = vld [vmem:[%s6193_s16 + $0xe8] sm:$0xff] }
  0x8c   : > { %5528 = vmatprep.mubr.msk.f32.mxu0 %vm239_vm0, %v6474_v4  ;;  %5578 = vmatpush3.msk.msra.mxu0 %vm336_vm1, %v4554_v51  ;;  %v185_v4 = vld [vmem:[%s6193_s16 + $0xf8] sm:$0xff]  ;;  %v6950_v35 = vld [vmem:[%s6193_s16 + $0xc2] sm:$0xff] }
  0x8d   : > { %5822 = vmatprep.subr.bf16.mxu0 %v6716_v38  ;;  %v4520_v51 = vld [vmem:[%s6193_s16 + $0x55] sm:$0xff] }
  0x8e   : > { %5223 = vmatmul.mubr.msk.f32.gmra.mrb[26].mxu1 %vm239_vm0, %v181_v61  ;;  %v4629_v61 = vld [vmem:[%s7350_s1 + $0x280] sm:$0xf] }
  0x8f   : > { %5529 = vmatmul.mubr.msk.f32.gmra.mrb[10].mxu0 %vm239_vm0, %v6485_v6  ;;  %5225 = vmatprep.mubr.msk.f32.mxu1 %vm239_vm0, %v182_v63  ;;  %v4139_v6 = vld [vmem:[%s6193_s16 + $0x2] sm:$0xff]  ;;  %v6962_v63 = vld [vmem:[%s6193_s16 + $0xca] sm:$0xff] }
  0x90   : > { %5531 = vmatprep.mubr.msk.f32.mxu0 %vm239_vm0, %v6489_v9  ;;  %v4248_v9 = vld [vmem:[%s7350_s1 + $0xe8] sm:$0xff] }
  0x91   : > { %v5745_v45 = vpack.c.bf16 %v4249_v41, %v4248_v9  ;;  %v4525_v9 = vld [vmem:[%s6193_s16 + $0x7d] sm:$0xff] }
  0x92   : > { %5226 = vmatmul.mubr.msk.f32.gmra.mrb[28].mxu1 %vm239_vm0, %v183_v2  ;;  %v4523_v2 = vld [vmem:[%s6193_s16 + $0x6d] sm:$0xff]  ;;  %v6982_v41 = vld [vmem:[%s6193_s16 + $0xe2] sm:$0xff] }
  0x93   : > { %5532 = vmatmul.mubr.msk.f32.gmra.mrb[12].mxu0 %vm239_vm0, %v6499_v11  ;;  %5228 = vmatprep.mubr.msk.f32.mxu1 %vm239_vm0, %v184_v39  ;;  %v4140_v11 = vld [vmem:[%s6193_s16 + $0xa] sm:$0xff]  ;;  %v6967_v39 = vld [vmem:[%s6193_s16 + $0xd2] sm:$0xff] }
  0x94   : > { %5534 = vmatprep.mubr.msk.f32.mxu0 %vm239_vm0, %v6503_v14  ;;  %v6758_v14 = vld [vmem:[%s6193_s16 + $0x12] sm:$0xff] }
  0x96   : > { %5229 = vmatmul.mubr.msk.f32.gmra.mrb[30].mxu1 %vm239_vm0, %v185_v4  ;;  %v4524_v4 = vld [vmem:[%s6193_s16 + $0x75] sm:$0xff] }
  0x97   : > { %5535 = vmatmul.mubr.msk.f32.gmra.mrb[14].mxu0 %vm239_vm0, %v6519_v19  ;;  %5249 = vmatprep.mubr.msk.f32.mxu1 %vm239_vm0, %v4139_v6  ;;  %v4251_v19 = vld [vmem:[%s7350_s1 + $0x100] sm:$0xff] }
  0x98   : > { %5537 = vmatprep.mubr.msk.f32.mxu0 %vm239_vm0, %v6523_v21  ;;  %v6771_v21 = vld [vmem:[%s6193_s16 + $0x1a] sm:$0xff]  ;;  %v5749_v48 = vpack.c.bf16 %v4251_v19, %v4250_v46  ;;  %v4527_v46 = vld [vmem:[%s6193_s16 + $0x8d] sm:$0xff] }
  0x99   : > { %v6977_v6 = vld [vmem:[%s6193_s16 + $0xda] sm:$0xff]  ;;  %v6997_v19 = vld [vmem:[%s6193_s16 + $0xf2] sm:$0xff] }
  0x9a   : > { %5250 = vmatmul.mubr.msk.f32.vlgmr.msra.gmra.mrb[0].mxu1 %vm239_vm0, %v4140_v11  ;;  %v4526_v11 = vld [vmem:[%s6193_s16 + $0x85] sm:$0xff] }
  0x9b   : > { %5538 = vmatmul.mubr.msk.f32.gmra.mrb[16].mxu0 %vm239_vm0, %v6540_v28  ;;  %5744 = vmatpush3.bf16.msra.mxu1 %v6604_v55  ;;  %v4252_v28 = vld [vmem:[%s7350_s1 + $0x108] sm:$0xff]  ;;  %v6798_v55 = vld [vmem:[%s6193_s16 + $0x32] sm:$0xff] }
  0x9c   : > { %5252 = vmatprep.mubr.msk.f32.mxu1 %vm239_vm0, %v6758_v14  ;;  %5540 = vmatprep.mubr.msk.f32.mxu0 %vm239_vm0, %v6544_v30  ;;  %v6793_v30 = vld [vmem:[%s6193_s16 + $0x2a] sm:$0xff]  ;;  %v5753_v57 = vpack.c.bf16 %v4253_v52, %v4252_v28  ;;  %v7006_v28 = vld [vmem:[%s6193_s16 + $0xfa] sm:$0xff] }
  0x9d   : > { %5746 = vmatprep.subr.bf16.mxu1 %v5745_v45  ;;  %v4529_v52 = vld [vmem:[%s6193_s16 + $0x9d] sm:$0xff] }
  0x9e   : > { %5253 = vmatmul.mubr.msk.f32.gmra.mrb[2].mxu1 %vm239_vm0, %v6771_v21 }
  0x9f   : > { %5541 = vmatmul.mubr.msk.f32.gmra.mrb[18].mxu0 %vm239_vm0, %v6560_v34  ;;  %5255 = vmatprep.mubr.msk.f32.mxu1 %vm239_vm0, %v6778_v47  ;;  %v6807_v34 = vld [vmem:[%s6193_s16 + $0x3a] sm:$0xff] }
  0xa0   : > { %5543 = vmatprep.mubr.msk.f32.mxu0 %vm239_vm0, %v6564_v36  ;;  %5748 = vmatpush3.bf16.msra.mxu1 %v5745_v45  ;;  %v6812_v36 = vld [vmem:[%s6193_s16 + $0x42] sm:$0xff]  ;;  %v6992_v45 = vld [vmem:[%s6193_s16 + $0xea] sm:$0xff] }
  0xa1   : > { %5750 = vmatprep.subr.bf16.mxu1 %v5749_v48 }
  0xa2   : > { %5256 = vmatmul.mubr.msk.f32.gmra.mrb[4].mxu1 %vm239_vm0, %v6793_v30 }
  0xa3   : > { %5544 = vmatmul.mubr.msk.f32.gmra.mrb[20].mxu0 %vm239_vm0, %v6574_v40  ;;  %5258 = vmatprep.mubr.msk.f32.mxu1 %vm239_vm0, %v6798_v55  ;;  %v4254_v40 = vld [vmem:[%s7350_s1 + $0x118] sm:$0xf] }
  0xa4   : > { %5546 = vmatprep.mubr.msk.f32.mxu0 %vm239_vm0, %v6578_v43  ;;  %5752 = vmatpush3.bf16.msra.mxu1 %v5749_v48  ;;  %v6824_v43 = vld [vmem:[%s6193_s16 + $0x4a] sm:$0xff]  ;;  %v4528_v48 = vld [vmem:[%s6193_s16 + $0x95] sm:$0xff] }
  0xa5   : > { %5754 = vmatprep.subr.bf16.mxu1 %v5753_v57 }
  0xa6   : > { %5259 = vmatmul.mubr.msk.f32.gmra.mrb[6].mxu1 %vm239_vm0, %v6807_v34 }
  0xa7   : > { %5547 = vmatmul.mubr.msk.f32.gmra.mrb[22].mxu0 %vm239_vm0, %v6597_v50  ;;  %5261 = vmatprep.mubr.msk.f32.mxu1 %vm239_vm0, %v6812_v36  ;;  %v6839_v50 = vld [vmem:[%s6193_s16 + $0x5a] sm:$0xff] }
  0xa8   : > { %5549 = vmatprep.mubr.msk.f32.mxu0 %vm239_vm0, %v6601_v53  ;;  %5756 = vmatpush3.bf16.msra.mxu1 %v5753_v57  ;;  %v6844_v53 = vld [vmem:[%s6193_s16 + $0x62] sm:$0xff] }
  0xa9   : > { %5313 = vmatprep.subr.msk.mxu1 %vm336_vm1, %v4254_v40  ;;  %v4530_v57 = vld [vmem:[%s6193_s16 + $0xa5] sm:$0xff] }
  0xaa   : > { %5262 = vmatmul.mubr.msk.f32.gmra.mrb[8].mxu1 %vm239_vm0, %v6824_v43 }
  0xab   : > { %5550 = vmatmul.mubr.msk.f32.gmra.mrb[24].mxu0 %vm239_vm0, %v6614_v58  ;;  %5264 = vmatprep.mubr.msk.f32.mxu1 %vm239_vm0, %v6829_v59  ;;  %v6855_v58 = vld [vmem:[%s6193_s16 + $0x6a] sm:$0xff] }
  0xac   : > { %5552 = vmatprep.mubr.msk.f32.mxu0 %vm239_vm0, %v6619_v60  ;;  %5314 = vmatpush3.msk.msra.mxu1 %vm336_vm1, %v4254_v40  ;;  %v6860_v60 = vld [vmem:[%s6193_s16 + $0x72] sm:$0xff] }
  0xad   : > { %5837 = vmatprep.subr.bf16.mxu1 %v6168_v7  ;;  %v4531_v40 = vld [vmem:[%s6193_s16 + $0xad] sm:$0xff] }
  0xae   : > { %5265 = vmatmul.mubr.msk.f32.gmra.mrb[10].mxu1 %vm239_vm0, %v6839_v50 }
  0xaf   : > { %5553 = vmatmul.mubr.msk.f32.gmra.mrb[26].mxu0 %vm239_vm0, %v6630_v1  ;;  %5267 = vmatprep.mubr.msk.f32.mxu1 %vm239_vm0, %v6844_v53  ;;  %v6870_v1 = vld [vmem:[%s6193_s16 + $0x7a] sm:$0xff] }
  0xb0   : > { %5555 = vmatprep.mubr.msk.f32.mxu0 %vm239_vm0, %v6634_v5  ;;  %v6875_v5 = vld [vmem:[%s6193_s16 + $0x82] sm:$0xff] }
  0xb2   : > { %5268 = vmatmul.mubr.msk.f32.gmra.mrb[12].mxu1 %vm239_vm0, %v6855_v58 }
  0xb3   : > { %5556 = vmatmul.mubr.msk.f32.gmra.mrb[28].mxu0 %vm239_vm0, %v6644_v10  ;;  %5270 = vmatprep.mubr.msk.f32.mxu1 %vm239_vm0, %v6860_v60  ;;  %v4623_v10 = vld [vmem:[%s7350_s1 + $0x250] sm:$0xff] }
  0xb4   : > { %5558 = vmatprep.mubr.msk.f32.mxu0 %vm239_vm0, %v4469_v62  ;;  %v5825_v23 = vpack.c.bf16 %v4624_v13, %v4623_v10  ;;  %v4532_v62 = vld [vmem:[%s6193_s16 + $0xb5] sm:$0xff]  ;;  %v4596_v10 = vld [vmem:[%s6193_s16 + $0x5e] sm:$0xff]  ;;  %v4597_v13 = vld [vmem:[%s6193_s16 + $0x66] sm:$0xff] }
  0xb6   : > { %5271 = vmatmul.mubr.msk.f32.gmra.mrb[14].mxu1 %vm239_vm0, %v6870_v1 }
  0xb7   : > { %5559 = vmatmul.mubr.msk.f32.gmra.mrb[30].mxu0 %vm239_vm0, %v4470_v3  ;;  %5273 = vmatprep.mubr.msk.f32.mxu1 %vm239_vm0, %v6875_v5  ;;  %v4534_v3 = vld [vmem:[%s6193_s16 + $0xc5] sm:$0xff] }
  0xb8   : > { %5579 = vmatprep.mubr.msk.f32.mxu0 %vm239_vm0, %v4514_v8  ;;  %v4595_v8 = vld [vmem:[%s6193_s16 + $0x56] sm:$0xff] }
  0xba   : > { %5274 = vmatmul.mubr.msk.f32.gmra.mrb[16].mxu1 %vm239_vm0, %v6890_v15 }
  0xbb   : > { %5580 = vmatmul.mubr.msk.f32.vlgmr.msra.gmra.mrb[0].mxu0 %vm239_vm0, %v4515_v16  ;;  %5276 = vmatprep.mubr.msk.f32.mxu1 %vm239_vm0, %v6895_v17  ;;  %v4599_v16 = vld [vmem:[%s6193_s16 + $0x76] sm:$0xff] }
  0xbc   : > { %5824 = vmatpush3.bf16.msra.mxu0 %v6716_v38  ;;  %5582 = vmatprep.mubr.msk.f32.mxu0 %vm239_vm0, %v4516_v20  ;;  %v4522_v38 = vld [vmem:[%s6193_s16 + $0x65] sm:$0xff] }
  0xbd   : > { %5826 = vmatprep.subr.bf16.mxu0 %v5825_v23  ;;  %v4601_v20 = vld [vmem:[%s6193_s16 + $0x86] sm:$0xff] }
  0xbe   : > { %5277 = vmatmul.mubr.msk.f32.gmra.mrb[18].mxu1 %vm239_vm0, %v6910_v37 }
  0xbf   : > { %5583 = vmatmul.mubr.msk.f32.gmra.mrb[2].mxu0 %vm239_vm0, %v4517_v27  ;;  %5279 = vmatprep.mubr.msk.f32.mxu1 %vm239_vm0, %v6916_v29  ;;  %v4604_v27 = vld [vmem:[%s6193_s16 + $0x9e] sm:$0xff] }
  0xc0   : > { %5585 = vmatprep.mubr.msk.f32.mxu0 %vm239_vm0, %v4518_v31  ;;  %5828 = vmatpush3.bf16.msra.mxu0 %v5825_v23  ;;  %v4602_v23 = vld [vmem:[%s6193_s16 + $0x8e] sm:$0xff]  ;;  %v4605_v31 = vld [vmem:[%s6193_s16 + $0xa6] sm:$0xff] }
  0xc1   : > { %5830 = vmatprep.subr.bf16.mxu0 %v5829_v42 }
  0xc2   : > { %5280 = vmatmul.mubr.msk.f32.gmra.mrb[20].mxu1 %vm239_vm0, %v6931_v22 }
  0xc3   : > { %5586 = vmatmul.mubr.msk.f32.gmra.mrb[4].mxu0 %vm239_vm0, %v4519_v49  ;;  %5282 = vmatprep.mubr.msk.f32.mxu1 %vm239_vm0, %v6936_v32  ;;  %v4308_v49 = vld [vmem:[%s6193_s16 + $0xab] sm:$0xff] }
  0xc4   : > { %5588 = vmatprep.mubr.msk.f32.mxu0 %vm239_vm0, %v4520_v51  ;;  %5832 = vmatpush3.bf16.msra.mxu0 %v5829_v42  ;;  %v4306_v42 = vld [vmem:[%s6193_s16 + $0x9b] sm:$0xff]  ;;  %v4309_v51 = vld [vmem:[%s6193_s16 + $0xb3] sm:$0xff] }
  0xc5   : > { %5834 = vmatprep.subr.bf16.mxu0 %v5833_v54 }
  0xc6   : > { %5283 = vmatmul.mubr.msk.f32.gmra.mrb[22].mxu1 %vm239_vm0, %v6945_v33 }
  0xc7   : > { %5589 = vmatmul.mubr.msk.f32.gmra.mrb[6].mxu0 %vm239_vm0, %v4521_v56  ;;  %5285 = vmatprep.mubr.msk.f32.mxu1 %vm239_vm0, %v6950_v35  ;;  %v4610_v56 = vld [vmem:[%s6193_s16 + $0xce] sm:$0xff] }
  0xc8   : > { %5591 = vmatprep.mubr.msk.f32.mxu0 %vm239_vm0, %v4522_v38  ;;  %5836 = vmatpush3.bf16.msra.mxu0 %v5833_v54  ;;  %v4609_v54 = vld [vmem:[%s6193_s16 + $0xc6] sm:$0xff]  ;;  %v4611_v38 = vld [vmem:[%s6193_s16 + $0xd6] sm:$0xff] }
  0xc9   : > { %5643 = vmatprep.subr.msk.mxu0 %vm336_vm1, %v4629_v61 }
  0xca   : > { %5286 = vmatmul.mubr.msk.f32.gmra.mrb[24].mxu1 %vm239_vm0, %v6962_v63 }
  0xcb   : > { %5592 = vmatmul.mubr.msk.f32.gmra.mrb[8].mxu0 %vm239_vm0, %v4523_v2  ;;  %5288 = vmatprep.mubr.msk.f32.mxu1 %vm239_vm0, %v6967_v39  ;;  %v4313_v2 = vld [vmem:[%s6193_s16 + $0xd3] sm:$0xff] }
  0xcc   : > { %5594 = vmatprep.mubr.msk.f32.mxu0 %vm239_vm0, %v4524_v4  ;;  %5644 = vmatpush3.msk.msra.mxu0 %vm336_vm1, %v4629_v61  ;;  %v4312_v61 = vld [vmem:[%s6193_s16 + $0xcb] sm:$0xff]  ;;  %v4314_v4 = vld [vmem:[%s6193_s16 + $0xdb] sm:$0xff] }
  0xce   : > { %5289 = vmatmul.mubr.msk.f32.gmra.mrb[26].mxu1 %vm239_vm0, %v6977_v6 }
  0xcf   : > { %5595 = vmatmul.mubr.msk.f32.gmra.mrb[10].mxu0 %vm239_vm0, %v4525_v9  ;;  %5291 = vmatprep.mubr.msk.f32.mxu1 %vm239_vm0, %v6982_v41  ;;  %v4315_v9 = vld [vmem:[%s6193_s16 + $0xe3] sm:$0xff] }
  0xd0   : > { %5597 = vmatprep.mubr.msk.f32.mxu0 %vm239_vm0, %v4526_v11  ;;  %v4316_v11 = vld [vmem:[%s6193_s16 + $0xeb] sm:$0xff] }
  0xd2   : > { %5292 = vmatmul.mubr.msk.f32.gmra.mrb[28].mxu1 %vm239_vm0, %v6992_v45 }
  0xd3   : > { %5598 = vmatmul.mubr.msk.f32.gmra.mrb[12].mxu0 %vm239_vm0, %v4527_v46  ;;  %5294 = vmatprep.mubr.msk.f32.mxu1 %vm239_vm0, %v6997_v19  ;;  %v4317_v46 = vld [vmem:[%s6193_s16 + $0xf3] sm:$0xff] }
  0xd4   : > { %5600 = vmatprep.mubr.msk.f32.mxu0 %vm239_vm0, %v4528_v48  ;;  %v4318_v48 = vld [vmem:[%s6193_s16 + $0xfb] sm:$0xff] }
  0xd6   : > { %5295 = vmatmul.mubr.msk.f32.gmra.mrb[30].mxu1 %vm239_vm0, %v7006_v28 }
  0xd7   : > { %5601 = vmatmul.mubr.msk.f32.gmra.mrb[14].mxu0 %vm239_vm0, %v4529_v52  ;;  %5315 = vmatprep.mubr.msk.f32.mxu1 %vm239_vm0, %v6758_v14  ;;  %v4533_v14 = vld [vmem:[%s6193_s16 + $0xbd] sm:$0xff] }
  0xd8   : > { %5603 = vmatprep.mubr.msk.f32.mxu0 %vm239_vm0, %v4530_v57  ;;  %v4319_v52 = vld [vmem:[%s6193_s16 + $0x103] sm:$0xff]  ;;  %v4619_v57 = vld [vmem:[%s6193_s16 + $0x116] sm:$0xff] }
  0xda   : > { %5316 = vmatmul.mubr.msk.f32.vlgmr.msra.gmra.mrb[0].mxu1 %vm239_vm0, %v6771_v21  ;;  %v4536_v21 = vld [vmem:[%s6193_s16 + $0xd5] sm:$0xff] }
  0xdb   : > { %5604 = vmatmul.mubr.msk.f32.gmra.mrb[16].mxu0 %vm239_vm0, %v4531_v40  ;;  %5842 = vmatpush3.bf16.msra.mxu1 %v6168_v7  ;;  %v4535_v7 = vld [vmem:[%s6193_s16 + $0xcd] sm:$0xff] }
  0xdc   : > { %5318 = vmatprep.mubr.msk.f32.mxu1 %vm239_vm0, %v6778_v47  ;;  %5606 = vmatprep.mubr.msk.f32.mxu0 %vm239_vm0, %v4532_v62  ;;  %v4537_v47 = vld [vmem:[%s6193_s16 + $0xdd] sm:$0xff]  ;;  %v4320_v40 = vld [vmem:[%s6193_s16 + $0x10b] sm:$0xff] }
  0xdd   : > { %5838 = vmatprep.subr.bf16.mxu1 %v6179_v12  ;;  %v4620_v62 = vld [vmem:[%s6193_s16 + $0x11e] sm:$0xff] }
  0xde   : > { %5319 = vmatmul.mubr.msk.f32.gmra.mrb[2].mxu1 %vm239_vm0, %v6793_v30  ;;  %v4538_v30 = vld [vmem:[%s6193_s16 + $0xe5] sm:$0xff] }
  0xdf   : > { %5607 = vmatmul.mubr.msk.f32.gmra.mrb[18].mxu0 %vm239_vm0, %v4533_v14  ;;  %5321 = vmatprep.mubr.msk.f32.mxu1 %vm239_vm0, %v6798_v55  ;;  %v6111_v55 = vld [vmem:[%s7350_s1 + $0x160] sm:$0xf] }
  0xe0   : > { %5609 = vmatprep.mubr.msk.f32.mxu0 %vm239_vm0, %v4534_v3  ;;  %5843 = vmatpush3.bf16.msra.mxu1 %v6179_v12  ;;  %v4539_v12 = vld [vmem:[%s6193_s16 + $0xed] sm:$0xff] }
  0xe1   : > { %5839 = vmatprep.subr.bf16.mxu1 %v6201_v18 }
  0xe2   : > { %5322 = vmatmul.mubr.msk.f32.gmra.mrb[4].mxu1 %vm239_vm0, %v6807_v34  ;;  %v4542_v34 = vld [vmem:[%s6193_s16 + $0x105] sm:$0xff] }
  0xe3   : > { %5610 = vmatmul.mubr.msk.f32.gmra.mrb[20].mxu0 %vm239_vm0, %v4535_v7  ;;  %5324 = vmatprep.mubr.msk.f32.mxu1 %vm239_vm0, %v6812_v36  ;;  %v4543_v36 = vld [vmem:[%s6193_s16 + $0x10d] sm:$0xff] }
  0xe4   : > { %5612 = vmatprep.mubr.msk.f32.mxu0 %vm239_vm0, %v4536_v21  ;;  %5844 = vmatpush3.bf16.msra.mxu1 %v6201_v18  ;;  %v4540_v18 = vld [vmem:[%s6193_s16 + $0xf5] sm:$0xff] }
  0xe5   : > { %5840 = vmatprep.subr.bf16.mxu1 %v6218_v25 }
  0xe6   : > { %5325 = vmatmul.mubr.msk.f32.gmra.mrb[6].mxu1 %vm239_vm0, %v6824_v43  ;;  %v4544_v43 = vld [vmem:[%s6193_s16 + $0x115] sm:$0xff] }
  0xe7   : > { %5613 = vmatmul.mubr.msk.f32.gmra.mrb[22].mxu0 %vm239_vm0, %v4537_v47  ;;  %5327 = vmatprep.mubr.msk.f32.mxu1 %vm239_vm0, %v6829_v59  ;;  %v4545_v59 = vld [vmem:[%s6193_s16 + $0x11d] sm:$0xff] }
  0xe8   : > { %5615 = vmatprep.mubr.msk.f32.mxu0 %vm239_vm0, %v4538_v30  ;;  %5845 = vmatpush3.bf16.msra.mxu1 %v6218_v25  ;;  %v4541_v25 = vld [vmem:[%s6193_s16 + $0xfd] sm:$0xff] }
  0xe9   : > { %5841 = vmatprep.subr.msk.mxu1 %vm336_vm1, %v6111_v55 }
  0xea   : > { %5328 = vmatmul.mubr.msk.f32.gmra.mrb[8].mxu1 %vm239_vm0, %v6839_v50  ;;  %v4589_v50 = vld [vmem:[%s6193_s16 + $0x26] sm:$0xff] }
  0xeb   : > { %5616 = vmatmul.mubr.msk.f32.gmra.mrb[24].mxu0 %vm239_vm0, %v4539_v12  ;;  %5330 = vmatprep.mubr.msk.f32.mxu1 %vm239_vm0, %v6844_v53  ;;  %v4590_v53 = vld [vmem:[%s6193_s16 + $0x2e] sm:$0xff] }
  0xec   : > { %5618 = vmatprep.mubr.msk.f32.mxu0 %vm239_vm0, %v4540_v18  ;;  %5846 = vmatpush3.msk.msra.mxu1 %vm336_vm1, %v6111_v55 }
  0xee   : > { %5331 = vmatmul.mubr.msk.f32.gmra.mrb[10].mxu1 %vm239_vm0, %v6855_v58  ;;  %v4591_v58 = vld [vmem:[%s6193_s16 + $0x36] sm:$0xff] }
  0xef   : > { %5619 = vmatmul.mubr.msk.f32.gmra.mrb[26].mxu0 %vm239_vm0, %v4541_v25  ;;  %5333 = vmatprep.mubr.msk.f32.mxu1 %vm239_vm0, %v6860_v60  ;;  %v4592_v60 = vld [vmem:[%s6193_s16 + $0x3e] sm:$0xff] }
  0xf0   : > { %5621 = vmatprep.mubr.msk.f32.mxu0 %vm239_vm0, %v4542_v34 }
  0xf2   : > { %5334 = vmatmul.mubr.msk.f32.gmra.mrb[12].mxu1 %vm239_vm0, %v6870_v1  ;;  %v4593_v1 = vld [vmem:[%s6193_s16 + $0x46] sm:$0xff] }
  0xf3   : > { %5622 = vmatmul.mubr.msk.f32.gmra.mrb[28].mxu0 %vm239_vm0, %v4543_v36  ;;  %5336 = vmatprep.mubr.msk.f32.mxu1 %vm239_vm0, %v6875_v5  ;;  %v4594_v5 = vld [vmem:[%s6193_s16 + $0x4e] sm:$0xff] }
  0xf4   : > { %5624 = vmatprep.mubr.msk.f32.mxu0 %vm239_vm0, %v4544_v43 }
  0xf6   : > { %5337 = vmatmul.mubr.msk.f32.gmra.mrb[14].mxu1 %vm239_vm0, %v6890_v15  ;;  %v4598_v15 = vld [vmem:[%s6193_s16 + $0x6e] sm:$0xff] }
  0xf7   : > { %5625 = vmatmul.mubr.msk.f32.gmra.mrb[30].mxu0 %vm239_vm0, %v4545_v59  ;;  %5339 = vmatprep.mubr.msk.f32.mxu1 %vm239_vm0, %v6895_v17  ;;  %v4600_v17 = vld [vmem:[%s6193_s16 + $0x7e] sm:$0xff] }
  0xf8   : > { %5645 = vmatprep.mubr.msk.f32.mxu0 %vm239_vm0, %v4589_v50 }
  0xfa   : > { %5340 = vmatmul.mubr.msk.f32.gmra.mrb[16].mxu1 %vm239_vm0, %v6910_v37  ;;  %v4245_v37 = vld [vmem:[%s6193_s16 + $0x10a] sm:$0xff] }
  0xfb   : > { %5646 = vmatmul.mubr.msk.f32.vlgmr.msra.gmra.mrb[0].mxu0 %vm239_vm0, %v4590_v53  ;;  %5342 = vmatprep.mubr.msk.f32.mxu1 %vm239_vm0, %v6916_v29  ;;  %v4305_v29 = vld [vmem:[%s6193_s16 + $0x93] sm:$0xff] }
  0xfc   : > { %5648 = vmatprep.mubr.msk.f32.mxu0 %vm239_vm0, %v4591_v58 }
  0xfe   : > { %5343 = vmatmul.mubr.msk.f32.gmra.mrb[18].mxu1 %vm239_vm0, %v6931_v22  ;;  %v4607_v22 = vld [vmem:[%s6193_s16 + $0xb6] sm:$0xff] }
  0xff   : > { %5649 = vmatmul.mubr.msk.f32.gmra.mrb[2].mxu0 %vm239_vm0, %v4592_v60  ;;  %5345 = vmatprep.mubr.msk.f32.mxu1 %vm239_vm0, %v6936_v32  ;;  %v4608_v32 = vld [vmem:[%s6193_s16 + $0xbe] sm:$0xff] }
 0x100   : > { %5651 = vmatprep.mubr.msk.f32.mxu0 %vm239_vm0, %v4593_v1  ;;  %v7236_v60 = vld [vmem:[%s7351_s2] ss:$0 sm:$0xff] }
 0x102   : > { %5346 = vmatmul.mubr.msk.f32.gmra.mrb[20].mxu1 %vm239_vm0, %v6945_v33  ;;  %v4310_v33 = vld [vmem:[%s6193_s16 + $0xbb] sm:$0xff] }
 0x103   : > { %5652 = vmatmul.mubr.msk.f32.gmra.mrb[4].mxu0 %vm239_vm0, %v4594_v5  ;;  %5348 = vmatprep.mubr.msk.f32.mxu1 %vm239_vm0, %v6950_v35  ;;  %v4311_v35 = vld [vmem:[%s6193_s16 + $0xc3] sm:$0xff] }
 0x104   : > { %5654 = vmatprep.mubr.msk.f32.mxu0 %vm239_vm0, %v4595_v8 }
 0x106   : > { %5349 = vmatmul.mubr.msk.f32.gmra.mrb[22].mxu1 %vm239_vm0, %v6962_v63  ;;  %v4612_v63 = vld [vmem:[%s6193_s16 + $0xde] sm:$0xff] }
 0x107   : > { %5655 = vmatmul.mubr.msk.f32.gmra.mrb[6].mxu0 %vm239_vm0, %v4596_v10  ;;  %5351 = vmatprep.mubr.msk.f32.mxu1 %vm239_vm0, %v6967_v39  ;;  %v4613_v39 = vld [vmem:[%s6193_s16 + $0xe6] sm:$0xff] }
 0x108   : > { %5657 = vmatprep.mubr.msk.f32.mxu0 %vm239_vm0, %v4597_v13 }
 0x10a   : > { %5352 = vmatmul.mubr.msk.f32.gmra.mrb[24].mxu1 %vm239_vm0, %v6977_v6  ;;  %v4614_v6 = vld [vmem:[%s6193_s16 + $0xee] sm:$0xff] }
 0x10b   : > { %5658 = vmatmul.mubr.msk.f32.gmra.mrb[8].mxu0 %vm239_vm0, %v4598_v15  ;;  %5354 = vmatprep.mubr.msk.f32.mxu1 %vm239_vm0, %v6982_v41  ;;  %v4615_v41 = vld [vmem:[%s6193_s16 + $0xf6] sm:$0xff] }
 0x10c   : > { %5660 = vmatprep.mubr.msk.f32.mxu0 %vm239_vm0, %v4599_v16 }
 0x10e   : > { %5355 = vmatmul.mubr.msk.f32.gmra.mrb[26].mxu1 %vm239_vm0, %v6992_v45  ;;  %v4616_v45 = vld [vmem:[%s6193_s16 + $0xfe] sm:$0xff] }
 0x10f   : > { %5661 = vmatmul.mubr.msk.f32.gmra.mrb[10].mxu0 %vm239_vm0, %v4600_v17  ;;  %5357 = vmatprep.mubr.msk.f32.mxu1 %vm239_vm0, %v6997_v19  ;;  %v4617_v19 = vld [vmem:[%s6193_s16 + $0x106] sm:$0xff] }
 0x110   : > { %5663 = vmatprep.mubr.msk.f32.mxu0 %vm239_vm0, %v4601_v20 }
 0x112   : > { %5358 = vmatmul.mubr.msk.f32.gmra.mrb[28].mxu1 %vm239_vm0, %v7006_v28  ;;  %v4618_v28 = vld [vmem:[%s6193_s16 + $0x10e] sm:$0xff]  ;;  %s4027_s16 = sshll.u32 %s4023_s13, 5 }
 0x113   : > { %5664 = vmatmul.mubr.msk.f32.gmra.mrb[12].mxu0 %vm239_vm0, %v4602_v23  ;;  %5360 = vmatprep.mubr.msk.f32.mxu1 %vm239_vm0, %v4244_v24  ;;  %p147_p3 = scmp.lt.s32.totalorder %s4027_s16, 95 }
 0x114   : > { %5666 = vmatprep.mubr.msk.f32.mxu0 %vm239_vm0, %v4603_v26 }
 0x115   : > { %s7354_s16 = smov (!%p147_p3, %s4027_s16), 95 }
 0x116   : > { %5361 = vmatmul.mubr.msk.f32.gmra.mrb[30].mxu1 %vm239_vm0, %v4245_v37  ;;  %s4028_s13 = sshll.u32 %s7354_s16, 2 }
 0x117   : > { %5667 = vmatmul.mubr.msk.f32.gmra.mrb[14].mxu0 %vm239_vm0, %v4604_v27  ;;  %5405 = vmatprep.mubr.msk.f32.mxu1 %vm239_vm0, %v4305_v29  ;;  %s7244_s17 = scalar_lea.vmem %s7352_s3, %s4028_s13 }
 0x118   : > { %5669 = vmatprep.mubr.msk.f32.mxu0 %vm239_vm0, %v4605_v31 }
 0x11a   : > { %5406 = vmatmul.mubr.msk.f32.vlgmr.msra.gmra.mrb[16].mxu1 %vm239_vm0, %v4306_v42 }
 0x11b   : > { %5670 = vmatmul.mubr.msk.f32.gmra.mrb[16].mxu0 %vm239_vm0, %v4606_v44  ;;  %5408 = vmatprep.mubr.msk.f32.mxu1 %vm239_vm0, %v4307_v0 }
 0x11c   : > { %5672 = vmatprep.mubr.msk.f32.mxu0 %vm239_vm0, %v4607_v22 }
 0x11e   : > { %5409 = vmatmul.mubr.msk.f32.gmra.mrb[18].mxu1 %vm239_vm0, %v4308_v49 }
 0x11f   : > { %5673 = vmatmul.mubr.msk.f32.gmra.mrb[18].mxu0 %vm239_vm0, %v4608_v32  ;;  %5411 = vmatprep.mubr.msk.f32.mxu1 %vm239_vm0, %v4309_v51 }
 0x120   : > { %5675 = vmatprep.mubr.msk.f32.mxu0 %vm239_vm0, %v4609_v54 }
 0x122   : > { %5412 = vmatmul.mubr.msk.f32.gmra.mrb[20].mxu1 %vm239_vm0, %v4310_v33 }
 0x123   : > { %5676 = vmatmul.mubr.msk.f32.gmra.mrb[20].mxu0 %vm239_vm0, %v4610_v56  ;;  %5414 = vmatprep.mubr.msk.f32.mxu1 %vm239_vm0, %v4311_v35 }
 0x124   : > { %5678 = vmatprep.mubr.msk.f32.mxu0 %vm239_vm0, %v4611_v38 }
 0x126   : > { %5415 = vmatmul.mubr.msk.f32.gmra.mrb[22].mxu1 %vm239_vm0, %v4312_v61 }
 0x127   : > { %5679 = vmatmul.mubr.msk.f32.gmra.mrb[22].mxu0 %vm239_vm0, %v4612_v63  ;;  %5417 = vmatprep.mubr.msk.f32.mxu1 %vm239_vm0, %v4313_v2 }
 0x128   : > { %5681 = vmatprep.mubr.msk.f32.mxu0 %vm239_vm0, %v4613_v39 }
 0x12a   : > { %5418 = vmatmul.mubr.msk.f32.gmra.mrb[24].mxu1 %vm239_vm0, %v4314_v4 }
 0x12b   : > { %5682 = vmatmul.mubr.msk.f32.gmra.mrb[24].mxu0 %vm239_vm0, %v4614_v6  ;;  %5420 = vmatprep.mubr.msk.f32.mxu1 %vm239_vm0, %v4315_v9 }
 0x12c   : > { %5684 = vmatprep.mubr.msk.f32.mxu0 %vm239_vm0, %v4615_v41 }
 0x12e   : > { %5421 = vmatmul.mubr.msk.f32.gmra.mrb[26].mxu1 %vm239_vm0, %v4316_v11 }
 0x12f   : > { %5685 = vmatmul.mubr.msk.f32.gmra.mrb[26].mxu0 %vm239_vm0, %v4616_v45  ;;  %5423 = vmatprep.mubr.msk.f32.mxu1 %vm239_vm0, %v4317_v46 }
 0x130   : > { %5687 = vmatprep.mubr.msk.f32.mxu0 %vm239_vm0, %v4617_v19 }
 0x132   : > { %5424 = vmatmul.mubr.msk.f32.gmra.mrb[28].mxu1 %vm239_vm0, %v4318_v48 }
 0x133   : > { %5688 = vmatmul.mubr.msk.f32.gmra.mrb[28].mxu0 %vm239_vm0, %v4618_v28  ;;  %5426 = vmatprep.mubr.msk.f32.mxu1 %vm239_vm0, %v4319_v52 }
 0x134   : > { %5690 = vmatprep.mubr.msk.f32.mxu0 %vm239_vm0, %v4619_v57 }
 0x136   : > { %5427 = vmatmul.mubr.msk.f32.gmra.mrb[30].mxu1 %vm239_vm0, %v4320_v40 }
 0x137   : > { %5691 = vmatmul.mubr.msk.f32.gmra.mrb[30].mxu0 %vm239_vm0, %v4620_v62 }
 0x1ad   : > { %v5317_v14 = vpop.f32.mrb[0].mxu1 }
 0x1ae   : > { %v1498_v3 = vpop.f32.mrb[1].mxu1 }
 0x1b1   : > { %v5320_v7 = vpop.f32.mrb[2].mxu1 }
 0x1b2   : > { %v1508_v21 = vpop.f32.mrb[3].mxu1 }
 0x1b5   : > { %v5323_v47 = vpop.f32.mrb[4].mxu1 }
 0x1b6   : > { %v1518_v30 = vpop.f32.mrb[5].mxu1 }
 0x1b9   : > { %v5326_v12 = vpop.f32.mrb[6].mxu1 }
 0x1ba   : > { %v1528_v18 = vpop.f32.mrb[7].mxu1 }
 0x1bd   : > { %v5329_v55 = vpop.f32.mrb[8].mxu1 }
 0x1be   : > { %v7217_v25 = vpop.f32.mrb[9].mxu1 }
 0x1c1   : > { %v7219_v34 = vpop.f32.mrb[10].mxu1 }
 0x1c2   : > { %v7221_v36 = vpop.f32.mrb[11].mxu1 }
 0x1c5   : > { %v7223_v43 = vpop.f32.mrb[12].mxu1 }
 0x1c6   : > { %v7225_v59 = vpop.f32.mrb[13].mxu1 }
 0x1c9   : > { %v7229_v50 = vpop.f32.mrb[14].mxu1 }
 0x1ca   : > { %v7231_v53 = vpop.f32.mrb[15].mxu1 }
 0x1ce   : > { %v5647_v58 = vpop.f32.mrb[0].mxu0 }
 0x1cf   : > { %v5847_v1 = vadd.f32 %v5647_v58, %v5317_v14  ;;  %v3498_v5 = vpop.f32.mrb[1].mxu0 }
 0x1d0   : > { %v5848_v8 = vadd.f32 %v3498_v5, %v1498_v3 }
 0x1d1   : > { %v3697_v10 = vadd.f32 %v5847_v1, %v7236_v60 }
 0x1d2   : > { %v3696_v13 = vadd.f32 %v5848_v8, %v7236_v60  ;;  %v5650_v15 = vpop.f32.mrb[2].mxu0 }
 0x1d3   : > { %v3729_v16 = vmul.f32 0.2, %v3697_v10  ;;  %v5849_v17 = vadd.f32 %v5650_v15, %v5320_v7  ;;  %v3508_v20 = vpop.f32.mrb[3].mxu0 }
 0x1d4   : > { %v3728_v23 = vmul.f32 0.2, %v3696_v13  ;;  %v5850_v24 = vadd.f32 %v3508_v20, %v1508_v21 }
 0x1d5   : > { %v3761_v26 = vmax.f32 %v3697_v10, %v3729_v16  ;;  %v3699_v37 = vadd.f32 %v5849_v17, %v7236_v60 }
 0x1d6   : > { %v3760_v27 = vmax.f32 %v3696_v13, %v3728_v23  ;;  %v3698_v29 = vadd.f32 %v5850_v24, %v7236_v60  ;;  %v5653_v31 = vpop.f32.mrb[4].mxu0 }
 0x1d7   : > { %v4699_v42 = vpack.c.bf16 %v3761_v26, %v3761_v26  ;;  %v3731_v44 = vmul.f32 0.2, %v3699_v37  ;;  %v5851_v0 = vadd.f32 %v5653_v31, %v5323_v47  ;;  %v3518_v22 = vpop.f32.mrb[5].mxu0 }
 0x1d8   : > { %v4698_v49 = vpack.c.bf16 %v3760_v27, %v3760_v27  ;;  %v3730_v32 = vmul.f32 0.2, %v3698_v29  ;;  %v5852_v51 = vadd.f32 %v3518_v22, %v1518_v30 }
 0x1d9   : > { %3922 = vst.msk [vmem:[%s7244_s17 + $0x4] sm:$0xf] %vm3920_vm2, %v4699_v42  ;;  %v3763_v54 = vmax.f32 %v3699_v37, %v3731_v44  ;;  %v3701_v33 = vadd.f32 %v5851_v0, %v7236_v60 }
 0x1da   : > { %3921 = vst.msk [vmem:[%s7244_s17] sm:$0xf] %vm3920_vm2, %v4698_v49  ;;  %v3762_v56 = vmax.f32 %v3698_v29, %v3730_v32  ;;  %v3700_v35 = vadd.f32 %v5852_v51, %v7236_v60  ;;  %v5656_v38 = vpop.f32.mrb[6].mxu0 }
 0x1db   : > { %v4701_v61 = vpack.c.bf16 %v3763_v54, %v3763_v54  ;;  %v3733_v63 = vmul.f32 0.2, %v3701_v33  ;;  %v5853_v2 = vadd.f32 %v5656_v38, %v5326_v12  ;;  %v3528_v39 = vpop.f32.mrb[7].mxu0 }
 0x1dc   : > { %v4700_v4 = vpack.c.bf16 %v3762_v56, %v3762_v56  ;;  %v3732_v6 = vmul.f32 0.2, %v3700_v35  ;;  %v5854_v9 = vadd.f32 %v3528_v39, %v1528_v18 }
 0x1dd   : > { %3924 = vst.msk [vmem:[%s7244_s17 + $0xc] sm:$0xf] %vm3920_vm2, %v4701_v61  ;;  %v3765_v41 = vmax.f32 %v3701_v33, %v3733_v63  ;;  %v3703_v11 = vadd.f32 %v5853_v2, %v7236_v60 }
 0x1de   : > { %3923 = vst.msk [vmem:[%s7244_s17 + $0x8] sm:$0xf] %vm3920_vm2, %v4700_v4  ;;  %v3764_v45 = vmax.f32 %v3700_v35, %v3732_v6  ;;  %v3702_v46 = vadd.f32 %v5854_v9, %v7236_v60  ;;  %v5659_v19 = vpop.f32.mrb[8].mxu0 }
 0x1df   : > { %v4703_v48 = vpack.c.bf16 %v3765_v41, %v3765_v41  ;;  %v3735_v28 = vmul.f32 0.2, %v3703_v11  ;;  %v5855_v52 = vadd.f32 %v5659_v19, %v5329_v55  ;;  %v3538_v57 = vpop.f32.mrb[9].mxu0 }
 0x1e0   : > { %v4702_v40 = vpack.c.bf16 %v3764_v45, %v3764_v45  ;;  %v3734_v62 = vmul.f32 0.2, %v3702_v46  ;;  %v5856_v14 = vadd.f32 %v3538_v57, %v7217_v25 }
 0x1e1   : > { %3926 = vst.msk [vmem:[%s7244_s17 + $0x14] sm:$0xf] %vm3920_vm2, %v4703_v48  ;;  %v3767_v3 = vmax.f32 %v3703_v11, %v3735_v28  ;;  %v3705_v7 = vadd.f32 %v5855_v52, %v7236_v60 }
 0x1e2   : > { %3925 = vst.msk [vmem:[%s7244_s17 + $0x10] sm:$0xf] %vm3920_vm2, %v4702_v40  ;;  %v3766_v21 = vmax.f32 %v3702_v46, %v3734_v62  ;;  %v3704_v47 = vadd.f32 %v5856_v14, %v7236_v60  ;;  %v5662_v30 = vpop.f32.mrb[10].mxu0 }
 0x1e3   : > { %v4705_v12 = vpack.c.bf16 %v3767_v3, %v3767_v3  ;;  %v3737_v18 = vmul.f32 0.2, %v3705_v7  ;;  %v5857_v55 = vadd.f32 %v5662_v30, %v7219_v34  ;;  %v3548_v58 = vpop.f32.mrb[11].mxu0 }
 0x1e4   : > { %v4704_v1 = vpack.c.bf16 %v3766_v21, %v3766_v21  ;;  %v3736_v5 = vmul.f32 0.2, %v3704_v47  ;;  %v5858_v25 = vadd.f32 %v3548_v58, %v7221_v36 }
 0x1e5   : > { %3928 = vst.msk [vmem:[%s7244_s17 + $0x1c] sm:$0xf] %vm3920_vm2, %v4705_v12  ;;  %v3769_v8 = vmax.f32 %v3705_v7, %v3737_v18  ;;  %v3707_v10 = vadd.f32 %v5857_v55, %v7236_v60 }
 0x1e6   : > { %3927 = vst.msk [vmem:[%s7244_s17 + $0x18] sm:$0xf] %vm3920_vm2, %v4704_v1  ;;  %v3768_v13 = vmax.f32 %v3704_v47, %v3736_v5  ;;  %v3706_v15 = vadd.f32 %v5858_v25, %v7236_v60  ;;  %v5665_v16 = vpop.f32.mrb[12].mxu0 }
 0x1e7   : > { %v4707_v17 = vpack.c.bf16 %v3769_v8, %v3769_v8  ;;  %v3739_v34 = vmul.f32 0.2, %v3707_v10  ;;  %v5859_v20 = vadd.f32 %v5665_v16, %v7223_v43  ;;  %v3558_v23 = vpop.f32.mrb[13].mxu0 }
 0x1e8   : > { %v4706_v24 = vpack.c.bf16 %v3768_v13, %v3768_v13  ;;  %v3738_v26 = vmul.f32 0.2, %v3706_v15  ;;  %v5860_v36 = vadd.f32 %v3558_v23, %v7225_v59 }
 0x1e9   : > { %3930 = vst.msk [vmem:[%s7244_s17 + $0x24] sm:$0xf] %vm3920_vm2, %v4707_v17  ;;  %v3771_v37 = vmax.f32 %v3707_v10, %v3739_v34  ;;  %v3709_v27 = vadd.f32 %v5859_v20, %v7236_v60 }
 0x1ea   : > { %3929 = vst.msk [vmem:[%s7244_s17 + $0x20] sm:$0xf] %vm3920_vm2, %v4706_v24  ;;  %v3770_v29 = vmax.f32 %v3706_v15, %v3738_v26  ;;  %v3708_v31 = vadd.f32 %v5860_v36, %v7236_v60  ;;  %v5668_v42 = vpop.f32.mrb[14].mxu0 }
 0x1eb   : > { %v4709_v44 = vpack.c.bf16 %v3771_v37, %v3771_v37  ;;  %v3741_v43 = vmul.f32 0.2, %v3709_v27  ;;  %v5861_v0 = vadd.f32 %v5668_v42, %v7229_v50  ;;  %v3568_v22 = vpop.f32.mrb[15].mxu0 }
 0x1ec   : > { %v4708_v49 = vpack.c.bf16 %v3770_v29, %v3770_v29  ;;  %v3740_v32 = vmul.f32 0.2, %v3708_v31  ;;  %v5862_v59 = vadd.f32 %v3568_v22, %v7231_v53 }
 0x1ed   : > { %3932 = vst.msk [vmem:[%s7244_s17 + $0x2c] sm:$0xf] %vm3920_vm2, %v4709_v44  ;;  %v3773_v51 = vmax.f32 %v3709_v27, %v3741_v43  ;;  %v3711_v54 = vadd.f32 %v5861_v0, %v7236_v60  ;;  %v5407_v33 = vpop.f32.mrb[16].mxu1 }
 0x1ee   : > { %3931 = vst.msk [vmem:[%s7244_s17 + $0x28] sm:$0xf] %vm3920_vm2, %v4708_v49  ;;  %v3772_v56 = vmax.f32 %v3708_v31, %v3740_v32  ;;  %v3710_v35 = vadd.f32 %v5862_v59, %v7236_v60  ;;  %v5671_v38 = vpop.f32.mrb[16].mxu0  ;;  %v1978_v50 = vpop.f32.mrb[17].mxu1 }
 0x1ef   : > { %v4711_v61 = vpack.c.bf16 %v3773_v51, %v3773_v51  ;;  %v3743_v63 = vmul.f32 0.2, %v3711_v54  ;;  %v5863_v2 = vadd.f32 %v5671_v38, %v5407_v33  ;;  %v3578_v39 = vpop.f32.mrb[17].mxu0 }
 0x1f0   : > { %v4710_v53 = vpack.c.bf16 %v3772_v56, %v3772_v56  ;;  %v3742_v4 = vmul.f32 0.2, %v3710_v35  ;;  %v5864_v6 = vadd.f32 %v3578_v39, %v1978_v50 }
 0x1f1   : > { %3934 = vst.msk [vmem:[%s7244_s17 + $0x34] sm:$0xf] %vm3920_vm2, %v4711_v61  ;;  %v3775_v9 = vmax.f32 %v3711_v54, %v3743_v63  ;;  %v3713_v41 = vadd.f32 %v5863_v2, %v7236_v60  ;;  %v5410_v11 = vpop.f32.mrb[18].mxu1 }
 0x1f2   : > { %3933 = vst.msk [vmem:[%s7244_s17 + $0x30] sm:$0xf] %vm3920_vm2, %v4710_v53  ;;  %v3774_v45 = vmax.f32 %v3710_v35, %v3742_v4  ;;  %v3712_v46 = vadd.f32 %v5864_v6, %v7236_v60  ;;  %v5674_v19 = vpop.f32.mrb[18].mxu0  ;;  %v1988_v48 = vpop.f32.mrb[19].mxu1 }
 0x1f3   : > { %v4713_v28 = vpack.c.bf16 %v3775_v9, %v3775_v9  ;;  %v3745_v52 = vmul.f32 0.2, %v3713_v41  ;;  %v5865_v57 = vadd.f32 %v5674_v19, %v5410_v11  ;;  %v3588_v40 = vpop.f32.mrb[19].mxu0 }
 0x1f4   : > { %v4712_v62 = vpack.c.bf16 %v3774_v45, %v3774_v45  ;;  %v3744_v14 = vmul.f32 0.2, %v3712_v46  ;;  %v5866_v3 = vadd.f32 %v3588_v40, %v1988_v48 }
 0x1f5   : > { %3936 = vst.msk [vmem:[%s7244_s17 + $0x3c] sm:$0xf] %vm3920_vm2, %v4713_v28  ;;  %v3777_v7 = vmax.f32 %v3713_v41, %v3745_v52  ;;  %v3715_v21 = vadd.f32 %v5865_v57, %v7236_v60  ;;  %v5413_v47 = vpop.f32.mrb[20].mxu1 }
 0x1f6   : > { %3935 = vst.msk [vmem:[%s7244_s17 + $0x38] sm:$0xf] %vm3920_vm2, %v4712_v62  ;;  %v3776_v30 = vmax.f32 %v3712_v46, %v3744_v14  ;;  %v3714_v12 = vadd.f32 %v5866_v3, %v7236_v60  ;;  %v5677_v18 = vpop.f32.mrb[20].mxu0  ;;  %v1998_v55 = vpop.f32.mrb[21].mxu1 }
 0x1f7   : > { %v4715_v58 = vpack.c.bf16 %v3777_v7, %v3777_v7  ;;  %v3747_v1 = vmul.f32 0.2, %v3715_v21  ;;  %v5867_v5 = vadd.f32 %v5677_v18, %v5413_v47  ;;  %v3598_v25 = vpop.f32.mrb[21].mxu0 }
 0x1f8   : > { %v4714_v8 = vpack.c.bf16 %v3776_v30, %v3776_v30  ;;  %v3746_v10 = vmul.f32 0.2, %v3714_v12  ;;  %v5868_v13 = vadd.f32 %v3598_v25, %v1998_v55 }
 0x1f9   : > { %3938 = vst.msk [vmem:[%s7244_s17 + $0x44] sm:$0xf] %vm3920_vm2, %v4715_v58  ;;  %v3779_v15 = vmax.f32 %v3715_v21, %v3747_v1  ;;  %v3717_v16 = vadd.f32 %v5867_v5, %v7236_v60  ;;  %v5416_v17 = vpop.f32.mrb[22].mxu1 }
 0x1fa   : > { %3937 = vst.msk [vmem:[%s7244_s17 + $0x40] sm:$0xf] %vm3920_vm2, %v4714_v8  ;;  %v3778_v34 = vmax.f32 %v3714_v12, %v3746_v10  ;;  %v3716_v20 = vadd.f32 %v5868_v13, %v7236_v60  ;;  %v5680_v23 = vpop.f32.mrb[22].mxu0  ;;  %v2008_v24 = vpop.f32.mrb[23].mxu1 }
 0x1fb   : > { %v4717_v26 = vpack.c.bf16 %v3779_v15, %v3779_v15  ;;  %v3749_v36 = vmul.f32 0.2, %v3717_v16  ;;  %v5869_v37 = vadd.f32 %v5680_v23, %v5416_v17  ;;  %v3608_v27 = vpop.f32.mrb[23].mxu0 }
 0x1fc   : > { %v4716_v29 = vpack.c.bf16 %v3778_v34, %v3778_v34  ;;  %v3748_v31 = vmul.f32 0.2, %v3716_v20  ;;  %v5870_v42 = vadd.f32 %v3608_v27, %v2008_v24 }
 0x1fd   : > { %3940 = vst.msk [vmem:[%s7244_s17 + $0x4c] sm:$0xf] %vm3920_vm2, %v4717_v26  ;;  %v3781_v44 = vmax.f32 %v3717_v16, %v3749_v36  ;;  %v3719_v43 = vadd.f32 %v5869_v37, %v7236_v60  ;;  %v5419_v0 = vpop.f32.mrb[24].mxu1 }
 0x1fe   : > { %3939 = vst.msk [vmem:[%s7244_s17 + $0x48] sm:$0xf] %vm3920_vm2, %v4716_v29  ;;  %v3780_v22 = vmax.f32 %v3716_v20, %v3748_v31  ;;  %v3718_v49 = vadd.f32 %v5870_v42, %v7236_v60  ;;  %v5683_v32 = vpop.f32.mrb[24].mxu0  ;;  %v2018_v59 = vpop.f32.mrb[25].mxu1 }
 0x1ff   : > { %v4719_v51 = vpack.c.bf16 %v3781_v44, %v3781_v44  ;;  %v3751_v54 = vmul.f32 0.2, %v3719_v43  ;;  %v5871_v33 = vadd.f32 %v5683_v32, %v5419_v0  ;;  %v3618_v56 = vpop.f32.mrb[25].mxu0 }
 0x200   : > { %v4718_v35 = vpack.c.bf16 %v3780_v22, %v3780_v22  ;;  %v3750_v38 = vmul.f32 0.2, %v3718_v49  ;;  %v5872_v50 = vadd.f32 %v3618_v56, %v2018_v59 }
 0x201   : > { %3942 = vst.msk [vmem:[%s7244_s17 + $0x54] sm:$0xf] %vm3920_vm2, %v4719_v51  ;;  %v3783_v61 = vmax.f32 %v3719_v43, %v3751_v54  ;;  %v3721_v63 = vadd.f32 %v5871_v33, %v7236_v60  ;;  %v5422_v2 = vpop.f32.mrb[26].mxu1 }
 0x202   : > { %3941 = vst.msk [vmem:[%s7244_s17 + $0x50] sm:$0xf] %vm3920_vm2, %v4718_v35  ;;  %v3782_v39 = vmax.f32 %v3718_v49, %v3750_v38  ;;  %v3720_v53 = vadd.f32 %v5872_v50, %v7236_v60  ;;  %v5686_v4 = vpop.f32.mrb[26].mxu0  ;;  %v2028_v6 = vpop.f32.mrb[27].mxu1 }
 0x203   : > { %v4721_v9 = vpack.c.bf16 %v3783_v61, %v3783_v61  ;;  %v3753_v41 = vmul.f32 0.2, %v3721_v63  ;;  %v5873_v11 = vadd.f32 %v5686_v4, %v5422_v2  ;;  %v3628_v45 = vpop.f32.mrb[27].mxu0 }
 0x204   : > { %v4720_v46 = vpack.c.bf16 %v3782_v39, %v3782_v39  ;;  %v3752_v19 = vmul.f32 0.2, %v3720_v53  ;;  %v5874_v48 = vadd.f32 %v3628_v45, %v2028_v6 }
 0x205   : > { %3944 = vst.msk [vmem:[%s7244_s17 + $0x5c] sm:$0xf] %vm3920_vm2, %v4721_v9  ;;  %v3785_v28 = vmax.f32 %v3721_v63, %v3753_v41  ;;  %v3723_v52 = vadd.f32 %v5873_v11, %v7236_v60  ;;  %v5425_v57 = vpop.f32.mrb[28].mxu1 }
 0x206   : > { %3943 = vst.msk [vmem:[%s7244_s17 + $0x58] sm:$0xf] %vm3920_vm2, %v4720_v46  ;;  %v3784_v40 = vmax.f32 %v3720_v53, %v3752_v19  ;;  %v3722_v62 = vadd.f32 %v5874_v48, %v7236_v60  ;;  %v5689_v14 = vpop.f32.mrb[28].mxu0  ;;  %v2038_v3 = vpop.f32.mrb[29].mxu1 }
 0x207   : > { %v4723_v7 = vpack.c.bf16 %v3785_v28, %v3785_v28  ;;  %v3755_v21 = vmul.f32 0.2, %v3723_v52  ;;  %v5875_v47 = vadd.f32 %v5689_v14, %v5425_v57  ;;  %v3638_v30 = vpop.f32.mrb[29].mxu0 }
 0x208   : > { %v4722_v12 = vpack.c.bf16 %v3784_v40, %v3784_v40  ;;  %v3754_v18 = vmul.f32 0.2, %v3722_v62  ;;  %v5876_v55 = vadd.f32 %v3638_v30, %v2038_v3 }
 0x209   : > { %3946 = vst.msk [vmem:[%s7244_s17 + $0x64] sm:$0xf] %vm3920_vm2, %v4723_v7  ;;  %v3787_v58 = vmax.f32 %v3723_v52, %v3755_v21  ;;  %v3725_v1 = vadd.f32 %v5875_v47, %v7236_v60  ;;  %v5428_v5 = vpop.f32.mrb[30].mxu1 }
 0x20a   : > { %3945 = vst.msk [vmem:[%s7244_s17 + $0x60] sm:$0xf] %vm3920_vm2, %v4722_v12  ;;  %v3786_v25 = vmax.f32 %v3722_v62, %v3754_v18  ;;  %v3724_v8 = vadd.f32 %v5876_v55, %v7236_v60  ;;  %v5692_v10 = vpop.f32.mrb[30].mxu0  ;;  %v2048_v13 = vpop.f32.mrb[31].mxu1 }
 0x20b   : > { %v4725_v15 = vpack.c.bf16 %v3787_v58, %v3787_v58  ;;  %v3757_v16 = vmul.f32 0.2, %v3725_v1  ;;  %v5877_v17 = vadd.f32 %v5692_v10, %v5428_v5  ;;  %v3648_v34 = vpop.f32.mrb[31].mxu0 }
 0x20c   : > { %v4724_v20 = vpack.c.bf16 %v3786_v25, %v3786_v25  ;;  %v3756_v23 = vmul.f32 0.2, %v3724_v8  ;;  %v5878_v24 = vadd.f32 %v3648_v34, %v2048_v13 }
 0x20d   : > { %3948 = vst.msk [vmem:[%s7244_s17 + $0x6c] sm:$0xf] %vm3920_vm2, %v4725_v15  ;;  %v3789_v26 = vmax.f32 %v3725_v1, %v3757_v16  ;;  %v3727_v36 = vadd.f32 %v5877_v17, %v7236_v60 }
 0x20e   : > { %3947 = vst.msk [vmem:[%s7244_s17 + $0x68] sm:$0xf] %vm3920_vm2, %v4724_v20  ;;  %v3788_v37 = vmax.f32 %v3724_v8, %v3756_v23  ;;  %v3726_v27 = vadd.f32 %v5878_v24, %v7236_v60 }
 0x20f   : > { %v4727_v29 = vpack.c.bf16 %v3789_v26, %v3789_v26  ;;  %v3759_v31 = vmul.f32 0.2, %v3727_v36 }
 0x210   : > { %v4726_v42 = vpack.c.bf16 %v3788_v37, %v3788_v37  ;;  %v3758_v44 = vmul.f32 0.2, %v3726_v27 }
 0x211   : > { %3950 = vst.msk [vmem:[%s7244_s17 + $0x74] sm:$0xf] %vm3920_vm2, %v4727_v29  ;;  %v3791_v43 = vmax.f32 %v3727_v36, %v3759_v31 }
 0x212   : > { %3949 = vst.msk [vmem:[%s7244_s17 + $0x70] sm:$0xf] %vm3920_vm2, %v4726_v42  ;;  %v3790_v0 = vmax.f32 %v3726_v27, %v3758_v44 }
 0x213   : > { %v4729_v22 = vpack.c.bf16 %v3791_v43, %v3791_v43 }
 0x214   : > { %v4728_v49 = vpack.c.bf16 %v3790_v0, %v3790_v0 }
 0x215   : > { %3952 = vst.msk [vmem:[%s7244_s17 + $0x7c] sm:$0xf] %vm3920_vm2, %v4729_v22 }
 0x216   : > { %3951 = vst.msk [vmem:[%s7244_s17 + $0x78] sm:$0xf] %vm3920_vm2, %v4728_v49 }
 0x217 PF: > { %s13_s12 = sadd.s32 1, %s6118_s12  }
 0x218   : > { %p10_p4 = scmp.ge.s32.totalorder %s13_s12, 5  }
 0x21a   :  { %12 = sbr.rel (!%p10_p4) target bundleno = 1 (0x1), region = 76 }

// kernel: _lambda_.9
= control target key start
LH: loop header
LB: loop body
LE: loop exit
PB: predicated region body
PF: predicated region fallthrough
CT: control target
= control target key end

     0   :  { %s1649_s12 = smov 0   ;;  %s1938_s0 = inlined_call_operand.vmem [shape: bf16[2048,8], index: 0, kind: input, shape index: {}]   ;;  %s1939_s1 = inlined_call_operand.vmem [shape: bf16[1,8,4], index: 1, kind: input, shape index: {}]   ;;  %s1940_s2 = inlined_call_operand.vmem [shape: f32[1,4], index: 2, kind: input, shape index: {}]   ;;  %s1941_s3 = inlined_call_operand.vmem [shape: bf16[2048,4], index: 3, kind: output, shape index: {}]  }
   0x1 LB: > { %s1275_s13 = sadd.s32 4294967295, %s1627_s12   ;;  %p1278_p0 = scmp.ge.s32.totalorder %s1627_s12, 1  ;;  %s1627_s12 = sphi %s1649_s12, %s13_s12  }
   0x2   : > { %p127_p1 = scmp.lt.s32.totalorder %s1627_s12, 5 }
   0x4   : > { %p128_p2 = pnand %p1278_p0, %p127_p1 }
   0x5   : > { %v222_v0 = vld [vmem:[%s1939_s1] sm:$0xf] (!%p128_p2)  ;;  %vm487_vm0 = vcmask (!%p128_p2), 1043456   ;;  %s1281_s16 = sshll.u32 (!%p128_p2), %s1275_s13, 9  ;;  %vm390_vm1 = vcmask (!%p128_p2), 64512   ;;  %s1279_s22 = sshll.u32 (!%p128_p2), %s1275_s13, 6 }
   0x6   : > { %131 = sbr.rel (%p128_p2) target bundleno = 294 (0x126), region = 32  ;;  %1579 = vmatprep.subr.msk.bf16.mxu0 (!%p128_p2), %vm487_vm0, %v222_v0  ;;  %1580 = vmatprep.subr.msk.bf16.mxu1 (!%p128_p2), %vm487_vm0, %v222_v0  ;;  %v489_v1 = vsel (!%p128_p2), %vm487_vm0, %v222_v0, 0  ;;  %s154_s17 = sshra.s32 (!%p128_p2), %s1281_s16, 3  ;;  %v1736_v34 = vld [vmem:[%s1940_s2] ss:$0 sm:$0xff] (!%p128_p2)  ;;  %vm1164_vm2 = vcmask (!%p128_p2), 27648  }
   0x7   : > { %1512 = vmatpush3.bf16.msra.mxu0 (!%p128_p2), %v489_v1  ;;  %1578 = vmatpush3.bf16.msra.mxu1 (!%p128_p2), %v489_v1  ;;  %s1282_s18 = sshll.u32 (!%p128_p2), %s154_s17, 2  ;;  %p147_p3 = scmp.lt.s32.totalorder (!%p128_p2), %s1279_s22, 255 }
   0x8   : > { %s1665_s21 = scalar_lea.vmem (!%p128_p2), %s1938_s0, %s1282_s18 }
   0x9   : > { %v1589_v2 = vld [vmem:[%s1665_s21] sm:$0xff] (!%p128_p2)   ;;  %v1591_v4 = vld [vmem:[%s1665_s21 + $0x8] sm:$0xff] (!%p128_p2)   ;;  %v1593_v6 = vld [vmem:[%s1665_s21 + $0x10] sm:$0xff] (!%p128_p2)  }
   0xa   : > { %v1590_v3 = vld [vmem:[%s1665_s21 + $0x80] sm:$0xff] (!%p128_p2)   ;;  %1513 = vmatprep.mubr.msk.bf16.mxu0 (!%p128_p2), %vm390_vm1, %v1589_v2  ;;  %v1592_v5 = vld [vmem:[%s1665_s21 + $0x88] sm:$0xff] (!%p128_p2)   ;;  %v1594_v7 = vld [vmem:[%s1665_s21 + $0x90] sm:$0xff] (!%p128_p2)  }
   0xb   : > { %1545 = vmatprep.mubr.msk.bf16.mxu1 (!%p128_p2), %vm390_vm1, %v1590_v3  ;;  %1514 = vmatmul.mubr.msk.bf16.vlgmr.msra.gmra.mrb[0].mxu0 (!%p128_p2), %vm390_vm1, %v1591_v4  ;;  %v1595_v8 = vld [vmem:[%s1665_s21 + $0x18] sm:$0xff] (!%p128_p2)   ;;  %v1597_v10 = vld [vmem:[%s1665_s21 + $0x20] sm:$0xff] (!%p128_p2)   ;;  %v1599_v12 = vld [vmem:[%s1665_s21 + $0x28] sm:$0xff] (!%p128_p2)  }
   0xc   : > { %1546 = vmatmul.mubr.msk.bf16.vlgmr.msra.gmra.mrb[0].mxu1 (!%p128_p2), %vm390_vm1, %v1592_v5  ;;  %1517 = vmatprep.mubr.msk.bf16.mxu0 (!%p128_p2), %vm390_vm1, %v1593_v6  ;;  %v1596_v9 = vld [vmem:[%s1665_s21 + $0x98] sm:$0xff] (!%p128_p2)   ;;  %v1598_v11 = vld [vmem:[%s1665_s21 + $0xa0] sm:$0xff] (!%p128_p2)   ;;  %v1600_v13 = vld [vmem:[%s1665_s21 + $0xa8] sm:$0xff] (!%p128_p2)  }
   0xd   : > { %1549 = vmatprep.mubr.msk.bf16.mxu1 %vm390_vm1, %v1594_v7  ;;  %v1601_v14 = vld [vmem:[%s1665_s21 + $0x30] sm:$0xff]   ;;  %v1603_v16 = vld [vmem:[%s1665_s21 + $0x38] sm:$0xff]   ;;  %v1605_v18 = vld [vmem:[%s1665_s21 + $0x40] sm:$0xff]   ;;  %s1943_s22 = smov (!%p147_p3, %s1279_s22), 255 }
   0xe   : > { %v1602_v15 = vld [vmem:[%s1665_s21 + $0xb0] sm:$0xff]   ;;  %v1604_v17 = vld [vmem:[%s1665_s21 + $0xb8] sm:$0xff]   ;;  %v1606_v19 = vld [vmem:[%s1665_s21 + $0xc0] sm:$0xff]   ;;  %s1280_s25 = sshll.u32 %s1943_s22, 2 }
   0xf   : > { %v1607_v20 = vld [vmem:[%s1665_s21 + $0x48] sm:$0xff]   ;;  %v1609_v22 = vld [vmem:[%s1665_s21 + $0x50] sm:$0xff]   ;;  %v1611_v24 = vld [vmem:[%s1665_s21 + $0x58] sm:$0xff]   ;;  %s1749_s28 = scalar_lea.vmem %s1941_s3, %s1280_s25 }
  0x10   : > { %v1608_v21 = vld [vmem:[%s1665_s21 + $0xc8] sm:$0xff]   ;;  %v1610_v23 = vld [vmem:[%s1665_s21 + $0xd0] sm:$0xff]   ;;  %v1612_v25 = vld [vmem:[%s1665_s21 + $0xd8] sm:$0xff]  }
  0x11   : > { %v1613_v26 = vld [vmem:[%s1665_s21 + $0x60] sm:$0xff]   ;;  %v1615_v28 = vld [vmem:[%s1665_s21 + $0x68] sm:$0xff]   ;;  %v1617_v30 = vld [vmem:[%s1665_s21 + $0x70] sm:$0xff]  }
  0x12   : > { %v1614_v27 = vld [vmem:[%s1665_s21 + $0xe0] sm:$0xff]   ;;  %v1616_v29 = vld [vmem:[%s1665_s21 + $0xe8] sm:$0xff]   ;;  %v1618_v31 = vld [vmem:[%s1665_s21 + $0xf0] sm:$0xff]  }
  0x13   : > { %1518 = vmatmul.mubr.msk.bf16.gmra.mrb[4].mxu0 %vm390_vm1, %v1595_v8  ;;  %v1619_v32 = vld [vmem:[%s1665_s21 + $0x78] sm:$0xff]  }
  0x14   : > { %1550 = vmatmul.mubr.msk.bf16.gmra.mrb[4].mxu1 %vm390_vm1, %v1596_v9  ;;  %1521 = vmatprep.mubr.msk.bf16.mxu0 %vm390_vm1, %v1597_v10  ;;  %v1620_v33 = vld [vmem:[%s1665_s21 + $0xf8] sm:$0xff]  }
  0x15   : > { %1553 = vmatprep.mubr.msk.bf16.mxu1 %vm390_vm1, %v1598_v11 }
  0x1b   : > { %1522 = vmatmul.mubr.msk.bf16.gmra.mrb[8].mxu0 %vm390_vm1, %v1599_v12 }
  0x1c   : > { %1554 = vmatmul.mubr.msk.bf16.gmra.mrb[8].mxu1 %vm390_vm1, %v1600_v13  ;;  %1525 = vmatprep.mubr.msk.bf16.mxu0 %vm390_vm1, %v1601_v14 }
  0x1d   : > { %1557 = vmatprep.mubr.msk.bf16.mxu1 %vm390_vm1, %v1602_v15 }
  0x23   : > { %1526 = vmatmul.mubr.msk.bf16.gmra.mrb[12].mxu0 %vm390_vm1, %v1603_v16 }
  0x24   : > { %1558 = vmatmul.mubr.msk.bf16.gmra.mrb[12].mxu1 %vm390_vm1, %v1604_v17  ;;  %1529 = vmatprep.mubr.msk.bf16.mxu0 %vm390_vm1, %v1605_v18 }
  0x25   : > { %1561 = vmatprep.mubr.msk.bf16.mxu1 %vm390_vm1, %v1606_v19 }
  0x2b   : > { %1530 = vmatmul.mubr.msk.bf16.gmra.mrb[16].mxu0 %vm390_vm1, %v1607_v20 }
  0x2c   : > { %1562 = vmatmul.mubr.msk.bf16.gmra.mrb[16].mxu1 %vm390_vm1, %v1608_v21  ;;  %1533 = vmatprep.mubr.msk.bf16.mxu0 %vm390_vm1, %v1609_v22 }
  0x2d   : > { %1565 = vmatprep.mubr.msk.bf16.mxu1 %vm390_vm1, %v1610_v23 }
  0x33   : > { %1534 = vmatmul.mubr.msk.bf16.gmra.mrb[20].mxu0 %vm390_vm1, %v1611_v24 }
  0x34   : > { %1566 = vmatmul.mubr.msk.bf16.gmra.mrb[20].mxu1 %vm390_vm1, %v1612_v25  ;;  %1537 = vmatprep.mubr.msk.bf16.mxu0 %vm390_vm1, %v1613_v26 }
  0x35   : > { %1569 = vmatprep.mubr.msk.bf16.mxu1 %vm390_vm1, %v1614_v27 }
  0x3b   : > { %1538 = vmatmul.mubr.msk.bf16.gmra.mrb[24].mxu0 %vm390_vm1, %v1615_v28 }
  0x3c   : > { %1570 = vmatmul.mubr.msk.bf16.gmra.mrb[24].mxu1 %vm390_vm1, %v1616_v29  ;;  %1541 = vmatprep.mubr.msk.bf16.mxu0 %vm390_vm1, %v1617_v30 }
  0x3d   : > { %1573 = vmatprep.mubr.msk.bf16.mxu1 %vm390_vm1, %v1618_v31 }
  0x43   : > { %1542 = vmatmul.mubr.msk.bf16.gmra.mrb[28].mxu0 %vm390_vm1, %v1619_v32 }
  0x44   : > { %1574 = vmatmul.mubr.msk.bf16.gmra.mrb[28].mxu1 %vm390_vm1, %v1620_v33 }
  0xde   : > { %v1515_v35 = vpop.f32.mrb[0].mxu0 }
  0xdf   : > { %v534_v36 = vadd.f32 %v1515_v35, %v1736_v34  ;;  %v1547_v37 = vpop.f32.mrb[0].mxu1  ;;  %v525_v38 = vpop.f32.mrb[1].mxu0 }
  0xe0   : > { %v662_v39 = vadd.f32 %v1547_v37, %v1736_v34  ;;  %v526_v40 = vadd.f32 %v1736_v34, %v525_v38  ;;  %v653_v41 = vpop.f32.mrb[1].mxu1  ;;  %v1516_v42 = vpop.f32.mrb[2].mxu0 }
  0xe1   : > { %v782_v43 = vmul.f32 0.2, %v534_v36  ;;  %v654_v44 = vadd.f32 %v1736_v34, %v653_v41  ;;  %v537_v45 = vadd.f32 %v1516_v42, %v1736_v34  ;;  %v1548_v46 = vpop.f32.mrb[2].mxu1  ;;  %v528_v47 = vpop.f32.mrb[3].mxu0 }
  0xe2   : > { %v814_v48 = vmul.f32 0.2, %v662_v39  ;;  %v780_v49 = vmul.f32 0.2, %v526_v40  ;;  %v665_v50 = vadd.f32 %v1548_v46, %v1736_v34  ;;  %v529_v51 = vadd.f32 %v1736_v34, %v528_v47  ;;  %v656_v52 = vpop.f32.mrb[3].mxu1 }
  0xe3   : > { %v846_v53 = vmax.f32 %v534_v36, %v782_v43  ;;  %v812_v54 = vmul.f32 0.2, %v654_v44  ;;  %v783_v55 = vmul.f32 0.2, %v537_v45  ;;  %v657_v56 = vadd.f32 %v1736_v34, %v656_v52 }
  0xe4   : > { %v878_v57 = vmax.f32 %v662_v39, %v814_v48  ;;  %v844_v58 = vmax.f32 %v526_v40, %v780_v49  ;;  %v815_v59 = vmul.f32 0.2, %v665_v50  ;;  %v781_v60 = vmul.f32 0.2, %v529_v51 }
  0xe5   : > { %v1416_v61 = vpack.c.bf16 %v846_v53, %v846_v53  ;;  %v876_v62 = vmax.f32 %v654_v44, %v812_v54  ;;  %v847_v63 = vmax.f32 %v537_v45, %v783_v55  ;;  %v813_v0 = vmul.f32 0.2, %v657_v56 }
  0xe6   : > { %v1448_v1 = vpack.c.bf16 %v878_v57, %v878_v57  ;;  %v1414_v2 = vpack.c.bf16 %v844_v58, %v844_v58  ;;  %v879_v3 = vmax.f32 %v665_v50, %v815_v59  ;;  %v845_v4 = vmax.f32 %v529_v51, %v781_v60  ;;  %v1519_v5 = vpop.f32.mrb[4].mxu0 }
  0xe7   : > { %1167 = vst.msk [vmem:[%s1749_s28 + $0x8] sm:$0xf] %vm1164_vm2, %v1416_v61  ;;  %v1446_v6 = vpack.c.bf16 %v876_v62, %v876_v62  ;;  %v1417_v7 = vpack.c.bf16 %v847_v63, %v847_v63  ;;  %v877_v8 = vmax.f32 %v657_v56, %v813_v0  ;;  %v550_v9 = vadd.f32 %v1519_v5, %v1736_v34  ;;  %v1551_v10 = vpop.f32.mrb[4].mxu1  ;;  %v541_v11 = vpop.f32.mrb[5].mxu0 }
  0xe8   : > { %1199 = vst.msk [vmem:[%s1749_s28 + $0x88] sm:$0xf] %vm1164_vm2, %v1448_v1  ;;  %1165 = vst.msk [vmem:[%s1749_s28] sm:$0xf] %vm1164_vm2, %v1414_v2  ;;  %v1449_v12 = vpack.c.bf16 %v879_v3, %v879_v3  ;;  %v1415_v13 = vpack.c.bf16 %v845_v4, %v845_v4  ;;  %v678_v14 = vadd.f32 %v1551_v10, %v1736_v34  ;;  %v669_v16 = vpop.f32.mrb[5].mxu1  ;;  %v1520_v17 = vpop.f32.mrb[6].mxu0 }
  0xe9   : > { %v542_v15 = vadd.f32 %v1736_v34, %v541_v11  ;;  %1197 = vst.msk [vmem:[%s1749_s28 + $0x80] sm:$0xf] %vm1164_vm2, %v1446_v6  ;;  %1168 = vst.msk [vmem:[%s1749_s28 + $0xc] sm:$0xf] %vm1164_vm2, %v1417_v7  ;;  %v1447_v18 = vpack.c.bf16 %v877_v8, %v877_v8  ;;  %v786_v19 = vmul.f32 0.2, %v550_v9  ;;  %v670_v20 = vadd.f32 %v1736_v34, %v669_v16 }
  0xea   : > { %v553_v21 = vadd.f32 %v1520_v17, %v1736_v34  ;;  %v1552_v22 = vpop.f32.mrb[6].mxu1  ;;  %v544_v23 = vpop.f32.mrb[7].mxu0  ;;  %1200 = vst.msk [vmem:[%s1749_s28 + $0x8c] sm:$0xf] %vm1164_vm2, %v1449_v12  ;;  %1166 = vst.msk [vmem:[%s1749_s28 + $0x4] sm:$0xf] %vm1164_vm2, %v1415_v13 }
  0xeb   : > { %v818_v24 = vmul.f32 0.2, %v678_v14  ;;  %v784_v25 = vmul.f32 0.2, %v542_v15  ;;  %v681_v26 = vadd.f32 %v1552_v22, %v1736_v34  ;;  %v545_v27 = vadd.f32 %v1736_v34, %v544_v23  ;;  %v672_v28 = vpop.f32.mrb[7].mxu1 }
  0xec   : > { %1198 = vst.msk [vmem:[%s1749_s28 + $0x84] sm:$0xf] %vm1164_vm2, %v1447_v18  ;;  %v850_v29 = vmax.f32 %v550_v9, %v786_v19  ;;  %v816_v30 = vmul.f32 0.2, %v670_v20  ;;  %v787_v31 = vmul.f32 0.2, %v553_v21  ;;  %v673_v32 = vadd.f32 %v1736_v34, %v672_v28 }
  0xed   : > { %v882_v33 = vmax.f32 %v678_v14, %v818_v24  ;;  %v848_v35 = vmax.f32 %v542_v15, %v784_v25  ;;  %v819_v36 = vmul.f32 0.2, %v681_v26  ;;  %v785_v37 = vmul.f32 0.2, %v545_v27 }
  0xee   : > { %v1420_v38 = vpack.c.bf16 %v850_v29, %v850_v29  ;;  %v880_v39 = vmax.f32 %v670_v20, %v816_v30  ;;  %v851_v40 = vmax.f32 %v553_v21, %v787_v31  ;;  %v817_v41 = vmul.f32 0.2, %v673_v32  ;;  %v1523_v46 = vpop.f32.mrb[8].mxu0 }
  0xef   : > { %v1452_v42 = vpack.c.bf16 %v882_v33, %v882_v33  ;;  %v1418_v43 = vpack.c.bf16 %v848_v35, %v848_v35  ;;  %v883_v44 = vmax.f32 %v681_v26, %v819_v36  ;;  %v849_v45 = vmax.f32 %v545_v27, %v785_v37  ;;  %v1555_v51 = vpop.f32.mrb[8].mxu1  ;;  %v557_v52 = vpop.f32.mrb[9].mxu0 }
  0xf0   : > { %1171 = vst.msk [vmem:[%s1749_s28 + $0x18] sm:$0xf] %vm1164_vm2, %v1420_v38  ;;  %v1450_v47 = vpack.c.bf16 %v880_v39, %v880_v39  ;;  %v1421_v48 = vpack.c.bf16 %v851_v40, %v851_v40  ;;  %v881_v49 = vmax.f32 %v673_v32, %v817_v41  ;;  %v566_v50 = vadd.f32 %v1523_v46, %v1736_v34  ;;  %v685_v57 = vpop.f32.mrb[9].mxu1  ;;  %v1524_v58 = vpop.f32.mrb[10].mxu0 }
  0xf1   : > { %1203 = vst.msk [vmem:[%s1749_s28 + $0x98] sm:$0xf] %vm1164_vm2, %v1452_v42  ;;  %1169 = vst.msk [vmem:[%s1749_s28 + $0x10] sm:$0xf] %vm1164_vm2, %v1418_v43  ;;  %v1453_v53 = vpack.c.bf16 %v883_v44, %v883_v44  ;;  %v1419_v54 = vpack.c.bf16 %v849_v45, %v849_v45  ;;  %v694_v55 = vadd.f32 %v1555_v51, %v1736_v34  ;;  %v1556_v63 = vpop.f32.mrb[10].mxu1  ;;  %v560_v0 = vpop.f32.mrb[11].mxu0 }
  0xf2   : > { %v558_v56 = vadd.f32 %v1736_v34, %v557_v52  ;;  %1201 = vst.msk [vmem:[%s1749_s28 + $0x90] sm:$0xf] %vm1164_vm2, %v1450_v47  ;;  %1172 = vst.msk [vmem:[%s1749_s28 + $0x1c] sm:$0xf] %vm1164_vm2, %v1421_v48  ;;  %v1451_v59 = vpack.c.bf16 %v881_v49, %v881_v49  ;;  %v790_v60 = vmul.f32 0.2, %v566_v50  ;;  %v686_v61 = vadd.f32 %v1736_v34, %v685_v57 }
  0xf3   : > { %v569_v62 = vadd.f32 %v1524_v58, %v1736_v34  ;;  %1204 = vst.msk [vmem:[%s1749_s28 + $0x9c] sm:$0xf] %vm1164_vm2, %v1453_v53  ;;  %1170 = vst.msk [vmem:[%s1749_s28 + $0x14] sm:$0xf] %vm1164_vm2, %v1419_v54  ;;  %v822_v1 = vmul.f32 0.2, %v694_v55  ;;  %v697_v3 = vadd.f32 %v1556_v63, %v1736_v34  ;;  %v561_v4 = vadd.f32 %v1736_v34, %v560_v0 }
  0xf4   : > { %v788_v2 = vmul.f32 0.2, %v558_v56  ;;  %v688_v5 = vpop.f32.mrb[11].mxu1  ;;  %1202 = vst.msk [vmem:[%s1749_s28 + $0x94] sm:$0xf] %vm1164_vm2, %v1451_v59  ;;  %v854_v6 = vmax.f32 %v566_v50, %v790_v60 }
  0xf5   : > { %v820_v7 = vmul.f32 0.2, %v686_v61  ;;  %v791_v8 = vmul.f32 0.2, %v569_v62  ;;  %v689_v9 = vadd.f32 %v1736_v34, %v688_v5  ;;  %v886_v10 = vmax.f32 %v694_v55, %v822_v1 }
  0xf6   : > { %v852_v11 = vmax.f32 %v558_v56, %v788_v2  ;;  %v823_v12 = vmul.f32 0.2, %v697_v3  ;;  %v789_v13 = vmul.f32 0.2, %v561_v4  ;;  %v1424_v14 = vpack.c.bf16 %v854_v6, %v854_v6  ;;  %v1527_v22 = vpop.f32.mrb[12].mxu0 }
  0xf7   : > { %v884_v15 = vmax.f32 %v686_v61, %v820_v7  ;;  %v855_v16 = vmax.f32 %v569_v62, %v791_v8  ;;  %v821_v17 = vmul.f32 0.2, %v689_v9  ;;  %v1456_v18 = vpack.c.bf16 %v886_v10, %v886_v10  ;;  %v1559_v27 = vpop.f32.mrb[12].mxu1  ;;  %v573_v28 = vpop.f32.mrb[13].mxu0 }
  0xf8   : > { %v1422_v19 = vpack.c.bf16 %v852_v11, %v852_v11  ;;  %v887_v20 = vmax.f32 %v697_v3, %v823_v12  ;;  %v853_v21 = vmax.f32 %v561_v4, %v789_v13  ;;  %1175 = vst.msk [vmem:[%s1749_s28 + $0x28] sm:$0xf] %vm1164_vm2, %v1424_v14  ;;  %v582_v26 = vadd.f32 %v1527_v22, %v1736_v34  ;;  %v701_v33 = vpop.f32.mrb[13].mxu1  ;;  %v1528_v35 = vpop.f32.mrb[14].mxu0 }
  0xf9   : > { %v1454_v23 = vpack.c.bf16 %v884_v15, %v884_v15  ;;  %v1425_v24 = vpack.c.bf16 %v855_v16, %v855_v16  ;;  %v885_v25 = vmax.f32 %v689_v9, %v821_v17  ;;  %1207 = vst.msk [vmem:[%s1749_s28 + $0xa8] sm:$0xf] %vm1164_vm2, %v1456_v18  ;;  %v710_v31 = vadd.f32 %v1559_v27, %v1736_v34  ;;  %v1560_v40 = vpop.f32.mrb[14].mxu1  ;;  %v576_v41 = vpop.f32.mrb[15].mxu0 }
  0xfa   : > { %1173 = vst.msk [vmem:[%s1749_s28 + $0x20] sm:$0xf] %vm1164_vm2, %v1422_v19  ;;  %v1457_v29 = vpack.c.bf16 %v887_v20, %v887_v20  ;;  %v1423_v30 = vpack.c.bf16 %v853_v21, %v853_v21  ;;  %v574_v32 = vadd.f32 %v1736_v34, %v573_v28  ;;  %v794_v37 = vmul.f32 0.2, %v582_v26  ;;  %v704_v46 = vpop.f32.mrb[15].mxu1 }
  0xfb   : > { %1205 = vst.msk [vmem:[%s1749_s28 + $0xa0] sm:$0xf] %vm1164_vm2, %v1454_v23  ;;  %1176 = vst.msk [vmem:[%s1749_s28 + $0x2c] sm:$0xf] %vm1164_vm2, %v1425_v24  ;;  %v1455_v36 = vpack.c.bf16 %v885_v25, %v885_v25  ;;  %v702_v38 = vadd.f32 %v1736_v34, %v701_v33  ;;  %v585_v39 = vadd.f32 %v1528_v35, %v1736_v34  ;;  %v826_v42 = vmul.f32 0.2, %v710_v31 }
  0xfc   : > { %1208 = vst.msk [vmem:[%s1749_s28 + $0xac] sm:$0xf] %vm1164_vm2, %v1457_v29  ;;  %1174 = vst.msk [vmem:[%s1749_s28 + $0x24] sm:$0xf] %vm1164_vm2, %v1423_v30  ;;  %v792_v43 = vmul.f32 0.2, %v574_v32  ;;  %v713_v44 = vadd.f32 %v1560_v40, %v1736_v34  ;;  %v577_v45 = vadd.f32 %v1736_v34, %v576_v41  ;;  %v858_v47 = vmax.f32 %v582_v26, %v794_v37 }
  0xfd   : > { %1206 = vst.msk [vmem:[%s1749_s28 + $0xa4] sm:$0xf] %vm1164_vm2, %v1455_v36  ;;  %v824_v48 = vmul.f32 0.2, %v702_v38  ;;  %v795_v49 = vmul.f32 0.2, %v585_v39  ;;  %v705_v50 = vadd.f32 %v1736_v34, %v704_v46  ;;  %v890_v51 = vmax.f32 %v710_v31, %v826_v42 }
  0xfe   : > { %v856_v52 = vmax.f32 %v574_v32, %v792_v43  ;;  %v827_v53 = vmul.f32 0.2, %v713_v44  ;;  %v793_v54 = vmul.f32 0.2, %v577_v45  ;;  %v1428_v55 = vpack.c.bf16 %v858_v47, %v858_v47  ;;  %v1531_v63 = vpop.f32.mrb[16].mxu0 }
  0xff   : > { %v888_v56 = vmax.f32 %v702_v38, %v824_v48  ;;  %v859_v57 = vmax.f32 %v585_v39, %v795_v49  ;;  %v825_v58 = vmul.f32 0.2, %v705_v50  ;;  %v1460_v59 = vpack.c.bf16 %v890_v51, %v890_v51  ;;  %v1563_v4 = vpop.f32.mrb[16].mxu1  ;;  %v589_v5 = vpop.f32.mrb[17].mxu0 }
 0x100   : > { %v1426_v60 = vpack.c.bf16 %v856_v52, %v856_v52  ;;  %v891_v61 = vmax.f32 %v713_v44, %v827_v53  ;;  %v857_v62 = vmax.f32 %v577_v45, %v793_v54  ;;  %1179 = vst.msk [vmem:[%s1749_s28 + $0x38] sm:$0xf] %vm1164_vm2, %v1428_v55  ;;  %v598_v3 = vadd.f32 %v1531_v63, %v1736_v34  ;;  %v717_v10 = vpop.f32.mrb[17].mxu1  ;;  %v1532_v11 = vpop.f32.mrb[18].mxu0 }
 0x101   : > { %v1458_v0 = vpack.c.bf16 %v888_v56, %v888_v56  ;;  %v1429_v1 = vpack.c.bf16 %v859_v57, %v859_v57  ;;  %v889_v2 = vmax.f32 %v705_v50, %v825_v58  ;;  %1211 = vst.msk [vmem:[%s1749_s28 + $0xb8] sm:$0xf] %vm1164_vm2, %v1460_v59  ;;  %v726_v8 = vadd.f32 %v1563_v4, %v1736_v34  ;;  %v1564_v16 = vpop.f32.mrb[18].mxu1  ;;  %v592_v17 = vpop.f32.mrb[19].mxu0 }
 0x102   : > { %1177 = vst.msk [vmem:[%s1749_s28 + $0x30] sm:$0xf] %vm1164_vm2, %v1426_v60  ;;  %v1461_v6 = vpack.c.bf16 %v891_v61, %v891_v61  ;;  %v1427_v7 = vpack.c.bf16 %v857_v62, %v857_v62  ;;  %v590_v9 = vadd.f32 %v1736_v34, %v589_v5  ;;  %v798_v13 = vmul.f32 0.2, %v598_v3  ;;  %v720_v22 = vpop.f32.mrb[19].mxu1 }
 0x103   : > { %1209 = vst.msk [vmem:[%s1749_s28 + $0xb0] sm:$0xf] %vm1164_vm2, %v1458_v0  ;;  %1180 = vst.msk [vmem:[%s1749_s28 + $0x3c] sm:$0xf] %vm1164_vm2, %v1429_v1  ;;  %v1459_v12 = vpack.c.bf16 %v889_v2, %v889_v2  ;;  %v718_v14 = vadd.f32 %v1736_v34, %v717_v10  ;;  %v601_v15 = vadd.f32 %v1532_v11, %v1736_v34  ;;  %v830_v18 = vmul.f32 0.2, %v726_v8 }
 0x104   : > { %1212 = vst.msk [vmem:[%s1749_s28 + $0xbc] sm:$0xf] %vm1164_vm2, %v1461_v6  ;;  %1178 = vst.msk [vmem:[%s1749_s28 + $0x34] sm:$0xf] %vm1164_vm2, %v1427_v7  ;;  %v796_v19 = vmul.f32 0.2, %v590_v9  ;;  %v729_v20 = vadd.f32 %v1564_v16, %v1736_v34  ;;  %v593_v21 = vadd.f32 %v1736_v34, %v592_v17  ;;  %v862_v23 = vmax.f32 %v598_v3, %v798_v13 }
 0x105   : > { %1210 = vst.msk [vmem:[%s1749_s28 + $0xb4] sm:$0xf] %vm1164_vm2, %v1459_v12  ;;  %v828_v24 = vmul.f32 0.2, %v718_v14  ;;  %v799_v25 = vmul.f32 0.2, %v601_v15  ;;  %v721_v26 = vadd.f32 %v1736_v34, %v720_v22  ;;  %v894_v27 = vmax.f32 %v726_v8, %v830_v18 }
 0x106   : > { %v860_v28 = vmax.f32 %v590_v9, %v796_v19  ;;  %v831_v29 = vmul.f32 0.2, %v729_v20  ;;  %v797_v30 = vmul.f32 0.2, %v593_v21  ;;  %v1432_v31 = vpack.c.bf16 %v862_v23, %v862_v23  ;;  %v1535_v40 = vpop.f32.mrb[20].mxu0 }
 0x107   : > { %v892_v32 = vmax.f32 %v718_v14, %v828_v24  ;;  %v863_v33 = vmax.f32 %v601_v15, %v799_v25  ;;  %v829_v35 = vmul.f32 0.2, %v721_v26  ;;  %v1464_v36 = vpack.c.bf16 %v894_v27, %v894_v27  ;;  %v1567_v45 = vpop.f32.mrb[20].mxu1  ;;  %v605_v46 = vpop.f32.mrb[21].mxu0 }
 0x108   : > { %v1430_v37 = vpack.c.bf16 %v860_v28, %v860_v28  ;;  %v895_v38 = vmax.f32 %v729_v20, %v831_v29  ;;  %v861_v39 = vmax.f32 %v593_v21, %v797_v30  ;;  %1183 = vst.msk [vmem:[%s1749_s28 + $0x48] sm:$0xf] %vm1164_vm2, %v1432_v31  ;;  %v614_v44 = vadd.f32 %v1535_v40, %v1736_v34  ;;  %v733_v51 = vpop.f32.mrb[21].mxu1  ;;  %v1536_v52 = vpop.f32.mrb[22].mxu0 }
 0x109   : > { %v1462_v41 = vpack.c.bf16 %v892_v32, %v892_v32  ;;  %v1433_v42 = vpack.c.bf16 %v863_v33, %v863_v33  ;;  %v893_v43 = vmax.f32 %v721_v26, %v829_v35  ;;  %1215 = vst.msk [vmem:[%s1749_s28 + $0xc8] sm:$0xf] %vm1164_vm2, %v1464_v36  ;;  %v742_v49 = vadd.f32 %v1567_v45, %v1736_v34  ;;  %v1568_v57 = vpop.f32.mrb[22].mxu1  ;;  %v608_v58 = vpop.f32.mrb[23].mxu0 }
 0x10a   : > { %1181 = vst.msk [vmem:[%s1749_s28 + $0x40] sm:$0xf] %vm1164_vm2, %v1430_v37  ;;  %v1465_v47 = vpack.c.bf16 %v895_v38, %v895_v38  ;;  %v1431_v48 = vpack.c.bf16 %v861_v39, %v861_v39  ;;  %v606_v50 = vadd.f32 %v1736_v34, %v605_v46  ;;  %v802_v54 = vmul.f32 0.2, %v614_v44  ;;  %v736_v63 = vpop.f32.mrb[23].mxu1 }
 0x10b   : > { %1213 = vst.msk [vmem:[%s1749_s28 + $0xc0] sm:$0xf] %vm1164_vm2, %v1462_v41  ;;  %1184 = vst.msk [vmem:[%s1749_s28 + $0x4c] sm:$0xf] %vm1164_vm2, %v1433_v42  ;;  %v1463_v53 = vpack.c.bf16 %v893_v43, %v893_v43  ;;  %v734_v55 = vadd.f32 %v1736_v34, %v733_v51  ;;  %v617_v56 = vadd.f32 %v1536_v52, %v1736_v34  ;;  %v834_v59 = vmul.f32 0.2, %v742_v49 }
 0x10c   : > { %1216 = vst.msk [vmem:[%s1749_s28 + $0xcc] sm:$0xf] %vm1164_vm2, %v1465_v47  ;;  %1182 = vst.msk [vmem:[%s1749_s28 + $0x44] sm:$0xf] %vm1164_vm2, %v1431_v48  ;;  %v800_v60 = vmul.f32 0.2, %v606_v50  ;;  %v745_v61 = vadd.f32 %v1568_v57, %v1736_v34  ;;  %v609_v62 = vadd.f32 %v1736_v34, %v608_v58  ;;  %v866_v0 = vmax.f32 %v614_v44, %v802_v54 }
 0x10d   : > { %1214 = vst.msk [vmem:[%s1749_s28 + $0xc4] sm:$0xf] %vm1164_vm2, %v1463_v53  ;;  %v832_v1 = vmul.f32 0.2, %v734_v55  ;;  %v803_v2 = vmul.f32 0.2, %v617_v56  ;;  %v737_v3 = vadd.f32 %v1736_v34, %v736_v63  ;;  %v898_v4 = vmax.f32 %v742_v49, %v834_v59 }
 0x10e   : > { %v864_v5 = vmax.f32 %v606_v50, %v800_v60  ;;  %v835_v6 = vmul.f32 0.2, %v745_v61  ;;  %v801_v7 = vmul.f32 0.2, %v609_v62  ;;  %v1436_v8 = vpack.c.bf16 %v866_v0, %v866_v0  ;;  %v1539_v16 = vpop.f32.mrb[24].mxu0 }
 0x10f   : > { %v896_v9 = vmax.f32 %v734_v55, %v832_v1  ;;  %v867_v10 = vmax.f32 %v617_v56, %v803_v2  ;;  %v833_v11 = vmul.f32 0.2, %v737_v3  ;;  %v1468_v12 = vpack.c.bf16 %v898_v4, %v898_v4  ;;  %v1571_v21 = vpop.f32.mrb[24].mxu1  ;;  %v621_v22 = vpop.f32.mrb[25].mxu0 }
 0x110   : > { %v1434_v13 = vpack.c.bf16 %v864_v5, %v864_v5  ;;  %v899_v14 = vmax.f32 %v745_v61, %v835_v6  ;;  %v865_v15 = vmax.f32 %v609_v62, %v801_v7  ;;  %1187 = vst.msk [vmem:[%s1749_s28 + $0x58] sm:$0xf] %vm1164_vm2, %v1436_v8  ;;  %v630_v20 = vadd.f32 %v1539_v16, %v1736_v34  ;;  %v749_v27 = vpop.f32.mrb[25].mxu1  ;;  %v1540_v28 = vpop.f32.mrb[26].mxu0 }
 0x111   : > { %v1466_v17 = vpack.c.bf16 %v896_v9, %v896_v9  ;;  %v1437_v18 = vpack.c.bf16 %v867_v10, %v867_v10  ;;  %v897_v19 = vmax.f32 %v737_v3, %v833_v11  ;;  %1219 = vst.msk [vmem:[%s1749_s28 + $0xd8] sm:$0xf] %vm1164_vm2, %v1468_v12  ;;  %v758_v25 = vadd.f32 %v1571_v21, %v1736_v34  ;;  %v1572_v33 = vpop.f32.mrb[26].mxu1  ;;  %v624_v35 = vpop.f32.mrb[27].mxu0 }
 0x112   : > { %1185 = vst.msk [vmem:[%s1749_s28 + $0x50] sm:$0xf] %vm1164_vm2, %v1434_v13  ;;  %v1469_v23 = vpack.c.bf16 %v899_v14, %v899_v14  ;;  %v1435_v24 = vpack.c.bf16 %v865_v15, %v865_v15  ;;  %v622_v26 = vadd.f32 %v1736_v34, %v621_v22  ;;  %v806_v30 = vmul.f32 0.2, %v630_v20  ;;  %v752_v40 = vpop.f32.mrb[27].mxu1 }
 0x113   : > { %1217 = vst.msk [vmem:[%s1749_s28 + $0xd0] sm:$0xf] %vm1164_vm2, %v1466_v17  ;;  %1188 = vst.msk [vmem:[%s1749_s28 + $0x5c] sm:$0xf] %vm1164_vm2, %v1437_v18  ;;  %v1467_v29 = vpack.c.bf16 %v897_v19, %v897_v19  ;;  %v750_v31 = vadd.f32 %v1736_v34, %v749_v27  ;;  %v633_v32 = vadd.f32 %v1540_v28, %v1736_v34  ;;  %v838_v36 = vmul.f32 0.2, %v758_v25 }
 0x114   : > { %1220 = vst.msk [vmem:[%s1749_s28 + $0xdc] sm:$0xf] %vm1164_vm2, %v1469_v23  ;;  %1186 = vst.msk [vmem:[%s1749_s28 + $0x54] sm:$0xf] %vm1164_vm2, %v1435_v24  ;;  %v804_v37 = vmul.f32 0.2, %v622_v26  ;;  %v761_v38 = vadd.f32 %v1572_v33, %v1736_v34  ;;  %v625_v39 = vadd.f32 %v1736_v34, %v624_v35  ;;  %v870_v41 = vmax.f32 %v630_v20, %v806_v30 }
 0x115   : > { %1218 = vst.msk [vmem:[%s1749_s28 + $0xd4] sm:$0xf] %vm1164_vm2, %v1467_v29  ;;  %v836_v42 = vmul.f32 0.2, %v750_v31  ;;  %v807_v43 = vmul.f32 0.2, %v633_v32  ;;  %v753_v44 = vadd.f32 %v1736_v34, %v752_v40  ;;  %v902_v45 = vmax.f32 %v758_v25, %v838_v36 }
 0x116   : > { %v868_v46 = vmax.f32 %v622_v26, %v804_v37  ;;  %v839_v47 = vmul.f32 0.2, %v761_v38  ;;  %v805_v48 = vmul.f32 0.2, %v625_v39  ;;  %v1440_v49 = vpack.c.bf16 %v870_v41, %v870_v41  ;;  %v1543_v57 = vpop.f32.mrb[28].mxu0 }
 0x117   : > { %v900_v50 = vmax.f32 %v750_v31, %v836_v42  ;;  %v871_v51 = vmax.f32 %v633_v32, %v807_v43  ;;  %v837_v52 = vmul.f32 0.2, %v753_v44  ;;  %v1472_v53 = vpack.c.bf16 %v902_v45, %v902_v45  ;;  %v1575_v62 = vpop.f32.mrb[28].mxu1  ;;  %v637_v63 = vpop.f32.mrb[29].mxu0 }
 0x118   : > { %v1438_v54 = vpack.c.bf16 %v868_v46, %v868_v46  ;;  %v903_v55 = vmax.f32 %v761_v38, %v839_v47  ;;  %v869_v56 = vmax.f32 %v625_v39, %v805_v48  ;;  %1191 = vst.msk [vmem:[%s1749_s28 + $0x68] sm:$0xf] %vm1164_vm2, %v1440_v49  ;;  %v646_v61 = vadd.f32 %v1543_v57, %v1736_v34  ;;  %v765_v4 = vpop.f32.mrb[29].mxu1  ;;  %v1544_v5 = vpop.f32.mrb[30].mxu0 }
 0x119   : > { %v1470_v58 = vpack.c.bf16 %v900_v50, %v900_v50  ;;  %v1441_v59 = vpack.c.bf16 %v871_v51, %v871_v51  ;;  %v901_v60 = vmax.f32 %v753_v44, %v837_v52  ;;  %1223 = vst.msk [vmem:[%s1749_s28 + $0xe8] sm:$0xf] %vm1164_vm2, %v1472_v53  ;;  %v774_v2 = vadd.f32 %v1575_v62, %v1736_v34  ;;  %v1576_v10 = vpop.f32.mrb[30].mxu1  ;;  %v640_v11 = vpop.f32.mrb[31].mxu0 }
 0x11a   : > { %1189 = vst.msk [vmem:[%s1749_s28 + $0x60] sm:$0xf] %vm1164_vm2, %v1438_v54  ;;  %v1473_v0 = vpack.c.bf16 %v903_v55, %v903_v55  ;;  %v1439_v1 = vpack.c.bf16 %v869_v56, %v869_v56  ;;  %v638_v3 = vadd.f32 %v1736_v34, %v637_v63  ;;  %v810_v7 = vmul.f32 0.2, %v646_v61  ;;  %v768_v16 = vpop.f32.mrb[31].mxu1 }
 0x11b   : > { %1221 = vst.msk [vmem:[%s1749_s28 + $0xe0] sm:$0xf] %vm1164_vm2, %v1470_v58  ;;  %1192 = vst.msk [vmem:[%s1749_s28 + $0x6c] sm:$0xf] %vm1164_vm2, %v1441_v59  ;;  %v1471_v6 = vpack.c.bf16 %v901_v60, %v901_v60  ;;  %v766_v8 = vadd.f32 %v1736_v34, %v765_v4  ;;  %v649_v9 = vadd.f32 %v1544_v5, %v1736_v34  ;;  %v842_v12 = vmul.f32 0.2, %v774_v2 }
 0x11c   : > { %1224 = vst.msk [vmem:[%s1749_s28 + $0xec] sm:$0xf] %vm1164_vm2, %v1473_v0  ;;  %1190 = vst.msk [vmem:[%s1749_s28 + $0x64] sm:$0xf] %vm1164_vm2, %v1439_v1  ;;  %v808_v13 = vmul.f32 0.2, %v638_v3  ;;  %v777_v14 = vadd.f32 %v1576_v10, %v1736_v34  ;;  %v641_v15 = vadd.f32 %v1736_v34, %v640_v11  ;;  %v874_v17 = vmax.f32 %v646_v61, %v810_v7 }
 0x11d   : > { %1222 = vst.msk [vmem:[%s1749_s28 + $0xe4] sm:$0xf] %vm1164_vm2, %v1471_v6  ;;  %v840_v18 = vmul.f32 0.2, %v766_v8  ;;  %v811_v19 = vmul.f32 0.2, %v649_v9  ;;  %v769_v20 = vadd.f32 %v1736_v34, %v768_v16  ;;  %v906_v21 = vmax.f32 %v774_v2, %v842_v12 }
 0x11e   : > { %v872_v22 = vmax.f32 %v638_v3, %v808_v13  ;;  %v843_v23 = vmul.f32 0.2, %v777_v14  ;;  %v809_v24 = vmul.f32 0.2, %v641_v15  ;;  %v1444_v25 = vpack.c.bf16 %v874_v17, %v874_v17 }
 0x11f   : > { %v904_v26 = vmax.f32 %v766_v8, %v840_v18  ;;  %v875_v27 = vmax.f32 %v649_v9, %v811_v19  ;;  %v841_v28 = vmul.f32 0.2, %v769_v20  ;;  %v1476_v29 = vpack.c.bf16 %v906_v21, %v906_v21 }
 0x120   : > { %v1442_v30 = vpack.c.bf16 %v872_v22, %v872_v22  ;;  %v907_v31 = vmax.f32 %v777_v14, %v843_v23  ;;  %v873_v32 = vmax.f32 %v641_v15, %v809_v24  ;;  %1195 = vst.msk [vmem:[%s1749_s28 + $0x78] sm:$0xf] %vm1164_vm2, %v1444_v25 }
 0x121   : > { %v1474_v34 = vpack.c.bf16 %v904_v26, %v904_v26  ;;  %v1445_v33 = vpack.c.bf16 %v875_v27, %v875_v27  ;;  %v905_v35 = vmax.f32 %v769_v20, %v841_v28  ;;  %1227 = vst.msk [vmem:[%s1749_s28 + $0xf8] sm:$0xf] %vm1164_vm2, %v1476_v29 }
 0x122   : > { %1193 = vst.msk [vmem:[%s1749_s28 + $0x70] sm:$0xf] %vm1164_vm2, %v1442_v30  ;;  %v1477_v36 = vpack.c.bf16 %v907_v31, %v907_v31  ;;  %v1443_v37 = vpack.c.bf16 %v873_v32, %v873_v32 }
 0x123   : > { %1225 = vst.msk [vmem:[%s1749_s28 + $0xf0] sm:$0xf] %vm1164_vm2, %v1474_v34  ;;  %1196 = vst.msk [vmem:[%s1749_s28 + $0x7c] sm:$0xf] %vm1164_vm2, %v1445_v33  ;;  %v1475_v38 = vpack.c.bf16 %v905_v35, %v905_v35 }
 0x124   : > { %1228 = vst.msk [vmem:[%s1749_s28 + $0xfc] sm:$0xf] %vm1164_vm2, %v1477_v36  ;;  %1194 = vst.msk [vmem:[%s1749_s28 + $0x74] sm:$0xf] %vm1164_vm2, %v1443_v37 }
 0x125   : > { %1226 = vst.msk [vmem:[%s1749_s28 + $0xf4] sm:$0xf] %vm1164_vm2, %v1475_v38 }
 0x126 PF: > { %s13_s12 = sadd.s32 1, %s1627_s12  }
 0x127   : > { %p10_p4 = scmp.ge.s32.totalorder %s13_s12, 6  }
 0x129   :  { %12 = sbr.rel (!%p10_p4) target bundleno = 1 (0x1), region = 60 }

// kernel: _lambda_.15
= control target key start
LH: loop header
LB: loop body
LE: loop exit
PB: predicated region body
PF: predicated region fallthrough
CT: control target
= control target key end

     0   :  { %s10544_s12 = smov 0   ;;  %s12546_s0 = inlined_call_operand.vmem [shape: f32[2630,36], index: 0, kind: input, shape index: {}]   ;;  %s12547_s1 = inlined_call_operand.vmem [shape: f32[9,36,16], index: 1, kind: input, shape index: {}]   ;;  %s12548_s2 = inlined_call_operand.vmem [shape: f32[1,16], index: 2, kind: input, shape index: {}]   ;;  %s12549_s3 = inlined_call_operand.vmem [shape: bf16[2560,16], index: 3, kind: output, shape index: {}]  }
   0x1 LB: > { %s7059_s13 = sadd.s32 4294967295, %s10522_s12   ;;  %p7062_p0 = scmp.ge.s32.totalorder %s10522_s12, 1  ;;  %s10522_s12 = sphi %s10544_s12, %s13_s12  }
   0x2   : > { %p127_p1 = scmp.lt.s32.totalorder %s10522_s12, 6 }
   0x4   : > { %p128_p2 = pnand %p7062_p0, %p127_p1 }
   0x6   : > { %131 = sbr.rel (%p128_p2) target bundleno = 823 (0x337), region = 32 }
   0xd   : > { %v7131_v0 = vld [vmem:[%s12547_s1 + $0x28] sm:$0xff]  ;;  %v7132_v1 = vld [vmem:[%s12547_s1 + $0x30] sm:$0xff]  ;;  %v7601_v2 = vld [vmem:[%s12547_s1 + $0xa0] sm:$0xff]  ;;  %s7065_s20 = sshll.u32 %s7059_s13, 9  ;;  %vm295_vm0 = vcmask 293888   ;;  %vm488_vm1 = vcmask 1043456  }
   0xe   : > { %v9917_v3 = vpack.c.bf16 %v7132_v1, %v7131_v0  ;;  %v7602_v4 = vld [vmem:[%s12547_s1 + $0xa8] sm:$0xff]  ;;  %v7133_v5 = vld [vmem:[%s12547_s1 + $0x38] sm:$0xff]  ;;  %v7134_v6 = vld [vmem:[%s12547_s1 + $0x40] sm:$0xff]  ;;  %s10575_s29 = scalar_lea.vmem %s12546_s0, %s7065_s20  ;;  %vm6924_vm2 = vcmask 125952  }
   0xf   : > { %v10577_v7 = vpack.c.bf16 %v7602_v4, %v7601_v2  ;;  %v9921_v8 = vpack.c.bf16 %v7134_v6, %v7133_v5  ;;  %v7603_v9 = vld [vmem:[%s12547_s1 + $0xb0] sm:$0xff]  ;;  %v7604_v10 = vld [vmem:[%s12547_s1 + $0xb8] sm:$0xff]  ;;  %v7067_v12 = vld [vmem:[%s10575_s29 + $0x1] sm:$0xff] }
  0x10   : > { %9918 = vmatprep.subr.bf16.mxu1 %v9917_v3  ;;  %v10585_v11 = vpack.c.bf16 %v7604_v10, %v7603_v9  ;;  %v7537_v13 = vld [vmem:[%s10575_s29 + $0x23] sm:$0xff]  ;;  %8973 = vmatprep.mubr.msk.f32.mxu1 %vm295_vm0, %v7067_v12  ;;  %v7737_v19 = vld [vmem:[%s12547_s1 + $0xd0] sm:$0xff]  ;;  %v7738_v24 = vld [vmem:[%s12547_s1 + $0xd8] sm:$0xff] }
  0x11   : > { %9950 = vmatprep.subr.bf16.mxu0 %v10577_v7  ;;  %9920 = vmatpush3.bf16.msra.mxu1 %v9917_v3  ;;  %v7135_v14 = vld [vmem:[%s12547_s1 + $0x48] sm:$0xf]  ;;  %v7605_v15 = vld [vmem:[%s12547_s1 + $0xc0] sm:$0xf]  ;;  %v7069_v25 = vld [vmem:[%s10575_s29 + $0x11] sm:$0xff] }
  0x12   : > { %12560 = vst [vmem:[#allocation2_spill] sm:$0xff] %v10585_v11  ;;  %9952 = vmatpush3.bf16.msra.mxu0 %v10577_v7  ;;  %9922 = vmatprep.subr.bf16.mxu1 %v9921_v8  ;;  %v218_v16 = vld [vmem:[%s12547_s1] sm:$0xff]  ;;  %v219_v17 = vld [vmem:[%s12547_s1 + $0x8] sm:$0xff]  ;;  %v7539_v27 = vld [vmem:[%s10575_s29 + $0x33] sm:$0xff] }
  0x13   : > { %9954 = vmatprep.subr.bf16.mxu0 %v10585_v11  ;;  %9397 = vmatprep.mubr.msk.f32.mxu0 %vm295_vm0, %v7537_v13  ;;  %v7736_v18 = vld [vmem:[%s12547_s1 + $0xc8] sm:$0xff]  ;;  %v9925_v21 = vpack.c.bf16 %v219_v17, %v218_v16  ;;  %v7739_v26 = vld [vmem:[%s12547_s1 + $0xe0] sm:$0xff]  ;;  %v7073_v35 = vld [vmem:[%s10575_s29 + $0x31] sm:$0xff] }
  0x14   : > { %v7068_v20 = vld [vmem:[%s10575_s29 + $0x9] sm:$0xff]  ;;  %v9957_v23 = vpack.c.bf16 %v7737_v19, %v7736_v18  ;;  %v7070_v28 = vld [vmem:[%s10575_s29 + $0x19] sm:$0xff]  ;;  %v7071_v30 = vld [vmem:[%s10575_s29 + $0x21] sm:$0xff]  ;;  %v9961_v31 = vpack.c.bf16 %v7739_v26, %v7738_v24 }
  0x15   : > { %9924 = vmatpush3.bf16.msra.mxu1 %v9921_v8  ;;  %v7538_v22 = vld [vmem:[%s10575_s29 + $0x2b] sm:$0xff]  ;;  %v7540_v29 = vld [vmem:[%s10575_s29 + $0x3b] sm:$0xff]  ;;  %v7541_v32 = vld [vmem:[%s10575_s29 + $0x43] sm:$0xff] }
  0x16   : > { %9956 = vmatpush3.bf16.msra.mxu0 %v10585_v11  ;;  %8971 = vmatprep.subr.msk.mxu1 %vm488_vm1, %v7135_v14  ;;  %v7072_v33 = vld [vmem:[%s10575_s29 + $0x29] sm:$0xff]  ;;  %v7543_v36 = vld [vmem:[%s10575_s29 + $0x53] sm:$0xff]  ;;  %v7544_v42 = vld [vmem:[%s10575_s29 + $0x5b] sm:$0xff] }
  0x17   : > { %9395 = vmatprep.subr.msk.mxu0 %vm488_vm1, %v7605_v15  ;;  %v7542_v34 = vld [vmem:[%s10575_s29 + $0x4b] sm:$0xff]  ;;  %v221_v38 = vld [vmem:[%s12547_s1 + $0x18] sm:$0xff]  ;;  %v7075_v43 = vld [vmem:[%s10575_s29 + $0x41] sm:$0xff] }
  0x18   : > { %v220_v37 = vld [vmem:[%s12547_s1 + $0x10] sm:$0xff]  ;;  %v7740_v40 = vld [vmem:[%s12547_s1 + $0xe8] sm:$0xf]  ;;  %v7074_v41 = vld [vmem:[%s10575_s29 + $0x39] sm:$0xff] }
  0x19   : > { %8972 = vmatpush3.msk.msra.mxu1 %vm488_vm1, %v7135_v14  ;;  %v9929_v39 = vpack.c.bf16 %v221_v38, %v220_v37  ;;  %v7545_v44 = vld [vmem:[%s10575_s29 + $0x63] sm:$0xff]  ;;  %v7546_v46 = vld [vmem:[%s10575_s29 + $0x6b] sm:$0xff]  ;;  %v7547_v48 = vld [vmem:[%s10575_s29 + $0x73] sm:$0xff] }
  0x1a   : > { %9396 = vmatpush3.msk.msra.mxu0 %vm488_vm1, %v7605_v15  ;;  %8974 = vmatmul.mubr.msk.f32.vlgmr.msra.gmra.mrb[0].mxu1 %vm295_vm0, %v7068_v20  ;;  %v7076_v45 = vld [vmem:[%s10575_s29 + $0x49] sm:$0xff]  ;;  %v7077_v47 = vld [vmem:[%s10575_s29 + $0x51] sm:$0xff]  ;;  %v7078_v51 = vld [vmem:[%s10575_s29 + $0x59] sm:$0xff] }
  0x1b   : > { %9926 = vmatprep.subr.bf16.mxu1 %v9925_v21  ;;  %9398 = vmatmul.mubr.msk.f32.vlgmr.msra.gmra.mrb[0].mxu0 %vm295_vm0, %v7538_v22  ;;  %v7871_v49 = vld [vmem:[%s12547_s1 + $0xf0] sm:$0xff]  ;;  %v7872_v50 = vld [vmem:[%s12547_s1 + $0xf8] sm:$0xff]  ;;  %v7079_v54 = vld [vmem:[%s10575_s29 + $0x61] sm:$0xff] }
  0x1c   : > { %9958 = vmatprep.subr.bf16.mxu0 %v9957_v23  ;;  %9928 = vmatpush3.bf16.msra.mxu1 %v9925_v21  ;;  %v10680_v52 = vpack.c.bf16 %v7872_v50, %v7871_v49  ;;  %v7548_v53 = vld [vmem:[%s10575_s29 + $0x7b] sm:$0xff]  ;;  %v7549_v55 = vld [vmem:[%s10575_s29 + $0x83] sm:$0xff]  ;;  %v7550_v57 = vld [vmem:[%s10575_s29 + $0x8b] sm:$0xff] }
  0x1d   : > { %9960 = vmatpush3.bf16.msra.mxu0 %v9957_v23  ;;  %8976 = vmatprep.mubr.msk.f32.mxu1 %vm295_vm0, %v7069_v25  ;;  %v7080_v56 = vld [vmem:[%s10575_s29 + $0x69] sm:$0xff]  ;;  %v7081_v58 = vld [vmem:[%s10575_s29 + $0x71] sm:$0xff]  ;;  %v222_v60 = vld [vmem:[%s12547_s1 + $0x20] sm:$0xf] }
  0x1e   : > { %9400 = vmatprep.mubr.msk.f32.mxu0 %vm295_vm0, %v7539_v27  ;;  %8977 = vmatmul.mubr.msk.f32.gmra.mrb[2].mxu1 %vm295_vm0, %v7070_v28  ;;  %v7551_v59 = vld [vmem:[%s10575_s29 + $0x93] sm:$0xff]  ;;  %v7552_v62 = vld [vmem:[%s10575_s29 + $0x9b] sm:$0xff]  ;;  %v7553_v0 = vld [vmem:[%s10575_s29 + $0xa3] sm:$0xff] }
  0x1f   : > { %9401 = vmatmul.mubr.msk.f32.gmra.mrb[2].mxu0 %vm295_vm0, %v7540_v29  ;;  %8979 = vmatprep.mubr.msk.f32.mxu1 %vm295_vm0, %v7071_v30  ;;  %v7082_v61 = vld [vmem:[%s10575_s29 + $0x79] sm:$0xff]  ;;  %v7083_v63 = vld [vmem:[%s10575_s29 + $0x81] sm:$0xff]  ;;  %v7084_v1 = vld [vmem:[%s10575_s29 + $0x89] sm:$0xff] }
  0x20   : > { %9403 = vmatprep.mubr.msk.f32.mxu0 %vm295_vm0, %v7541_v32  ;;  %9962 = vmatprep.subr.bf16.mxu0 %v9961_v31  ;;  %v7554_v2 = vld [vmem:[%s10575_s29 + $0xab] sm:$0xff]  ;;  %v7555_v4 = vld [vmem:[%s10575_s29 + $0xb3] sm:$0xff]  ;;  %v7556_v6 = vld [vmem:[%s10575_s29 + $0xbb] sm:$0xff] }
  0x21   : > { %9964 = vmatpush3.bf16.msra.mxu0 %v9961_v31  ;;  %9930 = vmatprep.subr.bf16.mxu1 %v9929_v39  ;;  %v7085_v3 = vld [vmem:[%s10575_s29 + $0x91] sm:$0xff]  ;;  %v7086_v5 = vld [vmem:[%s10575_s29 + $0x99] sm:$0xff]  ;;  %v7087_v8 = vld [vmem:[%s10575_s29 + $0xa1] sm:$0xff] }
  0x22   : > { %8980 = vmatmul.mubr.msk.f32.gmra.mrb[4].mxu1 %vm295_vm0, %v7072_v33  ;;  %9501 = vmatprep.subr.msk.mxu0 %vm488_vm1, %v7740_v40  ;;  %v7557_v9 = vld [vmem:[%s10575_s29 + $0xc3] sm:$0xff]  ;;  %v7558_v12 = vld [vmem:[%s10575_s29 + $0xcb] sm:$0xff]  ;;  %v7559_v15 = vld [vmem:[%s10575_s29 + $0xd3] sm:$0xff] }
  0x23   : > { %9404 = vmatmul.mubr.msk.f32.gmra.mrb[4].mxu0 %vm295_vm0, %v7542_v34  ;;  %8982 = vmatprep.mubr.msk.f32.mxu1 %vm295_vm0, %v7073_v35  ;;  %v7088_v10 = vld [vmem:[%s10575_s29 + $0xa9] sm:$0xff]  ;;  %v7089_v13 = vld [vmem:[%s10575_s29 + $0xb1] sm:$0xff]  ;;  %v7090_v18 = vld [vmem:[%s10575_s29 + $0xb9] sm:$0xff] }
  0x24   : > { %9406 = vmatprep.mubr.msk.f32.mxu0 %vm295_vm0, %v7543_v36  ;;  %9932 = vmatpush3.bf16.msra.mxu1 %v9929_v39  ;;  %v7331_v14 = vld [vmem:[%s12547_s1 + $0x50] sm:$0xff]  ;;  %v7332_v16 = vld [vmem:[%s12547_s1 + $0x58] sm:$0xff]  ;;  %v7091_v20 = vld [vmem:[%s10575_s29 + $0xc1] sm:$0xff] }
  0x25   : > { %9502 = vmatpush3.msk.msra.mxu0 %vm488_vm1, %v7740_v40  ;;  %9077 = vmatprep.subr.msk.mxu1 %vm488_vm1, %v222_v60  ;;  %v10739_v17 = vpack.c.bf16 %v7332_v16, %v7331_v14  ;;  %v7560_v19 = vld [vmem:[%s10575_s29 + $0xdb] sm:$0xff]  ;;  %v7561_v21 = vld [vmem:[%s10575_s29 + $0xe3] sm:$0xff]  ;;  %v7562_v23 = vld [vmem:[%s10575_s29 + $0xeb] sm:$0xff] }
  0x26   : > { %8983 = vmatmul.mubr.msk.f32.gmra.mrb[6].mxu1 %vm295_vm0, %v7074_v41  ;;  %9966 = vmatprep.subr.bf16.mxu0 %v10680_v52  ;;  %v7092_v22 = vld [vmem:[%s10575_s29 + $0xc9] sm:$0xff]  ;;  %v7093_v24 = vld [vmem:[%s10575_s29 + $0xd1] sm:$0xff]  ;;  %v7094_v26 = vld [vmem:[%s10575_s29 + $0xd9] sm:$0xff] }
  0x27   : > { %9407 = vmatmul.mubr.msk.f32.gmra.mrb[6].mxu0 %vm295_vm0, %v7544_v42  ;;  %8985 = vmatprep.mubr.msk.f32.mxu1 %vm295_vm0, %v7075_v43  ;;  %v7563_v25 = vld [vmem:[%s10575_s29 + $0xf3] sm:$0xff]  ;;  %v7564_v27 = vld [vmem:[%s10575_s29 + $0xfb] sm:$0xff]  ;;  %v7565_v29 = vld [vmem:[%s10575_s29 + $0x103] sm:$0xff] }
  0x28   : > { %9409 = vmatprep.mubr.msk.f32.mxu0 %vm295_vm0, %v7545_v44  ;;  %9078 = vmatpush3.msk.msra.mxu1 %vm488_vm1, %v222_v60  ;;  %v7095_v28 = vld [vmem:[%s10575_s29 + $0xe1] sm:$0xff]  ;;  %v7096_v30 = vld [vmem:[%s10575_s29 + $0xe9] sm:$0xff]  ;;  %v7097_v32 = vld [vmem:[%s10575_s29 + $0xf1] sm:$0xff] }
  0x29   : > { %9934 = vmatprep.subr.bf16.mxu1 %v10739_v17  ;;  %v7566_v31 = vld [vmem:[%s10575_s29 + $0x10b] sm:$0xff]  ;;  %v7567_v33 = vld [vmem:[%s10575_s29 + $0x113] sm:$0xff]  ;;  %v7568_v35 = vld [vmem:[%s10575_s29 + $0x11b] sm:$0xff] }
  0x2a   : > { %8986 = vmatmul.mubr.msk.f32.gmra.mrb[8].mxu1 %vm295_vm0, %v7076_v45  ;;  %v7098_v34 = vld [vmem:[%s10575_s29 + $0xf9] sm:$0xff]  ;;  %v7099_v36 = vld [vmem:[%s10575_s29 + $0x101] sm:$0xff]  ;;  %v7100_v40 = vld [vmem:[%s10575_s29 + $0x109] sm:$0xff] }
  0x2b   : > { %9410 = vmatmul.mubr.msk.f32.gmra.mrb[8].mxu0 %vm295_vm0, %v7546_v46  ;;  %8988 = vmatprep.mubr.msk.f32.mxu1 %vm295_vm0, %v7077_v47  ;;  %v7672_v37 = vld [vmem:[%s10575_s29 + $0x24] sm:$0xff]  ;;  %v7673_v41 = vld [vmem:[%s10575_s29 + $0x2c] sm:$0xff]  ;;  %v7674_v43 = vld [vmem:[%s10575_s29 + $0x34] sm:$0xff] }
  0x2c   : > { %9412 = vmatprep.mubr.msk.f32.mxu0 %vm295_vm0, %v7547_v48  ;;  %v7873_v38 = vld [vmem:[%s12547_s1 + $0x100] sm:$0xff]  ;;  %v7874_v39 = vld [vmem:[%s12547_s1 + $0x108] sm:$0xff]  ;;  %v7101_v42 = vld [vmem:[%s10575_s29 + $0x111] sm:$0xff] }
  0x2d   : > { %v9969_v44 = vpack.c.bf16 %v7874_v39, %v7873_v38  ;;  %v7102_v45 = vld [vmem:[%s10575_s29 + $0x119] sm:$0xff]  ;;  %v7103_v47 = vld [vmem:[%s10575_s29 + $0x121] sm:$0xff]  ;;  %v7875_v49 = vld [vmem:[%s12547_s1 + $0x110] sm:$0xf] }
  0x2e   : > { %8989 = vmatmul.mubr.msk.f32.gmra.mrb[10].mxu1 %vm295_vm0, %v7078_v51  ;;  %v7675_v46 = vld [vmem:[%s10575_s29 + $0x3c] sm:$0xff]  ;;  %v10804_v48 = vld [vmem:[%s10575_s29 + $0x44] sm:$0xff]  ;;  %v10911_v16 = vld [vmem:[%s10575_s29 + $0xac] sm:$0xff] }
  0x2f   : > { %9413 = vmatmul.mubr.msk.f32.gmra.mrb[10].mxu0 %vm295_vm0, %v7548_v53  ;;  %8991 = vmatprep.mubr.msk.f32.mxu1 %vm295_vm0, %v7079_v54  ;;  %v8006_v50 = vld [vmem:[%s12547_s1 + $0x118] sm:$0xff]  ;;  %v8007_v51 = vld [vmem:[%s12547_s1 + $0x120] sm:$0xff]  ;;  %v10822_v53 = vld [vmem:[%s10575_s29 + $0x4c] sm:$0xff] }
  0x30   : > { %9415 = vmatprep.mubr.msk.f32.mxu0 %vm295_vm0, %v7549_v55  ;;  %v7105_v54 = vld [vmem:[%s10575_s29 + $0x131] sm:$0xff]  ;;  %v10844_v60 = vld [vmem:[%s10575_s29 + $0x64] sm:$0xff] }
  0x31   : > { %v10826_v55 = vld [vmem:[%s10575_s29 + $0x54] sm:$0xff]  ;;  %v10901_v14 = vld [vmem:[%s10575_s29 + $0xa4] sm:$0xff] }
  0x32   : > { %8992 = vmatmul.mubr.msk.f32.gmra.mrb[12].mxu1 %vm295_vm0, %v7080_v56  ;;  %v10829_v56 = vpack.c.bf16 %v8007_v51, %v8006_v50  ;;  %v7127_v38 = vld [vmem:[%s10575_s29 + $0x1e1] sm:$0xff] }
  0x33   : > { %9416 = vmatmul.mubr.msk.f32.gmra.mrb[12].mxu0 %vm295_vm0, %v7550_v57  ;;  %8994 = vmatprep.mubr.msk.f32.mxu1 %vm295_vm0, %v7081_v58  ;;  %v7106_v57 = vld [vmem:[%s10575_s29 + $0x139] sm:$0xff]  ;;  %v10985_v39 = vld [vmem:[%s10575_s29 + $0x104] sm:$0xff] }
  0x34   : > { %9418 = vmatprep.mubr.msk.f32.mxu0 %vm295_vm0, %v7551_v59  ;;  %v10839_v58 = vld [vmem:[%s10575_s29 + $0x5c] sm:$0xff]  ;;  %v7334_v50 = vld [vmem:[%s12547_s1 + $0x68] sm:$0xff] }
  0x35   : > { %v7107_v59 = vld [vmem:[%s10575_s29 + $0x141] sm:$0xff] }
  0x36   : > { %8995 = vmatmul.mubr.msk.f32.gmra.mrb[14].mxu1 %vm295_vm0, %v7082_v61  ;;  %v7108_v61 = vld [vmem:[%s10575_s29 + $0x149] sm:$0xff] }
  0x37   : > { %9419 = vmatmul.mubr.msk.f32.gmra.mrb[14].mxu0 %vm295_vm0, %v7552_v62  ;;  %8997 = vmatprep.mubr.msk.f32.mxu1 %vm295_vm0, %v7083_v63  ;;  %v10855_v62 = vld [vmem:[%s10575_s29 + $0x6c] sm:$0xff]  ;;  %v11230_v11 = vld [vmem:[%s10575_s29 + $0x204] sm:$0xff] }
  0x38   : > { %9421 = vmatprep.mubr.msk.f32.mxu0 %vm295_vm0, %v7553_v0  ;;  %v7109_v63 = vld [vmem:[%s10575_s29 + $0x151] sm:$0xff]  ;;  %v155_v51 = vld [vmem:[%s10575_s29 + $0x8] sm:$0xff]  ;;  %12564 = vst [vmem:[#allocation6_spill] sm:$0xff] %v11230_v11 }
  0x39   : > { %v10859_v0 = vld [vmem:[%s10575_s29 + $0x74] sm:$0xff] }
  0x3a   : > { %8998 = vmatmul.mubr.msk.f32.gmra.mrb[16].mxu1 %vm295_vm0, %v7084_v1  ;;  %v7110_v1 = vld [vmem:[%s10575_s29 + $0x159] sm:$0xff] }
  0x3b   : > { %9422 = vmatmul.mubr.msk.f32.gmra.mrb[16].mxu0 %vm295_vm0, %v7554_v2  ;;  %9000 = vmatprep.mubr.msk.f32.mxu1 %vm295_vm0, %v7085_v3  ;;  %v10869_v2 = vld [vmem:[%s10575_s29 + $0x7c] sm:$0xff] }
  0x3c   : > { %9424 = vmatprep.mubr.msk.f32.mxu0 %vm295_vm0, %v7555_v4  ;;  %v7111_v3 = vld [vmem:[%s10575_s29 + $0x161] sm:$0xff] }
  0x3d   : > { %v10873_v4 = vld [vmem:[%s10575_s29 + $0x84] sm:$0xff] }
  0x3e   : > { %9001 = vmatmul.mubr.msk.f32.gmra.mrb[18].mxu1 %vm295_vm0, %v7086_v5  ;;  %v7112_v5 = vld [vmem:[%s10575_s29 + $0x169] sm:$0xff] }
  0x3f   : > { %9425 = vmatmul.mubr.msk.f32.gmra.mrb[18].mxu0 %vm295_vm0, %v7556_v6  ;;  %9003 = vmatprep.mubr.msk.f32.mxu1 %vm295_vm0, %v7087_v8  ;;  %v10883_v6 = vld [vmem:[%s10575_s29 + $0x8c] sm:$0xff] }
  0x40   : > { %9427 = vmatprep.mubr.msk.f32.mxu0 %vm295_vm0, %v7557_v9  ;;  %v7113_v8 = vld [vmem:[%s10575_s29 + $0x171] sm:$0xff] }
  0x41   : > { %v10887_v9 = vld [vmem:[%s10575_s29 + $0x94] sm:$0xff] }
  0x42   : > { %9004 = vmatmul.mubr.msk.f32.gmra.mrb[20].mxu1 %vm295_vm0, %v7088_v10  ;;  %v7114_v10 = vld [vmem:[%s10575_s29 + $0x179] sm:$0xff] }
  0x43   : > { %9428 = vmatmul.mubr.msk.f32.gmra.mrb[20].mxu0 %vm295_vm0, %v7558_v12  ;;  %9006 = vmatprep.mubr.msk.f32.mxu1 %vm295_vm0, %v7089_v13  ;;  %v10897_v12 = vld [vmem:[%s10575_s29 + $0x9c] sm:$0xff] }
  0x44   : > { %9430 = vmatprep.mubr.msk.f32.mxu0 %vm295_vm0, %v7559_v15  ;;  %v7115_v13 = vld [vmem:[%s10575_s29 + $0x181] sm:$0xff]  ;;  %v7116_v15 = vld [vmem:[%s10575_s29 + $0x189] sm:$0xff] }
  0x46   : > { %9007 = vmatmul.mubr.msk.f32.gmra.mrb[22].mxu1 %vm295_vm0, %v7090_v18  ;;  %v7117_v18 = vld [vmem:[%s10575_s29 + $0x191] sm:$0xff] }
  0x47   : > { %9431 = vmatmul.mubr.msk.f32.gmra.mrb[22].mxu0 %vm295_vm0, %v7560_v19  ;;  %9009 = vmatprep.mubr.msk.f32.mxu1 %vm295_vm0, %v7091_v20  ;;  %v10915_v19 = vld [vmem:[%s10575_s29 + $0xb4] sm:$0xff] }
  0x48   : > { %9433 = vmatprep.mubr.msk.f32.mxu0 %vm295_vm0, %v7561_v21  ;;  %v7118_v20 = vld [vmem:[%s10575_s29 + $0x199] sm:$0xff] }
  0x49   : > { %v10925_v21 = vld [vmem:[%s10575_s29 + $0xbc] sm:$0xff] }
  0x4a   : > { %9010 = vmatmul.mubr.msk.f32.gmra.mrb[24].mxu1 %vm295_vm0, %v7092_v22  ;;  %v7119_v22 = vld [vmem:[%s10575_s29 + $0x1a1] sm:$0xff] }
  0x4b   : > { %9434 = vmatmul.mubr.msk.f32.gmra.mrb[24].mxu0 %vm295_vm0, %v7562_v23  ;;  %9012 = vmatprep.mubr.msk.f32.mxu1 %vm295_vm0, %v7093_v24  ;;  %v10929_v23 = vld [vmem:[%s10575_s29 + $0xc4] sm:$0xff] }
  0x4c   : > { %9436 = vmatprep.mubr.msk.f32.mxu0 %vm295_vm0, %v7563_v25  ;;  %v7120_v24 = vld [vmem:[%s10575_s29 + $0x1a9] sm:$0xff] }
  0x4d   : > { %v10939_v25 = vld [vmem:[%s10575_s29 + $0xcc] sm:$0xff] }
  0x4e   : > { %9013 = vmatmul.mubr.msk.f32.gmra.mrb[26].mxu1 %vm295_vm0, %v7094_v26  ;;  %v7121_v26 = vld [vmem:[%s10575_s29 + $0x1b1] sm:$0xff] }
  0x4f   : > { %9437 = vmatmul.mubr.msk.f32.gmra.mrb[26].mxu0 %vm295_vm0, %v7564_v27  ;;  %9015 = vmatprep.mubr.msk.f32.mxu1 %vm295_vm0, %v7095_v28  ;;  %v10943_v27 = vld [vmem:[%s10575_s29 + $0xd4] sm:$0xff] }
  0x50   : > { %9439 = vmatprep.mubr.msk.f32.mxu0 %vm295_vm0, %v7565_v29  ;;  %v7122_v28 = vld [vmem:[%s10575_s29 + $0x1b9] sm:$0xff] }
  0x51   : > { %v10953_v29 = vld [vmem:[%s10575_s29 + $0xdc] sm:$0xff] }
  0x52   : > { %9016 = vmatmul.mubr.msk.f32.gmra.mrb[28].mxu1 %vm295_vm0, %v7096_v30  ;;  %v7123_v30 = vld [vmem:[%s10575_s29 + $0x1c1] sm:$0xff] }
  0x53   : > { %9440 = vmatmul.mubr.msk.f32.gmra.mrb[28].mxu0 %vm295_vm0, %v7566_v31  ;;  %9018 = vmatprep.mubr.msk.f32.mxu1 %vm295_vm0, %v7097_v32  ;;  %v10957_v31 = vld [vmem:[%s10575_s29 + $0xe4] sm:$0xff] }
  0x54   : > { %9442 = vmatprep.mubr.msk.f32.mxu0 %vm295_vm0, %v7567_v33  ;;  %v7124_v32 = vld [vmem:[%s10575_s29 + $0x1c9] sm:$0xff] }
  0x55   : > { %v10967_v33 = vld [vmem:[%s10575_s29 + $0xec] sm:$0xff] }
  0x56   : > { %9019 = vmatmul.mubr.msk.f32.gmra.mrb[30].mxu1 %vm295_vm0, %v7098_v34  ;;  %v7125_v34 = vld [vmem:[%s10575_s29 + $0x1d1] sm:$0xff] }
  0x57   : > { %9443 = vmatmul.mubr.msk.f32.gmra.mrb[30].mxu0 %vm295_vm0, %v7568_v35  ;;  %9021 = vmatprep.mubr.msk.f32.mxu1 %vm295_vm0, %v7099_v36  ;;  %v10971_v35 = vld [vmem:[%s10575_s29 + $0xf4] sm:$0xff] }
  0x58   : > { %9503 = vmatprep.mubr.msk.f32.mxu0 %vm295_vm0, %v7672_v37  ;;  %v7126_v36 = vld [vmem:[%s10575_s29 + $0x1d9] sm:$0xff] }
  0x59   : > { %v10981_v37 = vld [vmem:[%s10575_s29 + $0xfc] sm:$0xff] }
  0x5a   : > { %9022 = vmatmul.mubr.msk.f32.gmra.mrb[32].mxu1 %vm295_vm0, %v7100_v40  ;;  %v7128_v40 = vld [vmem:[%s10575_s29 + $0x1e9] sm:$0xff] }
  0x5b   : > { %9504 = vmatmul.mubr.msk.f32.vlgmr.msra.gmra.mrb[0].mxu0 %vm295_vm0, %v7673_v41  ;;  %9024 = vmatprep.mubr.msk.f32.mxu1 %vm295_vm0, %v7101_v42  ;;  %v10995_v41 = vld [vmem:[%s10575_s29 + $0x10c] sm:$0xff] }
  0x5c   : > { %9968 = vmatpush3.bf16.msra.mxu0 %v10680_v52  ;;  %9506 = vmatprep.mubr.msk.f32.mxu0 %vm295_vm0, %v7674_v43  ;;  %v7104_v52 = vld [vmem:[%s10575_s29 + $0x129] sm:$0xff]  ;;  %v7129_v42 = vld [vmem:[%s10575_s29 + $0x1f1] sm:$0xff] }
  0x5d   : > { %9970 = vmatprep.subr.bf16.mxu0 %v9969_v44  ;;  %v10999_v43 = vld [vmem:[%s10575_s29 + $0x114] sm:$0xff] }
  0x5e   : > { %9025 = vmatmul.mubr.msk.f32.gmra.mrb[34].mxu1 %vm295_vm0, %v7102_v45  ;;  %v11009_v45 = vld [vmem:[%s10575_s29 + $0x11c] sm:$0xff] }
  0x5f   : > { %9507 = vmatmul.mubr.msk.f32.gmra.mrb[2].mxu0 %vm295_vm0, %v7675_v46  ;;  %9027 = vmatprep.mubr.msk.f32.mxu1 %vm295_vm0, %v7103_v47  ;;  %v154_v46 = vld [vmem:[%s10575_s29] sm:$0xff] }
  0x60   : > { %9509 = vmatprep.mubr.msk.f32.mxu0 %vm295_vm0, %v10804_v48  ;;  %9972 = vmatpush3.bf16.msra.mxu0 %v9969_v44  ;;  %v7130_v44 = vld [vmem:[%s10575_s29 + $0x1f9] sm:$0xff]  ;;  %v11013_v47 = vld [vmem:[%s10575_s29 + $0x124] sm:$0xff] }
  0x61   : > { %9607 = vmatprep.subr.msk.mxu0 %vm488_vm1, %v7875_v49 }
  0x62   : > { %9028 = vmatmul.mubr.msk.f32.gmra.mrb[36].mxu1 %vm295_vm0, %v7104_v52  ;;  %v11029_v52 = vld [vmem:[%s10575_s29 + $0x12c] sm:$0xff] }
  0x63   : > { %9510 = vmatmul.mubr.msk.f32.gmra.mrb[4].mxu0 %vm295_vm0, %v10822_v53  ;;  %9030 = vmatprep.mubr.msk.f32.mxu1 %vm295_vm0, %v7105_v54  ;;  %v156_v54 = vld [vmem:[%s10575_s29 + $0x10] sm:$0xff] }
  0x64   : > { %9512 = vmatprep.mubr.msk.f32.mxu0 %vm295_vm0, %v10826_v55  ;;  %9608 = vmatpush3.msk.msra.mxu0 %vm488_vm1, %v7875_v49  ;;  %v7333_v49 = vld [vmem:[%s12547_s1 + $0x60] sm:$0xff] }
  0x65   : > { %9974 = vmatprep.subr.bf16.mxu0 %v10829_v56 }
  0x66   : > { %9031 = vmatmul.mubr.msk.f32.gmra.mrb[38].mxu1 %vm295_vm0, %v7106_v57  ;;  %v11033_v57 = vld [vmem:[%s10575_s29 + $0x134] sm:$0xff] }
  0x67   : > { %9513 = vmatmul.mubr.msk.f32.gmra.mrb[6].mxu0 %vm295_vm0, %v10839_v58  ;;  %9033 = vmatprep.mubr.msk.f32.mxu1 %vm295_vm0, %v7107_v59  ;;  %v9937_v59 = vpack.c.bf16 %v7334_v50, %v7333_v49  ;;  %v11128_v49 = vld [vmem:[%s10575_s29 + $0x18c] sm:$0xff] }
  0x68   : > { %9515 = vmatprep.mubr.msk.f32.mxu0 %vm295_vm0, %v10844_v60  ;;  %v168_v50 = vld [vmem:[%s10575_s29 + $0x70] sm:$0xff] }
  0x6a   : > { %9034 = vmatmul.mubr.msk.f32.gmra.mrb[40].mxu1 %vm295_vm0, %v7108_v61  ;;  %v157_v61 = vld [vmem:[%s10575_s29 + $0x18] sm:$0xff] }
  0x6b   : > { %9516 = vmatmul.mubr.msk.f32.gmra.mrb[8].mxu0 %vm295_vm0, %v10855_v62  ;;  %9036 = vmatprep.mubr.msk.f32.mxu1 %vm295_vm0, %v7109_v63  ;;  %v11044_v63 = vld [vmem:[%s10575_s29 + $0x13c] sm:$0xff] }
  0x6c   : > { %9518 = vmatprep.mubr.msk.f32.mxu0 %vm295_vm0, %v10859_v0 }
  0x6e   : > { %9037 = vmatmul.mubr.msk.f32.gmra.mrb[42].mxu1 %vm295_vm0, %v7110_v1  ;;  %v158_v1 = vld [vmem:[%s10575_s29 + $0x20] sm:$0xff] }
  0x6f   : > { %9519 = vmatmul.mubr.msk.f32.gmra.mrb[10].mxu0 %vm295_vm0, %v10869_v2  ;;  %9039 = vmatprep.mubr.msk.f32.mxu1 %vm295_vm0, %v7111_v3  ;;  %v11048_v3 = vld [vmem:[%s10575_s29 + $0x144] sm:$0xff] }
  0x70   : > { %9521 = vmatprep.mubr.msk.f32.mxu0 %vm295_vm0, %v10873_v4 }
  0x72   : > { %9040 = vmatmul.mubr.msk.f32.gmra.mrb[44].mxu1 %vm295_vm0, %v7112_v5  ;;  %v7466_v5 = vld [vmem:[%s12547_s1 + $0x78] sm:$0xff] }
  0x73   : > { %9522 = vmatmul.mubr.msk.f32.gmra.mrb[12].mxu0 %vm295_vm0, %v10883_v6  ;;  %9042 = vmatprep.mubr.msk.f32.mxu1 %vm295_vm0, %v7113_v8  ;;  %v7467_v8 = vld [vmem:[%s12547_s1 + $0x80] sm:$0xff] }
  0x74   : > { %9524 = vmatprep.mubr.msk.f32.mxu0 %vm295_vm0, %v10887_v9 }
  0x76   : > { %9043 = vmatmul.mubr.msk.f32.gmra.mrb[46].mxu1 %vm295_vm0, %v7114_v10  ;;  %v159_v10 = vld [vmem:[%s10575_s29 + $0x28] sm:$0xff] }
  0x77   : > { %9525 = vmatmul.mubr.msk.f32.gmra.mrb[14].mxu0 %vm295_vm0, %v10897_v12  ;;  %9045 = vmatprep.mubr.msk.f32.mxu1 %vm295_vm0, %v7115_v13  ;;  %v11067_v13 = vld [vmem:[%s10575_s29 + $0x14c] sm:$0xff] }
  0x78   : > { %9527 = vmatprep.mubr.msk.f32.mxu0 %vm295_vm0, %v10901_v14 }
  0x7a   : > { %9046 = vmatmul.mubr.msk.f32.gmra.mrb[48].mxu1 %vm295_vm0, %v7116_v15  ;;  %v160_v15 = vld [vmem:[%s10575_s29 + $0x30] sm:$0xff] }
  0x7b   : > { %9528 = vmatmul.mubr.msk.f32.gmra.mrb[16].mxu0 %vm295_vm0, %v10911_v16  ;;  %9048 = vmatprep.mubr.msk.f32.mxu1 %vm295_vm0, %v7117_v18  ;;  %v11071_v18 = vld [vmem:[%s10575_s29 + $0x154] sm:$0xff] }
  0x7c   : > { %9530 = vmatprep.mubr.msk.f32.mxu0 %vm295_vm0, %v10915_v19 }
  0x7e   : > { %9049 = vmatmul.mubr.msk.f32.gmra.mrb[50].mxu1 %vm295_vm0, %v7118_v20  ;;  %v11074_v20 = vpack.c.bf16 %v7467_v8, %v7466_v5  ;;  %v11156_v5 = vld [vmem:[%s10575_s29 + $0x1ac] sm:$0xff] }
  0x7f   : > { %9531 = vmatmul.mubr.msk.f32.gmra.mrb[18].mxu0 %vm295_vm0, %v10925_v21  ;;  %9051 = vmatprep.mubr.msk.f32.mxu1 %vm295_vm0, %v7119_v22  ;;  %v161_v22 = vld [vmem:[%s10575_s29 + $0x38] sm:$0xff]  ;;  %v172_v8 = vld [vmem:[%s10575_s29 + $0x90] sm:$0xff] }
  0x80   : > { %9533 = vmatprep.mubr.msk.f32.mxu0 %vm295_vm0, %v10929_v23 }
  0x82   : > { %9052 = vmatmul.mubr.msk.f32.gmra.mrb[52].mxu1 %vm295_vm0, %v7120_v24  ;;  %v11084_v24 = vld [vmem:[%s10575_s29 + $0x15c] sm:$0xff] }
  0x83   : > { %9534 = vmatmul.mubr.msk.f32.gmra.mrb[20].mxu0 %vm295_vm0, %v10939_v25  ;;  %9054 = vmatprep.mubr.msk.f32.mxu1 %vm295_vm0, %v7121_v26  ;;  %v162_v26 = vld [vmem:[%s10575_s29 + $0x40] sm:$0xff] }
  0x84   : > { %9536 = vmatprep.mubr.msk.f32.mxu0 %vm295_vm0, %v10943_v27 }
  0x86   : > { %9055 = vmatmul.mubr.msk.f32.gmra.mrb[54].mxu1 %vm295_vm0, %v7122_v28  ;;  %v11089_v28 = vld [vmem:[%s10575_s29 + $0x164] sm:$0xff] }
  0x87   : > { %9537 = vmatmul.mubr.msk.f32.gmra.mrb[22].mxu0 %vm295_vm0, %v10953_v29  ;;  %9057 = vmatprep.mubr.msk.f32.mxu1 %vm295_vm0, %v7123_v30  ;;  %v163_v30 = vld [vmem:[%s10575_s29 + $0x48] sm:$0xff] }
  0x88   : > { %9539 = vmatprep.mubr.msk.f32.mxu0 %vm295_vm0, %v10957_v31 }
  0x8a   : > { %9058 = vmatmul.mubr.msk.f32.gmra.mrb[56].mxu1 %vm295_vm0, %v7124_v32  ;;  %v11100_v32 = vld [vmem:[%s10575_s29 + $0x16c] sm:$0xff] }
  0x8b   : > { %9540 = vmatmul.mubr.msk.f32.gmra.mrb[24].mxu0 %vm295_vm0, %v10967_v33  ;;  %9060 = vmatprep.mubr.msk.f32.mxu1 %vm295_vm0, %v7125_v34  ;;  %v164_v34 = vld [vmem:[%s10575_s29 + $0x50] sm:$0xff] }
  0x8c   : > { %9542 = vmatprep.mubr.msk.f32.mxu0 %vm295_vm0, %v10971_v35 }
  0x8e   : > { %9061 = vmatmul.mubr.msk.f32.gmra.mrb[58].mxu1 %vm295_vm0, %v7126_v36  ;;  %v11104_v36 = vld [vmem:[%s10575_s29 + $0x174] sm:$0xff] }
  0x8f   : > { %9543 = vmatmul.mubr.msk.f32.gmra.mrb[26].mxu0 %vm295_vm0, %v10981_v37  ;;  %9063 = vmatprep.mubr.msk.f32.mxu1 %vm295_vm0, %v7127_v38  ;;  %v165_v38 = vld [vmem:[%s10575_s29 + $0x58] sm:$0xff] }
  0x90   : > { %9545 = vmatprep.mubr.msk.f32.mxu0 %vm295_vm0, %v10985_v39 }
  0x92   : > { %9064 = vmatmul.mubr.msk.f32.gmra.mrb[60].mxu1 %vm295_vm0, %v7128_v40  ;;  %v11114_v40 = vld [vmem:[%s10575_s29 + $0x17c] sm:$0xff] }
  0x93   : > { %9546 = vmatmul.mubr.msk.f32.gmra.mrb[28].mxu0 %vm295_vm0, %v10995_v41  ;;  %9066 = vmatprep.mubr.msk.f32.mxu1 %vm295_vm0, %v7129_v42  ;;  %v166_v42 = vld [vmem:[%s10575_s29 + $0x60] sm:$0xff] }
  0x94   : > { %9548 = vmatprep.mubr.msk.f32.mxu0 %vm295_vm0, %v10999_v43 }
  0x96   : > { %9067 = vmatmul.mubr.msk.f32.gmra.mrb[62].mxu1 %vm295_vm0, %v7130_v44  ;;  %v11118_v44 = vld [vmem:[%s10575_s29 + $0x184] sm:$0xff] }
  0x97   : > { %9549 = vmatmul.mubr.msk.f32.gmra.mrb[30].mxu0 %vm295_vm0, %v11009_v45  ;;  %9079 = vmatprep.mubr.msk.f32.mxu1 %vm295_vm0, %v154_v46  ;;  %v167_v46 = vld [vmem:[%s10575_s29 + $0x68] sm:$0xff] }
  0x98   : > { %9551 = vmatprep.mubr.msk.f32.mxu0 %vm295_vm0, %v11013_v47 }
  0x9a   : > { %9080 = vmatmul.mubr.msk.f32.vlgmr.msra.gmra.mrb[0].mxu1 %vm295_vm0, %v155_v51  ;;  %v11132_v51 = vld [vmem:[%s10575_s29 + $0x194] sm:$0xff] }
  0x9b   : > { %9552 = vmatmul.mubr.msk.f32.gmra.mrb[32].mxu0 %vm295_vm0, %v11029_v52  ;;  %9936 = vmatpush3.bf16.msra.mxu1 %v10739_v17  ;;  %v7335_v17 = vld [vmem:[%s12547_s1 + $0x70] sm:$0xf] }
  0x9c   : > { %9082 = vmatprep.mubr.msk.f32.mxu1 %vm295_vm0, %v156_v54  ;;  %9554 = vmatprep.mubr.msk.f32.mxu0 %vm295_vm0, %v11033_v57  ;;  %v169_v54 = vld [vmem:[%s10575_s29 + $0x78] sm:$0xff] }
  0x9d   : > { %9938 = vmatprep.subr.bf16.mxu1 %v9937_v59 }
  0x9e   : > { %9083 = vmatmul.mubr.msk.f32.gmra.mrb[2].mxu1 %vm295_vm0, %v157_v61  ;;  %v170_v61 = vld [vmem:[%s10575_s29 + $0x80] sm:$0xff] }
  0x9f   : > { %9555 = vmatmul.mubr.msk.f32.gmra.mrb[34].mxu0 %vm295_vm0, %v11044_v63  ;;  %9085 = vmatprep.mubr.msk.f32.mxu1 %vm295_vm0, %v158_v1  ;;  %v11146_v1 = vld [vmem:[%s10575_s29 + $0x1a4] sm:$0xff] }
  0xa0   : > { %9557 = vmatprep.mubr.msk.f32.mxu0 %vm295_vm0, %v11048_v3  ;;  %9940 = vmatpush3.bf16.msra.mxu1 %v9937_v59  ;;  %v11142_v59 = vld [vmem:[%s10575_s29 + $0x19c] sm:$0xff] }
  0xa1   : > { %9183 = vmatprep.subr.msk.mxu1 %vm488_vm1, %v7335_v17 }
  0xa2   : > { %9086 = vmatmul.mubr.msk.f32.gmra.mrb[4].mxu1 %vm295_vm0, %v159_v10  ;;  %v11160_v10 = vld [vmem:[%s10575_s29 + $0x1b4] sm:$0xff] }
  0xa3   : > { %9558 = vmatmul.mubr.msk.f32.gmra.mrb[36].mxu0 %vm295_vm0, %v11067_v13  ;;  %9088 = vmatprep.mubr.msk.f32.mxu1 %vm295_vm0, %v160_v15  ;;  %v173_v15 = vld [vmem:[%s10575_s29 + $0x98] sm:$0xff] }
  0xa4   : > { %9560 = vmatprep.mubr.msk.f32.mxu0 %vm295_vm0, %v11071_v18  ;;  %9184 = vmatpush3.msk.msra.mxu1 %vm488_vm1, %v7335_v17  ;;  %v171_v17 = vld [vmem:[%s10575_s29 + $0x88] sm:$0xff] }
  0xa5   : > { %9942 = vmatprep.subr.bf16.mxu1 %v11074_v20 }
  0xa6   : > { %9089 = vmatmul.mubr.msk.f32.gmra.mrb[6].mxu1 %vm295_vm0, %v161_v22  ;;  %v11170_v22 = vld [vmem:[%s10575_s29 + $0x1bc] sm:$0xff] }
  0xa7   : > { %9561 = vmatmul.mubr.msk.f32.gmra.mrb[38].mxu0 %vm295_vm0, %v11084_v24  ;;  %9091 = vmatprep.mubr.msk.f32.mxu1 %vm295_vm0, %v162_v26  ;;  %v174_v26 = vld [vmem:[%s10575_s29 + $0xa0] sm:$0xff] }
  0xa8   : > { %9563 = vmatprep.mubr.msk.f32.mxu0 %vm295_vm0, %v11089_v28 }
  0xaa   : > { %9092 = vmatmul.mubr.msk.f32.gmra.mrb[8].mxu1 %vm295_vm0, %v163_v30  ;;  %v11174_v30 = vld [vmem:[%s10575_s29 + $0x1c4] sm:$0xff] }
  0xab   : > { %9564 = vmatmul.mubr.msk.f32.gmra.mrb[40].mxu0 %vm295_vm0, %v11100_v32  ;;  %9094 = vmatprep.mubr.msk.f32.mxu1 %vm295_vm0, %v164_v34  ;;  %v175_v34 = vld [vmem:[%s10575_s29 + $0xa8] sm:$0xff] }
  0xac   : > { %9566 = vmatprep.mubr.msk.f32.mxu0 %vm295_vm0, %v11104_v36 }
  0xae   : > { %9095 = vmatmul.mubr.msk.f32.gmra.mrb[10].mxu1 %vm295_vm0, %v165_v38  ;;  %v11184_v38 = vld [vmem:[%s10575_s29 + $0x1cc] sm:$0xff] }
  0xaf   : > { %9567 = vmatmul.mubr.msk.f32.gmra.mrb[42].mxu0 %vm295_vm0, %v11114_v40  ;;  %9097 = vmatprep.mubr.msk.f32.mxu1 %vm295_vm0, %v166_v42  ;;  %v176_v42 = vld [vmem:[%s10575_s29 + $0xb0] sm:$0xff] }
  0xb0   : > { %9569 = vmatprep.mubr.msk.f32.mxu0 %vm295_vm0, %v11118_v44 }
  0xb2   : > { %9098 = vmatmul.mubr.msk.f32.gmra.mrb[12].mxu1 %vm295_vm0, %v167_v46  ;;  %v11188_v46 = vld [vmem:[%s10575_s29 + $0x1d4] sm:$0xff] }
  0xb3   : > { %9570 = vmatmul.mubr.msk.f32.gmra.mrb[44].mxu0 %vm295_vm0, %v11128_v49  ;;  %9100 = vmatprep.mubr.msk.f32.mxu1 %vm295_vm0, %v168_v50  ;;  %v177_v50 = vld [vmem:[%s10575_s29 + $0xb8] sm:$0xff] }
  0xb4   : > { %9572 = vmatprep.mubr.msk.f32.mxu0 %vm295_vm0, %v11132_v51 }
  0xb6   : > { %9101 = vmatmul.mubr.msk.f32.gmra.mrb[14].mxu1 %vm295_vm0, %v169_v54  ;;  %v11198_v54 = vld [vmem:[%s10575_s29 + $0x1dc] sm:$0xff] }
  0xb7   : > { %9573 = vmatmul.mubr.msk.f32.gmra.mrb[46].mxu0 %vm295_vm0, %v11142_v59  ;;  %9103 = vmatprep.mubr.msk.f32.mxu1 %vm295_vm0, %v170_v61  ;;  %v178_v61 = vld [vmem:[%s10575_s29 + $0xc0] sm:$0xff] }
  0xb8   : > { %9575 = vmatprep.mubr.msk.f32.mxu0 %vm295_vm0, %v11146_v1 }
  0xba   : > { %9104 = vmatmul.mubr.msk.f32.gmra.mrb[16].mxu1 %vm295_vm0, %v171_v17  ;;  %v11202_v17 = vld [vmem:[%s10575_s29 + $0x1e4] sm:$0xff] }
  0xbb   : > { %9576 = vmatmul.mubr.msk.f32.gmra.mrb[48].mxu0 %vm295_vm0, %v11156_v5  ;;  %9106 = vmatprep.mubr.msk.f32.mxu1 %vm295_vm0, %v172_v8  ;;  %v179_v8 = vld [vmem:[%s10575_s29 + $0xc8] sm:$0xff] }
  0xbc   : > { %9578 = vmatprep.mubr.msk.f32.mxu0 %vm295_vm0, %v11160_v10 }
  0xbe   : > { %9107 = vmatmul.mubr.msk.f32.gmra.mrb[18].mxu1 %vm295_vm0, %v173_v15  ;;  %v11212_v15 = vld [vmem:[%s10575_s29 + $0x1ec] sm:$0xff] }
  0xbf   : > { %9579 = vmatmul.mubr.msk.f32.gmra.mrb[50].mxu0 %vm295_vm0, %v11170_v22  ;;  %9109 = vmatprep.mubr.msk.f32.mxu1 %vm295_vm0, %v174_v26  ;;  %12561 = vst [vmem:[#allocation3_spill] sm:$0xff] %v11212_v15  ;;  %v180_v26 = vld [vmem:[%s10575_s29 + $0xd0] sm:$0xff] }
  0xc0   : > { %9581 = vmatprep.mubr.msk.f32.mxu0 %vm295_vm0, %v11174_v30 }
  0xc2   : > { %9110 = vmatmul.mubr.msk.f32.gmra.mrb[20].mxu1 %vm295_vm0, %v175_v34  ;;  %v11216_v34 = vld [vmem:[%s10575_s29 + $0x1f4] sm:$0xff] }
  0xc3   : > { %9582 = vmatmul.mubr.msk.f32.gmra.mrb[52].mxu0 %vm295_vm0, %v11184_v38  ;;  %9112 = vmatprep.mubr.msk.f32.mxu1 %vm295_vm0, %v176_v42  ;;  %12562 = vst [vmem:[#allocation4_spill] sm:$0xff] %v11216_v34  ;;  %v181_v42 = vld [vmem:[%s10575_s29 + $0xd8] sm:$0xff] }
  0xc4   : > { %9584 = vmatprep.mubr.msk.f32.mxu0 %vm295_vm0, %v11188_v46 }
  0xc6   : > { %9113 = vmatmul.mubr.msk.f32.gmra.mrb[22].mxu1 %vm295_vm0, %v177_v50  ;;  %v11226_v50 = vld [vmem:[%s10575_s29 + $0x1fc] sm:$0xff] }
  0xc7   : > { %9585 = vmatmul.mubr.msk.f32.gmra.mrb[54].mxu0 %vm295_vm0, %v11198_v54  ;;  %9115 = vmatprep.mubr.msk.f32.mxu1 %vm295_vm0, %v178_v61  ;;  %12563 = vst [vmem:[#allocation5_spill] sm:$0xff] %v11226_v50  ;;  %v182_v61 = vld [vmem:[%s10575_s29 + $0xe0] sm:$0xff] }
  0xc8   : > { %9587 = vmatprep.mubr.msk.f32.mxu0 %vm295_vm0, %v11202_v17 }
  0xca   : > { %9116 = vmatmul.mubr.msk.f32.gmra.mrb[24].mxu1 %vm295_vm0, %v179_v8  ;;  %v183_v8 = vld [vmem:[%s10575_s29 + $0xe8] sm:$0xff] }
  0xcb   : > { %9588 = vmatmul.mubr.msk.f32.gmra.mrb[56].mxu0 %vm295_vm0, %v11212_v15  ;;  %9118 = vmatprep.mubr.msk.f32.mxu1 %vm295_vm0, %v180_v26  ;;  %v11240_v26 = vld [vmem:[%s10575_s29 + $0x20c] sm:$0xff]  ;;  %v11244_v15 = vld [vmem:[%s10575_s29 + $0x214] sm:$0xff] }
  0xcc   : > { %9590 = vmatprep.mubr.msk.f32.mxu0 %vm295_vm0, %v11216_v34  ;;  %12565 = vst [vmem:[#allocation7_spill] sm:$0xff] %v11240_v26  ;;  %v184_v34 = vld [vmem:[%s10575_s29 + $0xf0] sm:$0xff]  ;;  %12566 = vst [vmem:[#allocation8_spill] sm:$0xff] %v11244_v15 }
  0xce   : > { %9119 = vmatmul.mubr.msk.f32.gmra.mrb[26].mxu1 %vm295_vm0, %v181_v42  ;;  %v185_v42 = vld [vmem:[%s10575_s29 + $0xf8] sm:$0xff] }
  0xcf   : > { %9591 = vmatmul.mubr.msk.f32.gmra.mrb[58].mxu0 %vm295_vm0, %v11226_v50  ;;  %9121 = vmatprep.mubr.msk.f32.mxu1 %vm295_vm0, %v182_v61  ;;  %v11254_v61 = vld [vmem:[%s10575_s29 + $0x21c] sm:$0xff] }
  0xd0   : > { %9593 = vmatprep.mubr.msk.f32.mxu0 %vm295_vm0, %v11230_v11  ;;  %v186_v11 = vld [vmem:[%s10575_s29 + $0x100] sm:$0xff]  ;;  %v189_v50 = vld [vmem:[%s10575_s29 + $0x118] sm:$0xff] }
  0xd2   : > { %9122 = vmatmul.mubr.msk.f32.gmra.mrb[28].mxu1 %vm295_vm0, %v183_v8  ;;  %v8008_v8 = vld [vmem:[%s12547_s1 + $0x128] sm:$0xff] }
  0xd3   : > { %9594 = vmatmul.mubr.msk.f32.gmra.mrb[60].mxu0 %vm295_vm0, %v11240_v26  ;;  %9124 = vmatprep.mubr.msk.f32.mxu1 %vm295_vm0, %v184_v34  ;;  %v8009_v26 = vld [vmem:[%s12547_s1 + $0x130] sm:$0xff]  ;;  %v187_v34 = vld [vmem:[%s10575_s29 + $0x108] sm:$0xff] }
  0xd4   : > { %9596 = vmatprep.mubr.msk.f32.mxu0 %vm295_vm0, %v11244_v15  ;;  %v188_v15 = vld [vmem:[%s10575_s29 + $0x110] sm:$0xff] }
  0xd6   : > { %9125 = vmatmul.mubr.msk.f32.gmra.mrb[30].mxu1 %vm295_vm0, %v185_v42  ;;  %v9977_v42 = vpack.c.bf16 %v8009_v26, %v8008_v8  ;;  %v196_v26 = vld [vmem:[%s10575_s29 + $0x150] sm:$0xff] }
  0xd7   : > { %9597 = vmatmul.mubr.msk.f32.gmra.mrb[62].mxu0 %vm295_vm0, %v11254_v61  ;;  %9127 = vmatprep.mubr.msk.f32.mxu1 %vm295_vm0, %v186_v11  ;;  %v190_v11 = vld [vmem:[%s10575_s29 + $0x120] sm:$0xff]  ;;  %v7469_v8 = vld [vmem:[%s12547_s1 + $0x90] sm:$0xff] }
  0xd8   : > { %9609 = vmatprep.mubr.msk.f32.mxu0 %vm295_vm0, %v10804_v48  ;;  %v8010_v48 = vld [vmem:[%s12547_s1 + $0x138] sm:$0xf] }
  0xda   : > { %9128 = vmatmul.mubr.msk.f32.gmra.mrb[32].mxu1 %vm295_vm0, %v187_v34 }
  0xdb   : > { %9610 = vmatmul.mubr.msk.f32.vlgmr.msra.gmra.mrb[0].mxu0 %vm295_vm0, %v10822_v53  ;;  %9130 = vmatprep.mubr.msk.f32.mxu1 %vm295_vm0, %v188_v15  ;;  %v8141_v53 = vld [vmem:[%s12547_s1 + $0x140] sm:$0xff]  ;;  %v192_v15 = vld [vmem:[%s10575_s29 + $0x130] sm:$0xff] }
  0xdc   : > { %9976 = vmatpush3.bf16.msra.mxu0 %v10829_v56  ;;  %9612 = vmatprep.mubr.msk.f32.mxu0 %vm295_vm0, %v10826_v55  ;;  %v8142_v56 = vld [vmem:[%s12547_s1 + $0x148] sm:$0xff] }
  0xdd   : > { %9978 = vmatprep.subr.bf16.mxu0 %v9977_v42  ;;  %v191_v55 = vld [vmem:[%s10575_s29 + $0x128] sm:$0xff] }
  0xde   : > { %9131 = vmatmul.mubr.msk.f32.gmra.mrb[34].mxu1 %vm295_vm0, %v189_v50  ;;  %v11298_v50 = vpack.c.bf16 %v8142_v56, %v8141_v53  ;;  %v11583_v53 = vld [vmem:[%s10575_s29 + $0xca] sm:$0xff]  ;;  %v12570_v56 = vld [vmem:[#allocation6_spill] sm:$0xff] }
  0xdf   : > { %9613 = vmatmul.mubr.msk.f32.gmra.mrb[2].mxu0 %vm295_vm0, %v10839_v58  ;;  %9133 = vmatprep.mubr.msk.f32.mxu1 %vm295_vm0, %v190_v11  ;;  %v193_v58 = vld [vmem:[%s10575_s29 + $0x138] sm:$0xff]  ;;  %v12568_v11 = vld [vmem:[#allocation4_spill] sm:$0xff] }
  0xe0   : > { %9615 = vmatprep.mubr.msk.f32.mxu0 %vm295_vm0, %v10844_v60  ;;  %9980 = vmatpush3.bf16.msra.mxu0 %v9977_v42  ;;  %v194_v60 = vld [vmem:[%s10575_s29 + $0x140] sm:$0xff] }
  0xe1   : > { %9713 = vmatprep.subr.msk.mxu0 %vm488_vm1, %v8010_v48  ;;  %v7270_v42 = vld [vmem:[%s10575_s29 + $0x1a] sm:$0xff] }
  0xe2   : > { %9134 = vmatmul.mubr.msk.f32.gmra.mrb[36].mxu1 %vm295_vm0, %v191_v55  ;;  %v11588_v55 = vld [vmem:[%s10575_s29 + $0xd2] sm:$0xff] }
  0xe3   : > { %9616 = vmatmul.mubr.msk.f32.gmra.mrb[4].mxu0 %vm295_vm0, %v10855_v62  ;;  %9136 = vmatprep.mubr.msk.f32.mxu1 %vm295_vm0, %v192_v15  ;;  %v195_v62 = vld [vmem:[%s10575_s29 + $0x148] sm:$0xff] }
  0xe4   : > { %9618 = vmatprep.mubr.msk.f32.mxu0 %vm295_vm0, %v10859_v0  ;;  %9714 = vmatpush3.msk.msra.mxu0 %vm488_vm1, %v8010_v48  ;;  %v197_v0 = vld [vmem:[%s10575_s29 + $0x158] sm:$0xff]  ;;  %v12571_v15 = vld [vmem:[#allocation7_spill] sm:$0xff] }
  0xe5   : > { %9982 = vmatprep.subr.bf16.mxu0 %v11298_v50  ;;  %v12569_v48 = vld [vmem:[#allocation5_spill] sm:$0xff] }
  0xe6   : > { %9137 = vmatmul.mubr.msk.f32.gmra.mrb[38].mxu1 %vm295_vm0, %v193_v58  ;;  %v11597_v58 = vld [vmem:[%s10575_s29 + $0xda] sm:$0xff] }
  0xe7   : > { %9619 = vmatmul.mubr.msk.f32.gmra.mrb[6].mxu0 %vm295_vm0, %v10869_v2  ;;  %9139 = vmatprep.mubr.msk.f32.mxu1 %vm295_vm0, %v194_v60  ;;  %v198_v2 = vld [vmem:[%s10575_s29 + $0x160] sm:$0xff]  ;;  %v12572_v60 = vld [vmem:[#allocation8_spill] sm:$0xff] }
  0xe8   : > { %9621 = vmatprep.mubr.msk.f32.mxu0 %vm295_vm0, %v10873_v4  ;;  %v199_v4 = vld [vmem:[%s10575_s29 + $0x168] sm:$0xff] }
  0xea   : > { %9140 = vmatmul.mubr.msk.f32.gmra.mrb[40].mxu1 %vm295_vm0, %v195_v62  ;;  %v11602_v62 = vld [vmem:[%s10575_s29 + $0xe2] sm:$0xff] }
  0xeb   : > { %9622 = vmatmul.mubr.msk.f32.gmra.mrb[8].mxu0 %vm295_vm0, %v10883_v6  ;;  %9142 = vmatprep.mubr.msk.f32.mxu1 %vm295_vm0, %v196_v26  ;;  %v200_v6 = vld [vmem:[%s10575_s29 + $0x170] sm:$0xff]  ;;  %v7867_v26 = vld [vmem:[%s10575_s29 + $0x224] sm:$0xff] }
  0xec   : > { %9624 = vmatprep.mubr.msk.f32.mxu0 %vm295_vm0, %v10887_v9  ;;  %v201_v9 = vld [vmem:[%s10575_s29 + $0x178] sm:$0xff] }
  0xee   : > { %9143 = vmatmul.mubr.msk.f32.gmra.mrb[42].mxu1 %vm295_vm0, %v197_v0  ;;  %v11612_v0 = vld [vmem:[%s10575_s29 + $0xea] sm:$0xff] }
  0xef   : > { %9625 = vmatmul.mubr.msk.f32.gmra.mrb[10].mxu0 %vm295_vm0, %v10897_v12  ;;  %9145 = vmatprep.mubr.msk.f32.mxu1 %vm295_vm0, %v198_v2  ;;  %v202_v12 = vld [vmem:[%s10575_s29 + $0x180] sm:$0xff]  ;;  %v7868_v2 = vld [vmem:[%s10575_s29 + $0x22c] sm:$0xff] }
  0xf0   : > { %9627 = vmatprep.mubr.msk.f32.mxu0 %vm295_vm0, %v10901_v14  ;;  %v203_v14 = vld [vmem:[%s10575_s29 + $0x188] sm:$0xff] }
  0xf2   : > { %9146 = vmatmul.mubr.msk.f32.gmra.mrb[44].mxu1 %vm295_vm0, %v199_v4  ;;  %v11617_v4 = vld [vmem:[%s10575_s29 + $0xf2] sm:$0xff] }
  0xf3   : > { %9628 = vmatmul.mubr.msk.f32.gmra.mrb[12].mxu0 %vm295_vm0, %v10911_v16  ;;  %9148 = vmatprep.mubr.msk.f32.mxu1 %vm295_vm0, %v200_v6  ;;  %v204_v16 = vld [vmem:[%s10575_s29 + $0x190] sm:$0xff] }
  0xf4   : > { %9630 = vmatprep.mubr.msk.f32.mxu0 %vm295_vm0, %v10915_v19  ;;  %v205_v19 = vld [vmem:[%s10575_s29 + $0x198] sm:$0xff] }
  0xf5   : > { %v7869_v6 = vld [vmem:[%s10575_s29 + $0x234] sm:$0xff] }
  0xf6   : > { %9149 = vmatmul.mubr.msk.f32.gmra.mrb[46].mxu1 %vm295_vm0, %v201_v9  ;;  %v7870_v9 = vld [vmem:[%s10575_s29 + $0x23c] sm:$0xff] }
  0xf7   : > { %9631 = vmatmul.mubr.msk.f32.gmra.mrb[14].mxu0 %vm295_vm0, %v10925_v21  ;;  %9151 = vmatprep.mubr.msk.f32.mxu1 %vm295_vm0, %v202_v12  ;;  %v206_v21 = vld [vmem:[%s10575_s29 + $0x1a0] sm:$0xff] }
  0xf8   : > { %9633 = vmatprep.mubr.msk.f32.mxu0 %vm295_vm0, %v10929_v23  ;;  %v207_v23 = vld [vmem:[%s10575_s29 + $0x1a8] sm:$0xff] }
  0xf9   : > { %v11631_v12 = vld [vmem:[%s10575_s29 + $0x102] sm:$0xff] }
  0xfa   : > { %9152 = vmatmul.mubr.msk.f32.gmra.mrb[48].mxu1 %vm295_vm0, %v203_v14  ;;  %v7942_v14 = vld [vmem:[%s10575_s29 + $0x45] sm:$0xff] }
  0xfb   : > { %9634 = vmatmul.mubr.msk.f32.gmra.mrb[16].mxu0 %vm295_vm0, %v10939_v25  ;;  %9154 = vmatprep.mubr.msk.f32.mxu1 %vm295_vm0, %v204_v16  ;;  %v208_v25 = vld [vmem:[%s10575_s29 + $0x1b0] sm:$0xff] }
  0xfc   : > { %9636 = vmatprep.mubr.msk.f32.mxu0 %vm295_vm0, %v10943_v27  ;;  %v209_v27 = vld [vmem:[%s10575_s29 + $0x1b8] sm:$0xff]  ;;  %v8143_v16 = vld [vmem:[%s12547_s1 + $0x150] sm:$0xff] }
  0xfe   : > { %9155 = vmatmul.mubr.msk.f32.gmra.mrb[50].mxu1 %vm295_vm0, %v205_v19  ;;  %v8144_v19 = vld [vmem:[%s12547_s1 + $0x158] sm:$0xff] }
  0xff   : > { %9637 = vmatmul.mubr.msk.f32.gmra.mrb[18].mxu0 %vm295_vm0, %v10953_v29  ;;  %9157 = vmatprep.mubr.msk.f32.mxu1 %vm295_vm0, %v206_v21  ;;  %v210_v29 = vld [vmem:[%s10575_s29 + $0x1c0] sm:$0xff]  ;;  %v11646_v21 = vld [vmem:[%s10575_s29 + $0x10a] sm:$0xff] }
 0x100   : > { %9639 = vmatprep.mubr.msk.f32.mxu0 %vm295_vm0, %v10957_v31  ;;  %v211_v31 = vld [vmem:[%s10575_s29 + $0x1c8] sm:$0xff] }
 0x102   : > { %9158 = vmatmul.mubr.msk.f32.gmra.mrb[52].mxu1 %vm295_vm0, %v207_v23  ;;  %v7943_v23 = vld [vmem:[%s10575_s29 + $0x4d] sm:$0xff] }
 0x103   : > { %9640 = vmatmul.mubr.msk.f32.gmra.mrb[20].mxu0 %vm295_vm0, %v10967_v33  ;;  %9160 = vmatprep.mubr.msk.f32.mxu1 %vm295_vm0, %v208_v25  ;;  %v212_v33 = vld [vmem:[%s10575_s29 + $0x1d0] sm:$0xff] }
 0x104   : > { %9642 = vmatprep.mubr.msk.f32.mxu0 %vm295_vm0, %v10971_v35  ;;  %v213_v35 = vld [vmem:[%s10575_s29 + $0x1d8] sm:$0xff] }
 0x105   : > { %v11651_v25 = vld [vmem:[%s10575_s29 + $0x112] sm:$0xff] }
 0x106   : > { %9161 = vmatmul.mubr.msk.f32.gmra.mrb[54].mxu1 %vm295_vm0, %v209_v27  ;;  %v7944_v27 = vld [vmem:[%s10575_s29 + $0x55] sm:$0xff] }
 0x107   : > { %9643 = vmatmul.mubr.msk.f32.gmra.mrb[22].mxu0 %vm295_vm0, %v10981_v37  ;;  %9163 = vmatprep.mubr.msk.f32.mxu1 %vm295_vm0, %v210_v29  ;;  %v214_v37 = vld [vmem:[%s10575_s29 + $0x1e0] sm:$0xff]  ;;  %v9985_v29 = vpack.c.bf16 %v8144_v19, %v8143_v16 }
 0x108   : > { %9645 = vmatprep.mubr.msk.f32.mxu0 %vm295_vm0, %v10985_v39  ;;  %v215_v39 = vld [vmem:[%s10575_s29 + $0x1e8] sm:$0xff] }
 0x109   : > { %v11755_v16 = vld [vmem:[%s10575_s29 + $0x182] sm:$0xff] }
 0x10a   : > { %9164 = vmatmul.mubr.msk.f32.gmra.mrb[56].mxu1 %vm295_vm0, %v211_v31  ;;  %v11660_v31 = vld [vmem:[%s10575_s29 + $0x11a] sm:$0xff]  ;;  %v7958_v19 = vld [vmem:[%s10575_s29 + $0xc5] sm:$0xff] }
 0x10b   : > { %9646 = vmatmul.mubr.msk.f32.gmra.mrb[24].mxu0 %vm295_vm0, %v10995_v41  ;;  %9166 = vmatprep.mubr.msk.f32.mxu1 %vm295_vm0, %v212_v33  ;;  %v216_v41 = vld [vmem:[%s10575_s29 + $0x1f0] sm:$0xff]  ;;  %v7945_v33 = vld [vmem:[%s10575_s29 + $0x5d] sm:$0xff] }
 0x10c   : > { %9648 = vmatprep.mubr.msk.f32.mxu0 %vm295_vm0, %v10999_v43  ;;  %v217_v43 = vld [vmem:[%s10575_s29 + $0x1f8] sm:$0xff] }
 0x10e   : > { %9167 = vmatmul.mubr.msk.f32.gmra.mrb[58].mxu1 %vm295_vm0, %v213_v35  ;;  %v11666_v35 = vld [vmem:[%s10575_s29 + $0x122] sm:$0xff] }
 0x10f   : > { %9649 = vmatmul.mubr.msk.f32.gmra.mrb[26].mxu0 %vm295_vm0, %v11009_v45  ;;  %9169 = vmatprep.mubr.msk.f32.mxu1 %vm295_vm0, %v214_v37  ;;  %v7267_v45 = vld [vmem:[%s10575_s29 + $0x2] sm:$0xff] }
 0x110   : > { %9651 = vmatprep.mubr.msk.f32.mxu0 %vm295_vm0, %v11013_v47  ;;  %v7468_v47 = vld [vmem:[%s12547_s1 + $0x88] sm:$0xff] }
 0x111   : > { %v9945_v34 = vpack.c.bf16 %v7469_v8, %v7468_v47  ;;  %v7946_v37 = vld [vmem:[%s10575_s29 + $0x65] sm:$0xff]  ;;  %v11693_v47 = vld [vmem:[%s10575_s29 + $0x13a] sm:$0xff] }
 0x112   : > { %9170 = vmatmul.mubr.msk.f32.gmra.mrb[60].mxu1 %vm295_vm0, %v215_v39  ;;  %v8145_v39 = vld [vmem:[%s12547_s1 + $0x160] sm:$0xf] }
 0x113   : > { %9652 = vmatmul.mubr.msk.f32.gmra.mrb[28].mxu0 %vm295_vm0, %v11029_v52  ;;  %9172 = vmatprep.mubr.msk.f32.mxu1 %vm295_vm0, %v216_v41  ;;  %v7268_v52 = vld [vmem:[%s10575_s29 + $0xa] sm:$0xff]  ;;  %v7949_v8 = vld [vmem:[%s10575_s29 + $0x7d] sm:$0xff] }
 0x114   : > { %9654 = vmatprep.mubr.msk.f32.mxu0 %vm295_vm0, %v11033_v57  ;;  %v7269_v57 = vld [vmem:[%s10575_s29 + $0x12] sm:$0xff] }
 0x115   : > { %v7947_v41 = vld [vmem:[%s10575_s29 + $0x6d] sm:$0xff] }
 0x116   : > { %9173 = vmatmul.mubr.msk.f32.gmra.mrb[62].mxu1 %vm295_vm0, %v217_v43  ;;  %v11683_v43 = vld [vmem:[%s10575_s29 + $0x132] sm:$0xff] }
 0x117   : > { %9655 = vmatmul.mubr.msk.f32.gmra.mrb[30].mxu0 %vm295_vm0, %v11044_v63  ;;  %9185 = vmatprep.mubr.msk.f32.mxu1 %vm295_vm0, %v7267_v45  ;;  %v11429_v63 = vld [vmem:[%s10575_s29 + $0x22] sm:$0xff]  ;;  %v7948_v45 = vld [vmem:[%s10575_s29 + $0x75] sm:$0xff] }
 0x118   : > { %9657 = vmatprep.mubr.msk.f32.mxu0 %vm295_vm0, %v11048_v3  ;;  %v7470_v3 = vld [vmem:[%s12547_s1 + $0x98] sm:$0xf] }
 0x11a   : > { %9186 = vmatmul.mubr.msk.f32.vlgmr.msra.gmra.mrb[0].mxu1 %vm295_vm0, %v7268_v52  ;;  %v11698_v52 = vld [vmem:[%s10575_s29 + $0x142] sm:$0xff] }
 0x11b   : > { %9658 = vmatmul.mubr.msk.f32.gmra.mrb[32].mxu0 %vm295_vm0, %v11067_v13  ;;  %9944 = vmatpush3.bf16.msra.mxu1 %v11074_v20  ;;  %v11440_v13 = vld [vmem:[%s10575_s29 + $0x2a] sm:$0xff]  ;;  %v11455_v20 = vld [vmem:[%s10575_s29 + $0x3a] sm:$0xff] }
 0x11c   : > { %9188 = vmatprep.mubr.msk.f32.mxu1 %vm295_vm0, %v7269_v57  ;;  %9660 = vmatprep.mubr.msk.f32.mxu0 %vm295_vm0, %v11071_v18  ;;  %v11445_v18 = vld [vmem:[%s10575_s29 + $0x32] sm:$0xff]  ;;  %v7950_v57 = vld [vmem:[%s10575_s29 + $0x85] sm:$0xff] }
 0x11d   : > { %9946 = vmatprep.subr.bf16.mxu1 %v9945_v34 }
 0x11e   : > { %9189 = vmatmul.mubr.msk.f32.gmra.mrb[2].mxu1 %vm295_vm0, %v7270_v42  ;;  %v7951_v42 = vld [vmem:[%s10575_s29 + $0x8d] sm:$0xff] }
 0x11f   : > { %9661 = vmatmul.mubr.msk.f32.gmra.mrb[34].mxu0 %vm295_vm0, %v11084_v24  ;;  %9191 = vmatprep.mubr.msk.f32.mxu1 %vm295_vm0, %v11429_v63  ;;  %v11460_v24 = vld [vmem:[%s10575_s29 + $0x42] sm:$0xff] }
 0x120   : > { %9663 = vmatprep.mubr.msk.f32.mxu0 %vm295_vm0, %v11089_v28  ;;  %9948 = vmatpush3.bf16.msra.mxu1 %v9945_v34  ;;  %v11471_v28 = vld [vmem:[%s10575_s29 + $0x4a] sm:$0xff] }
 0x121   : > { %9289 = vmatprep.subr.msk.mxu1 %vm488_vm1, %v7470_v3  ;;  %v11708_v34 = vld [vmem:[%s10575_s29 + $0x14a] sm:$0xff] }
 0x122   : > { %9192 = vmatmul.mubr.msk.f32.gmra.mrb[4].mxu1 %vm295_vm0, %v11440_v13 }
 0x123   : > { %9664 = vmatmul.mubr.msk.f32.gmra.mrb[36].mxu0 %vm295_vm0, %v11100_v32  ;;  %9194 = vmatprep.mubr.msk.f32.mxu1 %vm295_vm0, %v11445_v18  ;;  %v11476_v32 = vld [vmem:[%s10575_s29 + $0x52] sm:$0xff] }
 0x124   : > { %9666 = vmatprep.mubr.msk.f32.mxu0 %vm295_vm0, %v11104_v36  ;;  %9290 = vmatpush3.msk.msra.mxu1 %vm488_vm1, %v7470_v3  ;;  %v11485_v36 = vld [vmem:[%s10575_s29 + $0x5a] sm:$0xff]  ;;  %v11713_v3 = vld [vmem:[%s10575_s29 + $0x152] sm:$0xff] }
 0x125   : > { %9989 = vmatprep.subr.bf16.mxu1 %v10577_v7 }
 0x126   : > { %9195 = vmatmul.mubr.msk.f32.gmra.mrb[6].mxu1 %vm295_vm0, %v11455_v20 }
 0x127   : > { %9667 = vmatmul.mubr.msk.f32.gmra.mrb[38].mxu0 %vm295_vm0, %v11114_v40  ;;  %9197 = vmatprep.mubr.msk.f32.mxu1 %vm295_vm0, %v11460_v24  ;;  %v11490_v40 = vld [vmem:[%s10575_s29 + $0x62] sm:$0xff] }
 0x128   : > { %9669 = vmatprep.mubr.msk.f32.mxu0 %vm295_vm0, %v11118_v44  ;;  %v11499_v44 = vld [vmem:[%s10575_s29 + $0x6a] sm:$0xff] }
 0x12a   : > { %9198 = vmatmul.mubr.msk.f32.gmra.mrb[8].mxu1 %vm295_vm0, %v11471_v28 }
 0x12b   : > { %9670 = vmatmul.mubr.msk.f32.gmra.mrb[40].mxu0 %vm295_vm0, %v11128_v49  ;;  %9200 = vmatprep.mubr.msk.f32.mxu1 %vm295_vm0, %v11476_v32  ;;  %v11504_v49 = vld [vmem:[%s10575_s29 + $0x72] sm:$0xff] }
 0x12c   : > { %9672 = vmatprep.mubr.msk.f32.mxu0 %vm295_vm0, %v11132_v51  ;;  %v11513_v51 = vld [vmem:[%s10575_s29 + $0x7a] sm:$0xff] }
 0x12e   : > { %9201 = vmatmul.mubr.msk.f32.gmra.mrb[10].mxu1 %vm295_vm0, %v11485_v36 }
 0x12f   : > { %9673 = vmatmul.mubr.msk.f32.gmra.mrb[42].mxu0 %vm295_vm0, %v11142_v59  ;;  %9203 = vmatprep.mubr.msk.f32.mxu1 %vm295_vm0, %v11490_v40  ;;  %v11518_v59 = vld [vmem:[%s10575_s29 + $0x82] sm:$0xff] }
 0x130   : > { %9675 = vmatprep.mubr.msk.f32.mxu0 %vm295_vm0, %v11146_v1  ;;  %v11527_v1 = vld [vmem:[%s10575_s29 + $0x8a] sm:$0xff] }
 0x132   : > { %9204 = vmatmul.mubr.msk.f32.gmra.mrb[12].mxu1 %vm295_vm0, %v11499_v44 }
 0x133   : > { %9676 = vmatmul.mubr.msk.f32.gmra.mrb[44].mxu0 %vm295_vm0, %v11156_v5  ;;  %9206 = vmatprep.mubr.msk.f32.mxu1 %vm295_vm0, %v11504_v49  ;;  %v11532_v5 = vld [vmem:[%s10575_s29 + $0x92] sm:$0xff] }
 0x134   : > { %9678 = vmatprep.mubr.msk.f32.mxu0 %vm295_vm0, %v11160_v10  ;;  %v11541_v10 = vld [vmem:[%s10575_s29 + $0x9a] sm:$0xff] }
 0x136   : > { %9207 = vmatmul.mubr.msk.f32.gmra.mrb[14].mxu1 %vm295_vm0, %v11513_v51 }
 0x137   : > { %9679 = vmatmul.mubr.msk.f32.gmra.mrb[46].mxu0 %vm295_vm0, %v11170_v22  ;;  %9209 = vmatprep.mubr.msk.f32.mxu1 %vm295_vm0, %v11518_v59  ;;  %v11546_v22 = vld [vmem:[%s10575_s29 + $0xa2] sm:$0xff] }
 0x138   : > { %9681 = vmatprep.mubr.msk.f32.mxu0 %vm295_vm0, %v11174_v30  ;;  %v11555_v30 = vld [vmem:[%s10575_s29 + $0xaa] sm:$0xff] }
 0x13a   : > { %9210 = vmatmul.mubr.msk.f32.gmra.mrb[16].mxu1 %vm295_vm0, %v11527_v1 }
 0x13b   : > { %9682 = vmatmul.mubr.msk.f32.gmra.mrb[48].mxu0 %vm295_vm0, %v11184_v38  ;;  %9212 = vmatprep.mubr.msk.f32.mxu1 %vm295_vm0, %v11532_v5  ;;  %v11560_v38 = vld [vmem:[%s10575_s29 + $0xb2] sm:$0xff] }
 0x13c   : > { %9684 = vmatprep.mubr.msk.f32.mxu0 %vm295_vm0, %v11188_v46  ;;  %v12567_v46 = vld [vmem:[#allocation3_spill] sm:$0xff] }
 0x13e   : > { %9213 = vmatmul.mubr.msk.f32.gmra.mrb[18].mxu1 %vm295_vm0, %v11541_v10 }
 0x13f   : > { %9685 = vmatmul.mubr.msk.f32.gmra.mrb[50].mxu0 %vm295_vm0, %v11198_v54  ;;  %9215 = vmatprep.mubr.msk.f32.mxu1 %vm295_vm0, %v11546_v22  ;;  %v11569_v54 = vld [vmem:[%s10575_s29 + $0xba] sm:$0xff] }
 0x140   : > { %9687 = vmatprep.mubr.msk.f32.mxu0 %vm295_vm0, %v11202_v17  ;;  %v11574_v17 = vld [vmem:[%s10575_s29 + $0xc2] sm:$0xff] }
 0x142   : > { %9216 = vmatmul.mubr.msk.f32.gmra.mrb[20].mxu1 %vm295_vm0, %v11555_v30 }
 0x143   : > { %9688 = vmatmul.mubr.msk.f32.gmra.mrb[52].mxu0 %vm295_vm0, %v12567_v46  ;;  %9218 = vmatprep.mubr.msk.f32.mxu1 %vm295_vm0, %v11560_v38  ;;  %v7952_v46 = vld [vmem:[%s10575_s29 + $0x95] sm:$0xff] }
 0x144   : > { %9690 = vmatprep.mubr.msk.f32.mxu0 %vm295_vm0, %v12568_v11  ;;  %v11722_v11 = vld [vmem:[%s10575_s29 + $0x15a] sm:$0xff] }
 0x146   : > { %9219 = vmatmul.mubr.msk.f32.gmra.mrb[22].mxu1 %vm295_vm0, %v11569_v54 }
 0x147   : > { %9691 = vmatmul.mubr.msk.f32.gmra.mrb[54].mxu0 %vm295_vm0, %v12569_v48  ;;  %9221 = vmatprep.mubr.msk.f32.mxu1 %vm295_vm0, %v11574_v17  ;;  %v7953_v48 = vld [vmem:[%s10575_s29 + $0x9d] sm:$0xff] }
 0x148   : > { %9693 = vmatprep.mubr.msk.f32.mxu0 %vm295_vm0, %v12570_v56  ;;  %v11727_v56 = vld [vmem:[%s10575_s29 + $0x162] sm:$0xff] }
 0x14a   : > { %9222 = vmatmul.mubr.msk.f32.gmra.mrb[24].mxu1 %vm295_vm0, %v11583_v53 }
 0x14b   : > { %9694 = vmatmul.mubr.msk.f32.gmra.mrb[56].mxu0 %vm295_vm0, %v12571_v15  ;;  %9224 = vmatprep.mubr.msk.f32.mxu1 %vm295_vm0, %v11588_v55  ;;  %v7954_v15 = vld [vmem:[%s10575_s29 + $0xa5] sm:$0xff] }
 0x14c   : > { %9696 = vmatprep.mubr.msk.f32.mxu0 %vm295_vm0, %v12572_v60  ;;  %v11736_v60 = vld [vmem:[%s10575_s29 + $0x16a] sm:$0xff] }
 0x14e   : > { %9225 = vmatmul.mubr.msk.f32.gmra.mrb[26].mxu1 %vm295_vm0, %v11597_v58 }
 0x14f   : > { %9697 = vmatmul.mubr.msk.f32.gmra.mrb[58].mxu0 %vm295_vm0, %v11254_v61  ;;  %9227 = vmatprep.mubr.msk.f32.mxu1 %vm295_vm0, %v11602_v62  ;;  %v11626_v61 = vld [vmem:[%s10575_s29 + $0xfa] sm:$0xff] }
 0x150   : > { %9699 = vmatprep.mubr.msk.f32.mxu0 %vm295_vm0, %v7867_v26  ;;  %v7955_v26 = vld [vmem:[%s10575_s29 + $0xad] sm:$0xff] }
 0x152   : > { %9228 = vmatmul.mubr.msk.f32.gmra.mrb[28].mxu1 %vm295_vm0, %v11612_v0 }
 0x153   : > { %9700 = vmatmul.mubr.msk.f32.gmra.mrb[60].mxu0 %vm295_vm0, %v7868_v2  ;;  %9230 = vmatprep.mubr.msk.f32.mxu1 %vm295_vm0, %v11617_v4  ;;  %v11741_v2 = vld [vmem:[%s10575_s29 + $0x172] sm:$0xff] }
 0x154   : > { %9702 = vmatprep.mubr.msk.f32.mxu0 %vm295_vm0, %v7869_v6  ;;  %v7956_v6 = vld [vmem:[%s10575_s29 + $0xb5] sm:$0xff] }
 0x156   : > { %9231 = vmatmul.mubr.msk.f32.gmra.mrb[30].mxu1 %vm295_vm0, %v11626_v61 }
 0x157   : > { %9703 = vmatmul.mubr.msk.f32.gmra.mrb[62].mxu0 %vm295_vm0, %v7870_v9  ;;  %9233 = vmatprep.mubr.msk.f32.mxu1 %vm295_vm0, %v11631_v12  ;;  %v11750_v9 = vld [vmem:[%s10575_s29 + $0x17a] sm:$0xff] }
 0x158   : > { %9715 = vmatprep.mubr.msk.f32.mxu0 %vm295_vm0, %v7942_v14  ;;  %v7957_v14 = vld [vmem:[%s10575_s29 + $0xbd] sm:$0xff] }
 0x15a   : > { %9234 = vmatmul.mubr.msk.f32.gmra.mrb[32].mxu1 %vm295_vm0, %v11646_v21 }
 0x15b   : > { %9716 = vmatmul.mubr.msk.f32.vlgmr.msra.gmra.mrb[0].mxu0 %vm295_vm0, %v7943_v23  ;;  %9236 = vmatprep.mubr.msk.f32.mxu1 %vm295_vm0, %v11651_v25  ;;  %v11764_v23 = vld [vmem:[%s10575_s29 + $0x18a] sm:$0xff] }
 0x15c   : > { %9984 = vmatpush3.bf16.msra.mxu0 %v11298_v50  ;;  %9718 = vmatprep.mubr.msk.f32.mxu0 %vm295_vm0, %v7944_v27  ;;  %v11678_v50 = vld [vmem:[%s10575_s29 + $0x12a] sm:$0xff] }
 0x15d   : > { %9986 = vmatprep.subr.bf16.mxu0 %v9985_v29  ;;  %v7959_v27 = vld [vmem:[%s10575_s29 + $0xcd] sm:$0xff] }
 0x15e   : > { %9237 = vmatmul.mubr.msk.f32.gmra.mrb[34].mxu1 %vm295_vm0, %v11660_v31 }
 0x15f   : > { %9719 = vmatmul.mubr.msk.f32.gmra.mrb[2].mxu0 %vm295_vm0, %v7945_v33  ;;  %9239 = vmatprep.mubr.msk.f32.mxu1 %vm295_vm0, %v11666_v35  ;;  %v7960_v33 = vld [vmem:[%s10575_s29 + $0xd5] sm:$0xff] }
 0x160   : > { %9721 = vmatprep.mubr.msk.f32.mxu0 %vm295_vm0, %v7946_v37  ;;  %9988 = vmatpush3.bf16.msra.mxu0 %v9985_v29  ;;  %v11769_v29 = vld [vmem:[%s10575_s29 + $0x192] sm:$0xff]  ;;  %v11778_v37 = vld [vmem:[%s10575_s29 + $0x19a] sm:$0xff] }
 0x161   : > { %9819 = vmatprep.subr.msk.mxu0 %vm488_vm1, %v8145_v39 }
 0x162   : > { %9240 = vmatmul.mubr.msk.f32.gmra.mrb[36].mxu1 %vm295_vm0, %v11678_v50 }
 0x163   : > { %9722 = vmatmul.mubr.msk.f32.gmra.mrb[4].mxu0 %vm295_vm0, %v7947_v41  ;;  %9242 = vmatprep.mubr.msk.f32.mxu1 %vm295_vm0, %v11683_v43  ;;  %v11783_v41 = vld [vmem:[%s10575_s29 + $0x1a2] sm:$0xff] }
 0x164   : > { %9724 = vmatprep.mubr.msk.f32.mxu0 %vm295_vm0, %v7948_v45  ;;  %9820 = vmatpush3.msk.msra.mxu0 %vm488_vm1, %v8145_v39  ;;  %v7961_v39 = vld [vmem:[%s10575_s29 + $0xdd] sm:$0xff]  ;;  %v7962_v45 = vld [vmem:[%s10575_s29 + $0xe5] sm:$0xff] }
 0x166   : > { %9243 = vmatmul.mubr.msk.f32.gmra.mrb[38].mxu1 %vm295_vm0, %v11693_v47 }
 0x167   : > { %9725 = vmatmul.mubr.msk.f32.gmra.mrb[6].mxu0 %vm295_vm0, %v7949_v8  ;;  %9245 = vmatprep.mubr.msk.f32.mxu1 %vm295_vm0, %v11698_v52  ;;  %v11792_v8 = vld [vmem:[%s10575_s29 + $0x1aa] sm:$0xff] }
 0x168   : > { %9727 = vmatprep.mubr.msk.f32.mxu0 %vm295_vm0, %v7950_v57  ;;  %v7963_v57 = vld [vmem:[%s10575_s29 + $0xed] sm:$0xff] }
 0x16a   : > { %9246 = vmatmul.mubr.msk.f32.gmra.mrb[40].mxu1 %vm295_vm0, %v11708_v34 }
 0x16b   : > { %9728 = vmatmul.mubr.msk.f32.gmra.mrb[8].mxu0 %vm295_vm0, %v7951_v42  ;;  %9248 = vmatprep.mubr.msk.f32.mxu1 %vm295_vm0, %v11713_v3  ;;  %v11797_v42 = vld [vmem:[%s10575_s29 + $0x1b2] sm:$0xff] }
 0x16c   : > { %9730 = vmatprep.mubr.msk.f32.mxu0 %vm295_vm0, %v7952_v46  ;;  %v7964_v46 = vld [vmem:[%s10575_s29 + $0xf5] sm:$0xff] }
 0x16e   : > { %9249 = vmatmul.mubr.msk.f32.gmra.mrb[42].mxu1 %vm295_vm0, %v11722_v11 }
 0x16f   : > { %9731 = vmatmul.mubr.msk.f32.gmra.mrb[10].mxu0 %vm295_vm0, %v7953_v48  ;;  %9251 = vmatprep.mubr.msk.f32.mxu1 %vm295_vm0, %v11727_v56  ;;  %v11806_v48 = vld [vmem:[%s10575_s29 + $0x1ba] sm:$0xff] }
 0x170   : > { %9733 = vmatprep.mubr.msk.f32.mxu0 %vm295_vm0, %v7954_v15  ;;  %v7965_v15 = vld [vmem:[%s10575_s29 + $0xfd] sm:$0xff] }
 0x172   : > { %9252 = vmatmul.mubr.msk.f32.gmra.mrb[44].mxu1 %vm295_vm0, %v11736_v60 }
 0x173   : > { %9734 = vmatmul.mubr.msk.f32.gmra.mrb[12].mxu0 %vm295_vm0, %v7955_v26  ;;  %9254 = vmatprep.mubr.msk.f32.mxu1 %vm295_vm0, %v11741_v2  ;;  %v11811_v26 = vld [vmem:[%s10575_s29 + $0x1c2] sm:$0xff] }
 0x174   : > { %9736 = vmatprep.mubr.msk.f32.mxu0 %vm295_vm0, %v7956_v6  ;;  %v7966_v6 = vld [vmem:[%s10575_s29 + $0x105] sm:$0xff] }
 0x176   : > { %9255 = vmatmul.mubr.msk.f32.gmra.mrb[46].mxu1 %vm295_vm0, %v11750_v9 }
 0x177   : > { %9737 = vmatmul.mubr.msk.f32.gmra.mrb[14].mxu0 %vm295_vm0, %v7957_v14  ;;  %9257 = vmatprep.mubr.msk.f32.mxu1 %vm295_vm0, %v11755_v16  ;;  %v11820_v14 = vld [vmem:[%s10575_s29 + $0x1ca] sm:$0xff] }
 0x178   : > { %9739 = vmatprep.mubr.msk.f32.mxu0 %vm295_vm0, %v7958_v19  ;;  %v7967_v19 = vld [vmem:[%s10575_s29 + $0x10d] sm:$0xff] }
 0x17a   : > { %9258 = vmatmul.mubr.msk.f32.gmra.mrb[48].mxu1 %vm295_vm0, %v11764_v23 }
 0x17b   : > { %9740 = vmatmul.mubr.msk.f32.gmra.mrb[16].mxu0 %vm295_vm0, %v7959_v27  ;;  %9260 = vmatprep.mubr.msk.f32.mxu1 %vm295_vm0, %v11769_v29  ;;  %v11825_v27 = vld [vmem:[%s10575_s29 + $0x1d2] sm:$0xff] }
 0x17c   : > { %9742 = vmatprep.mubr.msk.f32.mxu0 %vm295_vm0, %v7960_v33  ;;  %v7968_v33 = vld [vmem:[%s10575_s29 + $0x115] sm:$0xff] }
 0x17e   : > { %9261 = vmatmul.mubr.msk.f32.gmra.mrb[50].mxu1 %vm295_vm0, %v11778_v37 }
 0x17f   : > { %9743 = vmatmul.mubr.msk.f32.gmra.mrb[18].mxu0 %vm295_vm0, %v7961_v39  ;;  %9263 = vmatprep.mubr.msk.f32.mxu1 %vm295_vm0, %v11783_v41  ;;  %v11834_v39 = vld [vmem:[%s10575_s29 + $0x1da] sm:$0xff] }
 0x180   : > { %9745 = vmatprep.mubr.msk.f32.mxu0 %vm295_vm0, %v7962_v45  ;;  %v7969_v45 = vld [vmem:[%s10575_s29 + $0x11d] sm:$0xff] }
 0x182   : > { %9264 = vmatmul.mubr.msk.f32.gmra.mrb[52].mxu1 %vm295_vm0, %v11792_v8 }
 0x183   : > { %9746 = vmatmul.mubr.msk.f32.gmra.mrb[20].mxu0 %vm295_vm0, %v7963_v57  ;;  %9266 = vmatprep.mubr.msk.f32.mxu1 %vm295_vm0, %v11797_v42  ;;  %v11839_v57 = vld [vmem:[%s10575_s29 + $0x1e2] sm:$0xff] }
 0x184   : > { %9748 = vmatprep.mubr.msk.f32.mxu0 %vm295_vm0, %v7964_v46  ;;  %12573 = vst [vmem:[#allocation3_spill] sm:$0xff] %v11839_v57  ;;  %v7970_v46 = vld [vmem:[%s10575_s29 + $0x125] sm:$0xff] }
 0x186   : > { %9267 = vmatmul.mubr.msk.f32.gmra.mrb[54].mxu1 %vm295_vm0, %v11806_v48 }
 0x187   : > { %9749 = vmatmul.mubr.msk.f32.gmra.mrb[22].mxu0 %vm295_vm0, %v7965_v15  ;;  %9269 = vmatprep.mubr.msk.f32.mxu1 %vm295_vm0, %v11811_v26  ;;  %v11848_v15 = vld [vmem:[%s10575_s29 + $0x1ea] sm:$0xff] }
 0x188   : > { %9751 = vmatprep.mubr.msk.f32.mxu0 %vm295_vm0, %v7966_v6  ;;  %v7971_v6 = vld [vmem:[%s10575_s29 + $0x12d] sm:$0xff] }
 0x18a   : > { %9270 = vmatmul.mubr.msk.f32.gmra.mrb[56].mxu1 %vm295_vm0, %v11820_v14 }
 0x18b   : > { %9752 = vmatmul.mubr.msk.f32.gmra.mrb[24].mxu0 %vm295_vm0, %v7967_v19  ;;  %9272 = vmatprep.mubr.msk.f32.mxu1 %vm295_vm0, %v11825_v27  ;;  %v11853_v19 = vld [vmem:[%s10575_s29 + $0x1f2] sm:$0xff] }
 0x18c   : > { %9754 = vmatprep.mubr.msk.f32.mxu0 %vm295_vm0, %v7968_v33  ;;  %12574 = vst [vmem:[#allocation4_spill] sm:$0xff] %v11853_v19  ;;  %v7972_v33 = vld [vmem:[%s10575_s29 + $0x135] sm:$0xff] }
 0x18e   : > { %9273 = vmatmul.mubr.msk.f32.gmra.mrb[58].mxu1 %vm295_vm0, %v11834_v39 }
 0x18f   : > { %9755 = vmatmul.mubr.msk.f32.gmra.mrb[26].mxu0 %vm295_vm0, %v7969_v45  ;;  %9275 = vmatprep.mubr.msk.f32.mxu1 %vm295_vm0, %v11839_v57  ;;  %v11862_v45 = vld [vmem:[%s10575_s29 + $0x1fa] sm:$0xff]  ;;  %v7974_v57 = vld [vmem:[%s10575_s29 + $0x145] sm:$0xff] }
 0x190   : > { %9757 = vmatprep.mubr.msk.f32.mxu0 %vm295_vm0, %v7970_v46  ;;  %v7973_v46 = vld [vmem:[%s10575_s29 + $0x13d] sm:$0xff] }
 0x192   : > { %9276 = vmatmul.mubr.msk.f32.gmra.mrb[60].mxu1 %vm295_vm0, %v11848_v15 }
 0x193   : > { %9758 = vmatmul.mubr.msk.f32.gmra.mrb[28].mxu0 %vm295_vm0, %v7971_v6  ;;  %9278 = vmatprep.mubr.msk.f32.mxu1 %vm295_vm0, %v11853_v19  ;;  %v7975_v6 = vld [vmem:[%s10575_s29 + $0x14d] sm:$0xff]  ;;  %v7976_v19 = vld [vmem:[%s10575_s29 + $0x155] sm:$0xff] }
 0x194   : > { %9760 = vmatprep.mubr.msk.f32.mxu0 %vm295_vm0, %v7972_v33  ;;  %v7977_v33 = vld [vmem:[%s10575_s29 + $0x15d] sm:$0xff] }
 0x196   : > { %9279 = vmatmul.mubr.msk.f32.gmra.mrb[62].mxu1 %vm295_vm0, %v11862_v45 }
 0x197   : > { %9761 = vmatmul.mubr.msk.f32.gmra.mrb[30].mxu0 %vm295_vm0, %v7973_v46  ;;  %9291 = vmatprep.mubr.msk.f32.mxu1 %vm295_vm0, %v11429_v63  ;;  %v7978_v63 = vld [vmem:[%s10575_s29 + $0x165] sm:$0xff] }
 0x198   : > { %9763 = vmatprep.mubr.msk.f32.mxu0 %vm295_vm0, %v7974_v57  ;;  %v12575_v46 = vld [vmem:[#allocation2_spill] sm:$0xff] }
 0x199   : > { %v7986_v57 = vld [vmem:[%s10575_s29 + $0x1a5] sm:$0xff] }
 0x19a   : > { %9292 = vmatmul.mubr.msk.f32.vlgmr.msra.gmra.mrb[0].mxu1 %vm295_vm0, %v11440_v13  ;;  %v7980_v13 = vld [vmem:[%s10575_s29 + $0x175] sm:$0xff] }
 0x19b   : > { %9764 = vmatmul.mubr.msk.f32.gmra.mrb[32].mxu0 %vm295_vm0, %v7975_v6  ;;  %9992 = vmatpush3.bf16.msra.mxu1 %v10577_v7  ;;  %v7979_v7 = vld [vmem:[%s10575_s29 + $0x16d] sm:$0xff]  ;;  %v7462_v6 = vld [vmem:[%s10575_s29 + $0x202] sm:$0xff] }
 0x19c   : > { %9294 = vmatprep.mubr.msk.f32.mxu1 %vm295_vm0, %v11445_v18  ;;  %9766 = vmatprep.mubr.msk.f32.mxu0 %vm295_vm0, %v7976_v19  ;;  %v10515_v18 = vld [vmem:[%s12547_s1 + $0xc0] sm:$0xf]  ;;  %v12577_v19 = vld [vmem:[#allocation4_spill] sm:$0xff] }
 0x19d   : > { %9990 = vmatprep.subr.bf16.mxu1 %v12575_v46 }
 0x19e   : > { %9295 = vmatmul.mubr.msk.f32.gmra.mrb[2].mxu1 %vm295_vm0, %v11455_v20  ;;  %v7981_v20 = vld [vmem:[%s10575_s29 + $0x17d] sm:$0xff] }
 0x19f   : > { %9767 = vmatmul.mubr.msk.f32.gmra.mrb[34].mxu0 %vm295_vm0, %v7977_v33  ;;  %9297 = vmatprep.mubr.msk.f32.mxu1 %vm295_vm0, %v11460_v24  ;;  %v7982_v24 = vld [vmem:[%s10575_s29 + $0x185] sm:$0xff] }
 0x1a0   : > { %9769 = vmatprep.mubr.msk.f32.mxu0 %vm295_vm0, %v7978_v63  ;;  %9993 = vmatpush3.bf16.msra.mxu1 %v12575_v46  ;;  %v8105_v33 = vld [vmem:[%s10575_s29 + $0x126] sm:$0xff]  ;;  %v8106_v63 = vld [vmem:[%s10575_s29 + $0x12e] sm:$0xff] }
 0x1a1   : > { %9991 = vmatprep.subr.msk.mxu1 %vm488_vm1, %v10515_v18  ;;  %v7464_v46 = vld [vmem:[%s10575_s29 + $0x212] sm:$0xff] }
 0x1a2   : > { %9298 = vmatmul.mubr.msk.f32.gmra.mrb[4].mxu1 %vm295_vm0, %v11471_v28  ;;  %v7983_v28 = vld [vmem:[%s10575_s29 + $0x18d] sm:$0xff] }
 0x1a3   : > { %9770 = vmatmul.mubr.msk.f32.gmra.mrb[36].mxu0 %vm295_vm0, %v7979_v7  ;;  %9300 = vmatprep.mubr.msk.f32.mxu1 %vm295_vm0, %v11476_v32  ;;  %v7984_v32 = vld [vmem:[%s10575_s29 + $0x195] sm:$0xff] }
 0x1a4   : > { %9772 = vmatprep.mubr.msk.f32.mxu0 %vm295_vm0, %v7980_v13  ;;  %9994 = vmatpush3.msk.msra.mxu1 %vm488_vm1, %v10515_v18  ;;  %v8107_v7 = vld [vmem:[%s10575_s29 + $0x136] sm:$0xff]  ;;  %v8108_v13 = vld [vmem:[%s10575_s29 + $0x13e] sm:$0xff] }
 0x1a5   : > { %v7569_v18 = vld [vmem:[%s10575_s29 + $0x123] sm:$0xff] }
 0x1a6   : > { %9301 = vmatmul.mubr.msk.f32.gmra.mrb[6].mxu1 %vm295_vm0, %v11485_v36  ;;  %v7985_v36 = vld [vmem:[%s10575_s29 + $0x19d] sm:$0xff] }
 0x1a7   : > { %9773 = vmatmul.mubr.msk.f32.gmra.mrb[38].mxu0 %vm295_vm0, %v7981_v20  ;;  %9303 = vmatprep.mubr.msk.f32.mxu1 %vm295_vm0, %v11490_v40  ;;  %v7987_v40 = vld [vmem:[%s10575_s29 + $0x1ad] sm:$0xff] }
 0x1a8   : > { %9775 = vmatprep.mubr.msk.f32.mxu0 %vm295_vm0, %v7982_v24  ;;  %v8109_v20 = vld [vmem:[%s10575_s29 + $0x146] sm:$0xff] }
 0x1a9   : > { %v7570_v24 = vld [vmem:[%s10575_s29 + $0x12b] sm:$0xff] }
 0x1aa   : > { %9304 = vmatmul.mubr.msk.f32.gmra.mrb[8].mxu1 %vm295_vm0, %v11499_v44  ;;  %v7988_v44 = vld [vmem:[%s10575_s29 + $0x1b5] sm:$0xff] }
 0x1ab   : > { %9776 = vmatmul.mubr.msk.f32.gmra.mrb[40].mxu0 %vm295_vm0, %v7983_v28  ;;  %9306 = vmatprep.mubr.msk.f32.mxu1 %vm295_vm0, %v11504_v49  ;;  %v7989_v49 = vld [vmem:[%s10575_s29 + $0x1bd] sm:$0xff]  ;;  %v8110_v28 = vld [vmem:[%s10575_s29 + $0x14e] sm:$0xff] }
 0x1ac   : > { %9778 = vmatprep.mubr.msk.f32.mxu0 %vm295_vm0, %v7984_v32  ;;  %v7571_v32 = vld [vmem:[%s10575_s29 + $0x133] sm:$0xff] }
 0x1ae   : > { %9307 = vmatmul.mubr.msk.f32.gmra.mrb[10].mxu1 %vm295_vm0, %v11513_v51  ;;  %v7990_v51 = vld [vmem:[%s10575_s29 + $0x1c5] sm:$0xff] }
 0x1af   : > { %9779 = vmatmul.mubr.msk.f32.gmra.mrb[42].mxu0 %vm295_vm0, %v7985_v36  ;;  %9309 = vmatprep.mubr.msk.f32.mxu1 %vm295_vm0, %v11518_v59  ;;  %v7991_v59 = vld [vmem:[%s10575_s29 + $0x1cd] sm:$0xff]  ;;  %v8111_v36 = vld [vmem:[%s10575_s29 + $0x156] sm:$0xff] }
 0x1b0   : > { %9781 = vmatprep.mubr.msk.f32.mxu0 %vm295_vm0, %v7986_v57  ;;  %v7572_v57 = vld [vmem:[%s10575_s29 + $0x13b] sm:$0xff] }
 0x1b2   : > { %9310 = vmatmul.mubr.msk.f32.gmra.mrb[12].mxu1 %vm295_vm0, %v11527_v1  ;;  %v7992_v1 = vld [vmem:[%s10575_s29 + $0x1d5] sm:$0xff] }
 0x1b3   : > { %9782 = vmatmul.mubr.msk.f32.gmra.mrb[44].mxu0 %vm295_vm0, %v7987_v40  ;;  %9312 = vmatprep.mubr.msk.f32.mxu1 %vm295_vm0, %v11532_v5  ;;  %v7993_v5 = vld [vmem:[%s10575_s29 + $0x1dd] sm:$0xff] }
 0x1b4   : > { %9784 = vmatprep.mubr.msk.f32.mxu0 %vm295_vm0, %v7988_v44  ;;  %v8112_v40 = vld [vmem:[%s10575_s29 + $0x15e] sm:$0xff] }
 0x1b5   : > { %v7573_v44 = vld [vmem:[%s10575_s29 + $0x143] sm:$0xff] }
 0x1b6   : > { %9313 = vmatmul.mubr.msk.f32.gmra.mrb[14].mxu1 %vm295_vm0, %v11541_v10  ;;  %v7994_v10 = vld [vmem:[%s10575_s29 + $0x1e5] sm:$0xff] }
 0x1b7   : > { %9785 = vmatmul.mubr.msk.f32.gmra.mrb[46].mxu0 %vm295_vm0, %v7989_v49  ;;  %9315 = vmatprep.mubr.msk.f32.mxu1 %vm295_vm0, %v11546_v22  ;;  %v7995_v22 = vld [vmem:[%s10575_s29 + $0x1ed] sm:$0xff] }
 0x1b8   : > { %9787 = vmatprep.mubr.msk.f32.mxu0 %vm295_vm0, %v7990_v51  ;;  %v8113_v49 = vld [vmem:[%s10575_s29 + $0x166] sm:$0xff] }
 0x1b9   : > { %v7574_v51 = vld [vmem:[%s10575_s29 + $0x14b] sm:$0xff] }
 0x1ba   : > { %9316 = vmatmul.mubr.msk.f32.gmra.mrb[16].mxu1 %vm295_vm0, %v11555_v30  ;;  %v7996_v30 = vld [vmem:[%s10575_s29 + $0x1f5] sm:$0xff] }
 0x1bb   : > { %9788 = vmatmul.mubr.msk.f32.gmra.mrb[48].mxu0 %vm295_vm0, %v7991_v59  ;;  %9318 = vmatprep.mubr.msk.f32.mxu1 %vm295_vm0, %v11560_v38  ;;  %v7997_v38 = vld [vmem:[%s10575_s29 + $0x1fd] sm:$0xff]  ;;  %v8114_v59 = vld [vmem:[%s10575_s29 + $0x16e] sm:$0xff] }
 0x1bc   : > { %9790 = vmatprep.mubr.msk.f32.mxu0 %vm295_vm0, %v7992_v1  ;;  %v7575_v1 = vld [vmem:[%s10575_s29 + $0x153] sm:$0xff] }
 0x1be   : > { %9319 = vmatmul.mubr.msk.f32.gmra.mrb[18].mxu1 %vm295_vm0, %v11569_v54  ;;  %v7998_v54 = vld [vmem:[%s10575_s29 + $0x205] sm:$0xff] }
 0x1bf   : > { %9791 = vmatmul.mubr.msk.f32.gmra.mrb[50].mxu0 %vm295_vm0, %v7993_v5  ;;  %9321 = vmatprep.mubr.msk.f32.mxu1 %vm295_vm0, %v11574_v17  ;;  %v7999_v17 = vld [vmem:[%s10575_s29 + $0x20d] sm:$0xff]  ;;  %v8115_v5 = vld [vmem:[%s10575_s29 + $0x176] sm:$0xff] }
 0x1c0   : > { %9793 = vmatprep.mubr.msk.f32.mxu0 %vm295_vm0, %v7994_v10  ;;  %v7576_v10 = vld [vmem:[%s10575_s29 + $0x15b] sm:$0xff] }
 0x1c2   : > { %9322 = vmatmul.mubr.msk.f32.gmra.mrb[20].mxu1 %vm295_vm0, %v11583_v53  ;;  %v8000_v53 = vld [vmem:[%s10575_s29 + $0x215] sm:$0xff] }
 0x1c3   : > { %9794 = vmatmul.mubr.msk.f32.gmra.mrb[52].mxu0 %vm295_vm0, %v7995_v22  ;;  %9324 = vmatprep.mubr.msk.f32.mxu1 %vm295_vm0, %v11588_v55  ;;  %v8001_v55 = vld [vmem:[%s10575_s29 + $0x21d] sm:$0xff] }
 0x1c4   : > { %9796 = vmatprep.mubr.msk.f32.mxu0 %vm295_vm0, %v7996_v30  ;;  %v8116_v22 = vld [vmem:[%s10575_s29 + $0x17e] sm:$0xff] }
 0x1c5   : > { %v7577_v30 = vld [vmem:[%s10575_s29 + $0x163] sm:$0xff] }
 0x1c6   : > { %9325 = vmatmul.mubr.msk.f32.gmra.mrb[22].mxu1 %vm295_vm0, %v11597_v58  ;;  %v8002_v58 = vld [vmem:[%s10575_s29 + $0x225] sm:$0xff] }
 0x1c7   : > { %9797 = vmatmul.mubr.msk.f32.gmra.mrb[54].mxu0 %vm295_vm0, %v7997_v38  ;;  %9327 = vmatprep.mubr.msk.f32.mxu1 %vm295_vm0, %v11602_v62  ;;  %v8003_v62 = vld [vmem:[%s10575_s29 + $0x22d] sm:$0xff] }
 0x1c8   : > { %9799 = vmatprep.mubr.msk.f32.mxu0 %vm295_vm0, %v7998_v54  ;;  %v8117_v38 = vld [vmem:[%s10575_s29 + $0x186] sm:$0xff] }
 0x1c9   : > { %v7578_v54 = vld [vmem:[%s10575_s29 + $0x16b] sm:$0xff] }
 0x1ca   : > { %9328 = vmatmul.mubr.msk.f32.gmra.mrb[24].mxu1 %vm295_vm0, %v11612_v0  ;;  %v8004_v0 = vld [vmem:[%s10575_s29 + $0x235] sm:$0xff] }
 0x1cb   : > { %9800 = vmatmul.mubr.msk.f32.gmra.mrb[56].mxu0 %vm295_vm0, %v7999_v17  ;;  %9330 = vmatprep.mubr.msk.f32.mxu1 %vm295_vm0, %v11617_v4  ;;  %v8005_v4 = vld [vmem:[%s10575_s29 + $0x23d] sm:$0xff]  ;;  %v8118_v17 = vld [vmem:[%s10575_s29 + $0x18e] sm:$0xff] }
 0x1cc   : > { %9802 = vmatprep.mubr.msk.f32.mxu0 %vm295_vm0, %v8000_v53  ;;  %v7579_v53 = vld [vmem:[%s10575_s29 + $0x173] sm:$0xff] }
 0x1ce   : > { %9331 = vmatmul.mubr.msk.f32.gmra.mrb[26].mxu1 %vm295_vm0, %v11626_v61  ;;  %v8077_v61 = vld [vmem:[%s10575_s29 + $0x46] sm:$0xff] }
 0x1cf   : > { %9803 = vmatmul.mubr.msk.f32.gmra.mrb[58].mxu0 %vm295_vm0, %v8001_v55  ;;  %9333 = vmatprep.mubr.msk.f32.mxu1 %vm295_vm0, %v11631_v12  ;;  %v8078_v12 = vld [vmem:[%s10575_s29 + $0x4e] sm:$0xff]  ;;  %v8119_v55 = vld [vmem:[%s10575_s29 + $0x196] sm:$0xff] }
 0x1d0   : > { %9805 = vmatprep.mubr.msk.f32.mxu0 %vm295_vm0, %v8002_v58  ;;  %v7580_v58 = vld [vmem:[%s10575_s29 + $0x17b] sm:$0xff] }
 0x1d2   : > { %9334 = vmatmul.mubr.msk.f32.gmra.mrb[28].mxu1 %vm295_vm0, %v11646_v21  ;;  %v8079_v21 = vld [vmem:[%s10575_s29 + $0x56] sm:$0xff] }
 0x1d3   : > { %9806 = vmatmul.mubr.msk.f32.gmra.mrb[60].mxu0 %vm295_vm0, %v8003_v62  ;;  %9336 = vmatprep.mubr.msk.f32.mxu1 %vm295_vm0, %v11651_v25  ;;  %v8080_v25 = vld [vmem:[%s10575_s29 + $0x5e] sm:$0xff] }
 0x1d4   : > { %9808 = vmatprep.mubr.msk.f32.mxu0 %vm295_vm0, %v8004_v0  ;;  %v8120_v62 = vld [vmem:[%s10575_s29 + $0x19e] sm:$0xff] }
 0x1d5   : > { %v7581_v0 = vld [vmem:[%s10575_s29 + $0x183] sm:$0xff] }
 0x1d6   : > { %9337 = vmatmul.mubr.msk.f32.gmra.mrb[30].mxu1 %vm295_vm0, %v11660_v31  ;;  %v8081_v31 = vld [vmem:[%s10575_s29 + $0x66] sm:$0xff] }
 0x1d7   : > { %9809 = vmatmul.mubr.msk.f32.gmra.mrb[62].mxu0 %vm295_vm0, %v8005_v4  ;;  %9339 = vmatprep.mubr.msk.f32.mxu1 %vm295_vm0, %v11666_v35  ;;  %v8082_v35 = vld [vmem:[%s10575_s29 + $0x6e] sm:$0xff]  ;;  %v8121_v4 = vld [vmem:[%s10575_s29 + $0x1a6] sm:$0xff] }
 0x1d8   : > { %9821 = vmatprep.mubr.msk.f32.mxu0 %vm295_vm0, %v8077_v61  ;;  %v7582_v61 = vld [vmem:[%s10575_s29 + $0x18b] sm:$0xff] }
 0x1da   : > { %9340 = vmatmul.mubr.msk.f32.gmra.mrb[32].mxu1 %vm295_vm0, %v11678_v50  ;;  %v8083_v50 = vld [vmem:[%s10575_s29 + $0x76] sm:$0xff] }
 0x1db   : > { %9822 = vmatmul.mubr.msk.f32.vlgmr.msra.gmra.mrb[0].mxu0 %vm295_vm0, %v8078_v12  ;;  %9342 = vmatprep.mubr.msk.f32.mxu1 %vm295_vm0, %v11683_v43  ;;  %v8084_v43 = vld [vmem:[%s10575_s29 + $0x7e] sm:$0xff]  ;;  %v8122_v12 = vld [vmem:[%s10575_s29 + $0x1ae] sm:$0xff] }
 0x1dc   : > { %9824 = vmatprep.mubr.msk.f32.mxu0 %vm295_vm0, %v8079_v21  ;;  %v7583_v21 = vld [vmem:[%s10575_s29 + $0x193] sm:$0xff] }
 0x1de   : > { %9343 = vmatmul.mubr.msk.f32.gmra.mrb[34].mxu1 %vm295_vm0, %v11693_v47  ;;  %v8085_v47 = vld [vmem:[%s10575_s29 + $0x86] sm:$0xff] }
 0x1df   : > { %9825 = vmatmul.mubr.msk.f32.gmra.mrb[2].mxu0 %vm295_vm0, %v8080_v25  ;;  %9345 = vmatprep.mubr.msk.f32.mxu1 %vm295_vm0, %v11698_v52  ;;  %v8086_v52 = vld [vmem:[%s10575_s29 + $0x8e] sm:$0xff]  ;;  %v8123_v25 = vld [vmem:[%s10575_s29 + $0x1b6] sm:$0xff] }
 0x1e0   : > { %9827 = vmatprep.mubr.msk.f32.mxu0 %vm295_vm0, %v8081_v31  ;;  %v7584_v31 = vld [vmem:[%s10575_s29 + $0x19b] sm:$0xff] }
 0x1e2   : > { %9346 = vmatmul.mubr.msk.f32.gmra.mrb[36].mxu1 %vm295_vm0, %v11708_v34  ;;  %v8087_v34 = vld [vmem:[%s10575_s29 + $0x96] sm:$0xff] }
 0x1e3   : > { %9828 = vmatmul.mubr.msk.f32.gmra.mrb[4].mxu0 %vm295_vm0, %v8082_v35  ;;  %9348 = vmatprep.mubr.msk.f32.mxu1 %vm295_vm0, %v11713_v3  ;;  %v8088_v3 = vld [vmem:[%s10575_s29 + $0x9e] sm:$0xff] }
 0x1e4   : > { %9830 = vmatprep.mubr.msk.f32.mxu0 %vm295_vm0, %v8083_v50  ;;  %v8124_v35 = vld [vmem:[%s10575_s29 + $0x1be] sm:$0xff] }
 0x1e5   : > { %v7585_v50 = vld [vmem:[%s10575_s29 + $0x1a3] sm:$0xff] }
 0x1e6   : > { %9349 = vmatmul.mubr.msk.f32.gmra.mrb[38].mxu1 %vm295_vm0, %v11722_v11  ;;  %v8089_v11 = vld [vmem:[%s10575_s29 + $0xa6] sm:$0xff] }
 0x1e7   : > { %9831 = vmatmul.mubr.msk.f32.gmra.mrb[6].mxu0 %vm295_vm0, %v8084_v43  ;;  %9351 = vmatprep.mubr.msk.f32.mxu1 %vm295_vm0, %v11727_v56  ;;  %v8090_v56 = vld [vmem:[%s10575_s29 + $0xae] sm:$0xff]  ;;  %v8125_v43 = vld [vmem:[%s10575_s29 + $0x1c6] sm:$0xff] }
 0x1e8   : > { %9833 = vmatprep.mubr.msk.f32.mxu0 %vm295_vm0, %v8085_v47  ;;  %v7586_v47 = vld [vmem:[%s10575_s29 + $0x1ab] sm:$0xff] }
 0x1ea   : > { %9352 = vmatmul.mubr.msk.f32.gmra.mrb[40].mxu1 %vm295_vm0, %v11736_v60  ;;  %v8091_v60 = vld [vmem:[%s10575_s29 + $0xb6] sm:$0xff] }
 0x1eb   : > { %9834 = vmatmul.mubr.msk.f32.gmra.mrb[8].mxu0 %vm295_vm0, %v8086_v52  ;;  %9354 = vmatprep.mubr.msk.f32.mxu1 %vm295_vm0, %v11741_v2  ;;  %v8092_v2 = vld [vmem:[%s10575_s29 + $0xbe] sm:$0xff]  ;;  %v8126_v52 = vld [vmem:[%s10575_s29 + $0x1ce] sm:$0xff] }
 0x1ec   : > { %9836 = vmatprep.mubr.msk.f32.mxu0 %vm295_vm0, %v8087_v34  ;;  %v7587_v34 = vld [vmem:[%s10575_s29 + $0x1b3] sm:$0xff] }
 0x1ee   : > { %9355 = vmatmul.mubr.msk.f32.gmra.mrb[42].mxu1 %vm295_vm0, %v11750_v9  ;;  %v8093_v9 = vld [vmem:[%s10575_s29 + $0xc6] sm:$0xff] }
 0x1ef   : > { %9837 = vmatmul.mubr.msk.f32.gmra.mrb[10].mxu0 %vm295_vm0, %v8088_v3  ;;  %9357 = vmatprep.mubr.msk.f32.mxu1 %vm295_vm0, %v11755_v16  ;;  %v8094_v16 = vld [vmem:[%s10575_s29 + $0xce] sm:$0xff]  ;;  %v8127_v3 = vld [vmem:[%s10575_s29 + $0x1d6] sm:$0xff] }
 0x1f0   : > { %9839 = vmatprep.mubr.msk.f32.mxu0 %vm295_vm0, %v8089_v11  ;;  %v7588_v11 = vld [vmem:[%s10575_s29 + $0x1bb] sm:$0xff] }
 0x1f2   : > { %9358 = vmatmul.mubr.msk.f32.gmra.mrb[44].mxu1 %vm295_vm0, %v11764_v23  ;;  %v8095_v23 = vld [vmem:[%s10575_s29 + $0xd6] sm:$0xff] }
 0x1f3   : > { %9840 = vmatmul.mubr.msk.f32.gmra.mrb[12].mxu0 %vm295_vm0, %v8090_v56  ;;  %9360 = vmatprep.mubr.msk.f32.mxu1 %vm295_vm0, %v11769_v29  ;;  %v8096_v29 = vld [vmem:[%s10575_s29 + $0xde] sm:$0xff] }
 0x1f4   : > { %9842 = vmatprep.mubr.msk.f32.mxu0 %vm295_vm0, %v8091_v60  ;;  %v8128_v56 = vld [vmem:[%s10575_s29 + $0x1de] sm:$0xff] }
 0x1f5   : > { %v7589_v60 = vld [vmem:[%s10575_s29 + $0x1c3] sm:$0xff] }
 0x1f6   : > { %9361 = vmatmul.mubr.msk.f32.gmra.mrb[46].mxu1 %vm295_vm0, %v11778_v37  ;;  %v8097_v37 = vld [vmem:[%s10575_s29 + $0xe6] sm:$0xff] }
 0x1f7   : > { %9843 = vmatmul.mubr.msk.f32.gmra.mrb[14].mxu0 %vm295_vm0, %v8092_v2  ;;  %9363 = vmatprep.mubr.msk.f32.mxu1 %vm295_vm0, %v11783_v41  ;;  %v8098_v41 = vld [vmem:[%s10575_s29 + $0xee] sm:$0xff]  ;;  %v8129_v2 = vld [vmem:[%s10575_s29 + $0x1e6] sm:$0xff] }
 0x1f8   : > { %9845 = vmatprep.mubr.msk.f32.mxu0 %vm295_vm0, %v8093_v9  ;;  %v7590_v9 = vld [vmem:[%s10575_s29 + $0x1cb] sm:$0xff] }
 0x1fa   : > { %9364 = vmatmul.mubr.msk.f32.gmra.mrb[48].mxu1 %vm295_vm0, %v11792_v8  ;;  %v8099_v8 = vld [vmem:[%s10575_s29 + $0xf6] sm:$0xff] }
 0x1fb   : > { %9846 = vmatmul.mubr.msk.f32.gmra.mrb[16].mxu0 %vm295_vm0, %v8094_v16  ;;  %9366 = vmatprep.mubr.msk.f32.mxu1 %vm295_vm0, %v11797_v42  ;;  %v8100_v42 = vld [vmem:[%s10575_s29 + $0xfe] sm:$0xff]  ;;  %v8130_v16 = vld [vmem:[%s10575_s29 + $0x1ee] sm:$0xff] }
 0x1fc   : > { %9848 = vmatprep.mubr.msk.f32.mxu0 %vm295_vm0, %v8095_v23  ;;  %v7591_v23 = vld [vmem:[%s10575_s29 + $0x1d3] sm:$0xff] }
 0x1fe   : > { %9367 = vmatmul.mubr.msk.f32.gmra.mrb[50].mxu1 %vm295_vm0, %v11806_v48  ;;  %v8101_v48 = vld [vmem:[%s10575_s29 + $0x106] sm:$0xff] }
 0x1ff   : > { %9849 = vmatmul.mubr.msk.f32.gmra.mrb[18].mxu0 %vm295_vm0, %v8096_v29  ;;  %9369 = vmatprep.mubr.msk.f32.mxu1 %vm295_vm0, %v11811_v26  ;;  %v12576_v26 = vld [vmem:[#allocation3_spill] sm:$0xff]  ;;  %v8131_v29 = vld [vmem:[%s10575_s29 + $0x1f6] sm:$0xff] }
 0x200   : > { %9851 = vmatprep.mubr.msk.f32.mxu0 %vm295_vm0, %v8097_v37  ;;  %v7592_v37 = vld [vmem:[%s10575_s29 + $0x1db] sm:$0xff] }
 0x202   : > { %9370 = vmatmul.mubr.msk.f32.gmra.mrb[52].mxu1 %vm295_vm0, %v11820_v14  ;;  %v8102_v14 = vld [vmem:[%s10575_s29 + $0x10e] sm:$0xff] }
 0x203   : > { %9852 = vmatmul.mubr.msk.f32.gmra.mrb[20].mxu0 %vm295_vm0, %v8098_v41  ;;  %9372 = vmatprep.mubr.msk.f32.mxu1 %vm295_vm0, %v11825_v27  ;;  %v8103_v27 = vld [vmem:[%s10575_s29 + $0x116] sm:$0xff]  ;;  %v8132_v41 = vld [vmem:[%s10575_s29 + $0x1fe] sm:$0xff] }
 0x204   : > { %9854 = vmatprep.mubr.msk.f32.mxu0 %vm295_vm0, %v8099_v8  ;;  %v7593_v8 = vld [vmem:[%s10575_s29 + $0x1e3] sm:$0xff] }
 0x206   : > { %9373 = vmatmul.mubr.msk.f32.gmra.mrb[54].mxu1 %vm295_vm0, %v11834_v39  ;;  %v8104_v39 = vld [vmem:[%s10575_s29 + $0x11e] sm:$0xff] }
 0x207   : > { %9855 = vmatmul.mubr.msk.f32.gmra.mrb[22].mxu0 %vm295_vm0, %v8100_v42  ;;  %9375 = vmatprep.mubr.msk.f32.mxu1 %vm295_vm0, %v12576_v26  ;;  %v8133_v42 = vld [vmem:[%s10575_s29 + $0x206] sm:$0xff]  ;;  %v8134_v26 = vld [vmem:[%s10575_s29 + $0x20e] sm:$0xff] }
 0x208   : > { %9857 = vmatprep.mubr.msk.f32.mxu0 %vm295_vm0, %v8101_v48  ;;  %v7594_v48 = vld [vmem:[%s10575_s29 + $0x1eb] sm:$0xff] }
 0x20a   : > { %9376 = vmatmul.mubr.msk.f32.gmra.mrb[56].mxu1 %vm295_vm0, %v11848_v15  ;;  %v7463_v15 = vld [vmem:[%s10575_s29 + $0x20a] sm:$0xff] }
 0x20b   : > { %9858 = vmatmul.mubr.msk.f32.gmra.mrb[24].mxu0 %vm295_vm0, %v8102_v14  ;;  %9378 = vmatprep.mubr.msk.f32.mxu1 %vm295_vm0, %v12577_v19  ;;  %v7595_v14 = vld [vmem:[%s10575_s29 + $0x1f3] sm:$0xff]  ;;  %v7596_v19 = vld [vmem:[%s10575_s29 + $0x1fb] sm:$0xff] }
 0x20c   : > { %9860 = vmatprep.mubr.msk.f32.mxu0 %vm295_vm0, %v8103_v27  ;;  %v8135_v27 = vld [vmem:[%s10575_s29 + $0x216] sm:$0xff] }
 0x20e   : > { %9379 = vmatmul.mubr.msk.f32.gmra.mrb[58].mxu1 %vm295_vm0, %v11862_v45  ;;  %v7465_v45 = vld [vmem:[%s10575_s29 + $0x21a] sm:$0xff] }
 0x20f   : > { %9861 = vmatmul.mubr.msk.f32.gmra.mrb[26].mxu0 %vm295_vm0, %v8104_v39  ;;  %9381 = vmatprep.mubr.msk.f32.mxu1 %vm295_vm0, %v7462_v6  ;;  %v8136_v39 = vld [vmem:[%s10575_s29 + $0x21e] sm:$0xff] }
 0x210   : > { %9863 = vmatprep.mubr.msk.f32.mxu0 %vm295_vm0, %v8105_v33  ;;  %v7597_v6 = vld [vmem:[%s10575_s29 + $0x203] sm:$0xff] }
 0x211   : > { %v8137_v33 = vld [vmem:[%s10575_s29 + $0x226] sm:$0xff] }
 0x212   : > { %9382 = vmatmul.mubr.msk.f32.gmra.mrb[60].mxu1 %vm295_vm0, %v7463_v15  ;;  %v7598_v15 = vld [vmem:[%s10575_s29 + $0x20b] sm:$0xff] }
 0x213   : > { %9864 = vmatmul.mubr.msk.f32.gmra.mrb[28].mxu0 %vm295_vm0, %v8106_v63  ;;  %9384 = vmatprep.mubr.msk.f32.mxu1 %vm295_vm0, %v7464_v46  ;;  %v8138_v63 = vld [vmem:[%s10575_s29 + $0x22e] sm:$0xff] }
 0x214   : > { %9866 = vmatprep.mubr.msk.f32.mxu0 %vm295_vm0, %v8107_v7  ;;  %v7599_v46 = vld [vmem:[%s10575_s29 + $0x213] sm:$0xff] }
 0x215   : > { %v8139_v7 = vld [vmem:[%s10575_s29 + $0x236] sm:$0xff] }
 0x216   : > { %9385 = vmatmul.mubr.msk.f32.gmra.mrb[62].mxu1 %vm295_vm0, %v7465_v45  ;;  %v7600_v45 = vld [vmem:[%s10575_s29 + $0x21b] sm:$0xff] }
 0x217   : > { %9867 = vmatmul.mubr.msk.f32.gmra.mrb[30].mxu0 %vm295_vm0, %v8108_v13  ;;  %9445 = vmatprep.mubr.msk.f32.mxu1 %vm295_vm0, %v7569_v18  ;;  %v8140_v13 = vld [vmem:[%s10575_s29 + $0x23e] sm:$0xff]  ;;  %s7063_s29 = sshll.u32 %s7059_s13, 6 }
 0x218   : > { %9869 = vmatprep.mubr.msk.f32.mxu0 %vm295_vm0, %v8109_v20  ;;  %p147_p3 = scmp.lt.s32.totalorder %s7063_s29, 319 }
 0x21a   : > { %9446 = vmatmul.mubr.msk.f32.vlgmr.msra.gmra.mrb[32].mxu1 %vm295_vm0, %v7570_v24  ;;  %s12579_s29 = smov (!%p147_p3, %s7063_s29), 319 }
 0x21b   : > { %9870 = vmatmul.mubr.msk.f32.gmra.mrb[32].mxu0 %vm295_vm0, %v8110_v28  ;;  %9448 = vmatprep.mubr.msk.f32.mxu1 %vm295_vm0, %v7571_v32  ;;  %s7064_s13 = sshll.u32 %s12579_s29, 2 }
 0x21c   : > { %9872 = vmatprep.mubr.msk.f32.mxu0 %vm295_vm0, %v8111_v36  ;;  %s12326_s17 = scalar_lea.vmem %s12549_s3, %s7064_s13 }
 0x21e   : > { %9449 = vmatmul.mubr.msk.f32.gmra.mrb[34].mxu1 %vm295_vm0, %v7572_v57 }
 0x21f   : > { %9873 = vmatmul.mubr.msk.f32.gmra.mrb[34].mxu0 %vm295_vm0, %v8112_v40  ;;  %9451 = vmatprep.mubr.msk.f32.mxu1 %vm295_vm0, %v7573_v44 }
 0x220   : > { %9875 = vmatprep.mubr.msk.f32.mxu0 %vm295_vm0, %v8113_v49 }
 0x222   : > { %9452 = vmatmul.mubr.msk.f32.gmra.mrb[36].mxu1 %vm295_vm0, %v7574_v51 }
 0x223   : > { %9876 = vmatmul.mubr.msk.f32.gmra.mrb[36].mxu0 %vm295_vm0, %v8114_v59  ;;  %9454 = vmatprep.mubr.msk.f32.mxu1 %vm295_vm0, %v7575_v1 }
 0x224   : > { %9878 = vmatprep.mubr.msk.f32.mxu0 %vm295_vm0, %v8115_v5 }
 0x226   : > { %9455 = vmatmul.mubr.msk.f32.gmra.mrb[38].mxu1 %vm295_vm0, %v7576_v10 }
 0x227   : > { %9879 = vmatmul.mubr.msk.f32.gmra.mrb[38].mxu0 %vm295_vm0, %v8116_v22  ;;  %9457 = vmatprep.mubr.msk.f32.mxu1 %vm295_vm0, %v7577_v30 }
 0x228   : > { %9881 = vmatprep.mubr.msk.f32.mxu0 %vm295_vm0, %v8117_v38 }
 0x22a   : > { %9458 = vmatmul.mubr.msk.f32.gmra.mrb[40].mxu1 %vm295_vm0, %v7578_v54 }
 0x22b   : > { %9882 = vmatmul.mubr.msk.f32.gmra.mrb[40].mxu0 %vm295_vm0, %v8118_v17  ;;  %9460 = vmatprep.mubr.msk.f32.mxu1 %vm295_vm0, %v7579_v53 }
 0x22c   : > { %9884 = vmatprep.mubr.msk.f32.mxu0 %vm295_vm0, %v8119_v55 }
 0x22e   : > { %9461 = vmatmul.mubr.msk.f32.gmra.mrb[42].mxu1 %vm295_vm0, %v7580_v58 }
 0x22f   : > { %9885 = vmatmul.mubr.msk.f32.gmra.mrb[42].mxu0 %vm295_vm0, %v8120_v62  ;;  %9463 = vmatprep.mubr.msk.f32.mxu1 %vm295_vm0, %v7581_v0 }
 0x230   : > { %9887 = vmatprep.mubr.msk.f32.mxu0 %vm295_vm0, %v8121_v4 }
 0x232   : > { %9464 = vmatmul.mubr.msk.f32.gmra.mrb[44].mxu1 %vm295_vm0, %v7582_v61 }
 0x233   : > { %9888 = vmatmul.mubr.msk.f32.gmra.mrb[44].mxu0 %vm295_vm0, %v8122_v12  ;;  %9466 = vmatprep.mubr.msk.f32.mxu1 %vm295_vm0, %v7583_v21 }
 0x234   : > { %9890 = vmatprep.mubr.msk.f32.mxu0 %vm295_vm0, %v8123_v25 }
 0x236   : > { %9467 = vmatmul.mubr.msk.f32.gmra.mrb[46].mxu1 %vm295_vm0, %v7584_v31 }
 0x237   : > { %9891 = vmatmul.mubr.msk.f32.gmra.mrb[46].mxu0 %vm295_vm0, %v8124_v35  ;;  %9469 = vmatprep.mubr.msk.f32.mxu1 %vm295_vm0, %v7585_v50 }
 0x238   : > { %9893 = vmatprep.mubr.msk.f32.mxu0 %vm295_vm0, %v8125_v43  ;;  %v12318_v43 = vld [vmem:[%s12548_s2] ss:$0 sm:$0xff] }
 0x23a   : > { %9470 = vmatmul.mubr.msk.f32.gmra.mrb[48].mxu1 %vm295_vm0, %v7586_v47 }
 0x23b   : > { %9894 = vmatmul.mubr.msk.f32.gmra.mrb[48].mxu0 %vm295_vm0, %v8126_v52  ;;  %9472 = vmatprep.mubr.msk.f32.mxu1 %vm295_vm0, %v7587_v34 }
 0x23c   : > { %9896 = vmatprep.mubr.msk.f32.mxu0 %vm295_vm0, %v8127_v3 }
 0x23e   : > { %9473 = vmatmul.mubr.msk.f32.gmra.mrb[50].mxu1 %vm295_vm0, %v7588_v11 }
 0x23f   : > { %9897 = vmatmul.mubr.msk.f32.gmra.mrb[50].mxu0 %vm295_vm0, %v8128_v56  ;;  %9475 = vmatprep.mubr.msk.f32.mxu1 %vm295_vm0, %v7589_v60 }
 0x240   : > { %9899 = vmatprep.mubr.msk.f32.mxu0 %vm295_vm0, %v8129_v2 }
 0x242   : > { %9476 = vmatmul.mubr.msk.f32.gmra.mrb[52].mxu1 %vm295_vm0, %v7590_v9 }
 0x243   : > { %9900 = vmatmul.mubr.msk.f32.gmra.mrb[52].mxu0 %vm295_vm0, %v8130_v16  ;;  %9478 = vmatprep.mubr.msk.f32.mxu1 %vm295_vm0, %v7591_v23 }
 0x244   : > { %9902 = vmatprep.mubr.msk.f32.mxu0 %vm295_vm0, %v8131_v29 }
 0x246   : > { %9479 = vmatmul.mubr.msk.f32.gmra.mrb[54].mxu1 %vm295_vm0, %v7592_v37 }
 0x247   : > { %9903 = vmatmul.mubr.msk.f32.gmra.mrb[54].mxu0 %vm295_vm0, %v8132_v41  ;;  %9481 = vmatprep.mubr.msk.f32.mxu1 %vm295_vm0, %v7593_v8 }
 0x248   : > { %9905 = vmatprep.mubr.msk.f32.mxu0 %vm295_vm0, %v8133_v42 }
 0x24a   : > { %9482 = vmatmul.mubr.msk.f32.gmra.mrb[56].mxu1 %vm295_vm0, %v7594_v48 }
 0x24b   : > { %9906 = vmatmul.mubr.msk.f32.gmra.mrb[56].mxu0 %vm295_vm0, %v8134_v26  ;;  %9484 = vmatprep.mubr.msk.f32.mxu1 %vm295_vm0, %v7595_v14 }
 0x24c   : > { %9908 = vmatprep.mubr.msk.f32.mxu0 %vm295_vm0, %v8135_v27 }
 0x24e   : > { %9485 = vmatmul.mubr.msk.f32.gmra.mrb[58].mxu1 %vm295_vm0, %v7596_v19 }
 0x24f   : > { %9909 = vmatmul.mubr.msk.f32.gmra.mrb[58].mxu0 %vm295_vm0, %v8136_v39  ;;  %9487 = vmatprep.mubr.msk.f32.mxu1 %vm295_vm0, %v7597_v6 }
 0x250   : > { %9911 = vmatprep.mubr.msk.f32.mxu0 %vm295_vm0, %v8137_v33 }
 0x252   : > { %9488 = vmatmul.mubr.msk.f32.gmra.mrb[60].mxu1 %vm295_vm0, %v7598_v15 }
 0x253   : > { %9912 = vmatmul.mubr.msk.f32.gmra.mrb[60].mxu0 %vm295_vm0, %v8138_v63  ;;  %9490 = vmatprep.mubr.msk.f32.mxu1 %vm295_vm0, %v7599_v46 }
 0x254   : > { %9914 = vmatprep.mubr.msk.f32.mxu0 %vm295_vm0, %v8139_v7 }
 0x256   : > { %9491 = vmatmul.mubr.msk.f32.gmra.mrb[62].mxu1 %vm295_vm0, %v7600_v45 }
 0x257   : > { %9915 = vmatmul.mubr.msk.f32.gmra.mrb[62].mxu0 %vm295_vm0, %v8140_v13 }
 0x26d   : > { %v9293_v18 = vpop.f32.mrb[0].mxu1 }
 0x26e   : > { %v2506_v20 = vpop.f32.mrb[1].mxu1 }
 0x271   : > { %v9296_v24 = vpop.f32.mrb[2].mxu1 }
 0x272   : > { %v2516_v28 = vpop.f32.mrb[3].mxu1 }
 0x275   : > { %v9299_v32 = vpop.f32.mrb[4].mxu1 }
 0x276   : > { %v2526_v36 = vpop.f32.mrb[5].mxu1 }
 0x279   : > { %v12261_v57 = vpop.f32.mrb[6].mxu1 }
 0x27a   : > { %v12263_v40 = vpop.f32.mrb[7].mxu1 }
 0x27d   : > { %v12265_v44 = vpop.f32.mrb[8].mxu1 }
 0x27e   : > { %v12267_v49 = vpop.f32.mrb[9].mxu1 }
 0x281   : > { %v12269_v51 = vpop.f32.mrb[10].mxu1 }
 0x282   : > { %v12271_v59 = vpop.f32.mrb[11].mxu1 }
 0x285   : > { %v12273_v1 = vpop.f32.mrb[12].mxu1 }
 0x286   : > { %v12275_v5 = vpop.f32.mrb[13].mxu1 }
 0x289   : > { %v12277_v10 = vpop.f32.mrb[14].mxu1 }
 0x28a   : > { %v12279_v22 = vpop.f32.mrb[15].mxu1 }
 0x28d   : > { %v12281_v30 = vpop.f32.mrb[16].mxu1 }
 0x28e   : > { %v12283_v38 = vpop.f32.mrb[17].mxu1 }
 0x291   : > { %v12285_v54 = vpop.f32.mrb[18].mxu1 }
 0x292   : > { %v12287_v17 = vpop.f32.mrb[19].mxu1 }
 0x295   : > { %v12289_v53 = vpop.f32.mrb[20].mxu1 }
 0x296   : > { %v12291_v55 = vpop.f32.mrb[21].mxu1 }
 0x299   : > { %v12293_v58 = vpop.f32.mrb[22].mxu1 }
 0x29a   : > { %v12295_v62 = vpop.f32.mrb[23].mxu1 }
 0x29d   : > { %v12297_v0 = vpop.f32.mrb[24].mxu1 }
 0x29e   : > { %v12299_v4 = vpop.f32.mrb[25].mxu1 }
 0x2a1   : > { %v12301_v61 = vpop.f32.mrb[26].mxu1 }
 0x2a2   : > { %v12303_v12 = vpop.f32.mrb[27].mxu1 }
 0x2a5   : > { %v12305_v21 = vpop.f32.mrb[28].mxu1 }
 0x2a6   : > { %v12307_v25 = vpop.f32.mrb[29].mxu1 }
 0x2a9   : > { %v12311_v31 = vpop.f32.mrb[30].mxu1 }
 0x2aa   : > { %v12313_v35 = vpop.f32.mrb[31].mxu1 }
 0x2ae   : > { %v9823_v50 = vpop.f32.mrb[0].mxu0 }
 0x2af   : > { %v9995_v47 = vadd.f32 %v9823_v50, %v9293_v18  ;;  %v6086_v52 = vpop.f32.mrb[1].mxu0 }
 0x2b0   : > { %v9996_v34 = vadd.f32 %v6086_v52, %v2506_v20 }
 0x2b1   : > { %v6477_v3 = vadd.f32 %v9995_v47, %v12318_v43 }
 0x2b2   : > { %v6476_v11 = vadd.f32 %v9996_v34, %v12318_v43  ;;  %v9826_v56 = vpop.f32.mrb[2].mxu0 }
 0x2b3   : > { %v6541_v60 = vmul.f32 0.2, %v6477_v3  ;;  %v9997_v2 = vadd.f32 %v9826_v56, %v9296_v24  ;;  %v6096_v9 = vpop.f32.mrb[3].mxu0 }
 0x2b4   : > { %v6540_v16 = vmul.f32 0.2, %v6476_v11  ;;  %v9998_v23 = vadd.f32 %v6096_v9, %v2516_v28 }
 0x2b5   : > { %v6605_v29 = vmax.f32 %v6477_v3, %v6541_v60  ;;  %v6479_v37 = vadd.f32 %v9997_v2, %v12318_v43 }
 0x2b6   : > { %v6604_v41 = vmax.f32 %v6476_v11, %v6540_v16  ;;  %v6478_v8 = vadd.f32 %v9998_v23, %v12318_v43  ;;  %v9829_v42 = vpop.f32.mrb[4].mxu0 }
 0x2b7   : > { %v8279_v48 = vpack.c.bf16 %v6605_v29, %v6605_v29  ;;  %v6543_v26 = vmul.f32 0.2, %v6479_v37  ;;  %v9999_v14 = vadd.f32 %v9829_v42, %v9299_v32  ;;  %v6106_v27 = vpop.f32.mrb[5].mxu0 }
 0x2b8   : > { %v8278_v19 = vpack.c.bf16 %v6604_v41, %v6604_v41  ;;  %v6542_v39 = vmul.f32 0.2, %v6478_v8  ;;  %v10000_v6 = vadd.f32 %v6106_v27, %v2526_v36 }
 0x2b9   : > { %6926 = vst.msk [vmem:[%s12326_s17 + $0x4] sm:$0xf] %vm6924_vm2, %v8279_v48  ;;  %v6607_v33 = vmax.f32 %v6479_v37, %v6543_v26  ;;  %v6481_v15 = vadd.f32 %v9999_v14, %v12318_v43 }
 0x2ba   : > { %6925 = vst.msk [vmem:[%s12326_s17] sm:$0xf] %vm6924_vm2, %v8278_v19  ;;  %v6606_v63 = vmax.f32 %v6478_v8, %v6542_v39  ;;  %v6480_v46 = vadd.f32 %v10000_v6, %v12318_v43  ;;  %v9832_v7 = vpop.f32.mrb[6].mxu0 }
 0x2bb   : > { %v8281_v45 = vpack.c.bf16 %v6607_v33, %v6607_v33  ;;  %v6545_v13 = vmul.f32 0.2, %v6481_v15  ;;  %v10001_v18 = vadd.f32 %v9832_v7, %v12261_v57  ;;  %v6116_v20 = vpop.f32.mrb[7].mxu0 }
 0x2bc   : > { %v8280_v24 = vpack.c.bf16 %v6606_v63, %v6606_v63  ;;  %v6544_v28 = vmul.f32 0.2, %v6480_v46  ;;  %v10002_v32 = vadd.f32 %v6116_v20, %v12263_v40 }
 0x2bd   : > { %6928 = vst.msk [vmem:[%s12326_s17 + $0xc] sm:$0xf] %vm6924_vm2, %v8281_v45  ;;  %v6609_v36 = vmax.f32 %v6481_v15, %v6545_v13  ;;  %v6483_v50 = vadd.f32 %v10001_v18, %v12318_v43 }
 0x2be   : > { %6927 = vst.msk [vmem:[%s12326_s17 + $0x8] sm:$0xf] %vm6924_vm2, %v8280_v24  ;;  %v6608_v47 = vmax.f32 %v6480_v46, %v6544_v28  ;;  %v6482_v52 = vadd.f32 %v10002_v32, %v12318_v43  ;;  %v9835_v34 = vpop.f32.mrb[8].mxu0 }
 0x2bf   : > { %v8283_v3 = vpack.c.bf16 %v6609_v36, %v6609_v36  ;;  %v6547_v57 = vmul.f32 0.2, %v6483_v50  ;;  %v10003_v11 = vadd.f32 %v9835_v34, %v12265_v44  ;;  %v6126_v56 = vpop.f32.mrb[9].mxu0 }
 0x2c0   : > { %v8282_v60 = vpack.c.bf16 %v6608_v47, %v6608_v47  ;;  %v6546_v2 = vmul.f32 0.2, %v6482_v52  ;;  %v10004_v40 = vadd.f32 %v6126_v56, %v12267_v49 }
 0x2c1   : > { %6930 = vst.msk [vmem:[%s12326_s17 + $0x14] sm:$0xf] %vm6924_vm2, %v8283_v3  ;;  %v6611_v9 = vmax.f32 %v6483_v50, %v6547_v57  ;;  %v6485_v16 = vadd.f32 %v10003_v11, %v12318_v43 }
 0x2c2   : > { %6929 = vst.msk [vmem:[%s12326_s17 + $0x10] sm:$0xf] %vm6924_vm2, %v8282_v60  ;;  %v6610_v23 = vmax.f32 %v6482_v52, %v6546_v2  ;;  %v6484_v29 = vadd.f32 %v10004_v40, %v12318_v43  ;;  %v9838_v37 = vpop.f32.mrb[10].mxu0 }
 0x2c3   : > { %v8285_v41 = vpack.c.bf16 %v6611_v9, %v6611_v9  ;;  %v6549_v44 = vmul.f32 0.2, %v6485_v16  ;;  %v10005_v8 = vadd.f32 %v9838_v37, %v12269_v51  ;;  %v6136_v42 = vpop.f32.mrb[11].mxu0 }
 0x2c4   : > { %v8284_v48 = vpack.c.bf16 %v6610_v23, %v6610_v23  ;;  %v6548_v26 = vmul.f32 0.2, %v6484_v29  ;;  %v10006_v49 = vadd.f32 %v6136_v42, %v12271_v59 }
 0x2c5   : > { %6932 = vst.msk [vmem:[%s12326_s17 + $0x1c] sm:$0xf] %vm6924_vm2, %v8285_v41  ;;  %v6613_v14 = vmax.f32 %v6485_v16, %v6549_v44  ;;  %v6487_v27 = vadd.f32 %v10005_v8, %v12318_v43 }
 0x2c6   : > { %6931 = vst.msk [vmem:[%s12326_s17 + $0x18] sm:$0xf] %vm6924_vm2, %v8284_v48  ;;  %v6612_v19 = vmax.f32 %v6484_v29, %v6548_v26  ;;  %v6486_v39 = vadd.f32 %v10006_v49, %v12318_v43  ;;  %v9841_v6 = vpop.f32.mrb[12].mxu0 }
 0x2c7   : > { %v8287_v33 = vpack.c.bf16 %v6613_v14, %v6613_v14  ;;  %v6551_v51 = vmul.f32 0.2, %v6487_v27  ;;  %v10007_v15 = vadd.f32 %v9841_v6, %v12273_v1  ;;  %v6146_v63 = vpop.f32.mrb[13].mxu0 }
 0x2c8   : > { %v8286_v46 = vpack.c.bf16 %v6612_v19, %v6612_v19  ;;  %v6550_v7 = vmul.f32 0.2, %v6486_v39  ;;  %v10008_v59 = vadd.f32 %v6146_v63, %v12275_v5 }
 0x2c9   : > { %6934 = vst.msk [vmem:[%s12326_s17 + $0x24] sm:$0xf] %vm6924_vm2, %v8287_v33  ;;  %v6615_v45 = vmax.f32 %v6487_v27, %v6551_v51  ;;  %v6489_v13 = vadd.f32 %v10007_v15, %v12318_v43 }
 0x2ca   : > { %6933 = vst.msk [vmem:[%s12326_s17 + $0x20] sm:$0xf] %vm6924_vm2, %v8286_v46  ;;  %v6614_v18 = vmax.f32 %v6486_v39, %v6550_v7  ;;  %v6488_v20 = vadd.f32 %v10008_v59, %v12318_v43  ;;  %v9844_v24 = vpop.f32.mrb[14].mxu0 }
 0x2cb   : > { %v8289_v28 = vpack.c.bf16 %v6615_v45, %v6615_v45  ;;  %v6553_v1 = vmul.f32 0.2, %v6489_v13  ;;  %v10009_v32 = vadd.f32 %v9844_v24, %v12277_v10  ;;  %v6156_v36 = vpop.f32.mrb[15].mxu0 }
 0x2cc   : > { %v8288_v50 = vpack.c.bf16 %v6614_v18, %v6614_v18  ;;  %v6552_v47 = vmul.f32 0.2, %v6488_v20  ;;  %v10010_v5 = vadd.f32 %v6156_v36, %v12279_v22 }
 0x2cd   : > { %6936 = vst.msk [vmem:[%s12326_s17 + $0x2c] sm:$0xf] %vm6924_vm2, %v8289_v28  ;;  %v6617_v52 = vmax.f32 %v6489_v13, %v6553_v1  ;;  %v6491_v34 = vadd.f32 %v10009_v32, %v12318_v43 }
 0x2ce   : > { %6935 = vst.msk [vmem:[%s12326_s17 + $0x28] sm:$0xf] %vm6924_vm2, %v8288_v50  ;;  %v6616_v3 = vmax.f32 %v6488_v20, %v6552_v47  ;;  %v6490_v57 = vadd.f32 %v10010_v5, %v12318_v43  ;;  %v9847_v11 = vpop.f32.mrb[16].mxu0 }
 0x2cf   : > { %v8291_v56 = vpack.c.bf16 %v6617_v52, %v6617_v52  ;;  %v6555_v10 = vmul.f32 0.2, %v6491_v34  ;;  %v10011_v60 = vadd.f32 %v9847_v11, %v12281_v30  ;;  %v6166_v2 = vpop.f32.mrb[17].mxu0 }
 0x2d0   : > { %v8290_v40 = vpack.c.bf16 %v6616_v3, %v6616_v3  ;;  %v6554_v9 = vmul.f32 0.2, %v6490_v57  ;;  %v10012_v22 = vadd.f32 %v6166_v2, %v12283_v38 }
 0x2d1   : > { %6938 = vst.msk [vmem:[%s12326_s17 + $0x34] sm:$0xf] %vm6924_vm2, %v8291_v56  ;;  %v6619_v16 = vmax.f32 %v6491_v34, %v6555_v10  ;;  %v6493_v23 = vadd.f32 %v10011_v60, %v12318_v43 }
 0x2d2   : > { %6937 = vst.msk [vmem:[%s12326_s17 + $0x30] sm:$0xf] %vm6924_vm2, %v8290_v40  ;;  %v6618_v29 = vmax.f32 %v6490_v57, %v6554_v9  ;;  %v6492_v37 = vadd.f32 %v10012_v22, %v12318_v43  ;;  %v9850_v41 = vpop.f32.mrb[18].mxu0 }
 0x2d3   : > { %v8293_v44 = vpack.c.bf16 %v6619_v16, %v6619_v16  ;;  %v6557_v30 = vmul.f32 0.2, %v6493_v23  ;;  %v10013_v8 = vadd.f32 %v9850_v41, %v12285_v54  ;;  %v6176_v42 = vpop.f32.mrb[19].mxu0 }
 0x2d4   : > { %v8292_v48 = vpack.c.bf16 %v6618_v29, %v6618_v29  ;;  %v6556_v26 = vmul.f32 0.2, %v6492_v37  ;;  %v10014_v38 = vadd.f32 %v6176_v42, %v12287_v17 }
 0x2d5   : > { %6940 = vst.msk [vmem:[%s12326_s17 + $0x3c] sm:$0xf] %vm6924_vm2, %v8293_v44  ;;  %v6621_v49 = vmax.f32 %v6493_v23, %v6557_v30  ;;  %v6495_v14 = vadd.f32 %v10013_v8, %v12318_v43 }
 0x2d6   : > { %6939 = vst.msk [vmem:[%s12326_s17 + $0x38] sm:$0xf] %vm6924_vm2, %v8292_v48  ;;  %v6620_v27 = vmax.f32 %v6492_v37, %v6556_v26  ;;  %v6494_v19 = vadd.f32 %v10014_v38, %v12318_v43  ;;  %v9853_v39 = vpop.f32.mrb[20].mxu0 }
 0x2d7   : > { %v8295_v6 = vpack.c.bf16 %v6621_v49, %v6621_v49  ;;  %v6559_v54 = vmul.f32 0.2, %v6495_v14  ;;  %v10015_v33 = vadd.f32 %v9853_v39, %v12289_v53  ;;  %v6186_v51 = vpop.f32.mrb[21].mxu0 }
 0x2d8   : > { %v8294_v15 = vpack.c.bf16 %v6620_v27, %v6620_v27  ;;  %v6558_v63 = vmul.f32 0.2, %v6494_v19  ;;  %v10016_v17 = vadd.f32 %v6186_v51, %v12291_v55 }
 0x2d9   : > { %6942 = vst.msk [vmem:[%s12326_s17 + $0x44] sm:$0xf] %vm6924_vm2, %v8295_v6  ;;  %v6623_v46 = vmax.f32 %v6495_v14, %v6559_v54  ;;  %v6497_v7 = vadd.f32 %v10015_v33, %v12318_v43 }
 0x2da   : > { %6941 = vst.msk [vmem:[%s12326_s17 + $0x40] sm:$0xf] %vm6924_vm2, %v8294_v15  ;;  %v6622_v59 = vmax.f32 %v6494_v19, %v6558_v63  ;;  %v6496_v45 = vadd.f32 %v10016_v17, %v12318_v43  ;;  %v9856_v13 = vpop.f32.mrb[22].mxu0 }
 0x2db   : > { %v8297_v18 = vpack.c.bf16 %v6623_v46, %v6623_v46  ;;  %v6561_v53 = vmul.f32 0.2, %v6497_v7  ;;  %v10017_v20 = vadd.f32 %v9856_v13, %v12293_v58  ;;  %v6196_v24 = vpop.f32.mrb[23].mxu0 }
 0x2dc   : > { %v8296_v28 = vpack.c.bf16 %v6622_v59, %v6622_v59  ;;  %v6560_v1 = vmul.f32 0.2, %v6496_v45  ;;  %v10018_v55 = vadd.f32 %v6196_v24, %v12295_v62 }
 0x2dd   : > { %6944 = vst.msk [vmem:[%s12326_s17 + $0x4c] sm:$0xf] %vm6924_vm2, %v8297_v18  ;;  %v6625_v32 = vmax.f32 %v6497_v7, %v6561_v53  ;;  %v6499_v36 = vadd.f32 %v10017_v20, %v12318_v43 }
 0x2de   : > { %6943 = vst.msk [vmem:[%s12326_s17 + $0x48] sm:$0xf] %vm6924_vm2, %v8296_v28  ;;  %v6624_v50 = vmax.f32 %v6496_v45, %v6560_v1  ;;  %v6498_v47 = vadd.f32 %v10018_v55, %v12318_v43  ;;  %v9859_v5 = vpop.f32.mrb[24].mxu0 }
 0x2df   : > { %v8299_v52 = vpack.c.bf16 %v6625_v32, %v6625_v32  ;;  %v6563_v58 = vmul.f32 0.2, %v6499_v36  ;;  %v10019_v34 = vadd.f32 %v9859_v5, %v12297_v0  ;;  %v6206_v3 = vpop.f32.mrb[25].mxu0 }
 0x2e0   : > { %v8298_v57 = vpack.c.bf16 %v6624_v50, %v6624_v50  ;;  %v6562_v11 = vmul.f32 0.2, %v6498_v47  ;;  %v10020_v62 = vadd.f32 %v6206_v3, %v12299_v4 }
 0x2e1   : > { %6946 = vst.msk [vmem:[%s12326_s17 + $0x54] sm:$0xf] %vm6924_vm2, %v8299_v52  ;;  %v6627_v56 = vmax.f32 %v6499_v36, %v6563_v58  ;;  %v6501_v10 = vadd.f32 %v10019_v34, %v12318_v43 }
 0x2e2   : > { %6945 = vst.msk [vmem:[%s12326_s17 + $0x50] sm:$0xf] %vm6924_vm2, %v8298_v57  ;;  %v6626_v60 = vmax.f32 %v6498_v47, %v6562_v11  ;;  %v6500_v2 = vadd.f32 %v10020_v62, %v12318_v43  ;;  %v9862_v40 = vpop.f32.mrb[26].mxu0 }
 0x2e3   : > { %v8301_v9 = vpack.c.bf16 %v6627_v56, %v6627_v56  ;;  %v6565_v0 = vmul.f32 0.2, %v6501_v10  ;;  %v10021_v22 = vadd.f32 %v9862_v40, %v12301_v61  ;;  %v6216_v16 = vpop.f32.mrb[27].mxu0 }
 0x2e4   : > { %v8300_v23 = vpack.c.bf16 %v6626_v60, %v6626_v60  ;;  %v6564_v29 = vmul.f32 0.2, %v6500_v2  ;;  %v10022_v4 = vadd.f32 %v6216_v16, %v12303_v12 }
 0x2e5   : > { %6948 = vst.msk [vmem:[%s12326_s17 + $0x5c] sm:$0xf] %vm6924_vm2, %v8301_v9  ;;  %v6629_v37 = vmax.f32 %v6501_v10, %v6565_v0  ;;  %v6503_v41 = vadd.f32 %v10021_v22, %v12318_v43 }
 0x2e6   : > { %6947 = vst.msk [vmem:[%s12326_s17 + $0x58] sm:$0xf] %vm6924_vm2, %v8300_v23  ;;  %v6628_v44 = vmax.f32 %v6500_v2, %v6564_v29  ;;  %v6502_v30 = vadd.f32 %v10022_v4, %v12318_v43  ;;  %v9865_v8 = vpop.f32.mrb[28].mxu0 }
 0x2e7   : > { %v8303_v42 = vpack.c.bf16 %v6629_v37, %v6629_v37  ;;  %v6567_v61 = vmul.f32 0.2, %v6503_v41  ;;  %v10023_v48 = vadd.f32 %v9865_v8, %v12305_v21  ;;  %v6226_v26 = vpop.f32.mrb[29].mxu0 }
 0x2e8   : > { %v8302_v38 = vpack.c.bf16 %v6628_v44, %v6628_v44  ;;  %v6566_v49 = vmul.f32 0.2, %v6502_v30  ;;  %v10024_v12 = vadd.f32 %v6226_v26, %v12307_v25 }
 0x2e9   : > { %6950 = vst.msk [vmem:[%s12326_s17 + $0x64] sm:$0xf] %vm6924_vm2, %v8303_v42  ;;  %v6631_v14 = vmax.f32 %v6503_v41, %v6567_v61  ;;  %v6505_v27 = vadd.f32 %v10023_v48, %v12318_v43 }
 0x2ea   : > { %6949 = vst.msk [vmem:[%s12326_s17 + $0x60] sm:$0xf] %vm6924_vm2, %v8302_v38  ;;  %v6630_v19 = vmax.f32 %v6502_v30, %v6566_v49  ;;  %v6504_v39 = vadd.f32 %v10024_v12, %v12318_v43  ;;  %v9868_v6 = vpop.f32.mrb[30].mxu0 }
 0x2eb   : > { %v8305_v54 = vpack.c.bf16 %v6631_v14, %v6631_v14  ;;  %v6569_v21 = vmul.f32 0.2, %v6505_v27  ;;  %v10025_v33 = vadd.f32 %v9868_v6, %v12311_v31  ;;  %v6236_v51 = vpop.f32.mrb[31].mxu0 }
 0x2ec   : > { %v8304_v15 = vpack.c.bf16 %v6630_v19, %v6630_v19  ;;  %v6568_v63 = vmul.f32 0.2, %v6504_v39  ;;  %v10026_v25 = vadd.f32 %v6236_v51, %v12313_v35 }
 0x2ed   : > { %6952 = vst.msk [vmem:[%s12326_s17 + $0x6c] sm:$0xf] %vm6924_vm2, %v8305_v54  ;;  %v6633_v17 = vmax.f32 %v6505_v27, %v6569_v21  ;;  %v6507_v46 = vadd.f32 %v10025_v33, %v12318_v43  ;;  %v9447_v7 = vpop.f32.mrb[32].mxu1 }
 0x2ee   : > { %6951 = vst.msk [vmem:[%s12326_s17 + $0x68] sm:$0xf] %vm6924_vm2, %v8304_v15  ;;  %v6632_v59 = vmax.f32 %v6504_v39, %v6568_v63  ;;  %v6506_v45 = vadd.f32 %v10026_v25, %v12318_v43  ;;  %v9871_v13 = vpop.f32.mrb[32].mxu0  ;;  %v3382_v31 = vpop.f32.mrb[33].mxu1 }
 0x2ef   : > { %v8307_v18 = vpack.c.bf16 %v6633_v17, %v6633_v17  ;;  %v6571_v53 = vmul.f32 0.2, %v6507_v46  ;;  %v10027_v20 = vadd.f32 %v9871_v13, %v9447_v7  ;;  %v6246_v24 = vpop.f32.mrb[33].mxu0 }
 0x2f0   : > { %v8306_v35 = vpack.c.bf16 %v6632_v59, %v6632_v59  ;;  %v6570_v28 = vmul.f32 0.2, %v6506_v45  ;;  %v10028_v1 = vadd.f32 %v6246_v24, %v3382_v31 }
 0x2f1   : > { %6954 = vst.msk [vmem:[%s12326_s17 + $0x74] sm:$0xf] %vm6924_vm2, %v8307_v18  ;;  %v6635_v55 = vmax.f32 %v6507_v46, %v6571_v53  ;;  %v6509_v32 = vadd.f32 %v10027_v20, %v12318_v43  ;;  %v9450_v36 = vpop.f32.mrb[34].mxu1 }
 0x2f2   : > { %6953 = vst.msk [vmem:[%s12326_s17 + $0x70] sm:$0xf] %vm6924_vm2, %v8306_v35  ;;  %v6634_v50 = vmax.f32 %v6506_v45, %v6570_v28  ;;  %v6508_v47 = vadd.f32 %v10028_v1, %v12318_v43  ;;  %v9874_v5 = vpop.f32.mrb[34].mxu0  ;;  %v3392_v52 = vpop.f32.mrb[35].mxu1 }
 0x2f3   : > { %v8309_v58 = vpack.c.bf16 %v6635_v55, %v6635_v55  ;;  %v6573_v34 = vmul.f32 0.2, %v6509_v32  ;;  %v10029_v3 = vadd.f32 %v9874_v5, %v9450_v36  ;;  %v6256_v57 = vpop.f32.mrb[35].mxu0 }
 0x2f4   : > { %v8308_v11 = vpack.c.bf16 %v6634_v50, %v6634_v50  ;;  %v6572_v62 = vmul.f32 0.2, %v6508_v47  ;;  %v10030_v56 = vadd.f32 %v6256_v57, %v3392_v52 }
 0x2f5   : > { %6956 = vst.msk [vmem:[%s12326_s17 + $0x7c] sm:$0xf] %vm6924_vm2, %v8309_v58  ;;  %v6637_v10 = vmax.f32 %v6509_v32, %v6573_v34  ;;  %v6511_v60 = vadd.f32 %v10029_v3, %v12318_v43  ;;  %v9453_v2 = vpop.f32.mrb[36].mxu1 }
 0x2f6   : > { %6955 = vst.msk [vmem:[%s12326_s17 + $0x78] sm:$0xf] %vm6924_vm2, %v8308_v11  ;;  %v6636_v40 = vmax.f32 %v6508_v47, %v6572_v62  ;;  %v6510_v9 = vadd.f32 %v10030_v56, %v12318_v43  ;;  %v9877_v0 = vpop.f32.mrb[36].mxu0  ;;  %v3402_v22 = vpop.f32.mrb[37].mxu1 }
 0x2f7   : > { %v8311_v16 = vpack.c.bf16 %v6637_v10, %v6637_v10  ;;  %v6575_v23 = vmul.f32 0.2, %v6511_v60  ;;  %v10031_v29 = vadd.f32 %v9877_v0, %v9453_v2  ;;  %v6266_v4 = vpop.f32.mrb[37].mxu0 }
 0x2f8   : > { %v8310_v37 = vpack.c.bf16 %v6636_v40, %v6636_v40  ;;  %v6574_v41 = vmul.f32 0.2, %v6510_v9  ;;  %v10032_v44 = vadd.f32 %v6266_v4, %v3402_v22 }
 0x2f9   : > { %6958 = vst.msk [vmem:[%s12326_s17 + $0x84] sm:$0xf] %vm6924_vm2, %v8311_v16  ;;  %v6639_v30 = vmax.f32 %v6511_v60, %v6575_v23  ;;  %v6513_v8 = vadd.f32 %v10031_v29, %v12318_v43  ;;  %v9456_v42 = vpop.f32.mrb[38].mxu1 }
 0x2fa   : > { %6957 = vst.msk [vmem:[%s12326_s17 + $0x80] sm:$0xf] %vm6924_vm2, %v8310_v37  ;;  %v6638_v61 = vmax.f32 %v6510_v9, %v6574_v41  ;;  %v6512_v48 = vadd.f32 %v10032_v44, %v12318_v43  ;;  %v9880_v26 = vpop.f32.mrb[38].mxu0  ;;  %v3412_v38 = vpop.f32.mrb[39].mxu1 }
 0x2fb   : > { %v8313_v49 = vpack.c.bf16 %v6639_v30, %v6639_v30  ;;  %v6577_v12 = vmul.f32 0.2, %v6513_v8  ;;  %v10033_v14 = vadd.f32 %v9880_v26, %v9456_v42  ;;  %v6276_v27 = vpop.f32.mrb[39].mxu0 }
 0x2fc   : > { %v8312_v19 = vpack.c.bf16 %v6638_v61, %v6638_v61  ;;  %v6576_v39 = vmul.f32 0.2, %v6512_v48  ;;  %v10034_v6 = vadd.f32 %v6276_v27, %v3412_v38 }
 0x2fd   : > { %6960 = vst.msk [vmem:[%s12326_s17 + $0x8c] sm:$0xf] %vm6924_vm2, %v8313_v49  ;;  %v6641_v54 = vmax.f32 %v6513_v8, %v6577_v12  ;;  %v6515_v21 = vadd.f32 %v10033_v14, %v12318_v43  ;;  %v9459_v33 = vpop.f32.mrb[40].mxu1 }
 0x2fe   : > { %6959 = vst.msk [vmem:[%s12326_s17 + $0x88] sm:$0xf] %vm6924_vm2, %v8312_v19  ;;  %v6640_v51 = vmax.f32 %v6512_v48, %v6576_v39  ;;  %v6514_v15 = vadd.f32 %v10034_v6, %v12318_v43  ;;  %v9883_v63 = vpop.f32.mrb[40].mxu0  ;;  %v3422_v25 = vpop.f32.mrb[41].mxu1 }
 0x2ff   : > { %v8315_v17 = vpack.c.bf16 %v6641_v54, %v6641_v54  ;;  %v6579_v46 = vmul.f32 0.2, %v6515_v21  ;;  %v10035_v7 = vadd.f32 %v9883_v63, %v9459_v33  ;;  %v6286_v59 = vpop.f32.mrb[41].mxu0 }
 0x300   : > { %v8314_v45 = vpack.c.bf16 %v6640_v51, %v6640_v51  ;;  %v6578_v13 = vmul.f32 0.2, %v6514_v15  ;;  %v10036_v31 = vadd.f32 %v6286_v59, %v3422_v25 }
 0x301   : > { %6962 = vst.msk [vmem:[%s12326_s17 + $0x94] sm:$0xf] %vm6924_vm2, %v8315_v17  ;;  %v6643_v18 = vmax.f32 %v6515_v21, %v6579_v46  ;;  %v6517_v53 = vadd.f32 %v10035_v7, %v12318_v43  ;;  %v9462_v20 = vpop.f32.mrb[42].mxu1 }
 0x302   : > { %6961 = vst.msk [vmem:[%s12326_s17 + $0x90] sm:$0xf] %vm6924_vm2, %v8314_v45  ;;  %v6642_v24 = vmax.f32 %v6514_v15, %v6578_v13  ;;  %v6516_v35 = vadd.f32 %v10036_v31, %v12318_v43  ;;  %v9886_v28 = vpop.f32.mrb[42].mxu0  ;;  %v3432_v1 = vpop.f32.mrb[43].mxu1 }
 0x303   : > { %v8317_v55 = vpack.c.bf16 %v6643_v18, %v6643_v18  ;;  %v6581_v32 = vmul.f32 0.2, %v6517_v53  ;;  %v10037_v36 = vadd.f32 %v9886_v28, %v9462_v20  ;;  %v6296_v50 = vpop.f32.mrb[43].mxu0 }
 0x304   : > { %v8316_v47 = vpack.c.bf16 %v6642_v24, %v6642_v24  ;;  %v6580_v5 = vmul.f32 0.2, %v6516_v35  ;;  %v10038_v52 = vadd.f32 %v6296_v50, %v3432_v1 }
 0x305   : > { %6964 = vst.msk [vmem:[%s12326_s17 + $0x9c] sm:$0xf] %vm6924_vm2, %v8317_v55  ;;  %v6645_v58 = vmax.f32 %v6517_v53, %v6581_v32  ;;  %v6519_v34 = vadd.f32 %v10037_v36, %v12318_v43  ;;  %v9465_v3 = vpop.f32.mrb[44].mxu1 }
 0x306   : > { %6963 = vst.msk [vmem:[%s12326_s17 + $0x98] sm:$0xf] %vm6924_vm2, %v8316_v47  ;;  %v6644_v57 = vmax.f32 %v6516_v35, %v6580_v5  ;;  %v6518_v11 = vadd.f32 %v10038_v52, %v12318_v43  ;;  %v9889_v62 = vpop.f32.mrb[44].mxu0  ;;  %v3442_v56 = vpop.f32.mrb[45].mxu1 }
 0x307   : > { %v8319_v10 = vpack.c.bf16 %v6645_v58, %v6645_v58  ;;  %v6583_v60 = vmul.f32 0.2, %v6519_v34  ;;  %v10039_v2 = vadd.f32 %v9889_v62, %v9465_v3  ;;  %v6306_v40 = vpop.f32.mrb[45].mxu0 }
 0x308   : > { %v8318_v9 = vpack.c.bf16 %v6644_v57, %v6644_v57  ;;  %v6582_v0 = vmul.f32 0.2, %v6518_v11  ;;  %v10040_v22 = vadd.f32 %v6306_v40, %v3442_v56 }
 0x309   : > { %6966 = vst.msk [vmem:[%s12326_s17 + $0xa4] sm:$0xf] %vm6924_vm2, %v8319_v10  ;;  %v6647_v16 = vmax.f32 %v6519_v34, %v6583_v60  ;;  %v6521_v23 = vadd.f32 %v10039_v2, %v12318_v43  ;;  %v9468_v29 = vpop.f32.mrb[46].mxu1 }
 0x30a   : > { %6965 = vst.msk [vmem:[%s12326_s17 + $0xa0] sm:$0xf] %vm6924_vm2, %v8318_v9  ;;  %v6646_v4 = vmax.f32 %v6518_v11, %v6582_v0  ;;  %v6520_v37 = vadd.f32 %v10040_v22, %v12318_v43  ;;  %v9892_v41 = vpop.f32.mrb[46].mxu0  ;;  %v3452_v44 = vpop.f32.mrb[47].mxu1 }
 0x30b   : > { %v8321_v30 = vpack.c.bf16 %v6647_v16, %v6647_v16  ;;  %v6585_v8 = vmul.f32 0.2, %v6521_v23  ;;  %v10041_v42 = vadd.f32 %v9892_v41, %v9468_v29  ;;  %v6316_v61 = vpop.f32.mrb[47].mxu0 }
 0x30c   : > { %v8320_v48 = vpack.c.bf16 %v6646_v4, %v6646_v4  ;;  %v6584_v26 = vmul.f32 0.2, %v6520_v37  ;;  %v10042_v38 = vadd.f32 %v6316_v61, %v3452_v44 }
 0x30d   : > { %6968 = vst.msk [vmem:[%s12326_s17 + $0xac] sm:$0xf] %vm6924_vm2, %v8321_v30  ;;  %v6649_v49 = vmax.f32 %v6521_v23, %v6585_v8  ;;  %v6523_v12 = vadd.f32 %v10041_v42, %v12318_v43  ;;  %v9471_v14 = vpop.f32.mrb[48].mxu1 }
 0x30e   : > { %6967 = vst.msk [vmem:[%s12326_s17 + $0xa8] sm:$0xf] %vm6924_vm2, %v8320_v48  ;;  %v6648_v27 = vmax.f32 %v6520_v37, %v6584_v26  ;;  %v6522_v19 = vadd.f32 %v10042_v38, %v12318_v43  ;;  %v9895_v39 = vpop.f32.mrb[48].mxu0  ;;  %v3462_v6 = vpop.f32.mrb[49].mxu1 }
 0x30f   : > { %v8323_v54 = vpack.c.bf16 %v6649_v49, %v6649_v49  ;;  %v6587_v21 = vmul.f32 0.2, %v6523_v12  ;;  %v10043_v33 = vadd.f32 %v9895_v39, %v9471_v14  ;;  %v6326_v51 = vpop.f32.mrb[49].mxu0 }
 0x310   : > { %v8322_v15 = vpack.c.bf16 %v6648_v27, %v6648_v27  ;;  %v6586_v63 = vmul.f32 0.2, %v6522_v19  ;;  %v10044_v25 = vadd.f32 %v6326_v51, %v3462_v6 }
 0x311   : > { %6970 = vst.msk [vmem:[%s12326_s17 + $0xb4] sm:$0xf] %vm6924_vm2, %v8323_v54  ;;  %v6651_v17 = vmax.f32 %v6523_v12, %v6587_v21  ;;  %v6525_v46 = vadd.f32 %v10043_v33, %v12318_v43  ;;  %v9474_v7 = vpop.f32.mrb[50].mxu1 }
 0x312   : > { %6969 = vst.msk [vmem:[%s12326_s17 + $0xb0] sm:$0xf] %vm6924_vm2, %v8322_v15  ;;  %v6650_v59 = vmax.f32 %v6522_v19, %v6586_v63  ;;  %v6524_v45 = vadd.f32 %v10044_v25, %v12318_v43  ;;  %v9898_v13 = vpop.f32.mrb[50].mxu0  ;;  %v3472_v31 = vpop.f32.mrb[51].mxu1 }
 0x313   : > { %v8325_v18 = vpack.c.bf16 %v6651_v17, %v6651_v17  ;;  %v6589_v53 = vmul.f32 0.2, %v6525_v46  ;;  %v10045_v20 = vadd.f32 %v9898_v13, %v9474_v7  ;;  %v6336_v24 = vpop.f32.mrb[51].mxu0 }
 0x314   : > { %v8324_v35 = vpack.c.bf16 %v6650_v59, %v6650_v59  ;;  %v6588_v28 = vmul.f32 0.2, %v6524_v45  ;;  %v10046_v1 = vadd.f32 %v6336_v24, %v3472_v31 }
 0x315   : > { %6972 = vst.msk [vmem:[%s12326_s17 + $0xbc] sm:$0xf] %vm6924_vm2, %v8325_v18  ;;  %v6653_v55 = vmax.f32 %v6525_v46, %v6589_v53  ;;  %v6527_v32 = vadd.f32 %v10045_v20, %v12318_v43  ;;  %v9477_v36 = vpop.f32.mrb[52].mxu1 }
 0x316   : > { %6971 = vst.msk [vmem:[%s12326_s17 + $0xb8] sm:$0xf] %vm6924_vm2, %v8324_v35  ;;  %v6652_v50 = vmax.f32 %v6524_v45, %v6588_v28  ;;  %v6526_v47 = vadd.f32 %v10046_v1, %v12318_v43  ;;  %v9901_v5 = vpop.f32.mrb[52].mxu0  ;;  %v3482_v52 = vpop.f32.mrb[53].mxu1 }
 0x317   : > { %v8327_v58 = vpack.c.bf16 %v6653_v55, %v6653_v55  ;;  %v6591_v34 = vmul.f32 0.2, %v6527_v32  ;;  %v10047_v3 = vadd.f32 %v9901_v5, %v9477_v36  ;;  %v6346_v57 = vpop.f32.mrb[53].mxu0 }
 0x318   : > { %v8326_v11 = vpack.c.bf16 %v6652_v50, %v6652_v50  ;;  %v6590_v62 = vmul.f32 0.2, %v6526_v47  ;;  %v10048_v56 = vadd.f32 %v6346_v57, %v3482_v52 }
 0x319   : > { %6974 = vst.msk [vmem:[%s12326_s17 + $0xc4] sm:$0xf] %vm6924_vm2, %v8327_v58  ;;  %v6655_v10 = vmax.f32 %v6527_v32, %v6591_v34  ;;  %v6529_v60 = vadd.f32 %v10047_v3, %v12318_v43  ;;  %v9480_v2 = vpop.f32.mrb[54].mxu1 }
 0x31a   : > { %6973 = vst.msk [vmem:[%s12326_s17 + $0xc0] sm:$0xf] %vm6924_vm2, %v8326_v11  ;;  %v6654_v40 = vmax.f32 %v6526_v47, %v6590_v62  ;;  %v6528_v9 = vadd.f32 %v10048_v56, %v12318_v43  ;;  %v9904_v0 = vpop.f32.mrb[54].mxu0  ;;  %v3492_v22 = vpop.f32.mrb[55].mxu1 }
 0x31b   : > { %v8329_v16 = vpack.c.bf16 %v6655_v10, %v6655_v10  ;;  %v6593_v23 = vmul.f32 0.2, %v6529_v60  ;;  %v10049_v29 = vadd.f32 %v9904_v0, %v9480_v2  ;;  %v6356_v4 = vpop.f32.mrb[55].mxu0 }
 0x31c   : > { %v8328_v37 = vpack.c.bf16 %v6654_v40, %v6654_v40  ;;  %v6592_v41 = vmul.f32 0.2, %v6528_v9  ;;  %v10050_v44 = vadd.f32 %v6356_v4, %v3492_v22 }
 0x31d   : > { %6976 = vst.msk [vmem:[%s12326_s17 + $0xcc] sm:$0xf] %vm6924_vm2, %v8329_v16  ;;  %v6657_v30 = vmax.f32 %v6529_v60, %v6593_v23  ;;  %v6531_v8 = vadd.f32 %v10049_v29, %v12318_v43  ;;  %v9483_v42 = vpop.f32.mrb[56].mxu1 }
 0x31e   : > { %6975 = vst.msk [vmem:[%s12326_s17 + $0xc8] sm:$0xf] %vm6924_vm2, %v8328_v37  ;;  %v6656_v61 = vmax.f32 %v6528_v9, %v6592_v41  ;;  %v6530_v48 = vadd.f32 %v10050_v44, %v12318_v43  ;;  %v9907_v26 = vpop.f32.mrb[56].mxu0  ;;  %v3502_v38 = vpop.f32.mrb[57].mxu1 }
 0x31f   : > { %v8331_v49 = vpack.c.bf16 %v6657_v30, %v6657_v30  ;;  %v6595_v12 = vmul.f32 0.2, %v6531_v8  ;;  %v10051_v14 = vadd.f32 %v9907_v26, %v9483_v42  ;;  %v6366_v27 = vpop.f32.mrb[57].mxu0 }
 0x320   : > { %v8330_v19 = vpack.c.bf16 %v6656_v61, %v6656_v61  ;;  %v6594_v39 = vmul.f32 0.2, %v6530_v48  ;;  %v10052_v6 = vadd.f32 %v6366_v27, %v3502_v38 }
 0x321   : > { %6978 = vst.msk [vmem:[%s12326_s17 + $0xd4] sm:$0xf] %vm6924_vm2, %v8331_v49  ;;  %v6659_v54 = vmax.f32 %v6531_v8, %v6595_v12  ;;  %v6533_v21 = vadd.f32 %v10051_v14, %v12318_v43  ;;  %v9486_v33 = vpop.f32.mrb[58].mxu1 }
 0x322   : > { %6977 = vst.msk [vmem:[%s12326_s17 + $0xd0] sm:$0xf] %vm6924_vm2, %v8330_v19  ;;  %v6658_v51 = vmax.f32 %v6530_v48, %v6594_v39  ;;  %v6532_v15 = vadd.f32 %v10052_v6, %v12318_v43  ;;  %v9910_v63 = vpop.f32.mrb[58].mxu0  ;;  %v3512_v25 = vpop.f32.mrb[59].mxu1 }
 0x323   : > { %v8333_v17 = vpack.c.bf16 %v6659_v54, %v6659_v54  ;;  %v6597_v46 = vmul.f32 0.2, %v6533_v21  ;;  %v10053_v7 = vadd.f32 %v9910_v63, %v9486_v33  ;;  %v6376_v59 = vpop.f32.mrb[59].mxu0 }
 0x324   : > { %v8332_v45 = vpack.c.bf16 %v6658_v51, %v6658_v51  ;;  %v6596_v13 = vmul.f32 0.2, %v6532_v15  ;;  %v10054_v31 = vadd.f32 %v6376_v59, %v3512_v25 }
 0x325   : > { %6980 = vst.msk [vmem:[%s12326_s17 + $0xdc] sm:$0xf] %vm6924_vm2, %v8333_v17  ;;  %v6661_v18 = vmax.f32 %v6533_v21, %v6597_v46  ;;  %v6535_v53 = vadd.f32 %v10053_v7, %v12318_v43  ;;  %v9489_v20 = vpop.f32.mrb[60].mxu1 }
 0x326   : > { %6979 = vst.msk [vmem:[%s12326_s17 + $0xd8] sm:$0xf] %vm6924_vm2, %v8332_v45  ;;  %v6660_v24 = vmax.f32 %v6532_v15, %v6596_v13  ;;  %v6534_v35 = vadd.f32 %v10054_v31, %v12318_v43  ;;  %v9913_v28 = vpop.f32.mrb[60].mxu0  ;;  %v3522_v1 = vpop.f32.mrb[61].mxu1 }
 0x327   : > { %v8335_v55 = vpack.c.bf16 %v6661_v18, %v6661_v18  ;;  %v6599_v32 = vmul.f32 0.2, %v6535_v53  ;;  %v10055_v36 = vadd.f32 %v9913_v28, %v9489_v20  ;;  %v6386_v50 = vpop.f32.mrb[61].mxu0 }
 0x328   : > { %v8334_v47 = vpack.c.bf16 %v6660_v24, %v6660_v24  ;;  %v6598_v5 = vmul.f32 0.2, %v6534_v35  ;;  %v10056_v52 = vadd.f32 %v6386_v50, %v3522_v1 }
 0x329   : > { %6982 = vst.msk [vmem:[%s12326_s17 + $0xe4] sm:$0xf] %vm6924_vm2, %v8335_v55  ;;  %v6663_v58 = vmax.f32 %v6535_v53, %v6599_v32  ;;  %v6537_v34 = vadd.f32 %v10055_v36, %v12318_v43  ;;  %v9492_v3 = vpop.f32.mrb[62].mxu1 }
 0x32a   : > { %6981 = vst.msk [vmem:[%s12326_s17 + $0xe0] sm:$0xf] %vm6924_vm2, %v8334_v47  ;;  %v6662_v57 = vmax.f32 %v6534_v35, %v6598_v5  ;;  %v6536_v11 = vadd.f32 %v10056_v52, %v12318_v43  ;;  %v9916_v62 = vpop.f32.mrb[62].mxu0  ;;  %v3532_v56 = vpop.f32.mrb[63].mxu1 }
 0x32b   : > { %v8337_v10 = vpack.c.bf16 %v6663_v58, %v6663_v58  ;;  %v6601_v60 = vmul.f32 0.2, %v6537_v34  ;;  %v10057_v2 = vadd.f32 %v9916_v62, %v9492_v3  ;;  %v6396_v40 = vpop.f32.mrb[63].mxu0 }
 0x32c   : > { %v8336_v9 = vpack.c.bf16 %v6662_v57, %v6662_v57  ;;  %v6600_v0 = vmul.f32 0.2, %v6536_v11  ;;  %v10058_v22 = vadd.f32 %v6396_v40, %v3532_v56 }
 0x32d   : > { %6984 = vst.msk [vmem:[%s12326_s17 + $0xec] sm:$0xf] %vm6924_vm2, %v8337_v10  ;;  %v6665_v16 = vmax.f32 %v6537_v34, %v6601_v60  ;;  %v6539_v23 = vadd.f32 %v10057_v2, %v12318_v43 }
 0x32e   : > { %6983 = vst.msk [vmem:[%s12326_s17 + $0xe8] sm:$0xf] %vm6924_vm2, %v8336_v9  ;;  %v6664_v29 = vmax.f32 %v6536_v11, %v6600_v0  ;;  %v6538_v4 = vadd.f32 %v10058_v22, %v12318_v43 }
 0x32f   : > { %v8339_v37 = vpack.c.bf16 %v6665_v16, %v6665_v16  ;;  %v6603_v41 = vmul.f32 0.2, %v6539_v23 }
 0x330   : > { %v8338_v44 = vpack.c.bf16 %v6664_v29, %v6664_v29  ;;  %v6602_v30 = vmul.f32 0.2, %v6538_v4 }
 0x331   : > { %6986 = vst.msk [vmem:[%s12326_s17 + $0xf4] sm:$0xf] %vm6924_vm2, %v8339_v37  ;;  %v6667_v8 = vmax.f32 %v6539_v23, %v6603_v41 }
 0x332   : > { %6985 = vst.msk [vmem:[%s12326_s17 + $0xf0] sm:$0xf] %vm6924_vm2, %v8338_v44  ;;  %v6666_v42 = vmax.f32 %v6538_v4, %v6602_v30 }
 0x333   : > { %v8341_v61 = vpack.c.bf16 %v6667_v8, %v6667_v8 }
 0x334   : > { %v8340_v48 = vpack.c.bf16 %v6666_v42, %v6666_v42 }
 0x335   : > { %6988 = vst.msk [vmem:[%s12326_s17 + $0xfc] sm:$0xf] %vm6924_vm2, %v8341_v61 }
 0x336   : > { %6987 = vst.msk [vmem:[%s12326_s17 + $0xf8] sm:$0xf] %vm6924_vm2, %v8340_v48 }
 0x337 PF: > { %s13_s12 = sadd.s32 1, %s10522_s12  }
 0x338   : > { %p10_p4 = scmp.ge.s32.totalorder %s13_s12, 7  }
 0x33a   :  { %12 = sbr.rel (!%p10_p4) target bundleno = 1 (0x1), region = 76 }

// kernel: _lambda_.16
= control target key start
LH: loop header
LB: loop body
LE: loop exit
PB: predicated region body
PF: predicated region fallthrough
CT: control target
= control target key end

     0   :  { %s1652_s12 = smov 0   ;;  %s1941_s0 = inlined_call_operand.vmem [shape: bf16[2048,16], index: 0, kind: input, shape index: {}]   ;;  %s1942_s1 = inlined_call_operand.vmem [shape: bf16[1,16,16], index: 1, kind: input, shape index: {}]   ;;  %s1943_s2 = inlined_call_operand.vmem [shape: f32[1,16], index: 2, kind: input, shape index: {}]   ;;  %s1944_s3 = inlined_call_operand.vmem [shape: bf16[2048,16], index: 3, kind: output, shape index: {}]  }
   0x1 LB: > { %s1278_s13 = sadd.s32 4294967295, %s1630_s12   ;;  %p1281_p0 = scmp.ge.s32.totalorder %s1630_s12, 1  ;;  %s1630_s12 = sphi %s1652_s12, %s13_s12  }
   0x2   : > { %p127_p1 = scmp.lt.s32.totalorder %s1630_s12, 5 }
   0x4   : > { %p128_p2 = pnand %p1281_p0, %p127_p1 }
   0x5   : > { %v1591_v0 = vld [vmem:[%s1942_s1] sm:$0xff] (!%p128_p2)   ;;  %s1284_s16 = sshll.u32 (!%p128_p2), %s1278_s13, 9  ;;  %vm397_vm0 = vcmask (!%p128_p2), 130048   ;;  %s1282_s22 = sshll.u32 (!%p128_p2), %s1278_s13, 6  ;;  %vm1167_vm1 = vcmask (!%p128_p2), 125952  }
   0x6   : > { %131 = sbr.rel (%p128_p2) target bundleno = 294 (0x126), region = 32  ;;  %s154_s17 = sshra.s32 (!%p128_p2), %s1284_s16, 3  ;;  %1515 = vmatprep.subr.bf16.mxu0 (!%p128_p2), %v1591_v0  ;;  %1581 = vmatprep.subr.bf16.mxu1 (!%p128_p2), %v1591_v0  ;;  %v1739_v33 = vld [vmem:[%s1943_s2] ss:$0 sm:$0xff] (!%p128_p2) }
   0x7   : > { %s1285_s18 = sshll.u32 (!%p128_p2), %s154_s17, 2  ;;  %1516 = vmatpush3.bf16.msra.mxu0 (!%p128_p2), %v1591_v0  ;;  %1582 = vmatpush3.bf16.msra.mxu1 (!%p128_p2), %v1591_v0  ;;  %p147_p3 = scmp.lt.s32.totalorder (!%p128_p2), %s1282_s22, 255 }
   0x8   : > { %s1668_s21 = scalar_lea.vmem (!%p128_p2), %s1941_s0, %s1285_s18 }
   0x9   : > { %v1592_v1 = vld [vmem:[%s1668_s21] sm:$0xff] (!%p128_p2)   ;;  %v1594_v3 = vld [vmem:[%s1668_s21 + $0x8] sm:$0xff] (!%p128_p2)   ;;  %v1596_v5 = vld [vmem:[%s1668_s21 + $0x10] sm:$0xff] (!%p128_p2)  }
   0xa   : > { %v1593_v2 = vld [vmem:[%s1668_s21 + $0x80] sm:$0xff] (!%p128_p2)   ;;  %1517 = vmatprep.mubr.msk.bf16.mxu0 (!%p128_p2), %vm397_vm0, %v1592_v1  ;;  %v1595_v4 = vld [vmem:[%s1668_s21 + $0x88] sm:$0xff] (!%p128_p2)   ;;  %v1597_v6 = vld [vmem:[%s1668_s21 + $0x90] sm:$0xff] (!%p128_p2)  }
   0xb   : > { %1549 = vmatprep.mubr.msk.bf16.mxu1 (!%p128_p2), %vm397_vm0, %v1593_v2  ;;  %1518 = vmatmul.mubr.msk.bf16.vlgmr.msra.gmra.mrb[0].mxu0 (!%p128_p2), %vm397_vm0, %v1594_v3  ;;  %v1598_v7 = vld [vmem:[%s1668_s21 + $0x18] sm:$0xff] (!%p128_p2)   ;;  %v1600_v9 = vld [vmem:[%s1668_s21 + $0x20] sm:$0xff] (!%p128_p2)   ;;  %v1602_v11 = vld [vmem:[%s1668_s21 + $0x28] sm:$0xff] (!%p128_p2)  }
   0xc   : > { %1550 = vmatmul.mubr.msk.bf16.vlgmr.msra.gmra.mrb[0].mxu1 (!%p128_p2), %vm397_vm0, %v1595_v4  ;;  %1521 = vmatprep.mubr.msk.bf16.mxu0 (!%p128_p2), %vm397_vm0, %v1596_v5  ;;  %v1599_v8 = vld [vmem:[%s1668_s21 + $0x98] sm:$0xff] (!%p128_p2)   ;;  %v1601_v10 = vld [vmem:[%s1668_s21 + $0xa0] sm:$0xff] (!%p128_p2)   ;;  %v1603_v12 = vld [vmem:[%s1668_s21 + $0xa8] sm:$0xff] (!%p128_p2)  }
   0xd   : > { %1553 = vmatprep.mubr.msk.bf16.mxu1 %vm397_vm0, %v1597_v6  ;;  %v1604_v13 = vld [vmem:[%s1668_s21 + $0x30] sm:$0xff]   ;;  %v1606_v15 = vld [vmem:[%s1668_s21 + $0x38] sm:$0xff]   ;;  %v1608_v17 = vld [vmem:[%s1668_s21 + $0x40] sm:$0xff]   ;;  %s1946_s22 = smov (!%p147_p3, %s1282_s22), 255 }
   0xe   : > { %v1605_v14 = vld [vmem:[%s1668_s21 + $0xb0] sm:$0xff]   ;;  %v1607_v16 = vld [vmem:[%s1668_s21 + $0xb8] sm:$0xff]   ;;  %v1609_v18 = vld [vmem:[%s1668_s21 + $0xc0] sm:$0xff]   ;;  %s1283_s25 = sshll.u32 %s1946_s22, 2 }
   0xf   : > { %v1610_v19 = vld [vmem:[%s1668_s21 + $0x48] sm:$0xff]   ;;  %v1612_v21 = vld [vmem:[%s1668_s21 + $0x50] sm:$0xff]   ;;  %v1614_v23 = vld [vmem:[%s1668_s21 + $0x58] sm:$0xff]   ;;  %s1752_s28 = scalar_lea.vmem %s1944_s3, %s1283_s25 }
  0x10   : > { %v1611_v20 = vld [vmem:[%s1668_s21 + $0xc8] sm:$0xff]   ;;  %v1613_v22 = vld [vmem:[%s1668_s21 + $0xd0] sm:$0xff]   ;;  %v1615_v24 = vld [vmem:[%s1668_s21 + $0xd8] sm:$0xff]  }
  0x11   : > { %v1616_v25 = vld [vmem:[%s1668_s21 + $0x60] sm:$0xff]   ;;  %v1618_v27 = vld [vmem:[%s1668_s21 + $0x68] sm:$0xff]   ;;  %v1620_v29 = vld [vmem:[%s1668_s21 + $0x70] sm:$0xff]  }
  0x12   : > { %v1617_v26 = vld [vmem:[%s1668_s21 + $0xe0] sm:$0xff]   ;;  %v1619_v28 = vld [vmem:[%s1668_s21 + $0xe8] sm:$0xff]   ;;  %v1621_v30 = vld [vmem:[%s1668_s21 + $0xf0] sm:$0xff]  }
  0x13   : > { %1522 = vmatmul.mubr.msk.bf16.gmra.mrb[4].mxu0 %vm397_vm0, %v1598_v7  ;;  %v1622_v31 = vld [vmem:[%s1668_s21 + $0x78] sm:$0xff]  }
  0x14   : > { %1554 = vmatmul.mubr.msk.bf16.gmra.mrb[4].mxu1 %vm397_vm0, %v1599_v8  ;;  %1525 = vmatprep.mubr.msk.bf16.mxu0 %vm397_vm0, %v1600_v9  ;;  %v1623_v32 = vld [vmem:[%s1668_s21 + $0xf8] sm:$0xff]  }
  0x15   : > { %1557 = vmatprep.mubr.msk.bf16.mxu1 %vm397_vm0, %v1601_v10 }
  0x1b   : > { %1526 = vmatmul.mubr.msk.bf16.gmra.mrb[8].mxu0 %vm397_vm0, %v1602_v11 }
  0x1c   : > { %1558 = vmatmul.mubr.msk.bf16.gmra.mrb[8].mxu1 %vm397_vm0, %v1603_v12  ;;  %1529 = vmatprep.mubr.msk.bf16.mxu0 %vm397_vm0, %v1604_v13 }
  0x1d   : > { %1561 = vmatprep.mubr.msk.bf16.mxu1 %vm397_vm0, %v1605_v14 }
  0x23   : > { %1530 = vmatmul.mubr.msk.bf16.gmra.mrb[12].mxu0 %vm397_vm0, %v1606_v15 }
  0x24   : > { %1562 = vmatmul.mubr.msk.bf16.gmra.mrb[12].mxu1 %vm397_vm0, %v1607_v16  ;;  %1533 = vmatprep.mubr.msk.bf16.mxu0 %vm397_vm0, %v1608_v17 }
  0x25   : > { %1565 = vmatprep.mubr.msk.bf16.mxu1 %vm397_vm0, %v1609_v18 }
  0x2b   : > { %1534 = vmatmul.mubr.msk.bf16.gmra.mrb[16].mxu0 %vm397_vm0, %v1610_v19 }
  0x2c   : > { %1566 = vmatmul.mubr.msk.bf16.gmra.mrb[16].mxu1 %vm397_vm0, %v1611_v20  ;;  %1537 = vmatprep.mubr.msk.bf16.mxu0 %vm397_vm0, %v1612_v21 }
  0x2d   : > { %1569 = vmatprep.mubr.msk.bf16.mxu1 %vm397_vm0, %v1613_v22 }
  0x33   : > { %1538 = vmatmul.mubr.msk.bf16.gmra.mrb[20].mxu0 %vm397_vm0, %v1614_v23 }
  0x34   : > { %1570 = vmatmul.mubr.msk.bf16.gmra.mrb[20].mxu1 %vm397_vm0, %v1615_v24  ;;  %1541 = vmatprep.mubr.msk.bf16.mxu0 %vm397_vm0, %v1616_v25 }
  0x35   : > { %1573 = vmatprep.mubr.msk.bf16.mxu1 %vm397_vm0, %v1617_v26 }
  0x3b   : > { %1542 = vmatmul.mubr.msk.bf16.gmra.mrb[24].mxu0 %vm397_vm0, %v1618_v27 }
  0x3c   : > { %1574 = vmatmul.mubr.msk.bf16.gmra.mrb[24].mxu1 %vm397_vm0, %v1619_v28  ;;  %1545 = vmatprep.mubr.msk.bf16.mxu0 %vm397_vm0, %v1620_v29 }
  0x3d   : > { %1577 = vmatprep.mubr.msk.bf16.mxu1 %vm397_vm0, %v1621_v30 }
  0x43   : > { %1546 = vmatmul.mubr.msk.bf16.gmra.mrb[28].mxu0 %vm397_vm0, %v1622_v31 }
  0x44   : > { %1578 = vmatmul.mubr.msk.bf16.gmra.mrb[28].mxu1 %vm397_vm0, %v1623_v32 }
  0xde   : > { %v1519_v34 = vpop.f32.mrb[0].mxu0 }
  0xdf   : > { %v537_v35 = vadd.f32 %v1519_v34, %v1739_v33  ;;  %v1551_v36 = vpop.f32.mrb[0].mxu1  ;;  %v528_v37 = vpop.f32.mrb[1].mxu0 }
  0xe0   : > { %v665_v38 = vadd.f32 %v1551_v36, %v1739_v33  ;;  %v529_v39 = vadd.f32 %v1739_v33, %v528_v37  ;;  %v656_v40 = vpop.f32.mrb[1].mxu1  ;;  %v1520_v41 = vpop.f32.mrb[2].mxu0 }
  0xe1   : > { %v785_v42 = vmul.f32 0.2, %v537_v35  ;;  %v657_v43 = vadd.f32 %v1739_v33, %v656_v40  ;;  %v540_v44 = vadd.f32 %v1520_v41, %v1739_v33  ;;  %v1552_v45 = vpop.f32.mrb[2].mxu1  ;;  %v531_v46 = vpop.f32.mrb[3].mxu0 }
  0xe2   : > { %v817_v47 = vmul.f32 0.2, %v665_v38  ;;  %v783_v48 = vmul.f32 0.2, %v529_v39  ;;  %v668_v49 = vadd.f32 %v1552_v45, %v1739_v33  ;;  %v532_v50 = vadd.f32 %v1739_v33, %v531_v46  ;;  %v659_v51 = vpop.f32.mrb[3].mxu1 }
  0xe3   : > { %v849_v52 = vmax.f32 %v537_v35, %v785_v42  ;;  %v815_v53 = vmul.f32 0.2, %v657_v43  ;;  %v786_v54 = vmul.f32 0.2, %v540_v44  ;;  %v660_v55 = vadd.f32 %v1739_v33, %v659_v51 }
  0xe4   : > { %v881_v56 = vmax.f32 %v665_v38, %v817_v47  ;;  %v847_v57 = vmax.f32 %v529_v39, %v783_v48  ;;  %v818_v58 = vmul.f32 0.2, %v668_v49  ;;  %v784_v59 = vmul.f32 0.2, %v532_v50 }
  0xe5   : > { %v1420_v60 = vpack.c.bf16 %v849_v52, %v849_v52  ;;  %v879_v61 = vmax.f32 %v657_v43, %v815_v53  ;;  %v850_v62 = vmax.f32 %v540_v44, %v786_v54  ;;  %v816_v63 = vmul.f32 0.2, %v660_v55 }
  0xe6   : > { %v1452_v0 = vpack.c.bf16 %v881_v56, %v881_v56  ;;  %v1418_v1 = vpack.c.bf16 %v847_v57, %v847_v57  ;;  %v882_v2 = vmax.f32 %v668_v49, %v818_v58  ;;  %v848_v3 = vmax.f32 %v532_v50, %v784_v59  ;;  %v1523_v4 = vpop.f32.mrb[4].mxu0 }
  0xe7   : > { %1170 = vst.msk [vmem:[%s1752_s28 + $0x8] sm:$0xf] %vm1167_vm1, %v1420_v60  ;;  %v1450_v5 = vpack.c.bf16 %v879_v61, %v879_v61  ;;  %v1421_v6 = vpack.c.bf16 %v850_v62, %v850_v62  ;;  %v880_v7 = vmax.f32 %v660_v55, %v816_v63  ;;  %v553_v8 = vadd.f32 %v1523_v4, %v1739_v33  ;;  %v1555_v9 = vpop.f32.mrb[4].mxu1  ;;  %v544_v10 = vpop.f32.mrb[5].mxu0 }
  0xe8   : > { %1202 = vst.msk [vmem:[%s1752_s28 + $0x88] sm:$0xf] %vm1167_vm1, %v1452_v0  ;;  %1168 = vst.msk [vmem:[%s1752_s28] sm:$0xf] %vm1167_vm1, %v1418_v1  ;;  %v1453_v11 = vpack.c.bf16 %v882_v2, %v882_v2  ;;  %v1419_v12 = vpack.c.bf16 %v848_v3, %v848_v3  ;;  %v681_v13 = vadd.f32 %v1555_v9, %v1739_v33  ;;  %v672_v15 = vpop.f32.mrb[5].mxu1  ;;  %v1524_v16 = vpop.f32.mrb[6].mxu0 }
  0xe9   : > { %v545_v14 = vadd.f32 %v1739_v33, %v544_v10  ;;  %1200 = vst.msk [vmem:[%s1752_s28 + $0x80] sm:$0xf] %vm1167_vm1, %v1450_v5  ;;  %1171 = vst.msk [vmem:[%s1752_s28 + $0xc] sm:$0xf] %vm1167_vm1, %v1421_v6  ;;  %v1451_v17 = vpack.c.bf16 %v880_v7, %v880_v7  ;;  %v789_v18 = vmul.f32 0.2, %v553_v8  ;;  %v673_v19 = vadd.f32 %v1739_v33, %v672_v15 }
  0xea   : > { %v556_v20 = vadd.f32 %v1524_v16, %v1739_v33  ;;  %v1556_v21 = vpop.f32.mrb[6].mxu1  ;;  %v547_v22 = vpop.f32.mrb[7].mxu0  ;;  %1203 = vst.msk [vmem:[%s1752_s28 + $0x8c] sm:$0xf] %vm1167_vm1, %v1453_v11  ;;  %1169 = vst.msk [vmem:[%s1752_s28 + $0x4] sm:$0xf] %vm1167_vm1, %v1419_v12 }
  0xeb   : > { %v821_v23 = vmul.f32 0.2, %v681_v13  ;;  %v787_v24 = vmul.f32 0.2, %v545_v14  ;;  %v684_v25 = vadd.f32 %v1556_v21, %v1739_v33  ;;  %v548_v26 = vadd.f32 %v1739_v33, %v547_v22  ;;  %v675_v27 = vpop.f32.mrb[7].mxu1 }
  0xec   : > { %1201 = vst.msk [vmem:[%s1752_s28 + $0x84] sm:$0xf] %vm1167_vm1, %v1451_v17  ;;  %v853_v28 = vmax.f32 %v553_v8, %v789_v18  ;;  %v819_v29 = vmul.f32 0.2, %v673_v19  ;;  %v790_v30 = vmul.f32 0.2, %v556_v20  ;;  %v676_v31 = vadd.f32 %v1739_v33, %v675_v27 }
  0xed   : > { %v885_v32 = vmax.f32 %v681_v13, %v821_v23  ;;  %v851_v34 = vmax.f32 %v545_v14, %v787_v24  ;;  %v822_v35 = vmul.f32 0.2, %v684_v25  ;;  %v788_v36 = vmul.f32 0.2, %v548_v26 }
  0xee   : > { %v1424_v37 = vpack.c.bf16 %v853_v28, %v853_v28  ;;  %v883_v38 = vmax.f32 %v673_v19, %v819_v29  ;;  %v854_v39 = vmax.f32 %v556_v20, %v790_v30  ;;  %v820_v40 = vmul.f32 0.2, %v676_v31  ;;  %v1527_v45 = vpop.f32.mrb[8].mxu0 }
  0xef   : > { %v1456_v41 = vpack.c.bf16 %v885_v32, %v885_v32  ;;  %v1422_v42 = vpack.c.bf16 %v851_v34, %v851_v34  ;;  %v886_v43 = vmax.f32 %v684_v25, %v822_v35  ;;  %v852_v44 = vmax.f32 %v548_v26, %v788_v36  ;;  %v1559_v50 = vpop.f32.mrb[8].mxu1  ;;  %v560_v51 = vpop.f32.mrb[9].mxu0 }
  0xf0   : > { %1174 = vst.msk [vmem:[%s1752_s28 + $0x18] sm:$0xf] %vm1167_vm1, %v1424_v37  ;;  %v1454_v46 = vpack.c.bf16 %v883_v38, %v883_v38  ;;  %v1425_v47 = vpack.c.bf16 %v854_v39, %v854_v39  ;;  %v884_v48 = vmax.f32 %v676_v31, %v820_v40  ;;  %v569_v49 = vadd.f32 %v1527_v45, %v1739_v33  ;;  %v688_v56 = vpop.f32.mrb[9].mxu1  ;;  %v1528_v57 = vpop.f32.mrb[10].mxu0 }
  0xf1   : > { %1206 = vst.msk [vmem:[%s1752_s28 + $0x98] sm:$0xf] %vm1167_vm1, %v1456_v41  ;;  %1172 = vst.msk [vmem:[%s1752_s28 + $0x10] sm:$0xf] %vm1167_vm1, %v1422_v42  ;;  %v1457_v52 = vpack.c.bf16 %v886_v43, %v886_v43  ;;  %v1423_v53 = vpack.c.bf16 %v852_v44, %v852_v44  ;;  %v697_v54 = vadd.f32 %v1559_v50, %v1739_v33  ;;  %v1560_v62 = vpop.f32.mrb[10].mxu1  ;;  %v563_v63 = vpop.f32.mrb[11].mxu0 }
  0xf2   : > { %v561_v55 = vadd.f32 %v1739_v33, %v560_v51  ;;  %1204 = vst.msk [vmem:[%s1752_s28 + $0x90] sm:$0xf] %vm1167_vm1, %v1454_v46  ;;  %1175 = vst.msk [vmem:[%s1752_s28 + $0x1c] sm:$0xf] %vm1167_vm1, %v1425_v47  ;;  %v1455_v58 = vpack.c.bf16 %v884_v48, %v884_v48  ;;  %v793_v59 = vmul.f32 0.2, %v569_v49  ;;  %v689_v60 = vadd.f32 %v1739_v33, %v688_v56 }
  0xf3   : > { %v572_v61 = vadd.f32 %v1528_v57, %v1739_v33  ;;  %1207 = vst.msk [vmem:[%s1752_s28 + $0x9c] sm:$0xf] %vm1167_vm1, %v1457_v52  ;;  %1173 = vst.msk [vmem:[%s1752_s28 + $0x14] sm:$0xf] %vm1167_vm1, %v1423_v53  ;;  %v825_v0 = vmul.f32 0.2, %v697_v54  ;;  %v700_v2 = vadd.f32 %v1560_v62, %v1739_v33  ;;  %v564_v3 = vadd.f32 %v1739_v33, %v563_v63 }
  0xf4   : > { %v791_v1 = vmul.f32 0.2, %v561_v55  ;;  %v691_v4 = vpop.f32.mrb[11].mxu1  ;;  %1205 = vst.msk [vmem:[%s1752_s28 + $0x94] sm:$0xf] %vm1167_vm1, %v1455_v58  ;;  %v857_v5 = vmax.f32 %v569_v49, %v793_v59 }
  0xf5   : > { %v823_v6 = vmul.f32 0.2, %v689_v60  ;;  %v794_v7 = vmul.f32 0.2, %v572_v61  ;;  %v692_v8 = vadd.f32 %v1739_v33, %v691_v4  ;;  %v889_v9 = vmax.f32 %v697_v54, %v825_v0 }
  0xf6   : > { %v855_v10 = vmax.f32 %v561_v55, %v791_v1  ;;  %v826_v11 = vmul.f32 0.2, %v700_v2  ;;  %v792_v12 = vmul.f32 0.2, %v564_v3  ;;  %v1428_v13 = vpack.c.bf16 %v857_v5, %v857_v5  ;;  %v1531_v21 = vpop.f32.mrb[12].mxu0 }
  0xf7   : > { %v887_v14 = vmax.f32 %v689_v60, %v823_v6  ;;  %v858_v15 = vmax.f32 %v572_v61, %v794_v7  ;;  %v824_v16 = vmul.f32 0.2, %v692_v8  ;;  %v1460_v17 = vpack.c.bf16 %v889_v9, %v889_v9  ;;  %v1563_v26 = vpop.f32.mrb[12].mxu1  ;;  %v576_v27 = vpop.f32.mrb[13].mxu0 }
  0xf8   : > { %v1426_v18 = vpack.c.bf16 %v855_v10, %v855_v10  ;;  %v890_v19 = vmax.f32 %v700_v2, %v826_v11  ;;  %v856_v20 = vmax.f32 %v564_v3, %v792_v12  ;;  %1178 = vst.msk [vmem:[%s1752_s28 + $0x28] sm:$0xf] %vm1167_vm1, %v1428_v13  ;;  %v585_v25 = vadd.f32 %v1531_v21, %v1739_v33  ;;  %v704_v32 = vpop.f32.mrb[13].mxu1  ;;  %v1532_v34 = vpop.f32.mrb[14].mxu0 }
  0xf9   : > { %v1458_v22 = vpack.c.bf16 %v887_v14, %v887_v14  ;;  %v1429_v23 = vpack.c.bf16 %v858_v15, %v858_v15  ;;  %v888_v24 = vmax.f32 %v692_v8, %v824_v16  ;;  %1210 = vst.msk [vmem:[%s1752_s28 + $0xa8] sm:$0xf] %vm1167_vm1, %v1460_v17  ;;  %v713_v30 = vadd.f32 %v1563_v26, %v1739_v33  ;;  %v1564_v39 = vpop.f32.mrb[14].mxu1  ;;  %v579_v40 = vpop.f32.mrb[15].mxu0 }
  0xfa   : > { %1176 = vst.msk [vmem:[%s1752_s28 + $0x20] sm:$0xf] %vm1167_vm1, %v1426_v18  ;;  %v1461_v28 = vpack.c.bf16 %v890_v19, %v890_v19  ;;  %v1427_v29 = vpack.c.bf16 %v856_v20, %v856_v20  ;;  %v577_v31 = vadd.f32 %v1739_v33, %v576_v27  ;;  %v797_v36 = vmul.f32 0.2, %v585_v25  ;;  %v707_v45 = vpop.f32.mrb[15].mxu1 }
  0xfb   : > { %1208 = vst.msk [vmem:[%s1752_s28 + $0xa0] sm:$0xf] %vm1167_vm1, %v1458_v22  ;;  %1179 = vst.msk [vmem:[%s1752_s28 + $0x2c] sm:$0xf] %vm1167_vm1, %v1429_v23  ;;  %v1459_v35 = vpack.c.bf16 %v888_v24, %v888_v24  ;;  %v705_v37 = vadd.f32 %v1739_v33, %v704_v32  ;;  %v588_v38 = vadd.f32 %v1532_v34, %v1739_v33  ;;  %v829_v41 = vmul.f32 0.2, %v713_v30 }
  0xfc   : > { %1211 = vst.msk [vmem:[%s1752_s28 + $0xac] sm:$0xf] %vm1167_vm1, %v1461_v28  ;;  %1177 = vst.msk [vmem:[%s1752_s28 + $0x24] sm:$0xf] %vm1167_vm1, %v1427_v29  ;;  %v795_v42 = vmul.f32 0.2, %v577_v31  ;;  %v716_v43 = vadd.f32 %v1564_v39, %v1739_v33  ;;  %v580_v44 = vadd.f32 %v1739_v33, %v579_v40  ;;  %v861_v46 = vmax.f32 %v585_v25, %v797_v36 }
  0xfd   : > { %1209 = vst.msk [vmem:[%s1752_s28 + $0xa4] sm:$0xf] %vm1167_vm1, %v1459_v35  ;;  %v827_v47 = vmul.f32 0.2, %v705_v37  ;;  %v798_v48 = vmul.f32 0.2, %v588_v38  ;;  %v708_v49 = vadd.f32 %v1739_v33, %v707_v45  ;;  %v893_v50 = vmax.f32 %v713_v30, %v829_v41 }
  0xfe   : > { %v859_v51 = vmax.f32 %v577_v31, %v795_v42  ;;  %v830_v52 = vmul.f32 0.2, %v716_v43  ;;  %v796_v53 = vmul.f32 0.2, %v580_v44  ;;  %v1432_v54 = vpack.c.bf16 %v861_v46, %v861_v46  ;;  %v1535_v62 = vpop.f32.mrb[16].mxu0 }
  0xff   : > { %v891_v55 = vmax.f32 %v705_v37, %v827_v47  ;;  %v862_v56 = vmax.f32 %v588_v38, %v798_v48  ;;  %v828_v57 = vmul.f32 0.2, %v708_v49  ;;  %v1464_v58 = vpack.c.bf16 %v893_v50, %v893_v50  ;;  %v1567_v3 = vpop.f32.mrb[16].mxu1  ;;  %v592_v4 = vpop.f32.mrb[17].mxu0 }
 0x100   : > { %v1430_v59 = vpack.c.bf16 %v859_v51, %v859_v51  ;;  %v894_v60 = vmax.f32 %v716_v43, %v830_v52  ;;  %v860_v61 = vmax.f32 %v580_v44, %v796_v53  ;;  %1182 = vst.msk [vmem:[%s1752_s28 + $0x38] sm:$0xf] %vm1167_vm1, %v1432_v54  ;;  %v601_v2 = vadd.f32 %v1535_v62, %v1739_v33  ;;  %v720_v9 = vpop.f32.mrb[17].mxu1  ;;  %v1536_v10 = vpop.f32.mrb[18].mxu0 }
 0x101   : > { %v1462_v63 = vpack.c.bf16 %v891_v55, %v891_v55  ;;  %v1433_v0 = vpack.c.bf16 %v862_v56, %v862_v56  ;;  %v892_v1 = vmax.f32 %v708_v49, %v828_v57  ;;  %1214 = vst.msk [vmem:[%s1752_s28 + $0xb8] sm:$0xf] %vm1167_vm1, %v1464_v58  ;;  %v729_v7 = vadd.f32 %v1567_v3, %v1739_v33  ;;  %v1568_v15 = vpop.f32.mrb[18].mxu1  ;;  %v595_v16 = vpop.f32.mrb[19].mxu0 }
 0x102   : > { %1180 = vst.msk [vmem:[%s1752_s28 + $0x30] sm:$0xf] %vm1167_vm1, %v1430_v59  ;;  %v1465_v5 = vpack.c.bf16 %v894_v60, %v894_v60  ;;  %v1431_v6 = vpack.c.bf16 %v860_v61, %v860_v61  ;;  %v593_v8 = vadd.f32 %v1739_v33, %v592_v4  ;;  %v801_v12 = vmul.f32 0.2, %v601_v2  ;;  %v723_v21 = vpop.f32.mrb[19].mxu1 }
 0x103   : > { %1212 = vst.msk [vmem:[%s1752_s28 + $0xb0] sm:$0xf] %vm1167_vm1, %v1462_v63  ;;  %1183 = vst.msk [vmem:[%s1752_s28 + $0x3c] sm:$0xf] %vm1167_vm1, %v1433_v0  ;;  %v1463_v11 = vpack.c.bf16 %v892_v1, %v892_v1  ;;  %v721_v13 = vadd.f32 %v1739_v33, %v720_v9  ;;  %v604_v14 = vadd.f32 %v1536_v10, %v1739_v33  ;;  %v833_v17 = vmul.f32 0.2, %v729_v7 }
 0x104   : > { %1215 = vst.msk [vmem:[%s1752_s28 + $0xbc] sm:$0xf] %vm1167_vm1, %v1465_v5  ;;  %1181 = vst.msk [vmem:[%s1752_s28 + $0x34] sm:$0xf] %vm1167_vm1, %v1431_v6  ;;  %v799_v18 = vmul.f32 0.2, %v593_v8  ;;  %v732_v19 = vadd.f32 %v1568_v15, %v1739_v33  ;;  %v596_v20 = vadd.f32 %v1739_v33, %v595_v16  ;;  %v865_v22 = vmax.f32 %v601_v2, %v801_v12 }
 0x105   : > { %1213 = vst.msk [vmem:[%s1752_s28 + $0xb4] sm:$0xf] %vm1167_vm1, %v1463_v11  ;;  %v831_v23 = vmul.f32 0.2, %v721_v13  ;;  %v802_v24 = vmul.f32 0.2, %v604_v14  ;;  %v724_v25 = vadd.f32 %v1739_v33, %v723_v21  ;;  %v897_v26 = vmax.f32 %v729_v7, %v833_v17 }
 0x106   : > { %v863_v27 = vmax.f32 %v593_v8, %v799_v18  ;;  %v834_v28 = vmul.f32 0.2, %v732_v19  ;;  %v800_v29 = vmul.f32 0.2, %v596_v20  ;;  %v1436_v30 = vpack.c.bf16 %v865_v22, %v865_v22  ;;  %v1539_v39 = vpop.f32.mrb[20].mxu0 }
 0x107   : > { %v895_v31 = vmax.f32 %v721_v13, %v831_v23  ;;  %v866_v32 = vmax.f32 %v604_v14, %v802_v24  ;;  %v832_v34 = vmul.f32 0.2, %v724_v25  ;;  %v1468_v35 = vpack.c.bf16 %v897_v26, %v897_v26  ;;  %v1571_v44 = vpop.f32.mrb[20].mxu1  ;;  %v608_v45 = vpop.f32.mrb[21].mxu0 }
 0x108   : > { %v1434_v36 = vpack.c.bf16 %v863_v27, %v863_v27  ;;  %v898_v37 = vmax.f32 %v732_v19, %v834_v28  ;;  %v864_v38 = vmax.f32 %v596_v20, %v800_v29  ;;  %1186 = vst.msk [vmem:[%s1752_s28 + $0x48] sm:$0xf] %vm1167_vm1, %v1436_v30  ;;  %v617_v43 = vadd.f32 %v1539_v39, %v1739_v33  ;;  %v736_v50 = vpop.f32.mrb[21].mxu1  ;;  %v1540_v51 = vpop.f32.mrb[22].mxu0 }
 0x109   : > { %v1466_v40 = vpack.c.bf16 %v895_v31, %v895_v31  ;;  %v1437_v41 = vpack.c.bf16 %v866_v32, %v866_v32  ;;  %v896_v42 = vmax.f32 %v724_v25, %v832_v34  ;;  %1218 = vst.msk [vmem:[%s1752_s28 + $0xc8] sm:$0xf] %vm1167_vm1, %v1468_v35  ;;  %v745_v48 = vadd.f32 %v1571_v44, %v1739_v33  ;;  %v1572_v56 = vpop.f32.mrb[22].mxu1  ;;  %v611_v57 = vpop.f32.mrb[23].mxu0 }
 0x10a   : > { %1184 = vst.msk [vmem:[%s1752_s28 + $0x40] sm:$0xf] %vm1167_vm1, %v1434_v36  ;;  %v1469_v46 = vpack.c.bf16 %v898_v37, %v898_v37  ;;  %v1435_v47 = vpack.c.bf16 %v864_v38, %v864_v38  ;;  %v609_v49 = vadd.f32 %v1739_v33, %v608_v45  ;;  %v805_v53 = vmul.f32 0.2, %v617_v43  ;;  %v739_v62 = vpop.f32.mrb[23].mxu1 }
 0x10b   : > { %1216 = vst.msk [vmem:[%s1752_s28 + $0xc0] sm:$0xf] %vm1167_vm1, %v1466_v40  ;;  %1187 = vst.msk [vmem:[%s1752_s28 + $0x4c] sm:$0xf] %vm1167_vm1, %v1437_v41  ;;  %v1467_v52 = vpack.c.bf16 %v896_v42, %v896_v42  ;;  %v737_v54 = vadd.f32 %v1739_v33, %v736_v50  ;;  %v620_v55 = vadd.f32 %v1540_v51, %v1739_v33  ;;  %v837_v58 = vmul.f32 0.2, %v745_v48 }
 0x10c   : > { %1219 = vst.msk [vmem:[%s1752_s28 + $0xcc] sm:$0xf] %vm1167_vm1, %v1469_v46  ;;  %1185 = vst.msk [vmem:[%s1752_s28 + $0x44] sm:$0xf] %vm1167_vm1, %v1435_v47  ;;  %v803_v59 = vmul.f32 0.2, %v609_v49  ;;  %v748_v60 = vadd.f32 %v1572_v56, %v1739_v33  ;;  %v612_v61 = vadd.f32 %v1739_v33, %v611_v57  ;;  %v869_v63 = vmax.f32 %v617_v43, %v805_v53 }
 0x10d   : > { %1217 = vst.msk [vmem:[%s1752_s28 + $0xc4] sm:$0xf] %vm1167_vm1, %v1467_v52  ;;  %v835_v0 = vmul.f32 0.2, %v737_v54  ;;  %v806_v1 = vmul.f32 0.2, %v620_v55  ;;  %v740_v2 = vadd.f32 %v1739_v33, %v739_v62  ;;  %v901_v3 = vmax.f32 %v745_v48, %v837_v58 }
 0x10e   : > { %v867_v4 = vmax.f32 %v609_v49, %v803_v59  ;;  %v838_v5 = vmul.f32 0.2, %v748_v60  ;;  %v804_v6 = vmul.f32 0.2, %v612_v61  ;;  %v1440_v7 = vpack.c.bf16 %v869_v63, %v869_v63  ;;  %v1543_v15 = vpop.f32.mrb[24].mxu0 }
 0x10f   : > { %v899_v8 = vmax.f32 %v737_v54, %v835_v0  ;;  %v870_v9 = vmax.f32 %v620_v55, %v806_v1  ;;  %v836_v10 = vmul.f32 0.2, %v740_v2  ;;  %v1472_v11 = vpack.c.bf16 %v901_v3, %v901_v3  ;;  %v1575_v20 = vpop.f32.mrb[24].mxu1  ;;  %v624_v21 = vpop.f32.mrb[25].mxu0 }
 0x110   : > { %v1438_v12 = vpack.c.bf16 %v867_v4, %v867_v4  ;;  %v902_v13 = vmax.f32 %v748_v60, %v838_v5  ;;  %v868_v14 = vmax.f32 %v612_v61, %v804_v6  ;;  %1190 = vst.msk [vmem:[%s1752_s28 + $0x58] sm:$0xf] %vm1167_vm1, %v1440_v7  ;;  %v633_v19 = vadd.f32 %v1543_v15, %v1739_v33  ;;  %v752_v26 = vpop.f32.mrb[25].mxu1  ;;  %v1544_v27 = vpop.f32.mrb[26].mxu0 }
 0x111   : > { %v1470_v16 = vpack.c.bf16 %v899_v8, %v899_v8  ;;  %v1441_v17 = vpack.c.bf16 %v870_v9, %v870_v9  ;;  %v900_v18 = vmax.f32 %v740_v2, %v836_v10  ;;  %1222 = vst.msk [vmem:[%s1752_s28 + $0xd8] sm:$0xf] %vm1167_vm1, %v1472_v11  ;;  %v761_v24 = vadd.f32 %v1575_v20, %v1739_v33  ;;  %v1576_v32 = vpop.f32.mrb[26].mxu1  ;;  %v627_v34 = vpop.f32.mrb[27].mxu0 }
 0x112   : > { %1188 = vst.msk [vmem:[%s1752_s28 + $0x50] sm:$0xf] %vm1167_vm1, %v1438_v12  ;;  %v1473_v22 = vpack.c.bf16 %v902_v13, %v902_v13  ;;  %v1439_v23 = vpack.c.bf16 %v868_v14, %v868_v14  ;;  %v625_v25 = vadd.f32 %v1739_v33, %v624_v21  ;;  %v809_v29 = vmul.f32 0.2, %v633_v19  ;;  %v755_v39 = vpop.f32.mrb[27].mxu1 }
 0x113   : > { %1220 = vst.msk [vmem:[%s1752_s28 + $0xd0] sm:$0xf] %vm1167_vm1, %v1470_v16  ;;  %1191 = vst.msk [vmem:[%s1752_s28 + $0x5c] sm:$0xf] %vm1167_vm1, %v1441_v17  ;;  %v1471_v28 = vpack.c.bf16 %v900_v18, %v900_v18  ;;  %v753_v30 = vadd.f32 %v1739_v33, %v752_v26  ;;  %v636_v31 = vadd.f32 %v1544_v27, %v1739_v33  ;;  %v841_v35 = vmul.f32 0.2, %v761_v24 }
 0x114   : > { %1223 = vst.msk [vmem:[%s1752_s28 + $0xdc] sm:$0xf] %vm1167_vm1, %v1473_v22  ;;  %1189 = vst.msk [vmem:[%s1752_s28 + $0x54] sm:$0xf] %vm1167_vm1, %v1439_v23  ;;  %v807_v36 = vmul.f32 0.2, %v625_v25  ;;  %v764_v37 = vadd.f32 %v1576_v32, %v1739_v33  ;;  %v628_v38 = vadd.f32 %v1739_v33, %v627_v34  ;;  %v873_v40 = vmax.f32 %v633_v19, %v809_v29 }
 0x115   : > { %1221 = vst.msk [vmem:[%s1752_s28 + $0xd4] sm:$0xf] %vm1167_vm1, %v1471_v28  ;;  %v839_v41 = vmul.f32 0.2, %v753_v30  ;;  %v810_v42 = vmul.f32 0.2, %v636_v31  ;;  %v756_v43 = vadd.f32 %v1739_v33, %v755_v39  ;;  %v905_v44 = vmax.f32 %v761_v24, %v841_v35 }
 0x116   : > { %v871_v45 = vmax.f32 %v625_v25, %v807_v36  ;;  %v842_v46 = vmul.f32 0.2, %v764_v37  ;;  %v808_v47 = vmul.f32 0.2, %v628_v38  ;;  %v1444_v48 = vpack.c.bf16 %v873_v40, %v873_v40  ;;  %v1547_v56 = vpop.f32.mrb[28].mxu0 }
 0x117   : > { %v903_v49 = vmax.f32 %v753_v30, %v839_v41  ;;  %v874_v50 = vmax.f32 %v636_v31, %v810_v42  ;;  %v840_v51 = vmul.f32 0.2, %v756_v43  ;;  %v1476_v52 = vpack.c.bf16 %v905_v44, %v905_v44  ;;  %v1579_v61 = vpop.f32.mrb[28].mxu1  ;;  %v640_v62 = vpop.f32.mrb[29].mxu0 }
 0x118   : > { %v1442_v53 = vpack.c.bf16 %v871_v45, %v871_v45  ;;  %v906_v54 = vmax.f32 %v764_v37, %v842_v46  ;;  %v872_v55 = vmax.f32 %v628_v38, %v808_v47  ;;  %1194 = vst.msk [vmem:[%s1752_s28 + $0x68] sm:$0xf] %vm1167_vm1, %v1444_v48  ;;  %v649_v60 = vadd.f32 %v1547_v56, %v1739_v33  ;;  %v768_v3 = vpop.f32.mrb[29].mxu1  ;;  %v1548_v4 = vpop.f32.mrb[30].mxu0 }
 0x119   : > { %v1474_v57 = vpack.c.bf16 %v903_v49, %v903_v49  ;;  %v1445_v58 = vpack.c.bf16 %v874_v50, %v874_v50  ;;  %v904_v59 = vmax.f32 %v756_v43, %v840_v51  ;;  %1226 = vst.msk [vmem:[%s1752_s28 + $0xe8] sm:$0xf] %vm1167_vm1, %v1476_v52  ;;  %v777_v1 = vadd.f32 %v1579_v61, %v1739_v33  ;;  %v1580_v9 = vpop.f32.mrb[30].mxu1  ;;  %v643_v10 = vpop.f32.mrb[31].mxu0 }
 0x11a   : > { %1192 = vst.msk [vmem:[%s1752_s28 + $0x60] sm:$0xf] %vm1167_vm1, %v1442_v53  ;;  %v1477_v63 = vpack.c.bf16 %v906_v54, %v906_v54  ;;  %v1443_v0 = vpack.c.bf16 %v872_v55, %v872_v55  ;;  %v641_v2 = vadd.f32 %v1739_v33, %v640_v62  ;;  %v813_v6 = vmul.f32 0.2, %v649_v60  ;;  %v771_v15 = vpop.f32.mrb[31].mxu1 }
 0x11b   : > { %1224 = vst.msk [vmem:[%s1752_s28 + $0xe0] sm:$0xf] %vm1167_vm1, %v1474_v57  ;;  %1195 = vst.msk [vmem:[%s1752_s28 + $0x6c] sm:$0xf] %vm1167_vm1, %v1445_v58  ;;  %v1475_v5 = vpack.c.bf16 %v904_v59, %v904_v59  ;;  %v769_v7 = vadd.f32 %v1739_v33, %v768_v3  ;;  %v652_v8 = vadd.f32 %v1548_v4, %v1739_v33  ;;  %v845_v11 = vmul.f32 0.2, %v777_v1 }
 0x11c   : > { %1227 = vst.msk [vmem:[%s1752_s28 + $0xec] sm:$0xf] %vm1167_vm1, %v1477_v63  ;;  %1193 = vst.msk [vmem:[%s1752_s28 + $0x64] sm:$0xf] %vm1167_vm1, %v1443_v0  ;;  %v811_v12 = vmul.f32 0.2, %v641_v2  ;;  %v780_v13 = vadd.f32 %v1580_v9, %v1739_v33  ;;  %v644_v14 = vadd.f32 %v1739_v33, %v643_v10  ;;  %v877_v16 = vmax.f32 %v649_v60, %v813_v6 }
 0x11d   : > { %1225 = vst.msk [vmem:[%s1752_s28 + $0xe4] sm:$0xf] %vm1167_vm1, %v1475_v5  ;;  %v843_v17 = vmul.f32 0.2, %v769_v7  ;;  %v814_v18 = vmul.f32 0.2, %v652_v8  ;;  %v772_v19 = vadd.f32 %v1739_v33, %v771_v15  ;;  %v909_v20 = vmax.f32 %v777_v1, %v845_v11 }
 0x11e   : > { %v875_v21 = vmax.f32 %v641_v2, %v811_v12  ;;  %v846_v22 = vmul.f32 0.2, %v780_v13  ;;  %v812_v23 = vmul.f32 0.2, %v644_v14  ;;  %v1448_v24 = vpack.c.bf16 %v877_v16, %v877_v16 }
 0x11f   : > { %v907_v25 = vmax.f32 %v769_v7, %v843_v17  ;;  %v878_v26 = vmax.f32 %v652_v8, %v814_v18  ;;  %v844_v27 = vmul.f32 0.2, %v772_v19  ;;  %v1480_v28 = vpack.c.bf16 %v909_v20, %v909_v20 }
 0x120   : > { %v1446_v29 = vpack.c.bf16 %v875_v21, %v875_v21  ;;  %v910_v30 = vmax.f32 %v780_v13, %v846_v22  ;;  %v876_v31 = vmax.f32 %v644_v14, %v812_v23  ;;  %1198 = vst.msk [vmem:[%s1752_s28 + $0x78] sm:$0xf] %vm1167_vm1, %v1448_v24 }
 0x121   : > { %v1478_v33 = vpack.c.bf16 %v907_v25, %v907_v25  ;;  %v1449_v32 = vpack.c.bf16 %v878_v26, %v878_v26  ;;  %v908_v34 = vmax.f32 %v772_v19, %v844_v27  ;;  %1230 = vst.msk [vmem:[%s1752_s28 + $0xf8] sm:$0xf] %vm1167_vm1, %v1480_v28 }
 0x122   : > { %1196 = vst.msk [vmem:[%s1752_s28 + $0x70] sm:$0xf] %vm1167_vm1, %v1446_v29  ;;  %v1481_v35 = vpack.c.bf16 %v910_v30, %v910_v30  ;;  %v1447_v36 = vpack.c.bf16 %v876_v31, %v876_v31 }
 0x123   : > { %1228 = vst.msk [vmem:[%s1752_s28 + $0xf0] sm:$0xf] %vm1167_vm1, %v1478_v33  ;;  %1199 = vst.msk [vmem:[%s1752_s28 + $0x7c] sm:$0xf] %vm1167_vm1, %v1449_v32  ;;  %v1479_v37 = vpack.c.bf16 %v908_v34, %v908_v34 }
 0x124   : > { %1231 = vst.msk [vmem:[%s1752_s28 + $0xfc] sm:$0xf] %vm1167_vm1, %v1481_v35  ;;  %1197 = vst.msk [vmem:[%s1752_s28 + $0x74] sm:$0xf] %vm1167_vm1, %v1447_v36 }
 0x125   : > { %1229 = vst.msk [vmem:[%s1752_s28 + $0xf4] sm:$0xf] %vm1167_vm1, %v1479_v37 }
 0x126 PF: > { %s13_s12 = sadd.s32 1, %s1630_s12  }
 0x127   : > { %p10_p4 = scmp.ge.s32.totalorder %s13_s12, 6  }
 0x129   :  { %12 = sbr.rel (!%p10_p4) target bundleno = 1 (0x1), region = 60 }

// kernel: _lambda_.17
= control target key start
LH: loop header
LB: loop body
LE: loop exit
PB: predicated region body
PF: predicated region fallthrough
CT: control target
= control target key end

     0   :  { %7 = vsyncpa [#allocation3], 0  ;;  %s369_s0 = inlined_call_operand.vmem [shape: f32[64,128], index: 0, kind: input, shape index: {}]   ;;  %s370_s1 = inlined_call_operand.vmem [shape: f32[2], index: 1, kind: input, shape index: {}]   ;;  %s371_s2 = inlined_call_operand.vmem [shape: f32[64,128], index: 2, kind: output, shape index: {}]  }
   0x1   :  { %s16_s11 = sshll.u32 %s370_s1, 4  ;;  %s17_s11 = int_to_ptr.vmem [resolvable:$true] %s16_s11 }
   0x2   :  { %s228_s12 = scalar_lea.vmem %s17_s11, 16  ;;  %p233_p1 = scmp.lt.s32.totalorder %s17_s11, %s17_s11 }
   0x3   :  { %p229_p0 = scmp.ne.s32.totalorder %s17_s11, %s228_s12  ;;  %p234_p2 = scmp.lt.s32.totalorder %s228_s12, %s228_s12 }
   0x5   :  { %p235_p3 = por %p234_p2, %p233_p1 }
   0x7   :  { %p236_p4 = pnand %p235_p3, %p229_p0 }
   0x9   :  { %239 = shalt.err (!%p236_p4)
}
   0xa   :  { %s242_s13 = smov [#allocation2]  }
   0xb   :  { %19 = dma.vmem_to_smem %s17_s11, 16, %s242_s13, [#allocation3]  }
   0xc   :  { %240 = dma.done.wait [#allocation3], 16  }
   0xd   :  { %241 = vsyncadd [#allocation3], 4294967280 }
   0xe   :  { %23 = sfence }
   0xf   :  { %s32_s14 = sld [smem:[#allocation2]]  ;;  %s208_s15 = sld [smem:[#allocation2 + $0x1]]  ;;  %v52_v0 = vlaneseq  ;;  %v26_v3 = vld [vmem:[%s369_s0 + $0x10] sm:$0xff]  ;;  %v24_v5 = vld [vmem:[%s369_s0] sm:$0xff]  ;;  %v27_v7 = vld [vmem:[%s369_s0 + $0x18] sm:$0xff] }
  0x10   :  { %v25_v10 = vld [vmem:[%s369_s0 + $0x8] sm:$0xff]  ;;  %v28_v31 = vld [vmem:[%s369_s0 + $0x20] sm:$0xff]  ;;  %v31_v35 = vld [vmem:[%s369_s0 + $0x38] sm:$0xff] }
  0x11   :  { %v53_v1 = vshrl.u32 %v52_v0, 7  ;;  %v62_v2 = vand.u32 127, %v52_v0  ;;  %v29_v23 = vld [vmem:[%s369_s0 + $0x28] sm:$0xff]  ;;  %v30_v36 = vld [vmem:[%s369_s0 + $0x30] sm:$0xff] }
  0x13   :  { %v55_v4 = vadd.s32 16, %v53_v1  ;;  %v63_v6 = vmul.u32 128, %v53_v1  ;;  %v56_v8 = vadd.s32 24, %v53_v1  ;;  %v54_v9 = vadd.s32 8, %v53_v1 }
  0x14   :  { %v58_v11 = vadd.s32 40, %v53_v1  ;;  %v57_v12 = vadd.s32 32, %v53_v1  ;;  %v60_v13 = vadd.s32 56, %v53_v1  ;;  %v59_v14 = vadd.s32 48, %v53_v1 }
  0x15   :  { %v33_v15 = vstv %s32_s14  ;;  %v43_v16 = vstv %s208_s15  ;;  %v65_v17 = vmul.u32 128, %v55_v4  ;;  %v273_v18 = vadd.s32 %v63_v6, %v62_v2 }
  0x16   :  { %v36_v19 = vmul.f32 %v33_v15, %v26_v3  ;;  %v34_v20 = vmul.f32 %v33_v15, %v24_v5  ;;  %v37_v21 = vmul.f32 %v33_v15, %v27_v7  ;;  %v66_v22 = vmul.u32 128, %v56_v8 }
  0x17   :  { %v278_v24 = vadd.s32 %v65_v17, %v62_v2  ;;  %vm79_vm0 = vcmp.lt.s32.totalorder %v273_v18, 8192  ;;  %v35_v25 = vmul.f32 %v33_v15, %v25_v10  ;;  %v64_v26 = vmul.u32 128, %v54_v9 }
  0x18   :  { %v46_v27 = vadd.f32 %v43_v16, %v36_v19  ;;  %v44_v28 = vadd.f32 %v43_v16, %v34_v20  ;;  %v47_v29 = vadd.f32 %v43_v16, %v37_v21  ;;  %v281_v30 = vadd.s32 %v66_v22, %v62_v2 }
  0x19   :  { %vm81_vm1 = vcmp.lt.s32.totalorder %v278_v24, 8192  ;;  %v45_v32 = vadd.f32 %v43_v16, %v35_v25  ;;  %v287_v33 = vadd.s32 %v64_v26, %v62_v2  ;;  %v39_v34 = vmul.f32 %v33_v15, %v29_v23 }
  0x1a   :  { %v297_v37 = vsel %vm81_vm1, %v46_v27, -1e+30  ;;  %v87_v38 = vsel %vm79_vm0, %v44_v28, -1e+30  ;;  %vm82_vm2 = vcmp.lt.s32.totalorder %v281_v30, 8192  ;;  %v68_v39 = vmul.u32 128, %v58_v11 }
  0x1b   :  { %99 = vmax.xlane.f32.xlu1 %v297_v37  ;;  %95 = vmax.xlane.f32.xlu0 %v87_v38  ;;  %v90_v40 = vsel %vm82_vm2, %v47_v29, -1e+30  ;;  %vm80_vm3 = vcmp.lt.s32.totalorder %v287_v33, 8192  ;;  %v49_v41 = vadd.f32 %v43_v16, %v39_v34  ;;  %v38_v42 = vmul.f32 %v33_v15, %v28_v31 }
  0x1c   :  { %v88_v43 = vsel %vm80_vm3, %v45_v32, -1e+30  ;;  %v308_v44 = vadd.s32 %v68_v39, %v62_v2  ;;  %v67_v45 = vmul.u32 128, %v57_v12  ;;  %v41_v46 = vmul.f32 %v33_v15, %v31_v35 }
  0x1d   :  { %v48_v47 = vadd.f32 %v43_v16, %v38_v42  ;;  %v70_v48 = vmul.u32 128, %v60_v13  ;;  %v40_v49 = vmul.f32 %v33_v15, %v30_v36  ;;  %v69_v50 = vmul.u32 128, %v59_v14 }
  0x1e   :  { %vm84_vm4 = vcmp.lt.s32.totalorder %v308_v44, 8192  ;;  %v311_v51 = vadd.s32 %v67_v45, %v62_v2  ;;  %v51_v55 = vadd.f32 %v43_v16, %v41_v46 }
  0x1f   :  { %101 = vmax.xlane.f32.xlu1 %v90_v40  ;;  %97 = vmax.xlane.f32.xlu0 %v88_v43  ;;  %v313_v52 = vadd.s32 %v70_v48, %v62_v2  ;;  %v315_v53 = vadd.s32 %v69_v50, %v62_v2  ;;  %v92_v54 = vsel %vm84_vm4, %v49_v41, -1e+30  ;;  %v50_v56 = vadd.f32 %v43_v16, %v40_v49 }
  0x20   :  { %vm83_vm5 = vcmp.lt.s32.totalorder %v311_v51, 8192 }
  0x21   :  { %v91_v57 = vsel %vm83_vm5, %v48_v47, -1e+30  ;;  %vm86_vm6 = vcmp.lt.s32.totalorder %v313_v52, 8192  ;;  %vm85_vm7 = vcmp.lt.s32.totalorder %v315_v53, 8192 }
  0x22   :  { %v94_v58 = vsel %vm86_vm6, %v51_v55, -1e+30  ;;  %v93_v59 = vsel %vm85_vm7, %v50_v56, -1e+30 }
  0x23   :  { %105 = vmax.xlane.f32.xlu1 %v92_v54  ;;  %103 = vmax.xlane.f32.xlu0 %v91_v57 }
  0x27   :  { %109 = vmax.xlane.f32.xlu1 %v94_v58  ;;  %107 = vmax.xlane.f32.xlu0 %v93_v59 }
  0xa8   :  { %v100_v60 = vpop.xlane.xlu1 %99  ;;  %v96_v61 = vpop.xlane.xlu0 %95 }
  0xac   :  { %v102_v62 = vpop.xlane.xlu1 %101  ;;  %v98_v63 = vpop.xlane.xlu0 %97 }
  0xb0   :  { %v106_v0 = vpop.xlane.xlu1 %105  ;;  %v104_v1 = vpop.xlane.xlu0 %103 }
  0xb1   :  { %v112_v2 = vmax.f32 %v98_v63, %v106_v0  ;;  %v111_v3 = vmax.f32 %v96_v61, %v104_v1 }
  0xb3   :  { %v115_v8 = vmax.f32 %v111_v3, %v112_v2 }
  0xb4   :  { %v110_v4 = vpop.xlane.xlu1 %109  ;;  %v108_v5 = vpop.xlane.xlu0 %107 }
  0xb5   :  { %v114_v6 = vmax.f32 %v102_v62, %v110_v4  ;;  %v113_v7 = vmax.f32 %v100_v60, %v108_v5 }
  0xb7   :  { %v116_v9 = vmax.f32 %v113_v7, %v114_v6 }
  0xb9   :  { %v117_v10 = vmax.f32 %v115_v8, %v116_v9 }
  0xbb   :  { %v118_v11 = vrot.slane %v117_v10, 4 }
  0xbd   :  { %v119_v12 = vmax.f32 %v117_v10, %v118_v11 }
  0xbf   :  { %v120_v13 = vrot.slane %v119_v12, 2 }
  0xc1   :  { %v121_v14 = vmax.f32 %v119_v12, %v120_v13 }
  0xc3   :  { %v122_v15 = vrot.slane %v121_v14, 1 }
  0xc5   :  { %v123_v16 = vmax.f32 %v121_v14, %v122_v15 }
  0xc7   :  { %v125_v17 = vsub.f32 %v88_v43, %v123_v16  ;;  %v124_v19 = vsub.f32 %v87_v38, %v123_v16  ;;  %v127_v20 = vsub.f32 %v90_v40, %v123_v16  ;;  %v126_v21 = vsub.f32 %v297_v37, %v123_v16 }
  0xc8   :  { %v129_v26 = vsub.f32 %v92_v54, %v123_v16  ;;  %v128_v28 = vsub.f32 %v91_v57, %v123_v16  ;;  %v131_v31 = vsub.f32 %v94_v58, %v123_v16  ;;  %v130_v34 = vsub.f32 %v93_v59, %v123_v16 }
  0xc9   :  { %v134_v22 = vmul.f32 1.442695, %v125_v17  ;;  %v132_v23 = vmul.f32 1.442695, %v124_v19  ;;  %v138_v25 = vmul.f32 1.442695, %v127_v20 }
  0xca   :  { %v136_v27 = vmul.f32 1.442695, %v126_v21  ;;  %v142_v29 = vmul.f32 1.442695, %v129_v26  ;;  %v140_v32 = vmul.f32 1.442695, %v128_v28 }
  0xcb   :  { %210 = vpow2.f32 %v134_v22  ;;  %v146_v35 = vmul.f32 1.442695, %v131_v31  ;;  %v144_v36 = vmul.f32 1.442695, %v130_v34 }
  0xcc   :  { %212 = vpow2.f32 %v132_v23 }
  0xcd   :  { %214 = vpow2.f32 %v138_v25 }
  0xce   :  { %216 = vpow2.f32 %v136_v27 }
  0xcf   :  { %218 = vpow2.f32 %v142_v29 }
  0xd0   :  { %220 = vpow2.f32 %v140_v32 }
  0xd1   :  { %222 = vpow2.f32 %v146_v35 }
  0xd2   :  { %224 = vpow2.f32 %v144_v36 }
  0xd5   :  { %v211_v38 = vpop.eup %210 }
  0xd6   :  { %v213_v37 = vpop.eup %212  ;;  %v149_v39 = vsel %vm80_vm3, %v211_v38, 0.0 }
  0xd7   :  { %v215_v40 = vpop.eup %214  ;;  %158 = vadd.xlane.f32.xlu1 %v149_v39  ;;  %v148_v41 = vsel %vm79_vm0, %v213_v37, 0.0 }
  0xd8   :  { %v217_v42 = vpop.eup %216  ;;  %156 = vadd.xlane.f32.xlu0 %v148_v41  ;;  %v151_v43 = vsel %vm82_vm2, %v215_v40, 0.0 }
  0xd9   :  { %v219_v45 = vpop.eup %218  ;;  %v150_v46 = vsel %vm81_vm1, %v217_v42, 0.0 }
  0xda   :  { %v221_v47 = vpop.eup %220  ;;  %v153_v33 = vsel %vm84_vm4, %v219_v45, 0.0 }
  0xdb   :  { %162 = vadd.xlane.f32.xlu1 %v151_v43  ;;  %v223_v48 = vpop.eup %222  ;;  %v152_v18 = vsel %vm83_vm5, %v221_v47, 0.0 }
  0xdc   :  { %160 = vadd.xlane.f32.xlu0 %v150_v46  ;;  %v225_v49 = vpop.eup %224  ;;  %v155_v30 = vsel %vm86_vm6, %v223_v48, 0.0 }
  0xdd   :  { %v154_v24 = vsel %vm85_vm7, %v225_v49, 0.0 }
  0xdf   :  { %166 = vadd.xlane.f32.xlu1 %v153_v33 }
  0xe0   :  { %164 = vadd.xlane.f32.xlu0 %v152_v18 }
  0xe3   :  { %170 = vadd.xlane.f32.xlu1 %v155_v30 }
  0xe4   :  { %168 = vadd.xlane.f32.xlu0 %v154_v24 }
 0x164   :  { %v159_v50 = vpop.xlane.xlu1 %158 }
 0x165   :  { %v157_v54 = vpop.xlane.xlu0 %156 }
 0x166   :  { %v172_v55 = vadd.f32 %v159_v50, %v157_v54 }
 0x168   :  { %v163_v44 = vpop.xlane.xlu1 %162 }
 0x169   :  { %v161_v56 = vpop.xlane.xlu0 %160 }
 0x16a   :  { %v173_v57 = vadd.f32 %v172_v55, %v161_v56 }
 0x16c   :  { %v174_v58 = vadd.f32 %v173_v57, %v163_v44  ;;  %v167_v59 = vpop.xlane.xlu1 %166 }
 0x16d   :  { %v165_v51 = vpop.xlane.xlu0 %164 }
 0x16e   :  { %v175_v60 = vadd.f32 %v174_v58, %v165_v51 }
 0x170   :  { %v176_v61 = vadd.f32 %v175_v60, %v167_v59  ;;  %v171_v52 = vpop.xlane.xlu1 %170 }
 0x171   :  { %v169_v62 = vpop.xlane.xlu0 %168 }
 0x172   :  { %v177_v63 = vadd.f32 %v176_v61, %v169_v62 }
 0x174   :  { %v178_v0 = vadd.f32 %v177_v63, %v171_v52 }
 0x176   :  { %v179_v1 = vrot.slane %v178_v0, 4 }
 0x178   :  { %v180_v2 = vadd.f32 %v179_v1, %v178_v0 }
 0x17a   :  { %v181_v53 = vrot.slane %v180_v2, 2 }
 0x17c   :  { %v182_v3 = vadd.f32 %v181_v53, %v180_v2 }
 0x17e   :  { %v183_v4 = vrot.slane %v182_v3, 1 }
 0x180   :  { %v184_v5 = vadd.f32 %v183_v4, %v182_v3 }
 0x182   :  { %226 = vrcp.f32 %v184_v5 }
 0x18c   :  { %v227_v6 = vpop.eup %226 }
 0x18d   :  { %v187_v7 = vmul.f32 %v227_v6, %v148_v41  ;;  %v188_v8 = vmul.f32 %v227_v6, %v149_v39  ;;  %v189_v9 = vmul.f32 %v227_v6, %v150_v46  ;;  %v190_v10 = vmul.f32 %v227_v6, %v151_v43 }
 0x18e   :  { %v191_v11 = vmul.f32 %v227_v6, %v152_v18  ;;  %v192_v12 = vmul.f32 %v227_v6, %v153_v33  ;;  %v193_v13 = vmul.f32 %v227_v6, %v154_v24  ;;  %v194_v14 = vmul.f32 %v227_v6, %v155_v30 }
 0x18f   :  { %195 = vst [vmem:[%s371_s2] sm:$0xff] %v187_v7  ;;  %196 = vst [vmem:[%s371_s2 + $0x8] sm:$0xff] %v188_v8 }
 0x190   :  { %197 = vst [vmem:[%s371_s2 + $0x10] sm:$0xff] %v189_v9  ;;  %198 = vst [vmem:[%s371_s2 + $0x18] sm:$0xff] %v190_v10 }
 0x191   :  { %199 = vst [vmem:[%s371_s2 + $0x20] sm:$0xff] %v191_v11  ;;  %200 = vst [vmem:[%s371_s2 + $0x28] sm:$0xff] %v192_v12 }
 0x192   :  { %201 = vst [vmem:[%s371_s2 + $0x30] sm:$0xff] %v193_v13  ;;  %202 = vst [vmem:[%s371_s2 + $0x38] sm:$0xff] %v194_v14 }
 0x193   :  { %207 = vsyncpa [#allocation3], 1 }

</bundles_post_ra>
